<compile_context>
chip_gen: v7x
topology: tpu7x:2x2x1
jax: 0.10.0
libtpu: 0.0.40
codegen_flags: <defaults>
</compile_context>

<pallas_src>
import functools

import jax
import jax.numpy as jnp
from jax.experimental import pallas as pl
from jax.experimental.pallas import tpu as pltpu

HIDDEN = 32          # hidden_dim (small)
N_WM = 48            # num_nodes_wm (module default)
N_GM = 18            # num_nodes_gm (module default)
LAYERS = 2
BATCH = 2
LN_EPS = 1e-5        # nn.LayerNorm default
L2_EPS = 1e-12       # F.normalize default

VMEM = pltpu.MemorySpace.VMEM


# ---------------- in-kernel building blocks (operate on loaded values) ----------------

def _dot(a, b):
    return jnp.dot(a, b, preferred_element_type=jnp.float32)


def _l2_normalize(x):
    n = jnp.sqrt(jnp.sum(x * x, axis=-1, keepdims=True))
    return x / jnp.maximum(n, L2_EPS)                      # F.normalize(p=2, dim=-1)


def _sage_relu(aggr_norm, x, p):
    """SAGEConv (mean aggr, root weight, normalize=True) + the BM3Layer ReLU.

    aggr_norm is the degree-pre-normalized message matrix; rows with no
    incoming edges are all-zero, so they receive exactly lin_l's bias —
    identical to PyG's empty-scatter-mean behaviour."""
    aggr = _dot(aggr_norm, x)
    out = _dot(aggr, p["wl"][...]) + p["bl"][...] + _dot(x, p["wr"][...])
    return jnp.maximum(_l2_normalize(out), 0.0)


def _sage_relu_root_only(x, p):
    """SAGE rows that provably receive zero aggregation (the gm rows under the
    module's buggy edge offsets): only lin_l bias + lin_r(x) survive."""
    out = p["bl"][...] + _dot(x, p["wr"][...])
    return jnp.maximum(_l2_normalize(out), 0.0)


def _update_ln_relu(parts, p):
    """Linear over the virtual lane-concat of `parts` (row-splits of W instead
    of an actual concatenate), then LayerNorm, then ReLU."""
    w = p["w"][...]
    h = p["b"][...]
    for k, part in enumerate(parts):
        h = h + _dot(part, w[k * HIDDEN:(k + 1) * HIDDEN, :])
    mu = jnp.mean(h, axis=-1, keepdims=True)
    xc = h - mu
    var = jnp.mean(xc * xc, axis=-1, keepdims=True)
    y = xc * jax.lax.rsqrt(var + LN_EPS) * p["gamma"][...] + p["beta"][...]
    return jnp.maximum(y, 0.0)


def _adversary_mean(orig, learned, p):
    """BiMatterAdversary(orig, learned).mean() -> (1, 1) (stays in VMEM)."""
    t = _dot(orig, p["wt"][...]) + p["bt"][...]
    w1 = p["w1"][...]
    h = jnp.maximum(_dot(t, w1[:HIDDEN, :]) + _dot(learned, w1[HIDDEN:, :])
                    + p["b1"][...], 0.0)
    d = jax.nn.sigmoid(_dot(h, p["w2"][...]) + p["b2"][...])        # [rows, 1]
    return jnp.sum(d, axis=0, keepdims=True) * (1.0 / d.shape[0])   # (1, 1)


# ------------------------------- fused kernel -------------------------------

def _fused_forward_kernel(treedef, n_leaves, *refs):
    (wm_ref, gm_ref, cblk_ref, ctblk_ref, aggr_ref,
     pool_wm_ref, pool_gm_ref) = refs[:7]
    param_refs = refs[7:7 + n_leaves]
    o_logits, o_adv, o_wm, o_gm = refs[7 + n_leaves:]

    P = jax.tree_util.tree_unflatten(treedef, list(param_refs))

    wm_orig = wm_ref[...]        # [B*N_WM, N_WM]
    gm_orig = gm_ref[...]        # [B*N_GM, N_GM]
    cblk = cblk_ref[...]         # [B*N_WM, B*N_GM]  block-diagonal connectivity
    ctblk = ctblk_ref[...]       # [B*N_GM, B*N_WM]  its transpose
    aggr_mat = aggr_ref[...]     # [B*N_WM, B*N_WM]  deg-normalized, zero-padded

    wm_h = gm_h = None
    adv_total = jnp.zeros((1, 1), jnp.float32)

    for i in range(LAYERS):
        lp = P["bm3"][i]
        if i == 0:
            w, b = lp["wm_transform"]
            wm_h = _dot(wm_orig, w[...]) + b[...]        # [B*N_WM, H]
            w, b = lp["gm_transform"]
            gm_h = _dot(gm_orig, w[...]) + b[...]        # [B*N_GM, H]

        # wm->gm two-hop SAGE chain.  Under the module's edge offsets only the
        # first B*N_WM combined-node rows are ever consumed downstream, and
        # they depend only on the wm rows -> both hops run on [B*N_WM, H].
        h1 = _sage_relu(aggr_mat, wm_h, lp["sage_wm_to_gm_1"])
        wm_msg = _sage_relu(aggr_mat, h1, lp["sage_wm_to_gm_2"])

        # gm->wm (reversed edges): the gm rows get no incoming edges, so only
        # the root weight + lin_l bias reach gm_msg (exactly as in the dense
        # formulation, where their aggregation is identically zero).
        g1 = _sage_relu_root_only(gm_h, lp["sage_gm_to_wm_1"])
        gm_msg = _sage_relu_root_only(g1, lp["sage_gm_to_wm_2"])

        # torch.bmm(connectivity, gm_h) / bmm(connectivity^T, wm_h) as single
        # block-diagonal matmuls (batch folded into rows).
        cg = _dot(cblk, gm_h)        # [B*N_WM, H]
        cw = _dot(ctblk, wm_h)       # [B*N_GM, H]

        wm_new = _update_ln_relu([wm_h, wm_msg, cg], lp["wm_update"])
        gm_new = _update_ln_relu([gm_h, gm_msg, cw], lp["gm_update"])
        wm_h, gm_h = wm_new, gm_new

        adv_total = (adv_total
                     + _adversary_mean(wm_orig, wm_h, P["adv_wm"][i])
                     + _adversary_mean(gm_orig, gm_h, P["adv_gm"][i]))

    # classifier: per-graph mean pooling (pooling-matrix matmul) + 2-layer MLP
    wm_g = _dot(pool_wm_ref[...], wm_h)                  # [B, H]
    gm_g = _dot(pool_gm_ref[...], gm_h)                  # [B, H]
    cp = P["classifier"]
    w1 = cp["w1"][...]
    hid = jnp.maximum(_dot(wm_g, w1[:HIDDEN, :]) + _dot(gm_g, w1[HIDDEN:, :])
                      + cp["b1"][...], 0.0)
    logits = _dot(hid, cp["w2"][...]) + cp["b2"][...]    # [B, 2]

    o_logits[...] = logits
    o_adv[...] = adv_total * (1.0 / LAYERS)
    o_wm[...] = wm_h
    o_gm[...] = gm_h


# ------------------------------- glue (JAX) --------------------------------

def brain_graph_forward(params, wm_time, gm_time, connectivity):
    B = wm_time.shape[0]
    wm_flat = wm_time.astype(jnp.float32).reshape(B * N_WM, N_WM)
    gm_flat = gm_time.astype(jnp.float32).reshape(B * N_GM, N_GM)
    conn = connectivity.astype(jnp.float32)

    # Block-diagonal connectivity placement (replaces both torch.bmm operands
    # AND the scatter-built dense adjacency) — static slice updates only.
    cblk = jnp.zeros((B * N_WM, B * N_GM), jnp.float32)
    for b in range(B):
        cblk = cblk.at[b * N_WM:(b + 1) * N_WM,
                       b * N_GM:(b + 1) * N_GM].set(conn[b])
    ctblk = cblk.T

    # Faithful buggy-offset edge set of BM3Layer._prepare_graph_input:
    # src = b*N_WM + r, dst = b*N_GM + c over the combined node set, i.e. all
    # nonzeros live in the [B*N_WM, B*N_GM] block.  Pre-normalize by in-degree
    # (mean aggregation, max(deg,1) as PyG) and zero-pad to a square message
    # matrix so each SAGE hop is a single matmul inside the kernel.
    adj = (cblk > 0).astype(jnp.float32)                      # adj[src, dst]
    deg = jnp.sum(adj, axis=0)                                # in-degree per dst
    aggr_norm = (adj / jnp.maximum(deg, 1.0)[None, :]).T      # [B*N_GM, B*N_WM]
    aggr_mat = jnp.concatenate(
        [aggr_norm, jnp.zeros((B * (N_WM - N_GM), B * N_WM), jnp.float32)],
        axis=0)                                               # [B*N_WM, B*N_WM]

    # Graph mean-pooling matrices (avoid unaligned sublane slicing in-kernel).
    pool_wm = jnp.repeat(jnp.eye(B, dtype=jnp.float32), N_WM, axis=1) / N_WM
    pool_gm = jnp.repeat(jnp.eye(B, dtype=jnp.float32), N_GM, axis=1) / N_GM

    leaves, treedef = jax.tree_util.tree_flatten(params)
    kernel = functools.partial(_fused_forward_kernel, treedef, len(leaves))

    n_in = 7 + len(leaves)
    out_shapes = (
        jax.ShapeDtypeStruct((B, 2), jnp.float32),
        jax.ShapeDtypeStruct((1, 1), jnp.float32),
        jax.ShapeDtypeStruct((B * N_WM, HIDDEN), jnp.float32),
        jax.ShapeDtypeStruct((B * N_GM, HIDDEN), jnp.float32),
    )
    logits, adv, wm_o, gm_o = pl.pallas_call(
        kernel,
        out_shape=out_shapes,
        in_specs=[pl.BlockSpec(memory_space=VMEM)] * n_in,
        out_specs=tuple(pl.BlockSpec(memory_space=VMEM) for _ in range(4)),
    )(wm_flat, gm_flat, cblk, ctblk, aggr_mat, pool_wm, pool_gm, *leaves)

    return (logits, adv[0, 0],
            wm_o.reshape(B, N_WM, HIDDEN), gm_o.reshape(B, N_GM, HIDDEN))


# ------------------------------- parameters --------------------------------

def init_params(seed=0):
    key = [jax.random.PRNGKey(seed)]

    def nxt():
        key[0], sub = jax.random.split(key[0])
        return sub

    def linear(in_f, out_f, bias=True):
        lim = float(in_f) ** -0.5
        w = jax.random.uniform(nxt(), (in_f, out_f), jnp.float32, -lim, lim)
        if not bias:
            return w, None
        b = jax.random.uniform(nxt(), (1, out_f), jnp.float32, -lim, lim)
        return w, b

    def sage():
        wl, bl = linear(HIDDEN, HIDDEN, bias=True)    # SAGEConv.lin_l (bias)
        wr, _ = linear(HIDDEN, HIDDEN, bias=False)    # SAGEConv.lin_r (no bias)
        return {"wl": wl, "bl": bl, "wr": wr}

    params = {"bm3": [], "adv_wm": [], "adv_gm": []}
    for i in range(LAYERS):
        layer = {
            "sage_wm_to_gm_1": sage(), "sage_wm_to_gm_2": sage(),
            "sage_gm_to_wm_1": sage(), "sage_gm_to_wm_2": sage(),
        }
        if i == 0:  # transforms of layers > 0 are never used by the forward
            layer["wm_transform"] = linear(N_WM, HIDDEN)
            layer["gm_transform"] = linear(N_GM, HIDDEN)
        wm_uw, wm_ub = linear(3 * HIDDEN, HIDDEN)
        gm_uw, gm_ub = linear(3 * HIDDEN, HIDDEN)
        layer["wm_update"] = {"w": wm_uw, "b": wm_ub,
                              "gamma": jnp.ones((1, HIDDEN), jnp.float32),
                              "beta": jnp.zeros((1, HIDDEN), jnp.float32)}
        layer["gm_update"] = {"w": gm_uw, "b": gm_ub,
                              "gamma": jnp.ones((1, HIDDEN), jnp.float32),
                              "beta": jnp.zeros((1, HIDDEN), jnp.float32)}
        params["bm3"].append(layer)
        for name, n_nodes in (("adv_wm", N_WM), ("adv_gm", N_GM)):
            wt, bt = linear(n_nodes, HIDDEN)
            w1, b1 = linear(2 * HIDDEN, HIDDEN)
            w2, b2 = linear(HIDDEN, 1)
            params[name].append({"wt": wt, "bt": bt, "w1": w1, "b1": b1,
                                 "w2": w2, "b2": b2})
    cw1, cb1 = linear(2 * HIDDEN, HIDDEN)
    cw2, cb2 = linear(HIDDEN, 2)
    params["classifier"] = {"w1": cw1, "b1": cb1, "w2": cw2, "b2": cb2}
    return params


if __name__ == "__main__":
    key = jax.random.PRNGKey(0)
    k1, k2, k3 = jax.random.split(key, 3)
    # data['wm_time']: [B, N_wm, N_wm], data['gm_time']: [B, N_gm, N_gm],
    # data['connectivity']: [B, N_wm, N_gm]
    wm_time = jax.random.normal(k1, (BATCH, N_WM, N_WM), jnp.float32)
    gm_time = jax.random.normal(k2, (BATCH, N_GM, N_GM), jnp.float32)
    connectivity = jax.random.normal(k3, (BATCH, N_WM, N_GM), jnp.float32)

    params = init_params(seed=0)
    fwd = jax.jit(brain_graph_forward)
    logits, adv_loss, wm_out, gm_out = fwd(params, wm_time, gm_time, connectivity)
    jax.block_until_ready((logits, adv_loss, wm_out, gm_out))

    assert logits.shape == (BATCH, 2)
    assert wm_out.shape == (BATCH, N_WM, HIDDEN)
    assert gm_out.shape == (BATCH, N_GM, HIDDEN)
    print("KERNEL_OK")
</pallas_src>

<mosaic_0001>
module attributes {stable_mosaic.version = 11 : i64} {
  func.func @_fused_forward_kernel(%arg0: memref<96x48xf32, #tpu.memory_space<vmem>>, %arg1: memref<36x18xf32, #tpu.memory_space<vmem>>, %arg2: memref<96x36xf32, #tpu.memory_space<vmem>>, %arg3: memref<36x96xf32, #tpu.memory_space<vmem>>, %arg4: memref<96x96xf32, #tpu.memory_space<vmem>>, %arg5: memref<2x96xf32, #tpu.memory_space<vmem>>, %arg6: memref<2x36xf32, #tpu.memory_space<vmem>>, %arg7: memref<1x32xf32, #tpu.memory_space<vmem>>, %arg8: memref<1x1xf32, #tpu.memory_space<vmem>>, %arg9: memref<1x32xf32, #tpu.memory_space<vmem>>, %arg10: memref<64x32xf32, #tpu.memory_space<vmem>>, %arg11: memref<32x1xf32, #tpu.memory_space<vmem>>, %arg12: memref<18x32xf32, #tpu.memory_space<vmem>>, %arg13: memref<1x32xf32, #tpu.memory_space<vmem>>, %arg14: memref<1x1xf32, #tpu.memory_space<vmem>>, %arg15: memref<1x32xf32, #tpu.memory_space<vmem>>, %arg16: memref<64x32xf32, #tpu.memory_space<vmem>>, %arg17: memref<32x1xf32, #tpu.memory_space<vmem>>, %arg18: memref<18x32xf32, #tpu.memory_space<vmem>>, %arg19: memref<1x32xf32, #tpu.memory_space<vmem>>, %arg20: memref<1x1xf32, #tpu.memory_space<vmem>>, %arg21: memref<1x32xf32, #tpu.memory_space<vmem>>, %arg22: memref<64x32xf32, #tpu.memory_space<vmem>>, %arg23: memref<32x1xf32, #tpu.memory_space<vmem>>, %arg24: memref<48x32xf32, #tpu.memory_space<vmem>>, %arg25: memref<1x32xf32, #tpu.memory_space<vmem>>, %arg26: memref<1x1xf32, #tpu.memory_space<vmem>>, %arg27: memref<1x32xf32, #tpu.memory_space<vmem>>, %arg28: memref<64x32xf32, #tpu.memory_space<vmem>>, %arg29: memref<32x1xf32, #tpu.memory_space<vmem>>, %arg30: memref<48x32xf32, #tpu.memory_space<vmem>>, %arg31: memref<18x32xf32, #tpu.memory_space<vmem>>, %arg32: memref<1x32xf32, #tpu.memory_space<vmem>>, %arg33: memref<1x32xf32, #tpu.memory_space<vmem>>, %arg34: memref<1x32xf32, #tpu.memory_space<vmem>>, %arg35: memref<1x32xf32, #tpu.memory_space<vmem>>, %arg36: memref<96x32xf32, #tpu.memory_space<vmem>>, %arg37: memref<1x32xf32, #tpu.memory_space<vmem>>, %arg38: memref<32x32xf32, #tpu.memory_space<vmem>>, %arg39: memref<32x32xf32, #tpu.memory_space<vmem>>, %arg40: memref<1x32xf32, #tpu.memory_space<vmem>>, %arg41: memref<32x32xf32, #tpu.memory_space<vmem>>, %arg42: memref<32x32xf32, #tpu.memory_space<vmem>>, %arg43: memref<1x32xf32, #tpu.memory_space<vmem>>, %arg44: memref<32x32xf32, #tpu.memory_space<vmem>>, %arg45: memref<32x32xf32, #tpu.memory_space<vmem>>, %arg46: memref<1x32xf32, #tpu.memory_space<vmem>>, %arg47: memref<32x32xf32, #tpu.memory_space<vmem>>, %arg48: memref<32x32xf32, #tpu.memory_space<vmem>>, %arg49: memref<48x32xf32, #tpu.memory_space<vmem>>, %arg50: memref<1x32xf32, #tpu.memory_space<vmem>>, %arg51: memref<1x32xf32, #tpu.memory_space<vmem>>, %arg52: memref<1x32xf32, #tpu.memory_space<vmem>>, %arg53: memref<1x32xf32, #tpu.memory_space<vmem>>, %arg54: memref<96x32xf32, #tpu.memory_space<vmem>>, %arg55: memref<1x32xf32, #tpu.memory_space<vmem>>, %arg56: memref<1x32xf32, #tpu.memory_space<vmem>>, %arg57: memref<1x32xf32, #tpu.memory_space<vmem>>, %arg58: memref<96x32xf32, #tpu.memory_space<vmem>>, %arg59: memref<1x32xf32, #tpu.memory_space<vmem>>, %arg60: memref<32x32xf32, #tpu.memory_space<vmem>>, %arg61: memref<32x32xf32, #tpu.memory_space<vmem>>, %arg62: memref<1x32xf32, #tpu.memory_space<vmem>>, %arg63: memref<32x32xf32, #tpu.memory_space<vmem>>, %arg64: memref<32x32xf32, #tpu.memory_space<vmem>>, %arg65: memref<1x32xf32, #tpu.memory_space<vmem>>, %arg66: memref<32x32xf32, #tpu.memory_space<vmem>>, %arg67: memref<32x32xf32, #tpu.memory_space<vmem>>, %arg68: memref<1x32xf32, #tpu.memory_space<vmem>>, %arg69: memref<32x32xf32, #tpu.memory_space<vmem>>, %arg70: memref<32x32xf32, #tpu.memory_space<vmem>>, %arg71: memref<1x32xf32, #tpu.memory_space<vmem>>, %arg72: memref<1x32xf32, #tpu.memory_space<vmem>>, %arg73: memref<1x32xf32, #tpu.memory_space<vmem>>, %arg74: memref<96x32xf32, #tpu.memory_space<vmem>>, %arg75: memref<1x32xf32, #tpu.memory_space<vmem>>, %arg76: memref<1x2xf32, #tpu.memory_space<vmem>>, %arg77: memref<64x32xf32, #tpu.memory_space<vmem>>, %arg78: memref<32x2xf32, #tpu.memory_space<vmem>>, %arg79: memref<2x2xf32, #tpu.memory_space<vmem>>, %arg80: memref<1x1xf32, #tpu.memory_space<vmem>>, %arg81: memref<96x32xf32, #tpu.memory_space<vmem>>, %arg82: memref<36x32xf32, #tpu.memory_space<vmem>>) attributes {dimension_semantics = [], scalar_prefetch = 0 : i64, scratch_operands = 0 : i64, tpu.core_type = #tpu.core_type<tc>} {
    %c0 = arith.constant 0 : index
    %c0_0 = arith.constant 0 : index
    %0 = vector.load %arg0[%c0, %c0_0] : memref<96x48xf32, #tpu.memory_space<vmem>>, vector<96x48xf32>
    %c0_1 = arith.constant 0 : index
    %c0_2 = arith.constant 0 : index
    %1 = vector.load %arg1[%c0_1, %c0_2] : memref<36x18xf32, #tpu.memory_space<vmem>>, vector<36x18xf32>
    %c0_3 = arith.constant 0 : index
    %c0_4 = arith.constant 0 : index
    %2 = vector.load %arg2[%c0_3, %c0_4] : memref<96x36xf32, #tpu.memory_space<vmem>>, vector<96x36xf32>
    %c0_5 = arith.constant 0 : index
    %c0_6 = arith.constant 0 : index
    %3 = vector.load %arg3[%c0_5, %c0_6] : memref<36x96xf32, #tpu.memory_space<vmem>>, vector<36x96xf32>
    %c0_7 = arith.constant 0 : index
    %c0_8 = arith.constant 0 : index
    %4 = vector.load %arg4[%c0_7, %c0_8] : memref<96x96xf32, #tpu.memory_space<vmem>>, vector<96x96xf32>
    %cst = arith.constant 0.000000e+00 : f32
    %5 = vector.broadcast %cst : f32 to vector<1x1xf32>
    %c0_9 = arith.constant 0 : index
    %c0_10 = arith.constant 0 : index
    %6 = vector.load %arg49[%c0_9, %c0_10] : memref<48x32xf32, #tpu.memory_space<vmem>>, vector<48x32xf32>
    %cst_11 = arith.constant dense<0.000000e+00> : vector<96x32xf32>
    %7 = tpu.matmul %0, %6, %cst_11 {dimension_numbers = #tpu.dot_dimension_numbers<[1], [0], [0], [1], [0, 0, 1, 1], [], []>} : vector<96x48xf32>, vector<48x32xf32>, vector<96x32xf32> -> vector<96x32xf32>
    %c0_12 = arith.constant 0 : index
    %c0_13 = arith.constant 0 : index
    %8 = vector.load %arg50[%c0_12, %c0_13] : memref<1x32xf32, #tpu.memory_space<vmem>>, vector<1x32xf32>
    %9 = vector.broadcast %8 : vector<1x32xf32> to vector<96x32xf32>
    %10 = arith.addf %7, %9 : vector<96x32xf32>
    %c0_14 = arith.constant 0 : index
    %c0_15 = arith.constant 0 : index
    %11 = vector.load %arg31[%c0_14, %c0_15] : memref<18x32xf32, #tpu.memory_space<vmem>>, vector<18x32xf32>
    %cst_16 = arith.constant dense<0.000000e+00> : vector<36x32xf32>
    %12 = tpu.matmul %1, %11, %cst_16 {dimension_numbers = #tpu.dot_dimension_numbers<[1], [0], [0], [1], [0, 0, 1, 1], [], []>} : vector<36x18xf32>, vector<18x32xf32>, vector<36x32xf32> -> vector<36x32xf32>
    %c0_17 = arith.constant 0 : index
    %c0_18 = arith.constant 0 : index
    %13 = vector.load %arg32[%c0_17, %c0_18] : memref<1x32xf32, #tpu.memory_space<vmem>>, vector<1x32xf32>
    %14 = vector.broadcast %13 : vector<1x32xf32> to vector<36x32xf32>
    %15 = arith.addf %12, %14 : vector<36x32xf32>
    %cst_19 = arith.constant dense<0.000000e+00> : vector<96x32xf32>
    %16 = tpu.matmul %4, %10, %cst_19 {dimension_numbers = #tpu.dot_dimension_numbers<[1], [0], [0], [1], [0, 0, 1, 1], [], []>} : vector<96x96xf32>, vector<96x32xf32>, vector<96x32xf32> -> vector<96x32xf32>
    %c0_20 = arith.constant 0 : index
    %c0_21 = arith.constant 0 : index
    %17 = vector.load %arg44[%c0_20, %c0_21] : memref<32x32xf32, #tpu.memory_space<vmem>>, vector<32x32xf32>
    %cst_22 = arith.constant dense<0.000000e+00> : vector<96x32xf32>
    %18 = tpu.matmul %16, %17, %cst_22 {dimension_numbers = #tpu.dot_dimension_numbers<[1], [0], [0], [1], [0, 0, 1, 1], [], []>} : vector<96x32xf32>, vector<32x32xf32>, vector<96x32xf32> -> vector<96x32xf32>
    %c0_23 = arith.constant 0 : index
    %c0_24 = arith.constant 0 : index
    %19 = vector.load %arg43[%c0_23, %c0_24] : memref<1x32xf32, #tpu.memory_space<vmem>>, vector<1x32xf32>
    %20 = vector.broadcast %19 : vector<1x32xf32> to vector<96x32xf32>
    %21 = arith.addf %18, %20 : vector<96x32xf32>
    %c0_25 = arith.constant 0 : index
    %c0_26 = arith.constant 0 : index
    %22 = vector.load %arg45[%c0_25, %c0_26] : memref<32x32xf32, #tpu.memory_space<vmem>>, vector<32x32xf32>
    %cst_27 = arith.constant dense<0.000000e+00> : vector<96x32xf32>
    %23 = tpu.matmul %10, %22, %cst_27 {dimension_numbers = #tpu.dot_dimension_numbers<[1], [0], [0], [1], [0, 0, 1, 1], [], []>} : vector<96x32xf32>, vector<32x32xf32>, vector<96x32xf32> -> vector<96x32xf32>
    %24 = arith.addf %21, %23 : vector<96x32xf32>
    %25 = arith.mulf %24, %24 : vector<96x32xf32>
    %cst_28 = arith.constant dense<0.000000e+00> : vector<96xf32>
    %26 = vector.multi_reduction <add>, %25, %cst_28 [1] : vector<96x32xf32> to vector<96xf32>
    %27 = vector.shape_cast %26 : vector<96xf32> to vector<96x1xf32>
    %28 = math.sqrt %27 : vector<96x1xf32>
    %cst_29 = arith.constant 9.99999996E-13 : f32
    %29 = vector.broadcast %cst_29 : f32 to vector<96x1xf32>
    %30 = arith.maximumf %28, %29 : vector<96x1xf32>
    %31 = vector.broadcast %30 : vector<96x1xf32> to vector<96x32xf32>
    %32 = arith.divf %24, %31 : vector<96x32xf32>
    %cst_30 = arith.constant 0.000000e+00 : f32
    %33 = vector.broadcast %cst_30 : f32 to vector<96x32xf32>
    %34 = arith.maximumf %32, %33 : vector<96x32xf32>
    %cst_31 = arith.constant dense<0.000000e+00> : vector<96x32xf32>
    %35 = tpu.matmul %4, %34, %cst_31 {dimension_numbers = #tpu.dot_dimension_numbers<[1], [0], [0], [1], [0, 0, 1, 1], [], []>} : vector<96x96xf32>, vector<96x32xf32>, vector<96x32xf32> -> vector<96x32xf32>
    %c0_32 = arith.constant 0 : index
    %c0_33 = arith.constant 0 : index
    %36 = vector.load %arg47[%c0_32, %c0_33] : memref<32x32xf32, #tpu.memory_space<vmem>>, vector<32x32xf32>
    %cst_34 = arith.constant dense<0.000000e+00> : vector<96x32xf32>
    %37 = tpu.matmul %35, %36, %cst_34 {dimension_numbers = #tpu.dot_dimension_numbers<[1], [0], [0], [1], [0, 0, 1, 1], [], []>} : vector<96x32xf32>, vector<32x32xf32>, vector<96x32xf32> -> vector<96x32xf32>
    %c0_35 = arith.constant 0 : index
    %c0_36 = arith.constant 0 : index
    %38 = vector.load %arg46[%c0_35, %c0_36] : memref<1x32xf32, #tpu.memory_space<vmem>>, vector<1x32xf32>
    %39 = vector.broadcast %38 : vector<1x32xf32> to vector<96x32xf32>
    %40 = arith.addf %37, %39 : vector<96x32xf32>
    %c0_37 = arith.constant 0 : index
    %c0_38 = arith.constant 0 : index
    %41 = vector.load %arg48[%c0_37, %c0_38] : memref<32x32xf32, #tpu.memory_space<vmem>>, vector<32x32xf32>
    %cst_39 = arith.constant dense<0.000000e+00> : vector<96x32xf32>
    %42 = tpu.matmul %34, %41, %cst_39 {dimension_numbers = #tpu.dot_dimension_numbers<[1], [0], [0], [1], [0, 0, 1, 1], [], []>} : vector<96x32xf32>, vector<32x32xf32>, vector<96x32xf32> -> vector<96x32xf32>
    %43 = arith.addf %40, %42 : vector<96x32xf32>
    %44 = arith.mulf %43, %43 : vector<96x32xf32>
    %cst_40 = arith.constant dense<0.000000e+00> : vector<96xf32>
    %45 = vector.multi_reduction <add>, %44, %cst_40 [1] : vector<96x32xf32> to vector<96xf32>
    %46 = vector.shape_cast %45 : vector<96xf32> to vector<96x1xf32>
    %47 = math.sqrt %46 : vector<96x1xf32>
    %cst_41 = arith.constant 9.99999996E-13 : f32
    %48 = vector.broadcast %cst_41 : f32 to vector<96x1xf32>
    %49 = arith.maximumf %47, %48 : vector<96x1xf32>
    %50 = vector.broadcast %49 : vector<96x1xf32> to vector<96x32xf32>
    %51 = arith.divf %43, %50 : vector<96x32xf32>
    %cst_42 = arith.constant 0.000000e+00 : f32
    %52 = vector.broadcast %cst_42 : f32 to vector<96x32xf32>
    %53 = arith.maximumf %51, %52 : vector<96x32xf32>
    %c0_43 = arith.constant 0 : index
    %c0_44 = arith.constant 0 : index
    %54 = vector.load %arg37[%c0_43, %c0_44] : memref<1x32xf32, #tpu.memory_space<vmem>>, vector<1x32xf32>
    %c0_45 = arith.constant 0 : index
    %c0_46 = arith.constant 0 : index
    %55 = vector.load %arg39[%c0_45, %c0_46] : memref<32x32xf32, #tpu.memory_space<vmem>>, vector<32x32xf32>
    %cst_47 = arith.constant dense<0.000000e+00> : vector<36x32xf32>
    %56 = tpu.matmul %15, %55, %cst_47 {dimension_numbers = #tpu.dot_dimension_numbers<[1], [0], [0], [1], [0, 0, 1, 1], [], []>} : vector<36x32xf32>, vector<32x32xf32>, vector<36x32xf32> -> vector<36x32xf32>
    %57 = vector.broadcast %54 : vector<1x32xf32> to vector<36x32xf32>
    %58 = arith.addf %57, %56 : vector<36x32xf32>
    %59 = arith.mulf %58, %58 : vector<36x32xf32>
    %cst_48 = arith.constant dense<0.000000e+00> : vector<36xf32>
    %60 = vector.multi_reduction <add>, %59, %cst_48 [1] : vector<36x32xf32> to vector<36xf32>
    %61 = vector.shape_cast %60 : vector<36xf32> to vector<36x1xf32>
    %62 = math.sqrt %61 : vector<36x1xf32>
    %cst_49 = arith.constant 9.99999996E-13 : f32
    %63 = vector.broadcast %cst_49 : f32 to vector<36x1xf32>
    %64 = arith.maximumf %62, %63 : vector<36x1xf32>
    %65 = vector.broadcast %64 : vector<36x1xf32> to vector<36x32xf32>
    %66 = arith.divf %58, %65 : vector<36x32xf32>
    %cst_50 = arith.constant 0.000000e+00 : f32
    %67 = vector.broadcast %cst_50 : f32 to vector<36x32xf32>
    %68 = arith.maximumf %66, %67 : vector<36x32xf32>
    %c0_51 = arith.constant 0 : index
    %c0_52 = arith.constant 0 : index
    %69 = vector.load %arg40[%c0_51, %c0_52] : memref<1x32xf32, #tpu.memory_space<vmem>>, vector<1x32xf32>
    %c0_53 = arith.constant 0 : index
    %c0_54 = arith.constant 0 : index
    %70 = vector.load %arg42[%c0_53, %c0_54] : memref<32x32xf32, #tpu.memory_space<vmem>>, vector<32x32xf32>
    %cst_55 = arith.constant dense<0.000000e+00> : vector<36x32xf32>
    %71 = tpu.matmul %68, %70, %cst_55 {dimension_numbers = #tpu.dot_dimension_numbers<[1], [0], [0], [1], [0, 0, 1, 1], [], []>} : vector<36x32xf32>, vector<32x32xf32>, vector<36x32xf32> -> vector<36x32xf32>
    %72 = vector.broadcast %69 : vector<1x32xf32> to vector<36x32xf32>
    %73 = arith.addf %72, %71 : vector<36x32xf32>
    %74 = arith.mulf %73, %73 : vector<36x32xf32>
    %cst_56 = arith.constant dense<0.000000e+00> : vector<36xf32>
    %75 = vector.multi_reduction <add>, %74, %cst_56 [1] : vector<36x32xf32> to vector<36xf32>
    %76 = vector.shape_cast %75 : vector<36xf32> to vector<36x1xf32>
    %77 = math.sqrt %76 : vector<36x1xf32>
    %cst_57 = arith.constant 9.99999996E-13 : f32
    %78 = vector.broadcast %cst_57 : f32 to vector<36x1xf32>
    %79 = arith.maximumf %77, %78 : vector<36x1xf32>
    %80 = vector.broadcast %79 : vector<36x1xf32> to vector<36x32xf32>
    %81 = arith.divf %73, %80 : vector<36x32xf32>
    %cst_58 = arith.constant 0.000000e+00 : f32
    %82 = vector.broadcast %cst_58 : f32 to vector<36x32xf32>
    %83 = arith.maximumf %81, %82 : vector<36x32xf32>
    %cst_59 = arith.constant dense<0.000000e+00> : vector<96x32xf32>
    %84 = tpu.matmul %2, %15, %cst_59 {dimension_numbers = #tpu.dot_dimension_numbers<[1], [0], [0], [1], [0, 0, 1, 1], [], []>} : vector<96x36xf32>, vector<36x32xf32>, vector<96x32xf32> -> vector<96x32xf32>
    %cst_60 = arith.constant dense<0.000000e+00> : vector<36x32xf32>
    %85 = tpu.matmul %3, %10, %cst_60 {dimension_numbers = #tpu.dot_dimension_numbers<[1], [0], [0], [1], [0, 0, 1, 1], [], []>} : vector<36x96xf32>, vector<96x32xf32>, vector<36x32xf32> -> vector<36x32xf32>
    %c0_61 = arith.constant 0 : index
    %c0_62 = arith.constant 0 : index
    %86 = vector.load %arg54[%c0_61, %c0_62] : memref<96x32xf32, #tpu.memory_space<vmem>>, vector<96x32xf32>
    %c0_63 = arith.constant 0 : index
    %c0_64 = arith.constant 0 : index
    %87 = vector.load %arg51[%c0_63, %c0_64] : memref<1x32xf32, #tpu.memory_space<vmem>>, vector<1x32xf32>
    %88 = vector.extract_strided_slice %86 {offsets = [0, 0], sizes = [32, 32], strides = [1, 1]} : vector<96x32xf32> to vector<32x32xf32>
    %cst_65 = arith.constant dense<0.000000e+00> : vector<96x32xf32>
    %89 = tpu.matmul %10, %88, %cst_65 {dimension_numbers = #tpu.dot_dimension_numbers<[1], [0], [0], [1], [0, 0, 1, 1], [], []>} : vector<96x32xf32>, vector<32x32xf32>, vector<96x32xf32> -> vector<96x32xf32>
    %90 = vector.broadcast %87 : vector<1x32xf32> to vector<96x32xf32>
    %91 = arith.addf %90, %89 : vector<96x32xf32>
    %92 = vector.extract_strided_slice %86 {offsets = [32, 0], sizes = [32, 32], strides = [1, 1]} : vector<96x32xf32> to vector<32x32xf32>
    %cst_66 = arith.constant dense<0.000000e+00> : vector<96x32xf32>
    %93 = tpu.matmul %53, %92, %cst_66 {dimension_numbers = #tpu.dot_dimension_numbers<[1], [0], [0], [1], [0, 0, 1, 1], [], []>} : vector<96x32xf32>, vector<32x32xf32>, vector<96x32xf32> -> vector<96x32xf32>
    %94 = arith.addf %91, %93 : vector<96x32xf32>
    %95 = vector.extract_strided_slice %86 {offsets = [64, 0], sizes = [32, 32], strides = [1, 1]} : vector<96x32xf32> to vector<32x32xf32>
    %cst_67 = arith.constant dense<0.000000e+00> : vector<96x32xf32>
    %96 = tpu.matmul %84, %95, %cst_67 {dimension_numbers = #tpu.dot_dimension_numbers<[1], [0], [0], [1], [0, 0, 1, 1], [], []>} : vector<96x32xf32>, vector<32x32xf32>, vector<96x32xf32> -> vector<96x32xf32>
    %97 = arith.addf %94, %96 : vector<96x32xf32>
    %cst_68 = arith.constant dense<0.000000e+00> : vector<96xf32>
    %98 = vector.multi_reduction <add>, %97, %cst_68 [1] : vector<96x32xf32> to vector<96xf32>
    %99 = vector.shape_cast %98 : vector<96xf32> to vector<96x1xf32>
    %cst_69 = arith.constant 3.200000e+01 : f32
    %100 = vector.broadcast %cst_69 : f32 to vector<96x1xf32>
    %101 = arith.divf %99, %100 : vector<96x1xf32>
    %102 = vector.broadcast %101 : vector<96x1xf32> to vector<96x32xf32>
    %103 = arith.subf %97, %102 : vector<96x32xf32>
    %104 = arith.mulf %103, %103 : vector<96x32xf32>
    %cst_70 = arith.constant dense<0.000000e+00> : vector<96xf32>
    %105 = vector.multi_reduction <add>, %104, %cst_70 [1] : vector<96x32xf32> to vector<96xf32>
    %106 = vector.shape_cast %105 : vector<96xf32> to vector<96x1xf32>
    %cst_71 = arith.constant 3.200000e+01 : f32
    %107 = vector.broadcast %cst_71 : f32 to vector<96x1xf32>
    %108 = arith.divf %106, %107 : vector<96x1xf32>
    %cst_72 = arith.constant 9.99999974E-6 : f32
    %109 = vector.broadcast %cst_72 : f32 to vector<96x1xf32>
    %110 = arith.addf %108, %109 : vector<96x1xf32>
    %111 = math.rsqrt %110 : vector<96x1xf32>
    %112 = vector.broadcast %111 : vector<96x1xf32> to vector<96x32xf32>
    %113 = arith.mulf %103, %112 : vector<96x32xf32>
    %c0_73 = arith.constant 0 : index
    %c0_74 = arith.constant 0 : index
    %114 = vector.load %arg53[%c0_73, %c0_74] : memref<1x32xf32, #tpu.memory_space<vmem>>, vector<1x32xf32>
    %115 = vector.broadcast %114 : vector<1x32xf32> to vector<96x32xf32>
    %116 = arith.mulf %113, %115 : vector<96x32xf32>
    %c0_75 = arith.constant 0 : index
    %c0_76 = arith.constant 0 : index
    %117 = vector.load %arg52[%c0_75, %c0_76] : memref<1x32xf32, #tpu.memory_space<vmem>>, vector<1x32xf32>
    %118 = vector.broadcast %117 : vector<1x32xf32> to vector<96x32xf32>
    %119 = arith.addf %116, %118 : vector<96x32xf32>
    %cst_77 = arith.constant 0.000000e+00 : f32
    %120 = vector.broadcast %cst_77 : f32 to vector<96x32xf32>
    %121 = arith.maximumf %119, %120 : vector<96x32xf32>
    %c0_78 = arith.constant 0 : index
    %c0_79 = arith.constant 0 : index
    %122 = vector.load %arg36[%c0_78, %c0_79] : memref<96x32xf32, #tpu.memory_space<vmem>>, vector<96x32xf32>
    %c0_80 = arith.constant 0 : index
    %c0_81 = arith.constant 0 : index
    %123 = vector.load %arg33[%c0_80, %c0_81] : memref<1x32xf32, #tpu.memory_space<vmem>>, vector<1x32xf32>
    %124 = vector.extract_strided_slice %122 {offsets = [0, 0], sizes = [32, 32], strides = [1, 1]} : vector<96x32xf32> to vector<32x32xf32>
    %cst_82 = arith.constant dense<0.000000e+00> : vector<36x32xf32>
    %125 = tpu.matmul %15, %124, %cst_82 {dimension_numbers = #tpu.dot_dimension_numbers<[1], [0], [0], [1], [0, 0, 1, 1], [], []>} : vector<36x32xf32>, vector<32x32xf32>, vector<36x32xf32> -> vector<36x32xf32>
    %126 = vector.broadcast %123 : vector<1x32xf32> to vector<36x32xf32>
    %127 = arith.addf %126, %125 : vector<36x32xf32>
    %128 = vector.extract_strided_slice %122 {offsets = [32, 0], sizes = [32, 32], strides = [1, 1]} : vector<96x32xf32> to vector<32x32xf32>
    %cst_83 = arith.constant dense<0.000000e+00> : vector<36x32xf32>
    %129 = tpu.matmul %83, %128, %cst_83 {dimension_numbers = #tpu.dot_dimension_numbers<[1], [0], [0], [1], [0, 0, 1, 1], [], []>} : vector<36x32xf32>, vector<32x32xf32>, vector<36x32xf32> -> vector<36x32xf32>
    %130 = arith.addf %127, %129 : vector<36x32xf32>
    %131 = vector.extract_strided_slice %122 {offsets = [64, 0], sizes = [32, 32], strides = [1, 1]} : vector<96x32xf32> to vector<32x32xf32>
    %cst_84 = arith.constant dense<0.000000e+00> : vector<36x32xf32>
    %132 = tpu.matmul %85, %131, %cst_84 {dimension_numbers = #tpu.dot_dimension_numbers<[1], [0], [0], [1], [0, 0, 1, 1], [], []>} : vector<36x32xf32>, vector<32x32xf32>, vector<36x32xf32> -> vector<36x32xf32>
    %133 = arith.addf %130, %132 : vector<36x32xf32>
    %cst_85 = arith.constant dense<0.000000e+00> : vector<36xf32>
    %134 = vector.multi_reduction <add>, %133, %cst_85 [1] : vector<36x32xf32> to vector<36xf32>
    %135 = vector.shape_cast %134 : vector<36xf32> to vector<36x1xf32>
    %cst_86 = arith.constant 3.200000e+01 : f32
    %136 = vector.broadcast %cst_86 : f32 to vector<36x1xf32>
    %137 = arith.divf %135, %136 : vector<36x1xf32>
    %138 = vector.broadcast %137 : vector<36x1xf32> to vector<36x32xf32>
    %139 = arith.subf %133, %138 : vector<36x32xf32>
    %140 = arith.mulf %139, %139 : vector<36x32xf32>
    %cst_87 = arith.constant dense<0.000000e+00> : vector<36xf32>
    %141 = vector.multi_reduction <add>, %140, %cst_87 [1] : vector<36x32xf32> to vector<36xf32>
    %142 = vector.shape_cast %141 : vector<36xf32> to vector<36x1xf32>
    %cst_88 = arith.constant 3.200000e+01 : f32
    %143 = vector.broadcast %cst_88 : f32 to vector<36x1xf32>
    %144 = arith.divf %142, %143 : vector<36x1xf32>
    %cst_89 = arith.constant 9.99999974E-6 : f32
    %145 = vector.broadcast %cst_89 : f32 to vector<36x1xf32>
    %146 = arith.addf %144, %145 : vector<36x1xf32>
    %147 = math.rsqrt %146 : vector<36x1xf32>
    %148 = vector.broadcast %147 : vector<36x1xf32> to vector<36x32xf32>
    %149 = arith.mulf %139, %148 : vector<36x32xf32>
    %c0_90 = arith.constant 0 : index
    %c0_91 = arith.constant 0 : index
    %150 = vector.load %arg35[%c0_90, %c0_91] : memref<1x32xf32, #tpu.memory_space<vmem>>, vector<1x32xf32>
    %151 = vector.broadcast %150 : vector<1x32xf32> to vector<36x32xf32>
    %152 = arith.mulf %149, %151 : vector<36x32xf32>
    %c0_92 = arith.constant 0 : index
    %c0_93 = arith.constant 0 : index
    %153 = vector.load %arg34[%c0_92, %c0_93] : memref<1x32xf32, #tpu.memory_space<vmem>>, vector<1x32xf32>
    %154 = vector.broadcast %153 : vector<1x32xf32> to vector<36x32xf32>
    %155 = arith.addf %152, %154 : vector<36x32xf32>
    %cst_94 = arith.constant 0.000000e+00 : f32
    %156 = vector.broadcast %cst_94 : f32 to vector<36x32xf32>
    %157 = arith.maximumf %155, %156 : vector<36x32xf32>
    %c0_95 = arith.constant 0 : index
    %c0_96 = arith.constant 0 : index
    %158 = vector.load %arg24[%c0_95, %c0_96] : memref<48x32xf32, #tpu.memory_space<vmem>>, vector<48x32xf32>
    %cst_97 = arith.constant dense<0.000000e+00> : vector<96x32xf32>
    %159 = tpu.matmul %0, %158, %cst_97 {dimension_numbers = #tpu.dot_dimension_numbers<[1], [0], [0], [1], [0, 0, 1, 1], [], []>} : vector<96x48xf32>, vector<48x32xf32>, vector<96x32xf32> -> vector<96x32xf32>
    %c0_98 = arith.constant 0 : index
    %c0_99 = arith.constant 0 : index
    %160 = vector.load %arg21[%c0_98, %c0_99] : memref<1x32xf32, #tpu.memory_space<vmem>>, vector<1x32xf32>
    %161 = vector.broadcast %160 : vector<1x32xf32> to vector<96x32xf32>
    %162 = arith.addf %159, %161 : vector<96x32xf32>
    %c0_100 = arith.constant 0 : index
    %c0_101 = arith.constant 0 : index
    %163 = vector.load %arg22[%c0_100, %c0_101] : memref<64x32xf32, #tpu.memory_space<vmem>>, vector<64x32xf32>
    %164 = vector.extract_strided_slice %163 {offsets = [0, 0], sizes = [32, 32], strides = [1, 1]} : vector<64x32xf32> to vector<32x32xf32>
    %cst_102 = arith.constant dense<0.000000e+00> : vector<96x32xf32>
    %165 = tpu.matmul %162, %164, %cst_102 {dimension_numbers = #tpu.dot_dimension_numbers<[1], [0], [0], [1], [0, 0, 1, 1], [], []>} : vector<96x32xf32>, vector<32x32xf32>, vector<96x32xf32> -> vector<96x32xf32>
    %166 = vector.extract_strided_slice %163 {offsets = [32, 0], sizes = [32, 32], strides = [1, 1]} : vector<64x32xf32> to vector<32x32xf32>
    %cst_103 = arith.constant dense<0.000000e+00> : vector<96x32xf32>
    %167 = tpu.matmul %121, %166, %cst_103 {dimension_numbers = #tpu.dot_dimension_numbers<[1], [0], [0], [1], [0, 0, 1, 1], [], []>} : vector<96x32xf32>, vector<32x32xf32>, vector<96x32xf32> -> vector<96x32xf32>
    %168 = arith.addf %165, %167 : vector<96x32xf32>
    %c0_104 = arith.constant 0 : index
    %c0_105 = arith.constant 0 : index
    %169 = vector.load %arg19[%c0_104, %c0_105] : memref<1x32xf32, #tpu.memory_space<vmem>>, vector<1x32xf32>
    %170 = vector.broadcast %169 : vector<1x32xf32> to vector<96x32xf32>
    %171 = arith.addf %168, %170 : vector<96x32xf32>
    %cst_106 = arith.constant 0.000000e+00 : f32
    %172 = vector.broadcast %cst_106 : f32 to vector<96x32xf32>
    %173 = arith.maximumf %171, %172 : vector<96x32xf32>
    %c0_107 = arith.constant 0 : index
    %c0_108 = arith.constant 0 : index
    %174 = vector.load %arg23[%c0_107, %c0_108] : memref<32x1xf32, #tpu.memory_space<vmem>>, vector<32x1xf32>
    %cst_109 = arith.constant dense<0.000000e+00> : vector<96x1xf32>
    %175 = tpu.matmul %173, %174, %cst_109 {dimension_numbers = #tpu.dot_dimension_numbers<[1], [0], [0], [1], [0, 0, 1, 1], [], []>} : vector<96x32xf32>, vector<32x1xf32>, vector<96x1xf32> -> vector<96x1xf32>
    %c0_110 = arith.constant 0 : index
    %c0_111 = arith.constant 0 : index
    %176 = vector.load %arg20[%c0_110, %c0_111] : memref<1x1xf32, #tpu.memory_space<vmem>>, vector<1x1xf32>
    %177 = vector.broadcast %176 : vector<1x1xf32> to vector<96x1xf32>
    %178 = arith.addf %175, %177 : vector<96x1xf32>
    %179 = arith.negf %178 : vector<96x1xf32>
    %180 = math.exp %179 : vector<96x1xf32>
    %cst_112 = arith.constant 1.000000e+00 : f32
    %181 = vector.broadcast %cst_112 : f32 to vector<96x1xf32>
    %182 = arith.addf %181, %180 : vector<96x1xf32>
    %183 = arith.divf %181, %182 : vector<96x1xf32>
    %cst_113 = arith.constant dense<0.000000e+00> : vector<1xf32>
    %184 = vector.multi_reduction <add>, %183, %cst_113 [0] : vector<96x1xf32> to vector<1xf32>
    %185 = vector.shape_cast %184 : vector<1xf32> to vector<1x1xf32>
    %cst_114 = arith.constant 0.010416667 : f32
    %186 = vector.broadcast %cst_114 : f32 to vector<1x1xf32>
    %187 = arith.mulf %185, %186 : vector<1x1xf32>
    %188 = arith.addf %5, %187 : vector<1x1xf32>
    %c0_115 = arith.constant 0 : index
    %c0_116 = arith.constant 0 : index
    %189 = vector.load %arg12[%c0_115, %c0_116] : memref<18x32xf32, #tpu.memory_space<vmem>>, vector<18x32xf32>
    %cst_117 = arith.constant dense<0.000000e+00> : vector<36x32xf32>
    %190 = tpu.matmul %1, %189, %cst_117 {dimension_numbers = #tpu.dot_dimension_numbers<[1], [0], [0], [1], [0, 0, 1, 1], [], []>} : vector<36x18xf32>, vector<18x32xf32>, vector<36x32xf32> -> vector<36x32xf32>
    %c0_118 = arith.constant 0 : index
    %c0_119 = arith.constant 0 : index
    %191 = vector.load %arg9[%c0_118, %c0_119] : memref<1x32xf32, #tpu.memory_space<vmem>>, vector<1x32xf32>
    %192 = vector.broadcast %191 : vector<1x32xf32> to vector<36x32xf32>
    %193 = arith.addf %190, %192 : vector<36x32xf32>
    %c0_120 = arith.constant 0 : index
    %c0_121 = arith.constant 0 : index
    %194 = vector.load %arg10[%c0_120, %c0_121] : memref<64x32xf32, #tpu.memory_space<vmem>>, vector<64x32xf32>
    %195 = vector.extract_strided_slice %194 {offsets = [0, 0], sizes = [32, 32], strides = [1, 1]} : vector<64x32xf32> to vector<32x32xf32>
    %cst_122 = arith.constant dense<0.000000e+00> : vector<36x32xf32>
    %196 = tpu.matmul %193, %195, %cst_122 {dimension_numbers = #tpu.dot_dimension_numbers<[1], [0], [0], [1], [0, 0, 1, 1], [], []>} : vector<36x32xf32>, vector<32x32xf32>, vector<36x32xf32> -> vector<36x32xf32>
    %197 = vector.extract_strided_slice %194 {offsets = [32, 0], sizes = [32, 32], strides = [1, 1]} : vector<64x32xf32> to vector<32x32xf32>
    %cst_123 = arith.constant dense<0.000000e+00> : vector<36x32xf32>
    %198 = tpu.matmul %157, %197, %cst_123 {dimension_numbers = #tpu.dot_dimension_numbers<[1], [0], [0], [1], [0, 0, 1, 1], [], []>} : vector<36x32xf32>, vector<32x32xf32>, vector<36x32xf32> -> vector<36x32xf32>
    %199 = arith.addf %196, %198 : vector<36x32xf32>
    %c0_124 = arith.constant 0 : index
    %c0_125 = arith.constant 0 : index
    %200 = vector.load %arg7[%c0_124, %c0_125] : memref<1x32xf32, #tpu.memory_space<vmem>>, vector<1x32xf32>
    %201 = vector.broadcast %200 : vector<1x32xf32> to vector<36x32xf32>
    %202 = arith.addf %199, %201 : vector<36x32xf32>
    %cst_126 = arith.constant 0.000000e+00 : f32
    %203 = vector.broadcast %cst_126 : f32 to vector<36x32xf32>
    %204 = arith.maximumf %202, %203 : vector<36x32xf32>
    %c0_127 = arith.constant 0 : index
    %c0_128 = arith.constant 0 : index
    %205 = vector.load %arg11[%c0_127, %c0_128] : memref<32x1xf32, #tpu.memory_space<vmem>>, vector<32x1xf32>
    %cst_129 = arith.constant dense<0.000000e+00> : vector<36x1xf32>
    %206 = tpu.matmul %204, %205, %cst_129 {dimension_numbers = #tpu.dot_dimension_numbers<[1], [0], [0], [1], [0, 0, 1, 1], [], []>} : vector<36x32xf32>, vector<32x1xf32>, vector<36x1xf32> -> vector<36x1xf32>
    %c0_130 = arith.constant 0 : index
    %c0_131 = arith.constant 0 : index
    %207 = vector.load %arg8[%c0_130, %c0_131] : memref<1x1xf32, #tpu.memory_space<vmem>>, vector<1x1xf32>
    %208 = vector.broadcast %207 : vector<1x1xf32> to vector<36x1xf32>
    %209 = arith.addf %206, %208 : vector<36x1xf32>
    %210 = arith.negf %209 : vector<36x1xf32>
    %211 = math.exp %210 : vector<36x1xf32>
    %cst_132 = arith.constant 1.000000e+00 : f32
    %212 = vector.broadcast %cst_132 : f32 to vector<36x1xf32>
    %213 = arith.addf %212, %211 : vector<36x1xf32>
    %214 = arith.divf %212, %213 : vector<36x1xf32>
    %cst_133 = arith.constant dense<0.000000e+00> : vector<1xf32>
    %215 = vector.multi_reduction <add>, %214, %cst_133 [0] : vector<36x1xf32> to vector<1xf32>
    %216 = vector.shape_cast %215 : vector<1xf32> to vector<1x1xf32>
    %cst_134 = arith.constant 0.027777778 : f32
    %217 = vector.broadcast %cst_134 : f32 to vector<1x1xf32>
    %218 = arith.mulf %216, %217 : vector<1x1xf32>
    %219 = arith.addf %188, %218 : vector<1x1xf32>
    %cst_135 = arith.constant dense<0.000000e+00> : vector<96x32xf32>
    %220 = tpu.matmul %4, %121, %cst_135 {dimension_numbers = #tpu.dot_dimension_numbers<[1], [0], [0], [1], [0, 0, 1, 1], [], []>} : vector<96x96xf32>, vector<96x32xf32>, vector<96x32xf32> -> vector<96x32xf32>
    %c0_136 = arith.constant 0 : index
    %c0_137 = arith.constant 0 : index
    %221 = vector.load %arg66[%c0_136, %c0_137] : memref<32x32xf32, #tpu.memory_space<vmem>>, vector<32x32xf32>
    %cst_138 = arith.constant dense<0.000000e+00> : vector<96x32xf32>
    %222 = tpu.matmul %220, %221, %cst_138 {dimension_numbers = #tpu.dot_dimension_numbers<[1], [0], [0], [1], [0, 0, 1, 1], [], []>} : vector<96x32xf32>, vector<32x32xf32>, vector<96x32xf32> -> vector<96x32xf32>
    %c0_139 = arith.constant 0 : index
    %c0_140 = arith.constant 0 : index
    %223 = vector.load %arg65[%c0_139, %c0_140] : memref<1x32xf32, #tpu.memory_space<vmem>>, vector<1x32xf32>
    %224 = vector.broadcast %223 : vector<1x32xf32> to vector<96x32xf32>
    %225 = arith.addf %222, %224 : vector<96x32xf32>
    %c0_141 = arith.constant 0 : index
    %c0_142 = arith.constant 0 : index
    %226 = vector.load %arg67[%c0_141, %c0_142] : memref<32x32xf32, #tpu.memory_space<vmem>>, vector<32x32xf32>
    %cst_143 = arith.constant dense<0.000000e+00> : vector<96x32xf32>
    %227 = tpu.matmul %121, %226, %cst_143 {dimension_numbers = #tpu.dot_dimension_numbers<[1], [0], [0], [1], [0, 0, 1, 1], [], []>} : vector<96x32xf32>, vector<32x32xf32>, vector<96x32xf32> -> vector<96x32xf32>
    %228 = arith.addf %225, %227 : vector<96x32xf32>
    %229 = arith.mulf %228, %228 : vector<96x32xf32>
    %cst_144 = arith.constant dense<0.000000e+00> : vector<96xf32>
    %230 = vector.multi_reduction <add>, %229, %cst_144 [1] : vector<96x32xf32> to vector<96xf32>
    %231 = vector.shape_cast %230 : vector<96xf32> to vector<96x1xf32>
    %232 = math.sqrt %231 : vector<96x1xf32>
    %cst_145 = arith.constant 9.99999996E-13 : f32
    %233 = vector.broadcast %cst_145 : f32 to vector<96x1xf32>
    %234 = arith.maximumf %232, %233 : vector<96x1xf32>
    %235 = vector.broadcast %234 : vector<96x1xf32> to vector<96x32xf32>
    %236 = arith.divf %228, %235 : vector<96x32xf32>
    %cst_146 = arith.constant 0.000000e+00 : f32
    %237 = vector.broadcast %cst_146 : f32 to vector<96x32xf32>
    %238 = arith.maximumf %236, %237 : vector<96x32xf32>
    %cst_147 = arith.constant dense<0.000000e+00> : vector<96x32xf32>
    %239 = tpu.matmul %4, %238, %cst_147 {dimension_numbers = #tpu.dot_dimension_numbers<[1], [0], [0], [1], [0, 0, 1, 1], [], []>} : vector<96x96xf32>, vector<96x32xf32>, vector<96x32xf32> -> vector<96x32xf32>
    %c0_148 = arith.constant 0 : index
    %c0_149 = arith.constant 0 : index
    %240 = vector.load %arg69[%c0_148, %c0_149] : memref<32x32xf32, #tpu.memory_space<vmem>>, vector<32x32xf32>
    %cst_150 = arith.constant dense<0.000000e+00> : vector<96x32xf32>
    %241 = tpu.matmul %239, %240, %cst_150 {dimension_numbers = #tpu.dot_dimension_numbers<[1], [0], [0], [1], [0, 0, 1, 1], [], []>} : vector<96x32xf32>, vector<32x32xf32>, vector<96x32xf32> -> vector<96x32xf32>
    %c0_151 = arith.constant 0 : index
    %c0_152 = arith.constant 0 : index
    %242 = vector.load %arg68[%c0_151, %c0_152] : memref<1x32xf32, #tpu.memory_space<vmem>>, vector<1x32xf32>
    %243 = vector.broadcast %242 : vector<1x32xf32> to vector<96x32xf32>
    %244 = arith.addf %241, %243 : vector<96x32xf32>
    %c0_153 = arith.constant 0 : index
    %c0_154 = arith.constant 0 : index
    %245 = vector.load %arg70[%c0_153, %c0_154] : memref<32x32xf32, #tpu.memory_space<vmem>>, vector<32x32xf32>
    %cst_155 = arith.constant dense<0.000000e+00> : vector<96x32xf32>
    %246 = tpu.matmul %238, %245, %cst_155 {dimension_numbers = #tpu.dot_dimension_numbers<[1], [0], [0], [1], [0, 0, 1, 1], [], []>} : vector<96x32xf32>, vector<32x32xf32>, vector<96x32xf32> -> vector<96x32xf32>
    %247 = arith.addf %244, %246 : vector<96x32xf32>
    %248 = arith.mulf %247, %247 : vector<96x32xf32>
    %cst_156 = arith.constant dense<0.000000e+00> : vector<96xf32>
    %249 = vector.multi_reduction <add>, %248, %cst_156 [1] : vector<96x32xf32> to vector<96xf32>
    %250 = vector.shape_cast %249 : vector<96xf32> to vector<96x1xf32>
    %251 = math.sqrt %250 : vector<96x1xf32>
    %cst_157 = arith.constant 9.99999996E-13 : f32
    %252 = vector.broadcast %cst_157 : f32 to vector<96x1xf32>
    %253 = arith.maximumf %251, %252 : vector<96x1xf32>
    %254 = vector.broadcast %253 : vector<96x1xf32> to vector<96x32xf32>
    %255 = arith.divf %247, %254 : vector<96x32xf32>
    %cst_158 = arith.constant 0.000000e+00 : f32
    %256 = vector.broadcast %cst_158 : f32 to vector<96x32xf32>
    %257 = arith.maximumf %255, %256 : vector<96x32xf32>
    %c0_159 = arith.constant 0 : index
    %c0_160 = arith.constant 0 : index
    %258 = vector.load %arg59[%c0_159, %c0_160] : memref<1x32xf32, #tpu.memory_space<vmem>>, vector<1x32xf32>
    %c0_161 = arith.constant 0 : index
    %c0_162 = arith.constant 0 : index
    %259 = vector.load %arg61[%c0_161, %c0_162] : memref<32x32xf32, #tpu.memory_space<vmem>>, vector<32x32xf32>
    %cst_163 = arith.constant dense<0.000000e+00> : vector<36x32xf32>
    %260 = tpu.matmul %157, %259, %cst_163 {dimension_numbers = #tpu.dot_dimension_numbers<[1], [0], [0], [1], [0, 0, 1, 1], [], []>} : vector<36x32xf32>, vector<32x32xf32>, vector<36x32xf32> -> vector<36x32xf32>
    %261 = vector.broadcast %258 : vector<1x32xf32> to vector<36x32xf32>
    %262 = arith.addf %261, %260 : vector<36x32xf32>
    %263 = arith.mulf %262, %262 : vector<36x32xf32>
    %cst_164 = arith.constant dense<0.000000e+00> : vector<36xf32>
    %264 = vector.multi_reduction <add>, %263, %cst_164 [1] : vector<36x32xf32> to vector<36xf32>
    %265 = vector.shape_cast %264 : vector<36xf32> to vector<36x1xf32>
    %266 = math.sqrt %265 : vector<36x1xf32>
    %cst_165 = arith.constant 9.99999996E-13 : f32
    %267 = vector.broadcast %cst_165 : f32 to vector<36x1xf32>
    %268 = arith.maximumf %266, %267 : vector<36x1xf32>
    %269 = vector.broadcast %268 : vector<36x1xf32> to vector<36x32xf32>
    %270 = arith.divf %262, %269 : vector<36x32xf32>
    %cst_166 = arith.constant 0.000000e+00 : f32
    %271 = vector.broadcast %cst_166 : f32 to vector<36x32xf32>
    %272 = arith.maximumf %270, %271 : vector<36x32xf32>
    %c0_167 = arith.constant 0 : index
    %c0_168 = arith.constant 0 : index
    %273 = vector.load %arg62[%c0_167, %c0_168] : memref<1x32xf32, #tpu.memory_space<vmem>>, vector<1x32xf32>
    %c0_169 = arith.constant 0 : index
    %c0_170 = arith.constant 0 : index
    %274 = vector.load %arg64[%c0_169, %c0_170] : memref<32x32xf32, #tpu.memory_space<vmem>>, vector<32x32xf32>
    %cst_171 = arith.constant dense<0.000000e+00> : vector<36x32xf32>
    %275 = tpu.matmul %272, %274, %cst_171 {dimension_numbers = #tpu.dot_dimension_numbers<[1], [0], [0], [1], [0, 0, 1, 1], [], []>} : vector<36x32xf32>, vector<32x32xf32>, vector<36x32xf32> -> vector<36x32xf32>
    %276 = vector.broadcast %273 : vector<1x32xf32> to vector<36x32xf32>
    %277 = arith.addf %276, %275 : vector<36x32xf32>
    %278 = arith.mulf %277, %277 : vector<36x32xf32>
    %cst_172 = arith.constant dense<0.000000e+00> : vector<36xf32>
    %279 = vector.multi_reduction <add>, %278, %cst_172 [1] : vector<36x32xf32> to vector<36xf32>
    %280 = vector.shape_cast %279 : vector<36xf32> to vector<36x1xf32>
    %281 = math.sqrt %280 : vector<36x1xf32>
    %cst_173 = arith.constant 9.99999996E-13 : f32
    %282 = vector.broadcast %cst_173 : f32 to vector<36x1xf32>
    %283 = arith.maximumf %281, %282 : vector<36x1xf32>
    %284 = vector.broadcast %283 : vector<36x1xf32> to vector<36x32xf32>
    %285 = arith.divf %277, %284 : vector<36x32xf32>
    %cst_174 = arith.constant 0.000000e+00 : f32
    %286 = vector.broadcast %cst_174 : f32 to vector<36x32xf32>
    %287 = arith.maximumf %285, %286 : vector<36x32xf32>
    %cst_175 = arith.constant dense<0.000000e+00> : vector<96x32xf32>
    %288 = tpu.matmul %2, %157, %cst_175 {dimension_numbers = #tpu.dot_dimension_numbers<[1], [0], [0], [1], [0, 0, 1, 1], [], []>} : vector<96x36xf32>, vector<36x32xf32>, vector<96x32xf32> -> vector<96x32xf32>
    %cst_176 = arith.constant dense<0.000000e+00> : vector<36x32xf32>
    %289 = tpu.matmul %3, %121, %cst_176 {dimension_numbers = #tpu.dot_dimension_numbers<[1], [0], [0], [1], [0, 0, 1, 1], [], []>} : vector<36x96xf32>, vector<96x32xf32>, vector<36x32xf32> -> vector<36x32xf32>
    %c0_177 = arith.constant 0 : index
    %c0_178 = arith.constant 0 : index
    %290 = vector.load %arg74[%c0_177, %c0_178] : memref<96x32xf32, #tpu.memory_space<vmem>>, vector<96x32xf32>
    %c0_179 = arith.constant 0 : index
    %c0_180 = arith.constant 0 : index
    %291 = vector.load %arg71[%c0_179, %c0_180] : memref<1x32xf32, #tpu.memory_space<vmem>>, vector<1x32xf32>
    %292 = vector.extract_strided_slice %290 {offsets = [0, 0], sizes = [32, 32], strides = [1, 1]} : vector<96x32xf32> to vector<32x32xf32>
    %cst_181 = arith.constant dense<0.000000e+00> : vector<96x32xf32>
    %293 = tpu.matmul %121, %292, %cst_181 {dimension_numbers = #tpu.dot_dimension_numbers<[1], [0], [0], [1], [0, 0, 1, 1], [], []>} : vector<96x32xf32>, vector<32x32xf32>, vector<96x32xf32> -> vector<96x32xf32>
    %294 = vector.broadcast %291 : vector<1x32xf32> to vector<96x32xf32>
    %295 = arith.addf %294, %293 : vector<96x32xf32>
    %296 = vector.extract_strided_slice %290 {offsets = [32, 0], sizes = [32, 32], strides = [1, 1]} : vector<96x32xf32> to vector<32x32xf32>
    %cst_182 = arith.constant dense<0.000000e+00> : vector<96x32xf32>
    %297 = tpu.matmul %257, %296, %cst_182 {dimension_numbers = #tpu.dot_dimension_numbers<[1], [0], [0], [1], [0, 0, 1, 1], [], []>} : vector<96x32xf32>, vector<32x32xf32>, vector<96x32xf32> -> vector<96x32xf32>
    %298 = arith.addf %295, %297 : vector<96x32xf32>
    %299 = vector.extract_strided_slice %290 {offsets = [64, 0], sizes = [32, 32], strides = [1, 1]} : vector<96x32xf32> to vector<32x32xf32>
    %cst_183 = arith.constant dense<0.000000e+00> : vector<96x32xf32>
    %300 = tpu.matmul %288, %299, %cst_183 {dimension_numbers = #tpu.dot_dimension_numbers<[1], [0], [0], [1], [0, 0, 1, 1], [], []>} : vector<96x32xf32>, vector<32x32xf32>, vector<96x32xf32> -> vector<96x32xf32>
    %301 = arith.addf %298, %300 : vector<96x32xf32>
    %cst_184 = arith.constant dense<0.000000e+00> : vector<96xf32>
    %302 = vector.multi_reduction <add>, %301, %cst_184 [1] : vector<96x32xf32> to vector<96xf32>
    %303 = vector.shape_cast %302 : vector<96xf32> to vector<96x1xf32>
    %cst_185 = arith.constant 3.200000e+01 : f32
    %304 = vector.broadcast %cst_185 : f32 to vector<96x1xf32>
    %305 = arith.divf %303, %304 : vector<96x1xf32>
    %306 = vector.broadcast %305 : vector<96x1xf32> to vector<96x32xf32>
    %307 = arith.subf %301, %306 : vector<96x32xf32>
    %308 = arith.mulf %307, %307 : vector<96x32xf32>
    %cst_186 = arith.constant dense<0.000000e+00> : vector<96xf32>
    %309 = vector.multi_reduction <add>, %308, %cst_186 [1] : vector<96x32xf32> to vector<96xf32>
    %310 = vector.shape_cast %309 : vector<96xf32> to vector<96x1xf32>
    %cst_187 = arith.constant 3.200000e+01 : f32
    %311 = vector.broadcast %cst_187 : f32 to vector<96x1xf32>
    %312 = arith.divf %310, %311 : vector<96x1xf32>
    %cst_188 = arith.constant 9.99999974E-6 : f32
    %313 = vector.broadcast %cst_188 : f32 to vector<96x1xf32>
    %314 = arith.addf %312, %313 : vector<96x1xf32>
    %315 = math.rsqrt %314 : vector<96x1xf32>
    %316 = vector.broadcast %315 : vector<96x1xf32> to vector<96x32xf32>
    %317 = arith.mulf %307, %316 : vector<96x32xf32>
    %c0_189 = arith.constant 0 : index
    %c0_190 = arith.constant 0 : index
    %318 = vector.load %arg73[%c0_189, %c0_190] : memref<1x32xf32, #tpu.memory_space<vmem>>, vector<1x32xf32>
    %319 = vector.broadcast %318 : vector<1x32xf32> to vector<96x32xf32>
    %320 = arith.mulf %317, %319 : vector<96x32xf32>
    %c0_191 = arith.constant 0 : index
    %c0_192 = arith.constant 0 : index
    %321 = vector.load %arg72[%c0_191, %c0_192] : memref<1x32xf32, #tpu.memory_space<vmem>>, vector<1x32xf32>
    %322 = vector.broadcast %321 : vector<1x32xf32> to vector<96x32xf32>
    %323 = arith.addf %320, %322 : vector<96x32xf32>
    %cst_193 = arith.constant 0.000000e+00 : f32
    %324 = vector.broadcast %cst_193 : f32 to vector<96x32xf32>
    %325 = arith.maximumf %323, %324 : vector<96x32xf32>
    %c0_194 = arith.constant 0 : index
    %c0_195 = arith.constant 0 : index
    %326 = vector.load %arg58[%c0_194, %c0_195] : memref<96x32xf32, #tpu.memory_space<vmem>>, vector<96x32xf32>
    %c0_196 = arith.constant 0 : index
    %c0_197 = arith.constant 0 : index
    %327 = vector.load %arg55[%c0_196, %c0_197] : memref<1x32xf32, #tpu.memory_space<vmem>>, vector<1x32xf32>
    %328 = vector.extract_strided_slice %326 {offsets = [0, 0], sizes = [32, 32], strides = [1, 1]} : vector<96x32xf32> to vector<32x32xf32>
    %cst_198 = arith.constant dense<0.000000e+00> : vector<36x32xf32>
    %329 = tpu.matmul %157, %328, %cst_198 {dimension_numbers = #tpu.dot_dimension_numbers<[1], [0], [0], [1], [0, 0, 1, 1], [], []>} : vector<36x32xf32>, vector<32x32xf32>, vector<36x32xf32> -> vector<36x32xf32>
    %330 = vector.broadcast %327 : vector<1x32xf32> to vector<36x32xf32>
    %331 = arith.addf %330, %329 : vector<36x32xf32>
    %332 = vector.extract_strided_slice %326 {offsets = [32, 0], sizes = [32, 32], strides = [1, 1]} : vector<96x32xf32> to vector<32x32xf32>
    %cst_199 = arith.constant dense<0.000000e+00> : vector<36x32xf32>
    %333 = tpu.matmul %287, %332, %cst_199 {dimension_numbers = #tpu.dot_dimension_numbers<[1], [0], [0], [1], [0, 0, 1, 1], [], []>} : vector<36x32xf32>, vector<32x32xf32>, vector<36x32xf32> -> vector<36x32xf32>
    %334 = arith.addf %331, %333 : vector<36x32xf32>
    %335 = vector.extract_strided_slice %326 {offsets = [64, 0], sizes = [32, 32], strides = [1, 1]} : vector<96x32xf32> to vector<32x32xf32>
    %cst_200 = arith.constant dense<0.000000e+00> : vector<36x32xf32>
    %336 = tpu.matmul %289, %335, %cst_200 {dimension_numbers = #tpu.dot_dimension_numbers<[1], [0], [0], [1], [0, 0, 1, 1], [], []>} : vector<36x32xf32>, vector<32x32xf32>, vector<36x32xf32> -> vector<36x32xf32>
    %337 = arith.addf %334, %336 : vector<36x32xf32>
    %cst_201 = arith.constant dense<0.000000e+00> : vector<36xf32>
    %338 = vector.multi_reduction <add>, %337, %cst_201 [1] : vector<36x32xf32> to vector<36xf32>
    %339 = vector.shape_cast %338 : vector<36xf32> to vector<36x1xf32>
    %cst_202 = arith.constant 3.200000e+01 : f32
    %340 = vector.broadcast %cst_202 : f32 to vector<36x1xf32>
    %341 = arith.divf %339, %340 : vector<36x1xf32>
    %342 = vector.broadcast %341 : vector<36x1xf32> to vector<36x32xf32>
    %343 = arith.subf %337, %342 : vector<36x32xf32>
    %344 = arith.mulf %343, %343 : vector<36x32xf32>
    %cst_203 = arith.constant dense<0.000000e+00> : vector<36xf32>
    %345 = vector.multi_reduction <add>, %344, %cst_203 [1] : vector<36x32xf32> to vector<36xf32>
    %346 = vector.shape_cast %345 : vector<36xf32> to vector<36x1xf32>
    %cst_204 = arith.constant 3.200000e+01 : f32
    %347 = vector.broadcast %cst_204 : f32 to vector<36x1xf32>
    %348 = arith.divf %346, %347 : vector<36x1xf32>
    %cst_205 = arith.constant 9.99999974E-6 : f32
    %349 = vector.broadcast %cst_205 : f32 to vector<36x1xf32>
    %350 = arith.addf %348, %349 : vector<36x1xf32>
    %351 = math.rsqrt %350 : vector<36x1xf32>
    %352 = vector.broadcast %351 : vector<36x1xf32> to vector<36x32xf32>
    %353 = arith.mulf %343, %352 : vector<36x32xf32>
    %c0_206 = arith.constant 0 : index
    %c0_207 = arith.constant 0 : index
    %354 = vector.load %arg57[%c0_206, %c0_207] : memref<1x32xf32, #tpu.memory_space<vmem>>, vector<1x32xf32>
    %355 = vector.broadcast %354 : vector<1x32xf32> to vector<36x32xf32>
    %356 = arith.mulf %353, %355 : vector<36x32xf32>
    %c0_208 = arith.constant 0 : index
    %c0_209 = arith.constant 0 : index
    %357 = vector.load %arg56[%c0_208, %c0_209] : memref<1x32xf32, #tpu.memory_space<vmem>>, vector<1x32xf32>
    %358 = vector.broadcast %357 : vector<1x32xf32> to vector<36x32xf32>
    %359 = arith.addf %356, %358 : vector<36x32xf32>
    %cst_210 = arith.constant 0.000000e+00 : f32
    %360 = vector.broadcast %cst_210 : f32 to vector<36x32xf32>
    %361 = arith.maximumf %359, %360 : vector<36x32xf32>
    %c0_211 = arith.constant 0 : index
    %c0_212 = arith.constant 0 : index
    %362 = vector.load %arg30[%c0_211, %c0_212] : memref<48x32xf32, #tpu.memory_space<vmem>>, vector<48x32xf32>
    %cst_213 = arith.constant dense<0.000000e+00> : vector<96x32xf32>
    %363 = tpu.matmul %0, %362, %cst_213 {dimension_numbers = #tpu.dot_dimension_numbers<[1], [0], [0], [1], [0, 0, 1, 1], [], []>} : vector<96x48xf32>, vector<48x32xf32>, vector<96x32xf32> -> vector<96x32xf32>
    %c0_214 = arith.constant 0 : index
    %c0_215 = arith.constant 0 : index
    %364 = vector.load %arg27[%c0_214, %c0_215] : memref<1x32xf32, #tpu.memory_space<vmem>>, vector<1x32xf32>
    %365 = vector.broadcast %364 : vector<1x32xf32> to vector<96x32xf32>
    %366 = arith.addf %363, %365 : vector<96x32xf32>
    %c0_216 = arith.constant 0 : index
    %c0_217 = arith.constant 0 : index
    %367 = vector.load %arg28[%c0_216, %c0_217] : memref<64x32xf32, #tpu.memory_space<vmem>>, vector<64x32xf32>
    %368 = vector.extract_strided_slice %367 {offsets = [0, 0], sizes = [32, 32], strides = [1, 1]} : vector<64x32xf32> to vector<32x32xf32>
    %cst_218 = arith.constant dense<0.000000e+00> : vector<96x32xf32>
    %369 = tpu.matmul %366, %368, %cst_218 {dimension_numbers = #tpu.dot_dimension_numbers<[1], [0], [0], [1], [0, 0, 1, 1], [], []>} : vector<96x32xf32>, vector<32x32xf32>, vector<96x32xf32> -> vector<96x32xf32>
    %370 = vector.extract_strided_slice %367 {offsets = [32, 0], sizes = [32, 32], strides = [1, 1]} : vector<64x32xf32> to vector<32x32xf32>
    %cst_219 = arith.constant dense<0.000000e+00> : vector<96x32xf32>
    %371 = tpu.matmul %325, %370, %cst_219 {dimension_numbers = #tpu.dot_dimension_numbers<[1], [0], [0], [1], [0, 0, 1, 1], [], []>} : vector<96x32xf32>, vector<32x32xf32>, vector<96x32xf32> -> vector<96x32xf32>
    %372 = arith.addf %369, %371 : vector<96x32xf32>
    %c0_220 = arith.constant 0 : index
    %c0_221 = arith.constant 0 : index
    %373 = vector.load %arg25[%c0_220, %c0_221] : memref<1x32xf32, #tpu.memory_space<vmem>>, vector<1x32xf32>
    %374 = vector.broadcast %373 : vector<1x32xf32> to vector<96x32xf32>
    %375 = arith.addf %372, %374 : vector<96x32xf32>
    %cst_222 = arith.constant 0.000000e+00 : f32
    %376 = vector.broadcast %cst_222 : f32 to vector<96x32xf32>
    %377 = arith.maximumf %375, %376 : vector<96x32xf32>
    %c0_223 = arith.constant 0 : index
    %c0_224 = arith.constant 0 : index
    %378 = vector.load %arg29[%c0_223, %c0_224] : memref<32x1xf32, #tpu.memory_space<vmem>>, vector<32x1xf32>
    %cst_225 = arith.constant dense<0.000000e+00> : vector<96x1xf32>
    %379 = tpu.matmul %377, %378, %cst_225 {dimension_numbers = #tpu.dot_dimension_numbers<[1], [0], [0], [1], [0, 0, 1, 1], [], []>} : vector<96x32xf32>, vector<32x1xf32>, vector<96x1xf32> -> vector<96x1xf32>
    %c0_226 = arith.constant 0 : index
    %c0_227 = arith.constant 0 : index
    %380 = vector.load %arg26[%c0_226, %c0_227] : memref<1x1xf32, #tpu.memory_space<vmem>>, vector<1x1xf32>
    %381 = vector.broadcast %380 : vector<1x1xf32> to vector<96x1xf32>
    %382 = arith.addf %379, %381 : vector<96x1xf32>
    %383 = arith.negf %382 : vector<96x1xf32>
    %384 = math.exp %383 : vector<96x1xf32>
    %cst_228 = arith.constant 1.000000e+00 : f32
    %385 = vector.broadcast %cst_228 : f32 to vector<96x1xf32>
    %386 = arith.addf %385, %384 : vector<96x1xf32>
    %387 = arith.divf %385, %386 : vector<96x1xf32>
    %cst_229 = arith.constant dense<0.000000e+00> : vector<1xf32>
    %388 = vector.multi_reduction <add>, %387, %cst_229 [0] : vector<96x1xf32> to vector<1xf32>
    %389 = vector.shape_cast %388 : vector<1xf32> to vector<1x1xf32>
    %cst_230 = arith.constant 0.010416667 : f32
    %390 = vector.broadcast %cst_230 : f32 to vector<1x1xf32>
    %391 = arith.mulf %389, %390 : vector<1x1xf32>
    %392 = arith.addf %219, %391 : vector<1x1xf32>
    %c0_231 = arith.constant 0 : index
    %c0_232 = arith.constant 0 : index
    %393 = vector.load %arg18[%c0_231, %c0_232] : memref<18x32xf32, #tpu.memory_space<vmem>>, vector<18x32xf32>
    %cst_233 = arith.constant dense<0.000000e+00> : vector<36x32xf32>
    %394 = tpu.matmul %1, %393, %cst_233 {dimension_numbers = #tpu.dot_dimension_numbers<[1], [0], [0], [1], [0, 0, 1, 1], [], []>} : vector<36x18xf32>, vector<18x32xf32>, vector<36x32xf32> -> vector<36x32xf32>
    %c0_234 = arith.constant 0 : index
    %c0_235 = arith.constant 0 : index
    %395 = vector.load %arg15[%c0_234, %c0_235] : memref<1x32xf32, #tpu.memory_space<vmem>>, vector<1x32xf32>
    %396 = vector.broadcast %395 : vector<1x32xf32> to vector<36x32xf32>
    %397 = arith.addf %394, %396 : vector<36x32xf32>
    %c0_236 = arith.constant 0 : index
    %c0_237 = arith.constant 0 : index
    %398 = vector.load %arg16[%c0_236, %c0_237] : memref<64x32xf32, #tpu.memory_space<vmem>>, vector<64x32xf32>
    %399 = vector.extract_strided_slice %398 {offsets = [0, 0], sizes = [32, 32], strides = [1, 1]} : vector<64x32xf32> to vector<32x32xf32>
    %cst_238 = arith.constant dense<0.000000e+00> : vector<36x32xf32>
    %400 = tpu.matmul %397, %399, %cst_238 {dimension_numbers = #tpu.dot_dimension_numbers<[1], [0], [0], [1], [0, 0, 1, 1], [], []>} : vector<36x32xf32>, vector<32x32xf32>, vector<36x32xf32> -> vector<36x32xf32>
    %401 = vector.extract_strided_slice %398 {offsets = [32, 0], sizes = [32, 32], strides = [1, 1]} : vector<64x32xf32> to vector<32x32xf32>
    %cst_239 = arith.constant dense<0.000000e+00> : vector<36x32xf32>
    %402 = tpu.matmul %361, %401, %cst_239 {dimension_numbers = #tpu.dot_dimension_numbers<[1], [0], [0], [1], [0, 0, 1, 1], [], []>} : vector<36x32xf32>, vector<32x32xf32>, vector<36x32xf32> -> vector<36x32xf32>
    %403 = arith.addf %400, %402 : vector<36x32xf32>
    %c0_240 = arith.constant 0 : index
    %c0_241 = arith.constant 0 : index
    %404 = vector.load %arg13[%c0_240, %c0_241] : memref<1x32xf32, #tpu.memory_space<vmem>>, vector<1x32xf32>
    %405 = vector.broadcast %404 : vector<1x32xf32> to vector<36x32xf32>
    %406 = arith.addf %403, %405 : vector<36x32xf32>
    %cst_242 = arith.constant 0.000000e+00 : f32
    %407 = vector.broadcast %cst_242 : f32 to vector<36x32xf32>
    %408 = arith.maximumf %406, %407 : vector<36x32xf32>
    %c0_243 = arith.constant 0 : index
    %c0_244 = arith.constant 0 : index
    %409 = vector.load %arg17[%c0_243, %c0_244] : memref<32x1xf32, #tpu.memory_space<vmem>>, vector<32x1xf32>
    %cst_245 = arith.constant dense<0.000000e+00> : vector<36x1xf32>
    %410 = tpu.matmul %408, %409, %cst_245 {dimension_numbers = #tpu.dot_dimension_numbers<[1], [0], [0], [1], [0, 0, 1, 1], [], []>} : vector<36x32xf32>, vector<32x1xf32>, vector<36x1xf32> -> vector<36x1xf32>
    %c0_246 = arith.constant 0 : index
    %c0_247 = arith.constant 0 : index
    %411 = vector.load %arg14[%c0_246, %c0_247] : memref<1x1xf32, #tpu.memory_space<vmem>>, vector<1x1xf32>
    %412 = vector.broadcast %411 : vector<1x1xf32> to vector<36x1xf32>
    %413 = arith.addf %410, %412 : vector<36x1xf32>
    %414 = arith.negf %413 : vector<36x1xf32>
    %415 = math.exp %414 : vector<36x1xf32>
    %cst_248 = arith.constant 1.000000e+00 : f32
    %416 = vector.broadcast %cst_248 : f32 to vector<36x1xf32>
    %417 = arith.addf %416, %415 : vector<36x1xf32>
    %418 = arith.divf %416, %417 : vector<36x1xf32>
    %cst_249 = arith.constant dense<0.000000e+00> : vector<1xf32>
    %419 = vector.multi_reduction <add>, %418, %cst_249 [0] : vector<36x1xf32> to vector<1xf32>
    %420 = vector.shape_cast %419 : vector<1xf32> to vector<1x1xf32>
    %cst_250 = arith.constant 0.027777778 : f32
    %421 = vector.broadcast %cst_250 : f32 to vector<1x1xf32>
    %422 = arith.mulf %420, %421 : vector<1x1xf32>
    %423 = arith.addf %392, %422 : vector<1x1xf32>
    %c0_251 = arith.constant 0 : index
    %c0_252 = arith.constant 0 : index
    %424 = vector.load %arg5[%c0_251, %c0_252] : memref<2x96xf32, #tpu.memory_space<vmem>>, vector<2x96xf32>
    %cst_253 = arith.constant dense<0.000000e+00> : vector<2x32xf32>
    %425 = tpu.matmul %424, %325, %cst_253 {dimension_numbers = #tpu.dot_dimension_numbers<[1], [0], [0], [1], [0, 0, 1, 1], [], []>} : vector<2x96xf32>, vector<96x32xf32>, vector<2x32xf32> -> vector<2x32xf32>
    %c0_254 = arith.constant 0 : index
    %c0_255 = arith.constant 0 : index
    %426 = vector.load %arg6[%c0_254, %c0_255] : memref<2x36xf32, #tpu.memory_space<vmem>>, vector<2x36xf32>
    %cst_256 = arith.constant dense<0.000000e+00> : vector<2x32xf32>
    %427 = tpu.matmul %426, %361, %cst_256 {dimension_numbers = #tpu.dot_dimension_numbers<[1], [0], [0], [1], [0, 0, 1, 1], [], []>} : vector<2x36xf32>, vector<36x32xf32>, vector<2x32xf32> -> vector<2x32xf32>
    %c0_257 = arith.constant 0 : index
    %c0_258 = arith.constant 0 : index
    %428 = vector.load %arg77[%c0_257, %c0_258] : memref<64x32xf32, #tpu.memory_space<vmem>>, vector<64x32xf32>
    %429 = vector.extract_strided_slice %428 {offsets = [0, 0], sizes = [32, 32], strides = [1, 1]} : vector<64x32xf32> to vector<32x32xf32>
    %cst_259 = arith.constant dense<0.000000e+00> : vector<2x32xf32>
    %430 = tpu.matmul %425, %429, %cst_259 {dimension_numbers = #tpu.dot_dimension_numbers<[1], [0], [0], [1], [0, 0, 1, 1], [], []>} : vector<2x32xf32>, vector<32x32xf32>, vector<2x32xf32> -> vector<2x32xf32>
    %431 = vector.extract_strided_slice %428 {offsets = [32, 0], sizes = [32, 32], strides = [1, 1]} : vector<64x32xf32> to vector<32x32xf32>
    %cst_260 = arith.constant dense<0.000000e+00> : vector<2x32xf32>
    %432 = tpu.matmul %427, %431, %cst_260 {dimension_numbers = #tpu.dot_dimension_numbers<[1], [0], [0], [1], [0, 0, 1, 1], [], []>} : vector<2x32xf32>, vector<32x32xf32>, vector<2x32xf32> -> vector<2x32xf32>
    %433 = arith.addf %430, %432 : vector<2x32xf32>
    %c0_261 = arith.constant 0 : index
    %c0_262 = arith.constant 0 : index
    %434 = vector.load %arg75[%c0_261, %c0_262] : memref<1x32xf32, #tpu.memory_space<vmem>>, vector<1x32xf32>
    %435 = vector.broadcast %434 : vector<1x32xf32> to vector<2x32xf32>
    %436 = arith.addf %433, %435 : vector<2x32xf32>
    %cst_263 = arith.constant 0.000000e+00 : f32
    %437 = vector.broadcast %cst_263 : f32 to vector<2x32xf32>
    %438 = arith.maximumf %436, %437 : vector<2x32xf32>
    %c0_264 = arith.constant 0 : index
    %c0_265 = arith.constant 0 : index
    %439 = vector.load %arg78[%c0_264, %c0_265] : memref<32x2xf32, #tpu.memory_space<vmem>>, vector<32x2xf32>
    %cst_266 = arith.constant dense<0.000000e+00> : vector<2x2xf32>
    %440 = tpu.matmul %438, %439, %cst_266 {dimension_numbers = #tpu.dot_dimension_numbers<[1], [0], [0], [1], [0, 0, 1, 1], [], []>} : vector<2x32xf32>, vector<32x2xf32>, vector<2x2xf32> -> vector<2x2xf32>
    %c0_267 = arith.constant 0 : index
    %c0_268 = arith.constant 0 : index
    %441 = vector.load %arg76[%c0_267, %c0_268] : memref<1x2xf32, #tpu.memory_space<vmem>>, vector<1x2xf32>
    %442 = vector.broadcast %441 : vector<1x2xf32> to vector<2x2xf32>
    %443 = arith.addf %440, %442 : vector<2x2xf32>
    %c0_269 = arith.constant 0 : index
    %c0_270 = arith.constant 0 : index
    %444 = vector.load %arg79[%c0_269, %c0_270] : memref<2x2xf32, #tpu.memory_space<vmem>>, vector<2x2xf32>
    tpu.vector_store %arg79[%c0_269, %c0_270], %443 {strides = array<i32>} : memref<2x2xf32, #tpu.memory_space<vmem>>, vector<2x2xf32>,
    %cst_271 = arith.constant 5.000000e-01 : f32
    %445 = vector.broadcast %cst_271 : f32 to vector<1x1xf32>
    %446 = arith.mulf %423, %445 : vector<1x1xf32>
    %c0_272 = arith.constant 0 : index
    %c0_273 = arith.constant 0 : index
    %447 = vector.load %arg80[%c0_272, %c0_273] : memref<1x1xf32, #tpu.memory_space<vmem>>, vector<1x1xf32>
    tpu.vector_store %arg80[%c0_272, %c0_273], %446 {strides = array<i32>} : memref<1x1xf32, #tpu.memory_space<vmem>>, vector<1x1xf32>,
    %c0_274 = arith.constant 0 : index
    %c0_275 = arith.constant 0 : index
    %448 = vector.load %arg81[%c0_274, %c0_275] : memref<96x32xf32, #tpu.memory_space<vmem>>, vector<96x32xf32>
    tpu.vector_store %arg81[%c0_274, %c0_275], %325 {strides = array<i32>} : memref<96x32xf32, #tpu.memory_space<vmem>>, vector<96x32xf32>,
    %c0_276 = arith.constant 0 : index
    %c0_277 = arith.constant 0 : index
    %449 = vector.load %arg82[%c0_276, %c0_277] : memref<36x32xf32, #tpu.memory_space<vmem>>, vector<36x32xf32>
    tpu.vector_store %arg82[%c0_276, %c0_277], %361 {strides = array<i32>} : memref<36x32xf32, #tpu.memory_space<vmem>>, vector<36x32xf32>,
    return
  }
}

</mosaic_0001>

<bundles_post_ra>
// kernel: brain_graph_forward.1
= control target key start
LH: loop header
LB: loop body
LE: loop exit
PB: predicated region body
PF: predicated region fallthrough
CT: control target
= control target key end

     0   :  { %s14742_s6 = smov 1   ;;  %s14743_s10 = smov 2   ;;  %s18824_s0 = inlined_call_operand.smem [shape: u32[83], index: -1, kind: input, shape index: {}] }
   0x1   :  { %s14853_s5 = sld [smem:[%s18824_s0]]   ;;  %s14744_s14 = smov 3  }
   0x2   :  { %s14858_s9 = sld [smem:[%s18824_s0 + %s14742_s6]]   ;;  %s14745_s18 = smov 4  }
   0x3   :  { %s14863_s13 = sld [smem:[%s18824_s0 + %s14743_s10]]   ;;  %s14746_s22 = smov 5  }
   0x4   :  { %s14868_s17 = sld [smem:[%s18824_s0 + %s14744_s14]]   ;;  %s14747_s26 = smov 6  }
   0x5   :  { %s14873_s21 = sld [smem:[%s18824_s0 + %s14745_s18]]   ;;  %s14748_s30 = smov 7  }
   0x6   :  { %s14878_s25 = sld [smem:[%s18824_s0 + %s14746_s22]]   ;;  %s14749_s4 = smov 8  }
   0x7   :  { %18903 = sst [smem:[#allocation54_spill]] %s14853_s5  ;;  %s14750_s10 = smov 9  }
   0x8   :  { %18904 = sst [smem:[#allocation55_spill]] %s14858_s9  ;;  %s14751_s15 = smov 10  }
   0x9   :  { %18905 = sst [smem:[#allocation56_spill]] %s14863_s13  ;;  %s14752_s20 = smov 11  }
   0xa   :  { %18906 = sst [smem:[#allocation57_spill]] %s14868_s17  ;;  %s14754_s1 = smov 13  }
   0xb   :  { %18907 = sst [smem:[#allocation58_spill]] %s14873_s21  ;;  %s14755_s7 = smov 15  }
   0xc   :  { %18908 = sst [smem:[#allocation59_spill]] %s14878_s25  ;;  %s14757_s22 = smov 17  }
   0xd   :  { %s14883_s29 = sld [smem:[%s18824_s0 + %s14747_s26]]   ;;  %s14753_s26 = smov 12  }
   0xe   :  { %s14888_s3 = sld [smem:[%s18824_s0 + %s14748_s30]]   ;;  %s14758_s28 = smov 18  }
   0xf   :  { %s10084_s8 = sld [smem:[%s18824_s0 + %s14749_s4]]  }
  0x10   :  { %s14896_s14 = sld [smem:[%s18824_s0 + %s14750_s10]]  }
  0x11   :  { %s14901_s19 = sld [smem:[%s18824_s0 + %s14751_s15]]   ;;  %s14756_s15 = smov 16  }
  0x12   :  { %s14906_s24 = sld [smem:[%s18824_s0 + %s14752_s20]]  }
  0x13   :  { %18909 = sst [smem:[#allocation60_spill]] %s14883_s29 }
  0x14   :  { %18910 = sst [smem:[#allocation61_spill]] %s14888_s3 }
  0x15   :  { %s14911_s30 = sld [smem:[%s18824_s0 + %s14753_s26]]   ;;  %v171_v0 = vstv %s10084_s8  ;;  %s14759_s8 = smov 19  }
  0x16   :  { %18911 = sst [smem:[#allocation62_spill]] %s14896_s14  ;;  %172 = vst [vmem:[#allocation2] sm:$0x1] %v171_v0 }
  0x17   :  { %18912 = sst [smem:[#allocation63_spill]] %s14901_s19 }
  0x18   :  { %18913 = sst [smem:[#allocation64_spill]] %s14906_s24 }
  0x19   :  { %s14916_s6 = sld [smem:[%s18824_s0 + %s14754_s1]]   ;;  %s14818_s1 = smov 20  }
  0x1a   :  { %s14921_s12 = sld [smem:[%s18824_s0 + %s14755_s7]]  }
  0x1b   :  { %18914 = sst [smem:[#allocation65_spill]] %s14911_s30 }
  0x1c   :  { %s14926_s20 = sld [smem:[%s18824_s0 + %s14756_s15]]   ;;  %s14760_s15 = smov 21  }
  0x1d   :  { %s14931_s27 = sld [smem:[%s18824_s0 + %s14757_s22]]   ;;  %s14761_s22 = smov 22  }
  0x1e   :  { %s14936_s4 = sld [smem:[%s18824_s0 + %s14758_s28]]   ;;  %s14762_s28 = smov 23  }
  0x1f   :  { %18915 = sst [smem:[#allocation66_spill]] %s14916_s6 }
  0x20   :  { %18916 = sst [smem:[#allocation67_spill]] %s14921_s12 }
  0x21   :  { %s14941_s11 = sld [smem:[%s18824_s0 + %s14759_s8]]   ;;  %s14763_s8 = smov 24  }
  0x22   :  { %18917 = sst [smem:[#allocation68_spill]] %s14926_s20 }
  0x23   :  { %18918 = sst [smem:[#allocation69_spill]] %s14931_s27 }
  0x24   :  { %18919 = sst [smem:[#allocation70_spill]] %s14936_s4 }
  0x25   :  { %s14946_s29 = sld [smem:[%s18824_s0 + %s14760_s15]]   ;;  %s14764_s15 = smov 25  }
  0x26   :  { %s14951_s6 = sld [smem:[%s18824_s0 + %s14761_s22]]   ;;  %s14765_s22 = smov 27  }
  0x27   :  { %18920 = sst [smem:[#allocation71_spill]] %s14941_s11 }
  0x28   :  { %s14956_s25 = sld [smem:[%s18824_s0 + %s14762_s28]]   ;;  %s14766_s28 = smov 28  }
  0x29   :  { %s14961_s12 = sld [smem:[%s18824_s0 + %s14763_s8]]   ;;  %s14767_s8 = smov 29  }
  0x2a   :  { %s14966_s27 = sld [smem:[%s18824_s0 + %s14764_s15]]   ;;  %s14768_s15 = smov 30  }
  0x2b   :  { %18921 = sst [smem:[#allocation72_spill]] %s14946_s29 }
  0x2c   :  { %18922 = sst [smem:[#allocation73_spill]] %s14951_s6 }
  0x2d   :  { %s14971_s4 = sld [smem:[%s18824_s0 + %s14765_s22]]   ;;  %s14769_s22 = smov 31  }
  0x2e   :  { %18923 = sst [smem:[#allocation74_spill]] %s14956_s25 }
  0x2f   :  { %18924 = sst [smem:[#allocation75_spill]] %s14961_s12 }
  0x30   :  { %18925 = sst [smem:[#allocation76_spill]] %s14966_s27 }
  0x31   :  { %s14976_s20 = sld [smem:[%s18824_s0 + %s14766_s28]]   ;;  %s14770_s28 = smov 32  }
  0x32   :  { %s14981_s3 = sld [smem:[%s18824_s0 + %s14767_s8]]   ;;  %s14771_s8 = smov 33  }
  0x33   :  { %18926 = sst [smem:[#allocation77_spill]] %s14971_s4 }
  0x34   :  { %s14986_s27 = sld [smem:[%s18824_s0 + %s14768_s15]]   ;;  %s14772_s15 = smov 34  }
  0x35   :  { %s14991_s4 = sld [smem:[%s18824_s0 + %s14769_s22]]   ;;  %s14773_s22 = smov 35  }
  0x36   :  { %s15011_s14 = sld [smem:[%s18824_s0 + %s14773_s22]]   ;;  %s14777_s22 = smov 40  }
  0x37   :  { %18927 = sst [smem:[#allocation78_spill]] %s14976_s20 }
  0x38   :  { %18928 = sst [smem:[#allocation79_spill]] %s14981_s3 }
  0x39   :  { %s14996_s20 = sld [smem:[%s18824_s0 + %s14770_s28]]   ;;  %s14774_s28 = smov 36  }
  0x3a   :  { %18929 = sst [smem:[#allocation80_spill]] %s14986_s27 }
  0x3b   :  { %18930 = sst [smem:[#allocation81_spill]] %s14991_s4 }
  0x3c   :  { %s15001_s3 = sld [smem:[%s18824_s0 + %s14771_s8]]   ;;  %s14775_s8 = smov 37  }
  0x3d   :  { %s15006_s27 = sld [smem:[%s18824_s0 + %s14772_s15]]   ;;  %s14776_s15 = smov 39  }
  0x3e   :  { %18934 = sst [smem:[#allocation85_spill]] %s15011_s14 }
  0x3f   :  { %18931 = sst [smem:[#allocation82_spill]] %s14996_s20 }
  0x40   :  { %s15016_s24 = sld [smem:[%s18824_s0 + %s14774_s28]]   ;;  %s14778_s28 = smov 42  }
  0x41   :  { %s15021_s30 = sld [smem:[%s18824_s0 + %s14775_s8]]   ;;  %s14779_s8 = smov 43  }
  0x42   :  { %18932 = sst [smem:[#allocation83_spill]] %s15001_s3 }
  0x43   :  { %18933 = sst [smem:[#allocation84_spill]] %s15006_s27 }
  0x44   :  { %s15026_s11 = sld [smem:[%s18824_s0 + %s14776_s15]]   ;;  %s14780_s15 = smov 44  }
  0x45   :  { %s15031_s27 = sld [smem:[%s18824_s0 + %s14777_s22]]   ;;  %s14781_s22 = smov 45  }
  0x46   :  { %18935 = sst [smem:[#allocation86_spill]] %s15016_s24 }
  0x47   :  { %s15036_s14 = sld [smem:[%s18824_s0 + %s14778_s28]]   ;;  %s14782_s28 = smov 46  }
  0x48   :  { %s15041_s25 = sld [smem:[%s18824_s0 + %s14779_s8]]   ;;  %s14783_s8 = smov 47  }
  0x49   :  { %s15046_s19 = sld [smem:[%s18824_s0 + %s14780_s15]]   ;;  %s14784_s15 = smov 48  }
  0x4a   :  { %18936 = sst [smem:[#allocation87_spill]] %s15026_s11 }
  0x4b   :  { %s15051_s29 = sld [smem:[%s18824_s0 + %s14781_s22]]   ;;  %s14785_s22 = smov 49  }
  0x4c   :  { %s15056_s6 = sld [smem:[%s18824_s0 + %s14782_s28]]   ;;  %s14786_s28 = smov 50  }
  0x4d   :  { %18937 = sst [smem:[#allocation88_spill]] %s15036_s14 }
  0x4e   :  { %s15061_s3 = sld [smem:[%s18824_s0 + %s14783_s8]]   ;;  %s14787_s8 = smov 51  }
  0x4f   :  { %18938 = sst [smem:[#allocation89_spill]] %s15046_s19 }
  0x50   :  { %s15066_s12 = sld [smem:[%s18824_s0 + %s14784_s15]]   ;;  %s14788_s15 = smov 52  }
  0x51   :  { %18939 = sst [smem:[#allocation90_spill]] %s15051_s29 }
  0x52   :  { %s15071_s17 = sld [smem:[%s18824_s0 + %s14785_s22]]   ;;  %s14789_s22 = smov 53  }
  0x53   :  { %s15076_s24 = sld [smem:[%s18824_s0 + %s14786_s28]]   ;;  %s14790_s28 = smov 54  }
  0x54   :  { %18940 = sst [smem:[#allocation91_spill]] %s15061_s3 }
  0x55   :  { %s15081_s13 = sld [smem:[%s18824_s0 + %s14787_s8]]   ;;  %s14791_s8 = smov 55  }
  0x56   :  { %18941 = sst [smem:[#allocation92_spill]] %s15066_s12 }
  0x57   :  { %s15086_s12 = sld [smem:[%s18824_s0 + %s14788_s15]]   ;;  %s14792_s15 = smov 56  }
  0x58   :  { %18942 = sst [smem:[#allocation93_spill]] %s15071_s17 }
  0x59   :  { %s15091_s3 = sld [smem:[%s18824_s0 + %s14789_s22]]   ;;  %s14793_s22 = smov 57  }
  0x5a   :  { %s15096_s20 = sld [smem:[%s18824_s0 + %s14790_s28]]   ;;  %s14794_s28 = smov 58  }
  0x5b   :  { %s15101_s14 = sld [smem:[%s18824_s0 + %s14791_s8]]   ;;  %s14795_s8 = smov 59  }
  0x5c   :  { %s15106_s11 = sld [smem:[%s18824_s0 + %s14792_s15]]   ;;  %s14796_s15 = smov 61  }
  0x5d   :  { %s15111_s29 = sld [smem:[%s18824_s0 + %s14793_s22]]   ;;  %s14797_s22 = smov 62  }
  0x5e   :  { %s15121_s19 = sld [smem:[%s18824_s0 + %s14795_s8]]   ;;  %s14799_s8 = smov 65  }
  0x5f   :  { %s15126_s21 = sld [smem:[%s18824_s0 + %s14796_s15]]   ;;  %s14800_s15 = smov 66  }
  0x60   :  { %18943 = sst [smem:[#allocation94_spill]] %s15096_s20 }
  0x61   :  { %18944 = sst [smem:[#allocation95_spill]] %s15101_s14  ;;  %s14819_s14 = smov 26  }
  0x62   :  { %s15116_s20 = sld [smem:[%s18824_s0 + %s14794_s28]]   ;;  %s14798_s28 = smov 64  }
  0x63   :  { %18945 = sst [smem:[#allocation96_spill]] %s15111_s29 }
  0x64   :  { %s15131_s9 = sld [smem:[%s18824_s0 + %s14797_s22]]   ;;  %s14801_s22 = smov 67  }
  0x65   :  { %18947 = sst [smem:[#allocation98_spill]] %s15126_s21 }
  0x66   :  { %s15141_s4 = sld [smem:[%s18824_s0 + %s14799_s8]]   ;;  %s14803_s8 = smov 69  }
  0x67   :  { %s15146_s21 = sld [smem:[%s18824_s0 + %s14800_s15]]   ;;  %s14804_s15 = smov 70  }
  0x68   :  { %18946 = sst [smem:[#allocation97_spill]] %s15116_s20 }
  0x69   :  { %s15136_s20 = sld [smem:[%s18824_s0 + %s14798_s28]]   ;;  %s14802_s28 = smov 68  }
  0x6a   :  { %18948 = sst [smem:[#allocation99_spill]] %s15131_s9 }
  0x6b   :  { %s15151_s5 = sld [smem:[%s18824_s0 + %s14801_s22]]   ;;  %s14805_s22 = smov 71  }
  0x6c   :  { %s15161_s17 = sld [smem:[%s18824_s0 + %s14803_s8]]   ;;  %s14807_s8 = smov 73  }
  0x6d   :  { %18950 = sst [smem:[#allocation101_spill]] %s15146_s21 }
  0x6e   :  { %s15166_s21 = sld [smem:[%s18824_s0 + %s14804_s15]]   ;;  %s14808_s15 = smov 74  }
  0x6f   :  { %18949 = sst [smem:[#allocation100_spill]] %s15136_s20 }
  0x70   :  { %s15156_s20 = sld [smem:[%s18824_s0 + %s14802_s28]]   ;;  %s14806_s28 = smov 72  }
  0x71   :  { %18951 = sst [smem:[#allocation102_spill]] %s15151_s5 }
  0x72   :  { %18953 = sst [smem:[#allocation104_spill]] %s15161_s17 }
  0x73   :  { %s15171_s5 = sld [smem:[%s18824_s0 + %s14805_s22]]   ;;  %s14809_s22 = smov 75  }
  0x74   :  { %18954 = sst [smem:[#allocation105_spill]] %s15166_s21 }
  0x75   :  { %s15181_s17 = sld [smem:[%s18824_s0 + %s14807_s8]]   ;;  %s14811_s8 = smov 77  }
  0x76   :  { %18952 = sst [smem:[#allocation103_spill]] %s15156_s20 }
  0x77   :  { %s15176_s20 = sld [smem:[%s18824_s0 + %s14806_s28]]   ;;  %s14810_s28 = smov 76  }
  0x78   :  { %s15186_s21 = sld [smem:[%s18824_s0 + %s14808_s15]]   ;;  %s14812_s15 = smov 78  }
  0x79   :  { %s15191_s9 = sld [smem:[%s18824_s0 + %s14809_s22]]   ;;  %s14813_s22 = smov 79  }
  0x7a   :  { %s15201_s29 = sld [smem:[%s18824_s0 + %s14811_s8]]   ;;  %s14815_s8 = smov 81  }
  0x7b   :  { %s10102_s10 = sld [smem:[%s18824_s0 + %s14819_s14]]  }
  0x7d   :  { %18955 = sst [smem:[#allocation106_spill]] %s15176_s20 }
  0x7e   :  { %18956 = sst [smem:[#allocation107_spill]] %s15186_s21 }
  0x7f   :  { %18957 = sst [smem:[#allocation108_spill]] %s15191_s9 }
  0x80   :  { %s15196_s20 = sld [smem:[%s18824_s0 + %s14810_s28]]   ;;  %s14814_s28 = smov 80  }
  0x81   :  { %18959 = sst [smem:[#allocation110_spill]] %s15201_s29  ;;  %v177_v3 = vstv %s10102_s10 }
  0x82   :  { %s15206_s21 = sld [smem:[%s18824_s0 + %s14812_s15]]   ;;  %s14816_s15 = smov 82   ;;  %178 = vst [vmem:[#allocation5] sm:$0x1] %v177_v3 }
  0x83   :  { %s15211_s9 = sld [smem:[%s18824_s0 + %s14813_s22]]   ;;  %s14817_s22 = smov 14  }
  0x84   :  { %s15221_s29 = sld [smem:[%s18824_s0 + %s14815_s8]]  }
  0x86   :  { %18958 = sst [smem:[#allocation109_spill]] %s15196_s20 }
  0x87   :  { %s15216_s20 = sld [smem:[%s18824_s0 + %s14814_s28]]  }
  0x88   :  { %18960 = sst [smem:[#allocation111_spill]] %s15206_s21 }
  0x89   :  { %18961 = sst [smem:[#allocation112_spill]] %s15211_s9 }
  0x8a   :  { %s15226_s21 = sld [smem:[%s18824_s0 + %s14816_s15]]  }
  0x8b   :  { %s10090_s9 = sld [smem:[%s18824_s0 + %s14817_s22]]  }
  0x8d   :  { %18962 = sst [smem:[#allocation113_spill]] %s15216_s20 }
  0x8e   :  { %s10096_s20 = sld [smem:[%s18824_s0 + %s14818_s1]]  }
  0x91   :  { %v173_v1 = vstv %s10090_s9 }
  0x92   :  { %174 = vst [vmem:[#allocation3] sm:$0x1] %v173_v1 }
  0x94   :  { %v175_v2 = vstv %s10096_s20 }
  0x95   :  { %176 = vst [vmem:[#allocation4] sm:$0x1] %v175_v2 }
  0x96   :  { %179 = vsyncpa [#allocation7], 0 }
  0x97   :  { %180 = vsyncpa [#allocation10], 0 }
  0x98   :  { %181 = vsyncpa [#allocation13], 0 }
  0x99   :  { %182 = vsyncpa [#allocation16], 0 }
  0x9a   :  { %183 = vsyncpa [#allocation19], 0 }
  0x9b   :  { %184 = vsyncpa [#allocation22], 0 }
  0x9c   :  { %185 = vsyncpa [#allocation25], 0 }
  0x9d   :  { %186 = vsyncpa [#allocation28], 0 }
  0x9e   :  { %187 = vsyncpa [#allocation31], 0 }
  0x9f   :  { %188 = vsyncpa [#allocation34], 0 }
  0xa0   :  { %189 = vsyncpa [#allocation37], 0 }
  0xa1   :  { %190 = vsyncpa [#allocation8], 0 }
  0xa2   :  { %191 = vsyncpa [#allocation40], 0  ;;  %s14820_s0 = smov [#allocation9]   ;;  %s14821_s14 = smov [#allocation12]  }
  0xa3   :  { %s286_s9 = sshll.u32 %s14820_s0, 4  ;;  %s314_s20 = sshll.u32 %s14821_s14, 4  ;;  %s287_s9 = int_to_ptr.vmem [resolvable:$true] %s286_s9  ;;  %s315_s20 = int_to_ptr.vmem [resolvable:$true] %s314_s20 }
  0xa4   :  { %s14232_s15 = scalar_lea.hbm %s15031_s27, 16 }
  0xa5   :  { %p14233_p0 = scmp.ne.s32.totalorder %s15031_s27, %s14232_s15  ;;  %p14236_p1 = scmp.lt.u32.totalorder %s14232_s15, %s15031_s27 }
  0xa7   :  { %p14238_p2 = pnand %p14236_p1, %p14233_p0 }
  0xa9   :  { %14241 = shalt.err (!%p14238_p2)
}
  0xaa   :  { %s14242_s16 = scalar_lea.vmem %s287_s9, 16  ;;  %s14246_s18 = scalar_lea.vmem %s287_s9, 32 }
  0xab   :  { %p14243_p3 = scmp.ne.s32.totalorder %s287_s9, %s14242_s16  ;;  %p14247_p4 = scmp.lt.s32.totalorder %s287_s9, %s287_s9 }
  0xac   :  { %p14248_p5 = scmp.lt.s32.totalorder %s14246_s18, %s14242_s16 }
  0xae   :  { %p14249_p6 = por %p14248_p5, %p14247_p4 }
  0xb0   :  { %p14250_p7 = pnand %p14249_p6, %p14243_p3 }
  0xb2   :  { %14253 = shalt.err (!%p14250_p7)
}
  0xb3   :  { %289 = dma.hbm_to_vmem [thread:$0]  %s15031_s27, 16, %s287_s9, [#allocation10]  }
  0xb4   :  { %s14254_s22 = scalar_lea.hbm %s15056_s6, 16 }
  0xb5   :  { %p14255_p8 = scmp.ne.s32.totalorder %s15056_s6, %s14254_s22  ;;  %p14258_p9 = scmp.lt.u32.totalorder %s14254_s22, %s15056_s6 }
  0xb7   :  { %p14260_p10 = pnand %p14258_p9, %p14255_p8 }
  0xb9   :  { %14263 = shalt.err (!%p14260_p10)
}
  0xba   :  { %s14264_s23 = scalar_lea.vmem %s315_s20, 16  ;;  %s14268_s26 = scalar_lea.vmem %s315_s20, 32 }
  0xbb   :  { %p14265_p11 = scmp.ne.s32.totalorder %s315_s20, %s14264_s23  ;;  %p14269_p12 = scmp.lt.s32.totalorder %s315_s20, %s315_s20 }
  0xbc   :  { %p14270_p13 = scmp.lt.s32.totalorder %s14268_s26, %s14264_s23 }
  0xbe   :  { %p14271_p0 = por %p14270_p13, %p14269_p12 }
  0xc0   :  { %p14272_p1 = pnand %p14271_p0, %p14265_p11 }
  0xc2   :  { %14275 = shalt.err (!%p14272_p1)
}
  0xc3   :  { %317 = dma.hbm_to_vmem [thread:$0]  %s15056_s6, 16, %s315_s20, [#allocation13]  }
  0xc4   :  { %s14822_s1 = smov [#allocation15]   ;;  %s14823_s28 = smov [#allocation18]  }
  0xc5   :  { %s340_s27 = sshll.u32 %s14822_s1, 4  ;;  %s360_s2 = sshll.u32 %s14823_s28, 4  ;;  %s341_s27 = int_to_ptr.vmem [resolvable:$true] %s340_s27  ;;  %s361_s2 = int_to_ptr.vmem [resolvable:$true] %s360_s2 }
  0xc6   :  { %s14276_s7 = scalar_lea.hbm %s15081_s13, 16 }
  0xc7   :  { %p14277_p2 = scmp.ne.s32.totalorder %s15081_s13, %s14276_s7  ;;  %p14280_p3 = scmp.lt.u32.totalorder %s14276_s7, %s15081_s13 }
  0xc9   :  { %p14282_p4 = pnand %p14280_p3, %p14277_p2 }
  0xcb   :  { %14285 = shalt.err (!%p14282_p4)
}
  0xcc   :  { %s14286_s8 = scalar_lea.vmem %s341_s27, 16  ;;  %s14290_s10 = scalar_lea.vmem %s341_s27, 32 }
  0xcd   :  { %p14287_p5 = scmp.ne.s32.totalorder %s341_s27, %s14286_s8  ;;  %p14291_p6 = scmp.lt.s32.totalorder %s341_s27, %s341_s27 }
  0xce   :  { %p14292_p7 = scmp.lt.s32.totalorder %s14290_s10, %s14286_s8 }
  0xd0   :  { %p14293_p8 = por %p14292_p7, %p14291_p6 }
  0xd2   :  { %p14294_p9 = pnand %p14293_p8, %p14287_p5 }
  0xd4   :  { %14297 = shalt.err (!%p14294_p9)
}
  0xd5   :  { %343 = dma.hbm_to_vmem [thread:$0]  %s15081_s13, 16, %s341_s27, [#allocation16]  }
  0xd6   :  { %s14298_s6 = scalar_lea.hbm %s15091_s3, 16 }
  0xd7   :  { %p14299_p10 = scmp.ne.s32.totalorder %s15091_s3, %s14298_s6  ;;  %p14302_p11 = scmp.lt.u32.totalorder %s14298_s6, %s15091_s3 }
  0xd9   :  { %p14304_p12 = pnand %p14302_p11, %p14299_p10 }
  0xdb   :  { %14307 = shalt.err (!%p14304_p12)
}
  0xdc   :  { %s14308_s0 = scalar_lea.vmem %s361_s2, 16  ;;  %s14312_s9 = scalar_lea.vmem %s361_s2, 32 }
  0xdd   :  { %p14309_p13 = scmp.ne.s32.totalorder %s361_s2, %s14308_s0  ;;  %p14313_p0 = scmp.lt.s32.totalorder %s361_s2, %s361_s2 }
  0xde   :  { %p14314_p1 = scmp.lt.s32.totalorder %s14312_s9, %s14308_s0 }
  0xe0   :  { %p14315_p2 = por %p14314_p1, %p14313_p0 }
  0xe2   :  { %p14316_p3 = pnand %p14315_p2, %p14309_p13 }
  0xe4   :  { %14319 = shalt.err (!%p14316_p3)
}
  0xe5   :  { %363 = dma.hbm_to_vmem [thread:$0]  %s15091_s3, 16, %s361_s2, [#allocation19]  }
  0xe6   :  { %s14824_s14 = smov [#allocation21]   ;;  %s14825_s20 = smov [#allocation24]  }
  0xe7   :  { %s382_s13 = sshll.u32 %s14824_s14, 4  ;;  %s404_s15 = sshll.u32 %s14825_s20, 4  ;;  %s383_s13 = int_to_ptr.vmem [resolvable:$true] %s382_s13  ;;  %s405_s15 = int_to_ptr.vmem [resolvable:$true] %s404_s15 }
  0xe8   :  { %s14320_s16 = scalar_lea.hbm %s15106_s11, 16 }
  0xe9   :  { %p14321_p4 = scmp.ne.s32.totalorder %s15106_s11, %s14320_s16  ;;  %p14324_p5 = scmp.lt.u32.totalorder %s14320_s16, %s15106_s11 }
  0xeb   :  { %p14326_p6 = pnand %p14324_p5, %p14321_p4 }
  0xed   :  { %14329 = shalt.err (!%p14326_p6)
}
  0xee   :  { %s14330_s18 = scalar_lea.vmem %s383_s13, 16  ;;  %s14334_s22 = scalar_lea.vmem %s383_s13, 32 }
  0xef   :  { %p14331_p7 = scmp.ne.s32.totalorder %s383_s13, %s14330_s18  ;;  %p14335_p8 = scmp.lt.s32.totalorder %s383_s13, %s383_s13 }
  0xf0   :  { %p14336_p9 = scmp.lt.s32.totalorder %s14334_s22, %s14330_s18 }
  0xf2   :  { %p14337_p10 = por %p14336_p9, %p14335_p8 }
  0xf4   :  { %p14338_p11 = pnand %p14337_p10, %p14331_p7 }
  0xf6   :  { %14341 = shalt.err (!%p14338_p11)
}
  0xf7   :  { %385 = dma.hbm_to_vmem [thread:$0]  %s15106_s11, 16, %s383_s13, [#allocation22]  }
  0xf8   :  { %s14342_s3 = scalar_lea.hbm %s15121_s19, 16 }
  0xf9   :  { %p14343_p12 = scmp.ne.s32.totalorder %s15121_s19, %s14342_s3  ;;  %p14346_p13 = scmp.lt.u32.totalorder %s14342_s3, %s15121_s19 }
  0xfb   :  { %p14348_p0 = pnand %p14346_p13, %p14343_p12 }
  0xfd   :  { %14351 = shalt.err (!%p14348_p0)
}
  0xfe   :  { %s14352_s23 = scalar_lea.vmem %s405_s15, 16  ;;  %s14356_s26 = scalar_lea.vmem %s405_s15, 32 }
  0xff   :  { %p14353_p1 = scmp.ne.s32.totalorder %s405_s15, %s14352_s23  ;;  %p14357_p2 = scmp.lt.s32.totalorder %s405_s15, %s405_s15 }
 0x100   :  { %p14358_p3 = scmp.lt.s32.totalorder %s14356_s26, %s14352_s23 }
 0x102   :  { %p14359_p4 = por %p14358_p3, %p14357_p2 }
 0x104   :  { %p14360_p5 = pnand %p14359_p4, %p14353_p1 }
 0x106   :  { %14363 = shalt.err (!%p14360_p5)
}
 0x107   :  { %407 = dma.hbm_to_vmem [thread:$0]  %s15121_s19, 16, %s405_s15, [#allocation25]  }
 0x108   :  { %s14826_s1 = smov [#allocation27]   ;;  %s14827_s27 = smov [#allocation30]  }
 0x109   :  { %s432_s11 = sshll.u32 %s14826_s1, 4  ;;  %s460_s28 = sshll.u32 %s14827_s27, 4  ;;  %s433_s11 = int_to_ptr.vmem [resolvable:$true] %s432_s11  ;;  %s461_s28 = int_to_ptr.vmem [resolvable:$true] %s460_s28 }
 0x10a   :  { %s14364_s2 = scalar_lea.hbm %s15141_s4, 16 }
 0x10b   :  { %p14365_p6 = scmp.ne.s32.totalorder %s15141_s4, %s14364_s2  ;;  %p14368_p7 = scmp.lt.u32.totalorder %s14364_s2, %s15141_s4 }
 0x10d   :  { %p14370_p8 = pnand %p14368_p7, %p14365_p6 }
 0x10f   :  { %14373 = shalt.err (!%p14370_p8)
}
 0x110   :  { %s14374_s7 = scalar_lea.vmem %s433_s11, 16  ;;  %s14378_s8 = scalar_lea.vmem %s433_s11, 32 }
 0x111   :  { %p14375_p9 = scmp.ne.s32.totalorder %s433_s11, %s14374_s7  ;;  %p14379_p10 = scmp.lt.s32.totalorder %s433_s11, %s433_s11 }
 0x112   :  { %p14380_p11 = scmp.lt.s32.totalorder %s14378_s8, %s14374_s7 }
 0x114   :  { %p14381_p12 = por %p14380_p11, %p14379_p10 }
 0x116   :  { %p14382_p13 = pnand %p14381_p12, %p14375_p9 }
 0x118   :  { %14385 = shalt.err (!%p14382_p13)
}
 0x119   :  { %435 = dma.hbm_to_vmem [thread:$0]  %s15141_s4, 16, %s433_s11, [#allocation28]  }
 0x11a   :  { %s14386_s19 = scalar_lea.hbm %s15171_s5, 16 }
 0x11b   :  { %p14387_p0 = scmp.ne.s32.totalorder %s15171_s5, %s14386_s19  ;;  %p14390_p1 = scmp.lt.u32.totalorder %s14386_s19, %s15171_s5 }
 0x11d   :  { %p14392_p2 = pnand %p14390_p1, %p14387_p0 }
 0x11f   :  { %14395 = shalt.err (!%p14392_p2)
}
 0x120   :  { %s14396_s10 = scalar_lea.vmem %s461_s28, 16  ;;  %s14400_s6 = scalar_lea.vmem %s461_s28, 32 }
 0x121   :  { %p14397_p3 = scmp.ne.s32.totalorder %s461_s28, %s14396_s10  ;;  %p14401_p4 = scmp.lt.s32.totalorder %s461_s28, %s461_s28 }
 0x122   :  { %p14402_p5 = scmp.lt.s32.totalorder %s14400_s6, %s14396_s10 }
 0x124   :  { %p14403_p6 = por %p14402_p5, %p14401_p4 }
 0x126   :  { %p14404_p7 = pnand %p14403_p6, %p14397_p3 }
 0x128   :  { %14407 = shalt.err (!%p14404_p7)
}
 0x129   :  { %463 = dma.hbm_to_vmem [thread:$0]  %s15171_s5, 16, %s461_s28, [#allocation31]  }
 0x12a   :  { %s14828_s0 = smov [#allocation33]   ;;  %s14829_s9 = smov [#allocation6]  }
 0x12b   :  { %s480_s4 = sshll.u32 %s14828_s0, 4  ;;  %s272_s14 = sshll.u32 %s14829_s9, 4  ;;  %s481_s4 = int_to_ptr.vmem [resolvable:$true] %s480_s4  ;;  %s273_s14 = int_to_ptr.vmem [resolvable:$true] %s272_s14 }
 0x12c   :  { %s14408_s13 = scalar_lea.hbm %s15181_s17, 16 }
 0x12d   :  { %p14409_p8 = scmp.ne.s32.totalorder %s15181_s17, %s14408_s13  ;;  %p14412_p9 = scmp.lt.u32.totalorder %s14408_s13, %s15181_s17 }
 0x12f   :  { %p14414_p10 = pnand %p14412_p9, %p14409_p8 }
 0x131   :  { %14417 = shalt.err (!%p14414_p10)
}
 0x132   :  { %s14418_s20 = scalar_lea.vmem %s481_s4, 16  ;;  %s14422_s15 = scalar_lea.vmem %s481_s4, 32 }
 0x133   :  { %p14419_p11 = scmp.ne.s32.totalorder %s481_s4, %s14418_s20  ;;  %p14423_p12 = scmp.lt.s32.totalorder %s481_s4, %s481_s4 }
 0x134   :  { %p14424_p13 = scmp.lt.s32.totalorder %s14422_s15, %s14418_s20 }
 0x136   :  { %p14425_p0 = por %p14424_p13, %p14423_p12 }
 0x138   :  { %p14426_p1 = pnand %p14425_p0, %p14419_p11 }
 0x13a   :  { %14429 = shalt.err (!%p14426_p1)
}
 0x13b   :  { %483 = dma.hbm_to_vmem [thread:$0]  %s15181_s17, 16, %s481_s4, [#allocation34]  }
 0x13c   :  { %s14430_s5 = scalar_lea.hbm %s15021_s30, 16 }
 0x13d   :  { %p14431_p2 = scmp.ne.s32.totalorder %s15021_s30, %s14430_s5  ;;  %p14434_p3 = scmp.lt.u32.totalorder %s14430_s5, %s15021_s30 }
 0x13f   :  { %p14436_p4 = pnand %p14434_p3, %p14431_p2 }
 0x141   :  { %14439 = shalt.err (!%p14436_p4)
}
 0x142   :  { %s14440_s16 = scalar_lea.vmem %s273_s14, 16  ;;  %s14444_s18 = scalar_lea.vmem %s273_s14, 32 }
 0x143   :  { %p14441_p5 = scmp.ne.s32.totalorder %s273_s14, %s14440_s16  ;;  %p14445_p6 = scmp.lt.s32.totalorder %s273_s14, %s273_s14 }
 0x144   :  { %p14446_p7 = scmp.lt.s32.totalorder %s14444_s18, %s14440_s16 }
 0x146   :  { %p14447_p8 = por %p14446_p7, %p14445_p6 }
 0x148   :  { %p14448_p9 = pnand %p14447_p8, %p14441_p5 }
 0x14a   :  { %14451 = shalt.err (!%p14448_p9)
}
 0x14b   :  { %275 = dma.hbm_to_vmem [thread:$0]  %s15021_s30, 16, %s273_s14, [#allocation7]  }
 0x14c   :  { %s14830_s22 = smov [#allocation11]   ;;  %s14831_s3 = smov [#allocation14]  }
 0x14d   :  { %s300_s17 = sshll.u32 %s14830_s22, 4  ;;  %s330_s23 = sshll.u32 %s14831_s3, 4  ;;  %s301_s17 = int_to_ptr.vmem [resolvable:$true] %s300_s17  ;;  %s331_s23 = int_to_ptr.vmem [resolvable:$true] %s330_s23 }
 0x14e   :  { %s14452_s26 = scalar_lea.hbm %s15041_s25, 16 }
 0x14f   :  { %p14453_p10 = scmp.ne.s32.totalorder %s15041_s25, %s14452_s26  ;;  %p14456_p11 = scmp.lt.u32.totalorder %s14452_s26, %s15041_s25 }
 0x151   :  { %p14458_p12 = pnand %p14456_p11, %p14453_p10 }
 0x153   :  { %14461 = shalt.err (!%p14458_p12)
}
 0x154   :  { %s14462_s1 = scalar_lea.vmem %s301_s17, 16  ;;  %s14466_s11 = scalar_lea.vmem %s301_s17, 32 }
 0x155   :  { %p14463_p13 = scmp.ne.s32.totalorder %s301_s17, %s14462_s1  ;;  %p14467_p0 = scmp.lt.s32.totalorder %s301_s17, %s301_s17 }
 0x156   :  { %p14468_p1 = scmp.lt.s32.totalorder %s14466_s11, %s14462_s1 }
 0x158   :  { %p14469_p2 = por %p14468_p1, %p14467_p0 }
 0x15a   :  { %p14470_p3 = pnand %p14469_p2, %p14463_p13 }
 0x15c   :  { %14473 = shalt.err (!%p14470_p3)
}
 0x15d   :  { %303 = dma.hbm_to_vmem [thread:$0]  %s15041_s25, 16, %s301_s17, [#allocation10]  }
 0x15e   :  { %s14474_s30 = scalar_lea.hbm %s15076_s24, 16 }
 0x15f   :  { %p14475_p4 = scmp.ne.s32.totalorder %s15076_s24, %s14474_s30  ;;  %p14478_p5 = scmp.lt.u32.totalorder %s14474_s30, %s15076_s24 }
 0x161   :  { %p14480_p6 = pnand %p14478_p5, %p14475_p4 }
 0x163   :  { %14483 = shalt.err (!%p14480_p6)
}
 0x164   :  { %s14484_s27 = scalar_lea.vmem %s331_s23, 16  ;;  %s14488_s28 = scalar_lea.vmem %s331_s23, 32 }
 0x165   :  { %p14485_p7 = scmp.ne.s32.totalorder %s331_s23, %s14484_s27  ;;  %p14489_p8 = scmp.lt.s32.totalorder %s331_s23, %s331_s23 }
 0x166   :  { %p14490_p9 = scmp.lt.s32.totalorder %s14488_s28, %s14484_s27 }
 0x168   :  { %p14491_p10 = por %p14490_p9, %p14489_p8 }
 0x16a   :  { %p14492_p11 = pnand %p14491_p10, %p14485_p7 }
 0x16c   :  { %14495 = shalt.err (!%p14492_p11)
}
 0x16d   :  { %333 = dma.hbm_to_vmem [thread:$0]  %s15076_s24, 16, %s331_s23, [#allocation13]  }
 0x16e   :  { %s14832_s2 = smov [#allocation17]   ;;  %s14833_s7 = smov [#allocation20]  }
 0x16f   :  { %s350_s25 = sshll.u32 %s14832_s2, 4  ;;  %s372_s8 = sshll.u32 %s14833_s7, 4  ;;  %s351_s25 = int_to_ptr.vmem [resolvable:$true] %s350_s25  ;;  %s373_s8 = int_to_ptr.vmem [resolvable:$true] %s372_s8 }
 0x170   :  { %s14496_s19 = scalar_lea.hbm %s15086_s12, 16 }
 0x171   :  { %p14497_p12 = scmp.ne.s32.totalorder %s15086_s12, %s14496_s19  ;;  %p14500_p13 = scmp.lt.u32.totalorder %s14496_s19, %s15086_s12 }
 0x173   :  { %p14502_p0 = pnand %p14500_p13, %p14497_p12 }
 0x175   :  { %14505 = shalt.err (!%p14502_p0)
}
 0x176   :  { %s14506_s10 = scalar_lea.vmem %s351_s25, 16  ;;  %s14510_s6 = scalar_lea.vmem %s351_s25, 32 }
 0x177   :  { %p14507_p1 = scmp.ne.s32.totalorder %s351_s25, %s14506_s10  ;;  %p14511_p2 = scmp.lt.s32.totalorder %s351_s25, %s351_s25 }
 0x178   :  { %p14512_p3 = scmp.lt.s32.totalorder %s14510_s6, %s14506_s10 }
 0x17a   :  { %p14513_p4 = por %p14512_p3, %p14511_p2 }
 0x17c   :  { %p14514_p5 = pnand %p14513_p4, %p14507_p1 }
 0x17e   :  { %14517 = shalt.err (!%p14514_p5)
}
 0x17f   :  { %s18963_s24 = sld [smem:[#allocation95_spill]] }
 0x180   :  { %353 = dma.hbm_to_vmem [thread:$0]  %s15086_s12, 16, %s351_s25, [#allocation16]  }
 0x185   :  { %s14518_s0 = scalar_lea.hbm %s18963_s24, 16 }
 0x186   :  { %p14519_p6 = scmp.ne.s32.totalorder %s18963_s24, %s14518_s0  ;;  %p14522_p7 = scmp.lt.u32.totalorder %s14518_s0, %s18963_s24 }
 0x188   :  { %p14524_p8 = pnand %p14522_p7, %p14519_p6 }
 0x18a   :  { %14527 = shalt.err (!%p14524_p8)
}
 0x18b   :  { %s14528_s4 = scalar_lea.vmem %s373_s8, 16  ;;  %s14532_s9 = scalar_lea.vmem %s373_s8, 32 }
 0x18c   :  { %p14529_p9 = scmp.ne.s32.totalorder %s373_s8, %s14528_s4  ;;  %p14533_p10 = scmp.lt.s32.totalorder %s373_s8, %s373_s8 }
 0x18d   :  { %p14534_p11 = scmp.lt.s32.totalorder %s14532_s9, %s14528_s4 }
 0x18f   :  { %p14535_p12 = por %p14534_p11, %p14533_p10 }
 0x191   :  { %p14536_p13 = pnand %p14535_p12, %p14529_p9 }
 0x193   :  { %14539 = shalt.err (!%p14536_p13)
}
 0x194   :  { %s18964_s14 = sld [smem:[#allocation96_spill]]  ;;  %s14834_s13 = smov [#allocation23]  }
 0x195   :  { %375 = dma.hbm_to_vmem [thread:$0]  %s18963_s24, 16, %s373_s8, [#allocation19]  }
 0x196   :  { %s392_s12 = sshll.u32 %s14834_s13, 4  ;;  %s14835_s20 = smov [#allocation26]   ;;  %s393_s12 = int_to_ptr.vmem [resolvable:$true] %s392_s12 }
 0x197   :  { %s418_s15 = sshll.u32 %s14835_s20, 4  ;;  %s419_s15 = int_to_ptr.vmem [resolvable:$true] %s418_s15 }
 0x19a   :  { %s14540_s5 = scalar_lea.hbm %s18964_s14, 16 }
 0x19b   :  { %p14541_p0 = scmp.ne.s32.totalorder %s18964_s14, %s14540_s5  ;;  %p14544_p1 = scmp.lt.u32.totalorder %s14540_s5, %s18964_s14 }
 0x19d   :  { %p14546_p2 = pnand %p14544_p1, %p14541_p0 }
 0x19f   :  { %14549 = shalt.err (!%p14546_p2)
}
 0x1a0   :  { %s14550_s16 = scalar_lea.vmem %s393_s12, 16  ;;  %s14554_s18 = scalar_lea.vmem %s393_s12, 32 }
 0x1a1   :  { %p14551_p3 = scmp.ne.s32.totalorder %s393_s12, %s14550_s16  ;;  %p14555_p4 = scmp.lt.s32.totalorder %s393_s12, %s393_s12 }
 0x1a2   :  { %p14556_p5 = scmp.lt.s32.totalorder %s14554_s18, %s14550_s16 }
 0x1a4   :  { %p14557_p6 = por %p14556_p5, %p14555_p4 }
 0x1a6   :  { %p14558_p7 = pnand %p14557_p6, %p14551_p3 }
 0x1a8   :  { %14561 = shalt.err (!%p14558_p7)
}
 0x1a9   :  { %s18965_s22 = sld [smem:[#allocation99_spill]] }
 0x1aa   :  { %395 = dma.hbm_to_vmem [thread:$0]  %s18964_s14, 16, %s393_s12, [#allocation22]  }
 0x1af   :  { %s14562_s17 = scalar_lea.hbm %s18965_s22, 16 }
 0x1b0   :  { %p14563_p8 = scmp.ne.s32.totalorder %s18965_s22, %s14562_s17  ;;  %p14566_p9 = scmp.lt.u32.totalorder %s14562_s17, %s18965_s22 }
 0x1b2   :  { %p14568_p10 = pnand %p14566_p9, %p14563_p8 }
 0x1b4   :  { %14571 = shalt.err (!%p14568_p10)
}
 0x1b5   :  { %s14572_s3 = scalar_lea.vmem %s419_s15, 16  ;;  %s14576_s23 = scalar_lea.vmem %s419_s15, 32 }
 0x1b6   :  { %p14573_p11 = scmp.ne.s32.totalorder %s419_s15, %s14572_s3  ;;  %p14577_p12 = scmp.lt.s32.totalorder %s419_s15, %s419_s15 }
 0x1b7   :  { %p14578_p13 = scmp.lt.s32.totalorder %s14576_s23, %s14572_s3 }
 0x1b9   :  { %p14579_p0 = por %p14578_p13, %p14577_p12 }
 0x1bb   :  { %p14580_p1 = pnand %p14579_p0, %p14573_p11 }
 0x1bd   :  { %14583 = shalt.err (!%p14580_p1)
}
 0x1be   :  { %s18966_s26 = sld [smem:[#allocation103_spill]]  ;;  %s14836_s1 = smov [#allocation29]  }
 0x1bf   :  { %421 = dma.hbm_to_vmem [thread:$0]  %s18965_s22, 16, %s419_s15, [#allocation25]  }
 0x1c0   :  { %s446_s11 = sshll.u32 %s14836_s1, 4  ;;  %s14837_s30 = smov [#allocation32]   ;;  %s447_s11 = int_to_ptr.vmem [resolvable:$true] %s446_s11 }
 0x1c1   :  { %s470_s27 = sshll.u32 %s14837_s30, 4  ;;  %s471_s27 = int_to_ptr.vmem [resolvable:$true] %s470_s27 }
 0x1c4   :  { %s14584_s28 = scalar_lea.hbm %s18966_s26, 16 }
 0x1c5   :  { %p14585_p2 = scmp.ne.s32.totalorder %s18966_s26, %s14584_s28  ;;  %p14588_p3 = scmp.lt.u32.totalorder %s14584_s28, %s18966_s26 }
 0x1c7   :  { %p14590_p4 = pnand %p14588_p3, %p14585_p2 }
 0x1c9   :  { %14593 = shalt.err (!%p14590_p4)
}
 0x1ca   :  { %s14594_s2 = scalar_lea.vmem %s447_s11, 16  ;;  %s14598_s25 = scalar_lea.vmem %s447_s11, 32 }
 0x1cb   :  { %p14595_p5 = scmp.ne.s32.totalorder %s447_s11, %s14594_s2  ;;  %p14599_p6 = scmp.lt.s32.totalorder %s447_s11, %s447_s11 }
 0x1cc   :  { %p14600_p7 = scmp.lt.s32.totalorder %s14598_s25, %s14594_s2 }
 0x1ce   :  { %p14601_p8 = por %p14600_p7, %p14599_p6 }
 0x1d0   :  { %p14602_p9 = pnand %p14601_p8, %p14595_p5 }
 0x1d2   :  { %14605 = shalt.err (!%p14602_p9)
}
 0x1d3   :  { %s18967_s7 = sld [smem:[#allocation106_spill]] }
 0x1d4   :  { %449 = dma.hbm_to_vmem [thread:$0]  %s18966_s26, 16, %s447_s11, [#allocation28]  }
 0x1d9   :  { %s14606_s8 = scalar_lea.hbm %s18967_s7, 16 }
 0x1da   :  { %p14607_p10 = scmp.ne.s32.totalorder %s18967_s7, %s14606_s8  ;;  %p14610_p11 = scmp.lt.u32.totalorder %s14606_s8, %s18967_s7 }
 0x1dc   :  { %p14612_p12 = pnand %p14610_p11, %p14607_p10 }
 0x1de   :  { %14615 = shalt.err (!%p14612_p12)
}
 0x1df   :  { %s14616_s19 = scalar_lea.vmem %s471_s27, 16  ;;  %s14620_s10 = scalar_lea.vmem %s471_s27, 32 }
 0x1e0   :  { %p14617_p13 = scmp.ne.s32.totalorder %s471_s27, %s14616_s19  ;;  %p14621_p0 = scmp.lt.s32.totalorder %s471_s27, %s471_s27 }
 0x1e1   :  { %p14622_p1 = scmp.lt.s32.totalorder %s14620_s10, %s14616_s19 }
 0x1e3   :  { %p14623_p2 = por %p14622_p1, %p14621_p0 }
 0x1e5   :  { %p14624_p3 = pnand %p14623_p2, %p14617_p13 }
 0x1e7   :  { %14627 = shalt.err (!%p14624_p3)
}
 0x1e8   :  { %s18968_s6 = sld [smem:[#allocation108_spill]]  ;;  %s14838_s24 = smov [#allocation35]  }
 0x1e9   :  { %473 = dma.hbm_to_vmem [thread:$0]  %s18967_s7, 16, %s471_s27, [#allocation31]  }
 0x1ea   :  { %s492_s0 = sshll.u32 %s14838_s24, 4  ;;  %s14839_s4 = smov [#allocation36]   ;;  %s493_s0 = int_to_ptr.vmem [resolvable:$true] %s492_s0 }
 0x1eb   :  { %s502_s9 = sshll.u32 %s14839_s4, 4  ;;  %s503_s9 = int_to_ptr.vmem [resolvable:$true] %s502_s9 }
 0x1ee   :  { %s14628_s14 = scalar_lea.hbm %s18968_s6, 16 }
 0x1ef   :  { %p14629_p4 = scmp.ne.s32.totalorder %s18968_s6, %s14628_s14  ;;  %p14632_p5 = scmp.lt.u32.totalorder %s14628_s14, %s18968_s6 }
 0x1f1   :  { %p14634_p6 = pnand %p14632_p5, %p14629_p4 }
 0x1f3   :  { %14637 = shalt.err (!%p14634_p6)
}
 0x1f4   :  { %s14638_s13 = scalar_lea.vmem %s493_s0, 16  ;;  %s14642_s12 = scalar_lea.vmem %s493_s0, 32 }
 0x1f5   :  { %p14639_p7 = scmp.ne.s32.totalorder %s493_s0, %s14638_s13  ;;  %p14643_p8 = scmp.lt.s32.totalorder %s493_s0, %s493_s0 }
 0x1f6   :  { %p14644_p9 = scmp.lt.s32.totalorder %s14642_s12, %s14638_s13 }
 0x1f8   :  { %p14645_p10 = por %p14644_p9, %p14643_p8 }
 0x1fa   :  { %p14646_p11 = pnand %p14645_p10, %p14639_p7 }
 0x1fc   :  { %14649 = shalt.err (!%p14646_p11)
}
 0x1fd   :  { %s18969_s20 = sld [smem:[#allocation109_spill]] }
 0x1fe   :  { %495 = dma.hbm_to_vmem [thread:$0]  %s18968_s6, 16, %s493_s0, [#allocation34]  }
 0x203   :  { %s14650_s15 = scalar_lea.hbm %s18969_s20, 16 }
 0x204   :  { %p14651_p12 = scmp.ne.s32.totalorder %s18969_s20, %s14650_s15  ;;  %p14654_p13 = scmp.lt.u32.totalorder %s14650_s15, %s18969_s20 }
 0x206   :  { %p14656_p0 = pnand %p14654_p13, %p14651_p12 }
 0x208   :  { %14659 = shalt.err (!%p14656_p0)
}
 0x209   :  { %s14660_s5 = scalar_lea.vmem %s503_s9, 16  ;;  %s14664_s16 = scalar_lea.vmem %s503_s9, 32 }
 0x20a   :  { %p14661_p1 = scmp.ne.s32.totalorder %s503_s9, %s14660_s5  ;;  %p14665_p2 = scmp.lt.s32.totalorder %s503_s9, %s503_s9 }
 0x20b   :  { %p14666_p3 = scmp.lt.s32.totalorder %s14664_s16, %s14660_s5 }
 0x20d   :  { %p14667_p4 = por %p14666_p3, %p14665_p2 }
 0x20f   :  { %p14668_p5 = pnand %p14667_p4, %p14661_p1 }
 0x211   :  { %14671 = shalt.err (!%p14668_p5)
}
 0x212   :  { %505 = dma.hbm_to_vmem [thread:$0]  %s18969_s20, 16, %s503_s9, [#allocation37]  }
 0x213   :  { %14716 = dma.done.wait [#allocation7], 16  }
 0x214   :  { %14717 = vsyncadd [#allocation7], 4294967280 }
 0x215   :  { %14718 = dma.done.wait [#allocation10], 32  }
 0x216   :  { %14719 = vsyncadd [#allocation10], 4294967264 }
 0x217   :  { %14720 = dma.done.wait [#allocation13], 32  }
 0x218   :  { %14721 = vsyncadd [#allocation13], 4294967264 }
 0x219   :  { %14722 = dma.done.wait [#allocation16], 32  }
 0x21a   :  { %14723 = vsyncadd [#allocation16], 4294967264 }
 0x21b   :  { %14724 = dma.done.wait [#allocation19], 32  }
 0x21c   :  { %14725 = vsyncadd [#allocation19], 4294967264 }
 0x21d   :  { %14726 = dma.done.wait [#allocation22], 32  }
 0x21e   :  { %14727 = vsyncadd [#allocation22], 4294967264 }
 0x21f   :  { %14728 = dma.done.wait [#allocation25], 32  }
 0x220   :  { %14729 = vsyncadd [#allocation25], 4294967264 }
 0x221   :  { %14730 = dma.done.wait [#allocation28], 32  }
 0x222   :  { %14731 = vsyncadd [#allocation28], 4294967264 }
 0x223   :  { %14732 = dma.done.wait [#allocation31], 32  }
 0x224   :  { %14733 = vsyncadd [#allocation31], 4294967264 }
 0x225   :  { %14734 = dma.done.wait [#allocation34], 32  }
 0x226   :  { %14735 = vsyncadd [#allocation34], 4294967264 }
 0x227   :  { %14736 = dma.done.wait [#allocation37], 16  }
 0x228   :  { %14737 = vsyncadd [#allocation37], 4294967280  ;;  %s18970_s18 = sld [smem:[#allocation93_spill]]  ;;  %s18971_s22 = sld [smem:[#allocation54_spill]]  ;;  %v18871_v4 = vmov 0.0|0.0   ;;  %vm18885_vm0 = vcmask 392192  }
 0x229   :  { %12857 = vmatprep.subr.bf16.mxu1 %v18871_v4  ;;  %s18972_s17 = sld [smem:[#allocation81_spill]]  ;;  %s18973_s3 = sld [smem:[#allocation55_spill]]  ;;  %v18873_v29 = vmov 0.0   ;;  %vm18884_vm1 = vcmask 1041408   ;;  %vm14842_vm2 = vmmov 0   ;;  %vm18881_vm3 = vcmask 146432  }
 0x22a   :  { %11465 = vmatprep.mubr.msk.f32.mxu1 %vm14842_vm2, %v18873_v29  ;;  %s18974_s23 = sld [smem:[#allocation58_spill]]  ;;  %s18975_s26 = sld [smem:[#allocation89_spill]]  ;;  %vm911_vm4 = vcmask 785408   ;;  %v10155_v43 = vld [vmem:[#allocation14] ss:$0 sm:$0xff]  ;;  %vm1084_vm5 = vcmask 261120  }
 0x22b   :  { %s18992_s1 = sld [smem:[#allocation90_spill]]  ;;  %s18993_s11 = sld [smem:[#allocation87_spill]]  ;;  %vm2395_vm6 = vcmask 257024  }
 0x22c   :  { %s18994_s30 = sld [smem:[#allocation88_spill]]  ;;  %s18995_s27 = sld [smem:[#allocation82_spill]] }
 0x22d   :  { %s18996_s28 = sld [smem:[#allocation91_spill]]  ;;  %s18998_s2 = sld [smem:[#allocation56_spill]] }
 0x22e   :  { %v616_v5 = vld [vmem:[%s18970_s18] sm:$0xff]  ;;  %v617_v6 = vld [vmem:[%s18970_s18 + $0x8] sm:$0xff]  ;;  %v618_v7 = vld [vmem:[%s18970_s18 + $0x10] sm:$0xff]  ;;  %s18999_s25 = sld [smem:[#allocation86_spill]]  ;;  %s19001_s7 = sld [smem:[#allocation92_spill]] }
 0x22f   :  { %v12845_v8 = vpack.c.bf16 %v617_v6, %v616_v5  ;;  %v619_v9 = vld [vmem:[%s18970_s18 + $0x18] sm:$0xff]  ;;  %v620_v11 = vld [vmem:[%s18970_s18 + $0x20] sm:$0xff]  ;;  %v621_v12 = vld [vmem:[%s18970_s18 + $0x28] sm:$0xff]  ;;  %s19002_s8 = sld [smem:[#allocation94_spill]]  ;;  %s19005_s19 = sld [smem:[#allocation57_spill]] }
 0x230   :  { %v12849_v10 = vpack.c.bf16 %v619_v9, %v618_v7  ;;  %v570_v13 = vld [vmem:[%s18971_s22] sm:$0xff]  ;;  %v12853_v14 = vpack.c.bf16 %v621_v12, %v620_v11  ;;  %v792_v16 = vld [vmem:[%s18972_s17 + $0x8] sm:$0xff]  ;;  %v572_v19 = vld [vmem:[%s18971_s22 + $0x10] sm:$0xff]  ;;  %s19023_s10 = sld [smem:[#allocation75_spill]]  ;;  %s19040_s24 = sld [smem:[#allocation73_spill]] }
 0x231   :  { %12846 = vmatprep.subr.bf16.mxu0 %v12845_v8  ;;  %11441 = vmatprep.mubr.msk.f32.mxu0 %vm18885_vm0, %v570_v13  ;;  %v791_v15 = vld [vmem:[%s18972_s17] sm:$0xff]  ;;  %v571_v18 = vld [vmem:[%s18971_s22 + $0x8] sm:$0xff]  ;;  %v573_v20 = vld [vmem:[%s18971_s22 + $0x18] sm:$0xff]  ;;  %s19039_s6 = sld [smem:[#allocation83_spill]]  ;;  %s19041_s0 = sld [smem:[#allocation72_spill]] }
 0x232   :  { %12848 = vmatpush3.bf16.msra.mxu0 %v12845_v8  ;;  %v12858_v17 = vpack.c.bf16 %v792_v16, %v791_v15  ;;  %v574_v21 = vld [vmem:[%s18971_s22 + $0x20] sm:$0xff]  ;;  %v575_v22 = vld [vmem:[%s18971_s22 + $0x28] sm:$0xff]  ;;  %v576_v23 = vld [vmem:[%s18971_s22 + $0x30] sm:$0xff]  ;;  %s19046_s4 = sld [smem:[#allocation63_spill]]  ;;  %s19047_s9 = sld [smem:[#allocation74_spill]] }
 0x233   :  { %12850 = vmatprep.subr.bf16.mxu0 %v12849_v10  ;;  %v577_v24 = vld [vmem:[%s18971_s22 + $0x38] sm:$0xff]  ;;  %v578_v25 = vld [vmem:[%s18971_s22 + $0x40] sm:$0xff]  ;;  %v579_v26 = vld [vmem:[%s18971_s22 + $0x48] sm:$0xff]  ;;  %s19048_s14 = sld [smem:[#allocation85_spill]]  ;;  %s19049_s13 = sld [smem:[#allocation84_spill]] }
 0x234   :  { %12859 = vmatpush3.bf16.msra.mxu1 %v12858_v17  ;;  %v580_v27 = vld [vmem:[%s18971_s22 + $0x50] sm:$0xff]  ;;  %v581_v28 = vld [vmem:[%s18971_s22 + $0x58] sm:$0xff]  ;;  %v582_v31 = vld [vmem:[%s18973_s3] sm:$0xff]  ;;  %s19050_s12 = sld [smem:[#allocation71_spill]]  ;;  %s19051_s20 = sld [smem:[#allocation65_spill]] }
 0x235   :  { %11463 = vmatprep.subr.mxu1 %v18873_v29  ;;  %v793_v30 = vld [vmem:[%s18972_s17 + $0x10] sm:$0x3]  ;;  %v583_v32 = vld [vmem:[%s18973_s3 + $0x8] sm:$0xff]  ;;  %v585_v34 = vld [vmem:[%s18973_s3 + $0x18] sm:$0xff]  ;;  %s19056_s15 = sld [smem:[#allocation64_spill]]  ;;  %s19059_s5 = sld [smem:[#allocation62_spill]] }
 0x236   :  { %12852 = vmatpush3.bf16.msra.mxu0 %v12849_v10  ;;  %v584_v33 = vld [vmem:[%s18973_s3 + $0x10] sm:$0xff]  ;;  %v586_v35 = vld [vmem:[%s18973_s3 + $0x20] sm:$0xf]  ;;  %v1074_v38 = vld [vmem:[%s18975_s26 + $0x8] sm:$0xff]  ;;  %s19060_s16 = sld [smem:[#allocation101_spill]]  ;;  %s19062_s17 = sld [smem:[#allocation102_spill]] }
 0x237   :  { %12854 = vmatprep.subr.bf16.mxu0 %v12853_v14  ;;  %v15374_v36 = vld [vmem:[%s18974_s23] sm:$0xff]  ;;  %v1075_v40 = vld [vmem:[%s18975_s26 + $0x10] sm:$0xff]  ;;  %v1076_v41 = vld [vmem:[%s18975_s26 + $0x18] sm:$0xff]  ;;  %s19061_s18 = sld [smem:[#allocation61_spill]] }
 0x238   :  { %11464 = vmatpush3.msk.msra.mxu1 %vm18884_vm1, %v793_v30  ;;  %v1073_v37 = vld [vmem:[%s18975_s26] sm:$0xff]  ;;  %v12888_v42 = vpack.c.bf16 %v1076_v41, %v1075_v40  ;;  %v15443_v11 = vld [vmem:[%s18974_s23 + $0x8] sm:$0xff]  ;;  %v15446_v12 = vld [vmem:[%s18974_s23 + $0x10] sm:$0xff]  ;;  %s19063_s26 = sld [smem:[#allocation98_spill]] }
 0x239   :  { %11466 = vmatmul.mubr.msk.f32.vlgmr.msra.gmra.mrb[0].mxu1 %vm18881_vm3, %v582_v31  ;;  %v12884_v39 = vpack.c.bf16 %v1074_v38, %v1073_v37  ;;  %v15453_v13 = vld [vmem:[%s18974_s23 + $0x18] sm:$0xff]  ;;  %v15463_v15 = vld [vmem:[%s18974_s23 + $0x28] sm:$0xff]  ;;  %v15466_v16 = vld [vmem:[%s18974_s23 + $0x30] sm:$0xff] }
 0x23a   :  { %12856 = vmatpush3.bf16.msra.mxu0 %v12853_v14  ;;  %11468 = vmatprep.mubr.msk.f32.mxu1 %vm14842_vm2, %v18873_v29  ;;  %v15456_v14 = vld [vmem:[%s18974_s23 + $0x20] sm:$0xff]  ;;  %v15473_v17 = vld [vmem:[%s18974_s23 + $0x38] sm:$0xff] }
 0x23b   :  { %12885 = vmatprep.subr.bf16.mxu0 %v12884_v39  ;;  %v1249_v37 = vld [vmem:[%s18992_s1 + $0x18] sm:$0xff] }
 0x23d   :  { %11442 = vmatmul.mubr.msk.f32.vlgmr.msra.gmra.mrb[0].mxu0 %vm18885_vm0, %v571_v18  ;;  %11469 = vmatmul.mubr.msk.f32.gmra.mrb[2].mxu1 %vm18881_vm3, %v583_v32  ;;  %v15476_v18 = vld [vmem:[%s18974_s23 + $0x40] sm:$0xff] }
 0x23e   :  { %11444 = vmatprep.mubr.msk.f32.mxu0 %vm18885_vm0, %v572_v19  ;;  %11471 = vmatprep.mubr.msk.f32.mxu1 %vm14842_vm2, %v18873_v29  ;;  %v15483_v19 = vld [vmem:[%s18974_s23 + $0x48] sm:$0xff] }
 0x23f   :  { %12887 = vmatpush3.bf16.msra.mxu0 %v12884_v39 }
 0x240   :  { %12889 = vmatprep.subr.bf16.mxu0 %v12888_v42 }
 0x241   :  { %11445 = vmatmul.mubr.msk.f32.gmra.mrb[2].mxu0 %vm18885_vm0, %v573_v20  ;;  %11472 = vmatmul.mubr.msk.f32.gmra.mrb[4].mxu1 %vm18881_vm3, %v584_v33  ;;  %v15486_v20 = vld [vmem:[%s18974_s23 + $0x50] sm:$0xff]  ;;  %v1246_v33 = vld [vmem:[%s18992_s1] sm:$0xff] }
 0x242   :  { %11447 = vmatprep.mubr.msk.f32.mxu0 %vm18885_vm0, %v574_v21  ;;  %11474 = vmatprep.mubr.msk.f32.mxu1 %vm14842_vm2, %v18873_v29  ;;  %v615_v21 = vld [vmem:[%s18974_s23 + $0x58] sm:$0xff] }
 0x243   :  { %12891 = vmatpush3.bf16.msra.mxu0 %v12888_v42 }
 0x245   :  { %11448 = vmatmul.mubr.msk.f32.gmra.mrb[4].mxu0 %vm18885_vm0, %v575_v22  ;;  %11475 = vmatmul.mubr.msk.f32.gmra.mrb[6].mxu1 %vm18881_vm3, %v585_v34  ;;  %v1247_v34 = vld [vmem:[%s18992_s1 + $0x8] sm:$0xff] }
 0x246   :  { %11450 = vmatprep.mubr.msk.f32.mxu0 %vm18885_vm0, %v576_v23  ;;  %11477 = vmatprep.mubr.msk.f32.mxu1 %vm14842_vm2, %v18873_v29 }
 0x249   :  { %11451 = vmatmul.mubr.msk.f32.gmra.mrb[6].mxu0 %vm18885_vm0, %v577_v24  ;;  %11478 = vmatmul.mubr.msk.f32.gmra.mrb[8].mxu1 %vm18881_vm3, %v586_v35  ;;  %v12892_v35 = vpack.c.bf16 %v1247_v34, %v1246_v33  ;;  %v2457_v33 = vld [vmem:[%s18994_s30 + $0x10] sm:$0xff]  ;;  %v2458_v34 = vld [vmem:[%s18994_s30 + $0x18] sm:$0xff] }
 0x24a   :  { %11453 = vmatprep.mubr.msk.f32.mxu0 %vm18885_vm0, %v578_v25  ;;  %11504 = vmatprep.mubr.msk.f32.mxu1 %vm911_vm4, %v15374_v36 }
 0x24b   :  { %12893 = vmatprep.subr.bf16.mxu0 %v12892_v35 }
 0x24d   :  { %11454 = vmatmul.mubr.msk.f32.gmra.mrb[8].mxu0 %vm18885_vm0, %v579_v26 }
 0x24e   :  { %11456 = vmatprep.mubr.msk.f32.mxu0 %vm18885_vm0, %v580_v27 }
 0x251   :  { %11457 = vmatmul.mubr.msk.f32.gmra.mrb[10].mxu0 %vm18885_vm0, %v581_v28 }
 0x30c   :  { %v15496_v22 = vpop.f32.mrb[0].mxu1 }
 0x30d   :  { %v11467_v23 = vpop.f32.mrb[1].mxu1 }
 0x30e   :  { %v2455_v23 = vld [vmem:[%s18994_s30] sm:$0xff] }
 0x310   :  { %v11443_v44 = vpop.f32.mrb[0].mxu0  ;;  %v15498_v24 = vpop.f32.mrb[2].mxu1 }
 0x311   :  { %v15382_v45 = vadd.f32 %v11443_v44, %v10155_v43  ;;  %v732_v46 = vpop.f32.mrb[1].mxu0  ;;  %v11470_v25 = vpop.f32.mrb[3].mxu1 }
 0x312   :  { %v15384_v47 = vadd.f32 %v10155_v43, %v732_v46  ;;  %v2456_v25 = vld [vmem:[%s18994_s30 + $0x8] sm:$0xff]  ;;  %s19067_s30 = sld [smem:[#allocation97_spill]] }
 0x313   :  { %18976 = vst [vmem:[#allocation114_spill] sm:$0xff] %v15382_v45 }
 0x314   :  { %18977 = vst [vmem:[#allocation115_spill] sm:$0xff] %v15384_v47  ;;  %v11446_v48 = vpop.f32.mrb[2].mxu0  ;;  %v15388_v49 = vpack.c.bf16 %v15382_v45, %v15384_v47  ;;  %v15500_v26 = vpop.f32.mrb[4].mxu1 }
 0x315   :  { %v15390_v50 = vadd.f32 %v11446_v48, %v10155_v43  ;;  %v742_v51 = vpop.f32.mrb[3].mxu0  ;;  %v11473_v27 = vpop.f32.mrb[5].mxu1 }
 0x316   :  { %v15392_v52 = vadd.f32 %v10155_v43, %v742_v51  ;;  %12861 = vmatprep.subr.bf16.mxu1 %v15388_v49  ;;  %v10168_v27 = vld [vmem:[%s18995_s27] ss:$0 sm:$0xff]  ;;  %s19081_s27 = sld [smem:[#allocation107_spill]] }
 0x317   :  { %18978 = vst [vmem:[#allocation116_spill] sm:$0xff] %v15390_v50  ;;  %12863 = vmatpush3.bf16.msra.mxu1 %v15388_v49 }
 0x318   :  { %18979 = vst [vmem:[#allocation117_spill] sm:$0xff] %v15392_v52  ;;  %v11449_v53 = vpop.f32.mrb[4].mxu0  ;;  %v15398_v54 = vpack.c.bf16 %v15390_v50, %v15392_v52  ;;  %v15502_v28 = vpop.f32.mrb[6].mxu1 }
 0x319   :  { %v15400_v55 = vadd.f32 %v11449_v53, %v10155_v43  ;;  %v752_v56 = vpop.f32.mrb[5].mxu0  ;;  %v11476_v30 = vpop.f32.mrb[7].mxu1 }
 0x31a   :  { %v15402_v57 = vadd.f32 %v10155_v43, %v752_v56  ;;  %12865 = vmatprep.subr.bf16.mxu1 %v15398_v54  ;;  %v12947_v30 = vpack.c.bf16 %v2456_v25, %v2455_v23 }
 0x31b   :  { %18980 = vst [vmem:[#allocation118_spill] sm:$0xff] %v15400_v55  ;;  %12867 = vmatpush3.bf16.msra.mxu1 %v15398_v54 }
 0x31c   :  { %18981 = vst [vmem:[#allocation119_spill] sm:$0xff] %v15402_v57  ;;  %v11452_v58 = vpop.f32.mrb[6].mxu0  ;;  %v15408_v59 = vpack.c.bf16 %v15400_v55, %v15402_v57  ;;  %v15504_v31 = vpop.f32.mrb[8].mxu1 }
 0x31d   :  { %v15410_v60 = vadd.f32 %v11452_v58, %v10155_v43  ;;  %v762_v61 = vpop.f32.mrb[7].mxu0  ;;  %v11479_v32 = vpop.f32.mrb[9].mxu1 }
 0x31e   :  { %18982 = vst [vmem:[#allocation120_spill] sm:$0xff] %v15408_v59  ;;  %v15412_v62 = vadd.f32 %v10155_v43, %v762_v61  ;;  %12869 = vmatprep.subr.bf16.mxu1 %v15408_v59  ;;  %v2258_v61 = vld [vmem:[%s18993_s11] sm:$0xff]  ;;  %v15559_v32 = vadd.f32 %v10168_v27, %v15496_v22 }
 0x31f   :  { %18983 = vst [vmem:[#allocation121_spill] sm:$0xff] %v15410_v60  ;;  %12871 = vmatpush3.bf16.msra.mxu1 %v15408_v59 }
 0x320   :  { %18984 = vst [vmem:[#allocation122_spill] sm:$0xff] %v15412_v62  ;;  %v11455_v63 = vpop.f32.mrb[8].mxu0  ;;  %v15418_v0 = vpack.c.bf16 %v15410_v60, %v15412_v62 }
 0x321   :  { %v15420_v1 = vadd.f32 %v11455_v63, %v10155_v43  ;;  %v772_v2 = vpop.f32.mrb[9].mxu0  ;;  %v2259_v63 = vld [vmem:[%s18993_s11 + $0x8] sm:$0xff] }
 0x322   :  { %18985 = vst [vmem:[#allocation123_spill] sm:$0xff] %v15418_v0  ;;  %v15422_v3 = vadd.f32 %v10155_v43, %v772_v2  ;;  %12873 = vmatprep.subr.bf16.mxu1 %v15418_v0  ;;  %v12941_v2 = vpack.c.bf16 %v2259_v63, %v2258_v61 }
 0x323   :  { %18986 = vst [vmem:[#allocation124_spill] sm:$0xff] %v15420_v1  ;;  %12875 = vmatpush3.bf16.msra.mxu1 %v15418_v0 }
 0x324   :  { %18987 = vst [vmem:[#allocation125_spill] sm:$0xff] %v15422_v3  ;;  %v11458_v5 = vpop.f32.mrb[10].mxu0  ;;  %v15428_v6 = vpack.c.bf16 %v15420_v1, %v15422_v3 }
 0x325   :  { %v15430_v7 = vadd.f32 %v11458_v5, %v10155_v43  ;;  %v782_v8 = vpop.f32.mrb[11].mxu0  ;;  %v2260_v5 = vld [vmem:[%s18993_s11 + $0x10] sm:$0xff] }
 0x326   :  { %18988 = vst [vmem:[#allocation126_spill] sm:$0xff] %v15428_v6  ;;  %v15432_v9 = vadd.f32 %v10155_v43, %v782_v8  ;;  %12877 = vmatprep.subr.bf16.mxu1 %v15428_v6  ;;  %v2261_v8 = vld [vmem:[%s18993_s11 + $0x18] sm:$0xff]  ;;  %s19066_s11 = sld [smem:[#allocation104_spill]] }
 0x327   :  { %18989 = vst [vmem:[#allocation127_spill] sm:$0xff] %v15430_v7  ;;  %12879 = vmatpush3.bf16.msra.mxu1 %v15428_v6 }
 0x328   :  { %18990 = vst [vmem:[#allocation128_spill] sm:$0xff] %v15432_v9  ;;  %v15438_v10 = vpack.c.bf16 %v15430_v7, %v15432_v9 }
 0x32a   :  { %18991 = vst [vmem:[#allocation129_spill] sm:$0xff] %v15438_v10  ;;  %12881 = vmatprep.subr.bf16.mxu1 %v15438_v10 }
 0x32b   :  { %12883 = vmatpush3.bf16.msra.mxu1 %v15438_v10 }
 0x32e   :  { %11505 = vmatmul.mubr.msk.f32.vlgmr.msra.gmra.mrb[10].mxu1 %vm911_vm4, %v15443_v11 }
 0x32f   :  { %11507 = vmatprep.mubr.msk.f32.mxu1 %vm911_vm4, %v15446_v12 }
 0x332   :  { %11508 = vmatmul.mubr.msk.f32.gmra.mrb[12].mxu1 %vm911_vm4, %v15453_v13 }
 0x333   :  { %11510 = vmatprep.mubr.msk.f32.mxu1 %vm911_vm4, %v15456_v14 }
 0x336   :  { %11511 = vmatmul.mubr.msk.f32.gmra.mrb[14].mxu1 %vm911_vm4, %v15463_v15 }
 0x337   :  { %11513 = vmatprep.mubr.msk.f32.mxu1 %vm911_vm4, %v15466_v16 }
 0x33a   :  { %11514 = vmatmul.mubr.msk.f32.gmra.mrb[16].mxu1 %vm911_vm4, %v15473_v17 }
 0x33b   :  { %11516 = vmatprep.mubr.msk.f32.mxu1 %vm911_vm4, %v15476_v18 }
 0x33e   :  { %11517 = vmatmul.mubr.msk.f32.gmra.mrb[18].mxu1 %vm911_vm4, %v15483_v19 }
 0x33f   :  { %11519 = vmatprep.mubr.msk.f32.mxu1 %vm911_vm4, %v15486_v20 }
 0x342   :  { %11520 = vmatmul.mubr.msk.f32.gmra.mrb[20].mxu1 %vm911_vm4, %v615_v21  ;;  %v12944_v21 = vpack.c.bf16 %v2261_v8, %v2260_v5 }
 0x343   :  { %11598 = vmatprep.mubr.msk.f32.mxu1 %vm911_vm4, %v15374_v36  ;;  %v1248_v36 = vld [vmem:[%s18992_s1 + $0x10] sm:$0xff]  ;;  %s19064_s1 = sld [smem:[#allocation100_spill]] }
 0x344   :  { %v12896_v40 = vpack.c.bf16 %v1249_v37, %v1248_v36  ;;  %v12950_v36 = vpack.c.bf16 %v2458_v34, %v2457_v33  ;;  %v15588_v37 = vadd.f32 %v10168_v27, %v15502_v28 }
 0x401   :  { %v11506_v38 = vpop.f32.mrb[10].mxu1 }
 0x402   :  { %v1014_v39 = vpop.f32.mrb[11].mxu1 }
 0x403   :  { %11530 = vmatprep.mubr.msk.f32.mxu0 %vm1084_vm5, %v1014_v39 }
 0x404   :  { %11531 = vmatmul.mubr.msk.f32.vlgmr.msra.gmra.mrb[12].mxu0 %vm1084_vm5, %v11506_v38  ;;  %v10187_v38 = vld [vmem:[#allocation11] ss:$0 sm:$0xff] }
 0x405   :  { %v11509_v41 = vpop.f32.mrb[12].mxu1  ;;  %12895 = vmatpush3.bf16.msra.mxu0 %v12892_v35  ;;  %v15564_v35 = vadd.f32 %v10168_v27, %v15498_v24  ;;  %v15580_v24 = vadd.f32 %v10168_v27, %v15500_v26  ;;  %v15595_v26 = vadd.f32 %v10168_v27, %v15504_v31 }
 0x406   :  { %v1024_v42 = vpop.f32.mrb[13].mxu1  ;;  %12897 = vmatprep.subr.bf16.mxu0 %v12896_v40 }
 0x407   :  { %11533 = vmatprep.mubr.msk.f32.mxu0 %vm1084_vm5, %v1024_v42  ;;  %v15575_v22 = vpack.c.bf16 %v15564_v35, %v15559_v32 }
 0x408   :  { %11534 = vmatmul.mubr.msk.f32.gmra.mrb[14].mxu0 %vm1084_vm5, %v11509_v41 }
 0x409   :  { %v11512_v43 = vpop.f32.mrb[14].mxu1  ;;  %12899 = vmatpush3.bf16.msra.mxu0 %v12896_v40 }
 0x40a   :  { %v1034_v44 = vpop.f32.mrb[15].mxu1  ;;  %12940 = vmatprep.subr.bf16.mxu0 %v18871_v4 }
 0x40b   :  { %11536 = vmatprep.mubr.msk.f32.mxu0 %vm1084_vm5, %v1034_v44 }
 0x40c   :  { %11537 = vmatmul.mubr.msk.f32.gmra.mrb[16].mxu0 %vm1084_vm5, %v11512_v43 }
 0x40d   :  { %v11515_v46 = vpop.f32.mrb[16].mxu1 }
 0x40e   :  { %v1044_v48 = vpop.f32.mrb[17].mxu1 }
 0x40f   :  { %11539 = vmatprep.mubr.msk.f32.mxu0 %vm1084_vm5, %v1044_v48 }
 0x410   :  { %11540 = vmatmul.mubr.msk.f32.gmra.mrb[18].mxu0 %vm1084_vm5, %v11515_v46 }
 0x411   :  { %v11518_v51 = vpop.f32.mrb[18].mxu1 }
 0x412   :  { %v1054_v53 = vpop.f32.mrb[19].mxu1 }
 0x413   :  { %11542 = vmatprep.mubr.msk.f32.mxu0 %vm1084_vm5, %v1054_v53 }
 0x414   :  { %11543 = vmatmul.mubr.msk.f32.gmra.mrb[20].mxu0 %vm1084_vm5, %v11518_v51 }
 0x415   :  { %v11521_v56 = vpop.f32.mrb[20].mxu1 }
 0x416   :  { %v1064_v58 = vpop.f32.mrb[21].mxu1 }
 0x417   :  { %11545 = vmatprep.mubr.msk.f32.mxu0 %vm1084_vm5, %v1064_v58 }
 0x418   :  { %11546 = vmatmul.mubr.msk.f32.gmra.mrb[22].mxu0 %vm1084_vm5, %v11521_v56 }
 0x419   :  { %11556 = vmatprep.mubr.msk.f32.mxu0 %vm1084_vm5, %v15384_v47 }
 0x41c   :  { %11557 = vmatmul.mubr.msk.f32.vlgmr.msra.gmra.mrb[12].mxu0 %vm1084_vm5, %v15382_v45 }
 0x41d   :  { %11559 = vmatprep.mubr.msk.f32.mxu0 %vm1084_vm5, %v15392_v52  ;;  %12942 = vmatpush3.bf16.msra.mxu0 %v12941_v2 }
 0x41e   :  { %12943 = vmatprep.subr.bf16.mxu0 %v18871_v4 }
 0x420   :  { %11560 = vmatmul.mubr.msk.f32.gmra.mrb[14].mxu0 %vm1084_vm5, %v15390_v50 }
 0x421   :  { %11562 = vmatprep.mubr.msk.f32.mxu0 %vm1084_vm5, %v15402_v57  ;;  %12945 = vmatpush3.bf16.msra.mxu0 %v12944_v21 }
 0x422   :  { %12946 = vmatprep.subr.bf16.mxu0 %v18871_v4 }
 0x424   :  { %11563 = vmatmul.mubr.msk.f32.gmra.mrb[16].mxu0 %vm1084_vm5, %v15400_v55 }
 0x425   :  { %11565 = vmatprep.mubr.msk.f32.mxu0 %vm1084_vm5, %v15412_v62 }
 0x428   :  { %11566 = vmatmul.mubr.msk.f32.gmra.mrb[18].mxu0 %vm1084_vm5, %v15410_v60 }
 0x429   :  { %11568 = vmatprep.mubr.msk.f32.mxu0 %vm1084_vm5, %v15422_v3 }
 0x42c   :  { %11569 = vmatmul.mubr.msk.f32.gmra.mrb[20].mxu0 %vm1084_vm5, %v15420_v1 }
 0x42d   :  { %11571 = vmatprep.mubr.msk.f32.mxu0 %vm1084_vm5, %v15432_v9 }
 0x430   :  { %11572 = vmatmul.mubr.msk.f32.gmra.mrb[22].mxu0 %vm1084_vm5, %v15430_v7 }
 0x431   :  { %11676 = vmatprep.mubr.msk.f32.mxu0 %vm14842_vm2, %v18873_v29 }
 0x434   :  { %11677 = vmatmul.mubr.msk.f32.vlgmr.msra.gmra.mrb[24].mxu0 %vm1084_vm5, %v15559_v32 }
 0x435   :  { %12948 = vmatpush3.bf16.msra.mxu0 %v12947_v30  ;;  %11679 = vmatprep.mubr.msk.f32.mxu0 %vm14842_vm2, %v18873_v29 }
 0x436   :  { %12949 = vmatprep.subr.bf16.mxu0 %v18871_v4 }
 0x438   :  { %11680 = vmatmul.mubr.msk.f32.gmra.mrb[26].mxu0 %vm1084_vm5, %v15564_v35 }
 0x439   :  { %12951 = vmatpush3.bf16.msra.mxu0 %v12950_v36  ;;  %11682 = vmatprep.mubr.msk.f32.mxu0 %vm14842_vm2, %v18873_v29 }
 0x43a   :  { %12953 = vmatprep.subr.bf16.mxu0 %v15575_v22 }
 0x43c   :  { %11683 = vmatmul.mubr.msk.f32.gmra.mrb[28].mxu0 %vm1084_vm5, %v15580_v24 }
 0x43d   :  { %11685 = vmatprep.mubr.msk.f32.mxu0 %vm14842_vm2, %v18873_v29 }
 0x440   :  { %11686 = vmatmul.mubr.msk.f32.gmra.mrb[30].mxu0 %vm1084_vm5, %v15588_v37 }
 0x441   :  { %11688 = vmatprep.mubr.msk.f32.mxu0 %vm14842_vm2, %v18873_v29 }
 0x444   :  { %11689 = vmatmul.mubr.msk.f32.gmra.mrb[32].mxu0 %vm1084_vm5, %v15595_v26 }
 0x445   :  { %11699 = vmatprep.mubr.msk.f32.mxu0 %vm14842_vm2, %v18873_v29 }
 0x4ef   :  { %v11558_v39 = vpop.f32.mrb[12].mxu0 }
 0x4f0   :  { %v1352_v40 = vpop.f32.mrb[13].mxu0  ;;  %v15601_v28 = vadd.f32 %v11558_v39, %v10187_v38 }
 0x4f1   :  { %v15603_v41 = vadd.f32 %v10187_v38, %v1352_v40 }
 0x4f2   :  { %v1424_v51 = vmul.f32 %v15601_v28, %v15601_v28 }
 0x4f3   :  { %v11561_v42 = vpop.f32.mrb[14].mxu0  ;;  %v1423_v43 = vmul.f32 %v15603_v41, %v15603_v41 }
 0x4f4   :  { %v15607_v44 = vadd.f32 %v11561_v42, %v10187_v38  ;;  %v1362_v31 = vpop.f32.mrb[15].mxu0  ;;  %v1438_v8 = vsel %vm1084_vm5, %v1424_v51, 0.0 }
 0x4f5   :  { %v15609_v46 = vadd.f32 %v10187_v38, %v1362_v31  ;;  %v1435_v48 = vsel %vm1084_vm5, %v1423_v43, 0.0 }
 0x4f6   :  { %1436 = vadd.xlane.f32.xlu0 %v1435_v48  ;;  %v1426_v53 = vmul.f32 %v15607_v44, %v15607_v44 }
 0x4f7   :  { %v11564_v56 = vpop.f32.mrb[16].mxu0  ;;  %v1425_v2 = vmul.f32 %v15609_v46, %v15609_v46 }
 0x4f8   :  { %v15616_v58 = vadd.f32 %v11564_v56, %v10187_v38  ;;  %v1372_v61 = vpop.f32.mrb[17].mxu0  ;;  %v1444_v63 = vsel %vm1084_vm5, %v1426_v53, 0.0 }
 0x4f9   :  { %v15621_v5 = vadd.f32 %v10187_v38, %v1372_v61  ;;  %1445 = vadd.xlane.f32.xlu1 %v1444_v63  ;;  %v1441_v30 = vsel %vm1084_vm5, %v1425_v2, 0.0 }
 0x4fa   :  { %1439 = vadd.xlane.f32.xlu0 %v1438_v8  ;;  %v1428_v33 = vmul.f32 %v15616_v58, %v15616_v58 }
 0x4fb   :  { %v11567_v21 = vpop.f32.mrb[18].mxu0  ;;  %v1427_v23 = vmul.f32 %v15621_v5, %v15621_v5 }
 0x4fc   :  { %v15626_v25 = vadd.f32 %v11567_v21, %v10187_v38  ;;  %v1382_v27 = vpop.f32.mrb[19].mxu0  ;;  %v1450_v31 = vsel %vm1084_vm5, %v1428_v33, 0.0 }
 0x4fd   :  { %v15631_v34 = vadd.f32 %v10187_v38, %v1382_v27  ;;  %1442 = vadd.xlane.f32.xlu1 %v1441_v30  ;;  %v1447_v36 = vsel %vm1084_vm5, %v1427_v23, 0.0  ;;  %v10254_v30 = vld [vmem:[#allocation6] ss:$0 sm:$0xff] }
 0x4fe   :  { %1448 = vadd.xlane.f32.xlu0 %v1447_v36  ;;  %v1430_v48 = vmul.f32 %v15626_v25, %v15626_v25 }
 0x4ff   :  { %v11570_v39 = vpop.f32.mrb[20].mxu0  ;;  %v1429_v40 = vmul.f32 %v15631_v34, %v15631_v34 }
 0x500   :  { %v15636_v42 = vadd.f32 %v11570_v39, %v10187_v38  ;;  %v1392_v43 = vpop.f32.mrb[21].mxu0  ;;  %v1456_v8 = vsel %vm1084_vm5, %v1430_v48, 0.0 }
 0x501   :  { %v15641_v51 = vadd.f32 %v10187_v38, %v1392_v43  ;;  %1451 = vadd.xlane.f32.xlu1 %v1450_v31  ;;  %v1453_v53 = vsel %vm1084_vm5, %v1429_v40, 0.0 }
 0x502   :  { %1454 = vadd.xlane.f32.xlu0 %v1453_v53  ;;  %v1432_v21 = vmul.f32 %v15636_v42, %v15636_v42 }
 0x503   :  { %v11573_v56 = vpop.f32.mrb[22].mxu0  ;;  %v1431_v61 = vmul.f32 %v15641_v51, %v15641_v51 }
 0x504   :  { %v15646_v63 = vadd.f32 %v11573_v56, %v10187_v38  ;;  %v1402_v2 = vpop.f32.mrb[23].mxu0  ;;  %v1462_v43 = vsel %vm1084_vm5, %v1432_v21, 0.0 }
 0x505   :  { %v15651_v23 = vadd.f32 %v10187_v38, %v1402_v2  ;;  %1457 = vadd.xlane.f32.xlu1 %v1456_v8  ;;  %v1459_v27 = vsel %vm1084_vm5, %v1431_v61, 0.0 }
 0x506   :  { %1460 = vadd.xlane.f32.xlu0 %v1459_v27  ;;  %v1434_v31 = vmul.f32 %v15646_v63, %v15646_v63 }
 0x507   :  { %v2343_v33 = vpop.f32.mrb[24].mxu0  ;;  %v1433_v36 = vmul.f32 %v15651_v23, %v15651_v23 }
 0x508   :  { %v15656_v39 = vadd.f32 %v10254_v30, %v2343_v33  ;;  %v11678_v40 = vpop.f32.mrb[25].mxu0  ;;  %v1468_v2 = vsel %vm1084_vm5, %v1434_v31, 0.0 }
 0x509   :  { %1463 = vadd.xlane.f32.xlu1 %v1462_v43  ;;  %v1465_v38 = vsel %vm1084_vm5, %v1433_v36, 0.0 }
 0x50a   :  { %1466 = vadd.xlane.f32.xlu0 %v1465_v38  ;;  %v2378_v48 = vmul.f32 %v15656_v39, %v15656_v39 }
 0x50b   :  { %v2348_v53 = vpop.f32.mrb[26].mxu0 }
 0x50c   :  { %v15664_v56 = vadd.f32 %v10254_v30, %v2348_v53  ;;  %v11681_v61 = vpop.f32.mrb[27].mxu0  ;;  %v2383_v8 = vsel %vm1084_vm5, %v2378_v48, 0.0 }
 0x50d   :  { %1469 = vadd.xlane.f32.xlu1 %v1468_v2 }
 0x50e   :  { %2384 = vadd.xlane.f32.xlu0 %v2383_v8  ;;  %v2379_v21 = vmul.f32 %v15664_v56, %v15664_v56 }
 0x50f   :  { %v2353_v27 = vpop.f32.mrb[28].mxu0 }
 0x510   :  { %v15670_v33 = vadd.f32 %v10254_v30, %v2353_v27  ;;  %v11684_v36 = vpop.f32.mrb[29].mxu0  ;;  %v2386_v40 = vsel %vm1084_vm5, %v2379_v21, 0.0 }
 0x511   :  { %2387 = vadd.xlane.f32.xlu1 %v2386_v40 }
 0x512   :  { %v2380_v43 = vmul.f32 %v15670_v33, %v15670_v33 }
 0x513   :  { %v2358_v38 = vpop.f32.mrb[30].mxu0 }
 0x514   :  { %v15675_v53 = vadd.f32 %v10254_v30, %v2358_v38  ;;  %v11687_v31 = vpop.f32.mrb[31].mxu0  ;;  %v2389_v48 = vsel %vm1084_vm5, %v2380_v43, 0.0 }
 0x515   :  { %2390 = vadd.xlane.f32.xlu0 %v2389_v48 }
 0x516   :  { %v2381_v61 = vmul.f32 %v15675_v53, %v15675_v53 }
 0x517   :  { %v2363_v2 = vpop.f32.mrb[32].mxu0 }
 0x518   :  { %v15680_v8 = vadd.f32 %v10254_v30, %v2363_v2  ;;  %v11690_v27 = vpop.f32.mrb[33].mxu0  ;;  %v2392_v21 = vsel %vm1084_vm5, %v2381_v61, 0.0 }
 0x519   :  { %2393 = vadd.xlane.f32.xlu1 %v2392_v21 }
 0x51a   :  { %v2382_v36 = vmul.f32 %v15680_v8, %v15680_v8 }
 0x51c   :  { %v2396_v40 = vsel %vm2395_vm6, %v2382_v36, 0.0 }
 0x51d   :  { %2397 = vadd.xlane.f32.xlu0 %v2396_v40 }
 0x583   :  { %v1437_v38 = vpop.xlane.xlu0 %1436 }
 0x584   :  { %13681 = vrsqrt.f32 %v1437_v38  ;;  %vm1473_vm7 = vcmp.eq.f32.partialorder %v1437_v38, inf  ;;  %vm1475_vm8 = vcmp.eq.f32.partialorder %v1437_v38, 0.0  ;;  %v1476_v21 = vand.u32 2147483648, %v1437_v38 }
 0x586   :  { %v1446_v43 = vpop.xlane.xlu1 %1445 }
 0x587   :  { %13683 = vrsqrt.f32 %v1446_v43  ;;  %v1440_v31 = vpop.xlane.xlu0 %1439  ;;  %vm1494_vm9 = vcmp.eq.f32.partialorder %v1446_v43, inf  ;;  %vm1496_vm10 = vcmp.eq.f32.partialorder %v1446_v43, 0.0  ;;  %v1497_v40 = vand.u32 2147483648, %v1446_v43 }
 0x588   :  { %13685 = vrsqrt.f32 %v1440_v31  ;;  %vm1480_vm11 = vcmp.eq.f32.partialorder %v1440_v31, inf  ;;  %vm1482_vm12 = vcmp.eq.f32.partialorder %v1440_v31, 0.0  ;;  %v1483_v7 = vand.u32 2147483648, %v1440_v31 }
 0x58a   :  { %v15686_v48 = vpop.xlane.xlu1 %1442 }
 0x58b   :  { %13687 = vrsqrt.f32 %v15686_v48  ;;  %v15689_v30 = vpop.xlane.xlu0 %1448  ;;  %vm1487_vm13 = vcmp.eq.f32.partialorder %v15686_v48, inf  ;;  %vm1489_vm14 = vcmp.eq.f32.partialorder %v15686_v48, 0.0 }
 0x58c   :  { %13689 = vrsqrt.f32 %v15689_v30  ;;  %vm1501_vm15 = vcmp.eq.f32.partialorder %v15689_v30, inf }
 0x58e   :  { %v13682_v61 = vpop.eup %13681  ;;  %v15692_v2 = vpop.xlane.xlu1 %1451 }
 0x58f   :  { %v1472_v27 = vmul.f32 %v13682_v61, %v1437_v38  ;;  %13691 = vrsqrt.f32 %v15692_v2  ;;  %v15695_v36 = vpop.xlane.xlu0 %1454  ;;  %v1490_v61 = vand.u32 2147483648, %v15686_v48  ;;  %vm1508_vm3 = vcmp.eq.f32.partialorder %v15692_v2, inf }
 0x590   :  { %13693 = vrsqrt.f32 %v15695_v36  ;;  %vm1515_vm1 = vcmp.eq.f32.partialorder %v15695_v36, inf  ;;  %vm1517_vm0 = vcmp.eq.f32.partialorder %v15695_v36, 0.0 }
 0x591   :  { %v13684_v4 = vpop.eup %13683  ;;  %v1474_v29 = vsel %vm1473_vm7, %v1437_v38, %v1472_v27  ;;  %vm1503_vm7 = vcmp.eq.f32.partialorder %v15689_v30, 0.0 }
 0x592   :  { %v13686_v9 = vpop.eup %13685  ;;  %v1493_v1 = vmul.f32 %v13684_v4, %v1446_v43  ;;  %v15701_v3 = vpop.xlane.xlu1 %1457  ;;  %v1477_v60 = vsel %vm1475_vm8, %v1476_v21, %v1474_v29  ;;  %v1504_v4 = vand.u32 2147483648, %v15689_v30  ;;  %vm1510_vm8 = vcmp.eq.f32.partialorder %v15692_v2, 0.0 }
 0x593   :  { %v1479_v62 = vmul.f32 %v13686_v9, %v1440_v31  ;;  %13695 = vrsqrt.f32 %v15701_v3  ;;  %v15706_v27 = vpop.xlane.xlu0 %1460  ;;  %v1511_v9 = vand.u32 2147483648, %v15692_v2  ;;  %v1555_v52 = vmax.f32 %v1477_v60, 1e-12 }
 0x594   :  { %13697 = vrsqrt.f32 %v15706_v27  ;;  %v1495_v57 = vsel %vm1494_vm9, %v1446_v43, %v1493_v1  ;;  %vm1522_vm9 = vcmp.eq.f32.partialorder %v15701_v3, inf }
 0x595   :  { %v13688_v55 = vpop.eup %13687  ;;  %v1481_v29 = vsel %vm1480_vm11, %v1440_v31, %v1479_v62  ;;  %v1518_v62 = vand.u32 2147483648, %v15695_v36  ;;  %v1498_v10 = vsel %vm1496_vm10, %v1497_v40, %v1495_v57  ;;  %vm1524_vm11 = vcmp.eq.f32.partialorder %v15701_v3, 0.0 }
 0x596   :  { %v13690_v38 = vpop.eup %13689  ;;  %v1486_v21 = vmul.f32 %v13688_v55, %v15686_v48  ;;  %v15719_v50 = vpop.xlane.xlu1 %1463  ;;  %v1484_v45 = vsel %vm1482_vm12, %v1483_v7, %v1481_v29  ;;  %v1525_v7 = vand.u32 2147483648, %v15701_v3  ;;  %vm1529_vm12 = vcmp.eq.f32.partialorder %v15706_v27, inf }
 0x597   :  { %v1500_v1 = vmul.f32 %v13690_v38, %v15689_v30  ;;  %13699 = vrsqrt.f32 %v15719_v50  ;;  %v15725_v47 = vpop.xlane.xlu0 %1466  ;;  %v1532_v31 = vand.u32 2147483648, %v15706_v27  ;;  %vm1531_vm10 = vcmp.eq.f32.partialorder %v15706_v27, 0.0 }
 0x598   :  { %v1488_v55 = vsel %vm1487_vm13, %v15686_v48, %v1486_v21  ;;  %13701 = vrsqrt.f32 %v15725_v47  ;;  %v1556_v38 = vmax.f32 %v1484_v45, 1e-12  ;;  %v1558_v59 = vmax.f32 %v1498_v10, 1e-12 }
 0x599   :  { %v13692_v60 = vpop.eup %13691  ;;  %v1502_v57 = vsel %vm1501_vm15, %v15689_v30, %v1500_v1  ;;  %13703 = vrcp.f32 %v1555_v52  ;;  %v1491_v21 = vsel %vm1489_vm14, %v1490_v61, %v1488_v55  ;;  %vm1536_vm13 = vcmp.eq.f32.partialorder %v15719_v50, inf }
 0x59a   :  { %v13694_v29 = vpop.eup %13693  ;;  %v1507_v43 = vmul.f32 %v13692_v60, %v15692_v2  ;;  %v15742_v40 = vpop.xlane.xlu1 %1469  ;;  %vm1538_vm15 = vcmp.eq.f32.partialorder %v15719_v50, 0.0  ;;  %v1505_v52 = vsel %vm1503_vm7, %v1504_v4, %v1502_v57  ;;  %v1539_v10 = vand.u32 2147483648, %v15719_v50 }
 0x59b   :  { %v1514_v6 = vmul.f32 %v13694_v29, %v15695_v36  ;;  %13705 = vrsqrt.f32 %v15742_v40  ;;  %v15748_v0 = vpop.xlane.xlu0 %2384  ;;  %vm1543_vm14 = vcmp.eq.f32.partialorder %v15725_v47, inf  ;;  %v1559_v57 = vmax.f32 %v1505_v52, 1e-12 }
 0x59c   :  { %v1509_v1 = vsel %vm1508_vm3, %v15692_v2, %v1507_v43  ;;  %13707 = vrsqrt.f32 %v15748_v0  ;;  %v1557_v43 = vmax.f32 %v1491_v21, 1e-12  ;;  %vm1550_vm3 = vcmp.eq.f32.partialorder %v15742_v40, inf }
 0x59d   :  { %v13696_v45 = vpop.eup %13695  ;;  %v1516_v48 = vsel %vm1515_vm1, %v15695_v36, %v1514_v6  ;;  %v1512_v55 = vsel %vm1510_vm8, %v1511_v9, %v1509_v1  ;;  %13709 = vrcp.f32 %v1556_v38  ;;  %vm1545_vm1 = vcmp.eq.f32.partialorder %v15725_v47, 0.0 }
 0x59e   :  { %v13698_v61 = vpop.eup %13697  ;;  %v1521_v60 = vmul.f32 %v13696_v45, %v15701_v3  ;;  %v15766_v29 = vpop.xlane.xlu1 %2387  ;;  %v1519_v30 = vsel %vm1517_vm0, %v1518_v62, %v1516_v48  ;;  %v1546_v6 = vand.u32 2147483648, %v15725_v47  ;;  %v1553_v9 = vand.u32 2147483648, %v15742_v40 }
 0x59f   :  { %v1528_v4 = vmul.f32 %v13698_v61, %v15706_v27  ;;  %13711 = vrsqrt.f32 %v15766_v29  ;;  %v1560_v21 = vmax.f32 %v1512_v55, 1e-12  ;;  %vm2401_vm0 = vcmp.eq.f32.partialorder %v15748_v0, inf }
 0x5a0   :  { %v1523_v2 = vsel %vm1522_vm9, %v15701_v3, %v1521_v60  ;;  %13713 = vrcp.f32 %v1557_v43  ;;  %v1561_v61 = vmax.f32 %v1519_v30, 1e-12  ;;  %vm1552_vm7 = vcmp.eq.f32.partialorder %v15742_v40, 0.0 }
 0x5a1   :  { %v13700_v36 = vpop.eup %13699  ;;  %v1526_v62 = vsel %vm1524_vm11, %v1525_v7, %v1523_v2  ;;  %v1530_v38 = vsel %vm1529_vm12, %v15706_v27, %v1528_v4  ;;  %13715 = vrcp.f32 %v1558_v59  ;;  %vm2403_vm8 = vcmp.eq.f32.partialorder %v15748_v0, 0.0 }
 0x5a2   :  { %v13702_v1 = vpop.eup %13701  ;;  %v1535_v45 = vmul.f32 %v13700_v36, %v15719_v50  ;;  %v15786_v48 = vpop.xlane.xlu0 %2390  ;;  %13717 = vrcp.f32 %v1559_v57  ;;  %v1533_v52 = vsel %vm1531_vm10, %v1532_v31, %v1530_v38  ;;  %v2404_v55 = vand.u32 2147483648, %v15748_v0 }
 0x5a3   :  { %v1542_v3 = vmul.f32 %v13702_v1, %v15725_v47  ;;  %13719 = vrsqrt.f32 %v15786_v48  ;;  %v13704_v59 = vpop.eup %13703  ;;  %v1562_v60 = vmax.f32 %v1526_v62, 1e-12  ;;  %vm2408_vm9 = vcmp.eq.f32.partialorder %v15766_v29, inf }
 0x5a4   :  { %v1537_v7 = vsel %vm1536_vm13, %v15719_v50, %v1535_v45  ;;  %13721 = vrcp.f32 %v1560_v21  ;;  %v15808_v57 = vmul.f32 %v13704_v59, %v15603_v41  ;;  %v1563_v36 = vmax.f32 %v1533_v52, 1e-12 }
 0x5a5   :  { %v13706_v43 = vpop.eup %13705  ;;  %v1540_v27 = vsel %vm1538_vm15, %v1539_v10, %v1537_v7  ;;  %v1544_v31 = vsel %vm1543_vm14, %v15725_v47, %v1542_v3  ;;  %13723 = vrcp.f32 %v1561_v61  ;;  %vm2410_vm11 = vcmp.eq.f32.partialorder %v15766_v29, 0.0 }
 0x5a6   :  { %v13708_v30 = vpop.eup %13707  ;;  %v1549_v4 = vmul.f32 %v13706_v43, %v15742_v40  ;;  %v15805_v2 = vpop.xlane.xlu1 %2393  ;;  %13725 = vrcp.f32 %v1562_v60  ;;  %v2411_v10 = vand.u32 2147483648, %v15766_v29  ;;  %v1547_v38 = vsel %vm1545_vm1, %v1546_v6, %v1544_v31 }
 0x5a7   :  { %v2400_v50 = vmul.f32 %v13708_v30, %v15748_v0  ;;  %13727 = vrsqrt.f32 %v15805_v2  ;;  %v13710_v62 = vpop.eup %13709  ;;  %vm2415_vm12 = vcmp.eq.f32.partialorder %v15786_v48, inf  ;;  %vm2417_vm10 = vcmp.eq.f32.partialorder %v15786_v48, 0.0 }
 0x5a8   :  { %v1564_v41 = vmax.f32 %v1540_v27, 1e-12  ;;  %v1551_v1 = vsel %vm1550_vm3, %v15742_v40, %v1549_v4  ;;  %v15825_v61 = vmul.f32 %v13710_v62, %v15601_v28  ;;  %13729 = vrcp.f32 %v1563_v36 }
 0x5a9   :  { %v13712_v21 = vpop.eup %13711  ;;  %v2402_v45 = vsel %vm2401_vm0, %v15748_v0, %v2400_v50  ;;  %v1591_v3 = vmax.f32 %v15808_v57, 0.0  ;;  %v1565_v28 = vmax.f32 %v1547_v38, 1e-12  ;;  %v1554_v31 = vsel %vm1552_vm7, %v1553_v9, %v1551_v1  ;;  %v2920_v57 = vld [vmem:[%s19002_s8] sm:$0xff] }
 0x5aa   :  { %v13714_v47 = vpop.eup %13713  ;;  %v2405_v6 = vsel %vm2403_vm8, %v2404_v55, %v2402_v45  ;;  %v2407_v52 = vmul.f32 %v13712_v21, %v15766_v29  ;;  %v15831_v59 = vpop.xlane.xlu0 %2397  ;;  %13731 = vrcp.f32 %v1564_v41  ;;  %v1592_v43 = vmax.f32 %v15825_v61, 0.0  ;;  %v2921_v61 = vld [vmem:[%s19002_s8 + $0x8] sm:$0xff] }
 0x5ab   :  { %v13716_v7 = vpop.eup %13715  ;;  %v2434_v60 = vmax.f32 %v2405_v6, 1e-12  ;;  %13733 = vrsqrt.f32 %v15831_v59  ;;  %v2418_v55 = vand.u32 2147483648, %v15786_v48  ;;  %v15842_v30 = vmul.f32 %v13714_v47, %v15609_v46 }
 0x5ac   :  { %v13718_v27 = vpop.eup %13717  ;;  %v2409_v0 = vsel %vm2408_vm9, %v15766_v29, %v2407_v52  ;;  %v12900_v40 = vpack.c.bf16 %v1592_v43, %v1591_v3  ;;  %v15851_v9 = vmul.f32 %v13716_v7, %v15607_v44  ;;  %v1566_v1 = vmax.f32 %v1554_v31, 1e-12 }
 0x5ad   :  { %v13720_v4 = vpop.eup %13719  ;;  %13735 = vrcp.f32 %v2434_v60  ;;  %v2412_v36 = vsel %vm2410_vm11, %v2411_v10, %v2409_v0  ;;  %v1593_v46 = vmax.f32 %v15842_v30, 0.0  ;;  %v15856_v41 = vmul.f32 %v13718_v27, %v15621_v5  ;;  %v2922_v30 = vld [vmem:[%s19002_s8 + $0x10] sm:$0xff] }
 0x5ae   :  { %v13722_v50 = vpop.eup %13721  ;;  %v2435_v62 = vmax.f32 %v2412_v36, 1e-12  ;;  %v2414_v38 = vmul.f32 %v13720_v4, %v15786_v48  ;;  %12901 = vmatprep.subr.bf16.mxu1 %v12900_v40  ;;  %v1594_v29 = vmax.f32 %v15851_v9, 0.0  ;;  %13737 = vrcp.f32 %v1565_v28  ;;  %v2923_v9 = vld [vmem:[%s19002_s8 + $0x18] sm:$0xff] }
 0x5af   :  { %v13724_v21 = vpop.eup %13723  ;;  %v15860_v10 = vmul.f32 %v13722_v50, %v15616_v58  ;;  %12903 = vmatpush3.bf16.msra.mxu1 %v12900_v40  ;;  %v1595_v47 = vmax.f32 %v15856_v41, 0.0  ;;  %vm2422_vm13 = vcmp.eq.f32.partialorder %v15805_v2, inf  ;;  %vm2424_vm15 = vcmp.eq.f32.partialorder %v15805_v2, 0.0  ;;  %v599_v41 = vld [vmem:[%s19005_s19] sm:$0xff] }
 0x5b0   :  { %v13726_v44 = vpop.eup %13725  ;;  %13739 = vrcp.f32 %v2435_v62  ;;  %v2416_v45 = vsel %vm2415_vm12, %v15786_v48, %v2414_v38  ;;  %v15867_v5 = vmul.f32 %v13724_v21, %v15631_v34  ;;  %v12904_v58 = vpack.c.bf16 %v1594_v29, %v1593_v46 }
 0x5b1   :  { %v13728_v6 = vpop.eup %13727  ;;  %v2419_v52 = vsel %vm2417_vm10, %v2418_v55, %v2416_v45  ;;  %v1596_v7 = vmax.f32 %v15860_v10, 0.0  ;;  %v15877_v60 = vmul.f32 %v13726_v44, %v15626_v25  ;;  %13741 = vrcp.f32 %v1566_v1  ;;  %v600_v10 = vld [vmem:[%s19005_s19 + $0x8] sm:$0xff] }
 0x5b2   :  { %v2436_v28 = vmax.f32 %v2419_v52, 1e-12  ;;  %v2421_v27 = vmul.f32 %v13728_v6, %v15805_v2  ;;  %v13730_v34 = vpop.eup %13729  ;;  %v2425_v48 = vand.u32 2147483648, %v15805_v2  ;;  %12905 = vmatprep.subr.bf16.mxu1 %v12904_v58  ;;  %v1597_v0 = vmax.f32 %v15867_v5, 0.0  ;;  %v602_v5 = vld [vmem:[%s19005_s19 + $0x18] sm:$0xff] }
 0x5b3   :  { %v12908_v31 = vpack.c.bf16 %v1596_v7, %v1595_v47  ;;  %v1598_v25 = vmax.f32 %v15877_v60, 0.0  ;;  %12907 = vmatpush3.bf16.msra.mxu1 %v12904_v58  ;;  %v15891_v36 = vmul.f32 %v13730_v34, %v15641_v51  ;;  %vm2429_vm14 = vcmp.eq.f32.partialorder %v15831_v59, inf  ;;  %v19008_v60 = vld [vmem:[#allocation115_spill] sm:$0xff] }
 0x5b4   :  { %v13732_v55 = vpop.eup %13731  ;;  %13743 = vrcp.f32 %v2436_v28  ;;  %v2423_v4 = vsel %vm2422_vm13, %v15805_v2, %v2421_v27  ;;  %v2432_v51 = vand.u32 2147483648, %v15831_v59  ;;  %vm2431_vm1 = vcmp.eq.f32.partialorder %v15831_v59, 0.0 }
 0x5b5   :  { %v13734_v40 = vpop.eup %13733  ;;  %v2426_v50 = vsel %vm2424_vm15, %v2425_v48, %v2423_v4  ;;  %12909 = vmatprep.subr.bf16.mxu1 %v12908_v31  ;;  %v12912_v62 = vpack.c.bf16 %v1598_v25, %v1597_v0  ;;  %v15898_v38 = vmul.f32 %v13732_v55, %v15636_v42  ;;  %v1599_v2 = vmax.f32 %v15891_v36, 0.0  ;;  %v19011_v36 = vld [vmem:[#allocation116_spill] sm:$0xff] }
 0x5b6   :  { %v2437_v21 = vmax.f32 %v2426_v50, 1e-12  ;;  %v2428_v1 = vmul.f32 %v13734_v40, %v15831_v59  ;;  %vm18902_vm3 = vcmask 1043456   ;;  %vm18894_vm0 = vcmask 293888  }
 0x5b7   :  { %v13736_v44 = vpop.eup %13735  ;;  %v1600_v45 = vmax.f32 %v15898_v38, 0.0  ;;  %12911 = vmatpush3.bf16.msra.mxu1 %v12908_v31  ;;  %v19012_v38 = vld [vmem:[#allocation119_spill] sm:$0xff] }
 0x5b8   :  { %13745 = vrcp.f32 %v2437_v21  ;;  %v2430_v6 = vsel %vm2429_vm14, %v15831_v59, %v2428_v1  ;;  %v2440_v42 = vmul.f32 %v13736_v44, %v15656_v39  ;;  %v13738_v52 = vpop.eup %13737  ;;  %12913 = vmatprep.subr.bf16.mxu1 %v12912_v62  ;;  %v12956_v39 = vpack.c.bf16 %v15588_v37, %v15580_v24  ;;  %v1728_v1 = vld [vmem:[%s18996_s28] sm:$0xff] }
 0x5b9   :  { %v2433_v58 = vsel %vm2431_vm1, %v2432_v51, %v2430_v6  ;;  %v12916_v28 = vpack.c.bf16 %v1600_v45, %v1599_v2  ;;  %v15913_v55 = vmul.f32 %v13738_v52, %v15651_v23  ;;  %v1731_v52 = vld [vmem:[%s18996_s28 + $0x18] sm:$0xff] }
 0x5ba   :  { %v13740_v27 = vpop.eup %13739  ;;  %v2438_v34 = vmax.f32 %v2433_v58, 1e-12  ;;  %v2449_v48 = vmax.f32 %v2440_v42, 0.0  ;;  %v1730_v42 = vld [vmem:[%s18996_s28 + $0x10] sm:$0xff] }
 0x5bb   :  { %v2442_v4 = vmul.f32 %v13740_v27, %v15664_v56  ;;  %v13742_v59 = vpop.eup %13741  ;;  %12915 = vmatpush3.bf16.msra.mxu1 %v12912_v62  ;;  %v18997_v56 = vmov 0.0   ;;  %v1601_v50 = vmax.f32 %v15913_v55, 0.0  ;;  %v19000_v27 = vmov 0.0|0.0   ;;  %v19015_v55 = vld [vmem:[#allocation121_spill] sm:$0xff] }
 0x5bc   :  { %13747 = vrcp.f32 %v2438_v34  ;;  %11700 = vmatmul.mubr.msk.f32.vlgmr.msra.gmra.mrb[34].mxu0 %vm1084_vm5, %v2449_v48  ;;  %12917 = vmatprep.subr.bf16.mxu1 %v12916_v28  ;;  %v15921_v31 = vmul.f32 %v13742_v59, %v15646_v63  ;;  %v3629_v59 = vld [vmem:[%s18999_s25] sm:$0xff] }
 0x5bd   :  { %12955 = vmatpush3.bf16.msra.mxu0 %v15575_v22  ;;  %v2450_v23 = vmax.f32 %v2442_v4, 0.0  ;;  %11702 = vmatprep.mubr.msk.f32.mxu0 %vm14842_vm2, %v18997_v56  ;;  %v1729_v22 = vld [vmem:[%s18996_s28 + $0x8] sm:$0xff]  ;;  %v587_v4 = vld [vmem:[%s18998_s2] sm:$0xff]  ;;  %s19091_s28 = sld [smem:[#allocation80_spill]] }
 0x5be   :  { %v13744_v40 = vpop.eup %13743  ;;  %12957 = vmatprep.subr.bf16.mxu0 %v12956_v39  ;;  %v1602_v62 = vmax.f32 %v15921_v31, 0.0  ;;  %v19016_v31 = vld [vmem:[#allocation125_spill] sm:$0xff] }
 0x5bf   :  { %v2444_v21 = vmul.f32 %v13744_v40, %v15670_v33  ;;  %12919 = vmatpush3.bf16.msra.mxu1 %v12916_v28  ;;  %v12924_v33 = vpack.c.bf16 %v1729_v22, %v1728_v1  ;;  %v3632_v40 = vld [vmem:[%s18999_s25 + $0x18] sm:$0xff]  ;;  %v596_v22 = vld [vmem:[%s18998_s2 + $0x48] sm:$0xff] }
 0x5c0   :  { %11703 = vmatmul.mubr.msk.f32.gmra.mrb[36].mxu0 %vm1084_vm5, %v2450_v23  ;;  %v12920_v63 = vpack.c.bf16 %v1602_v62, %v1601_v50  ;;  %v3631_v23 = vld [vmem:[%s18999_s25 + $0x10] sm:$0xff]  ;;  %v14157_v1 = vld [vmem:[%s18974_s23 + $0x58] sm:$0xff] }
 0x5c1   :  { %12959 = vmatpush3.bf16.msra.mxu0 %v12956_v39  ;;  %11705 = vmatprep.mubr.msk.f32.mxu0 %vm14842_vm2, %v18997_v56  ;;  %v2451_v44 = vmax.f32 %v2444_v21, 0.0  ;;  %v589_v39 = vld [vmem:[%s18998_s2 + $0x10] sm:$0xff]  ;;  %v591_v21 = vld [vmem:[%s18998_s2 + $0x20] sm:$0xff] }
 0x5c2   :  { %v13746_v51 = vpop.eup %13745  ;;  %11722 = vmatprep.subr.msk.mxu0 %vm18902_vm3, %v15595_v26  ;;  %12921 = vmatprep.subr.bf16.mxu1 %v12920_v63 }
 0x5c3   :  { %v2446_v6 = vmul.f32 %v13746_v51, %v15675_v53  ;;  %12923 = vmatpush3.bf16.msra.mxu1 %v12920_v63  ;;  %v12928_v53 = vpack.c.bf16 %v1731_v52, %v1730_v42  ;;  %v597_v63 = vld [vmem:[%s18998_s2 + $0x50] sm:$0xff]  ;;  %v1903_v52 = vld [vmem:[%s19001_s7 + $0x18] sm:$0xff] }
 0x5c4   :  { %11706 = vmatmul.mubr.msk.f32.gmra.mrb[38].mxu0 %vm1084_vm5, %v2451_v44  ;;  %12925 = vmatprep.subr.bf16.mxu1 %v12924_v33  ;;  %v1902_v42 = vld [vmem:[%s19001_s7 + $0x10] sm:$0xff] }
 0x5c5   :  { %11723 = vmatpush3.msk.msra.mxu0 %vm18902_vm3, %v15595_v26  ;;  %11708 = vmatprep.mubr.msk.f32.mxu0 %vm14842_vm2, %v18997_v56  ;;  %v2452_v58 = vmax.f32 %v2446_v6, 0.0 }
 0x5c6   :  { %v13748_v28 = vpop.eup %13747  ;;  %13002 = vmatprep.subr.bf16.mxu0 %v19000_v27  ;;  %11599 = vmatmul.mubr.msk.f32.vlgmr.msra.gmra.mrb[22].mxu1 %vm911_vm4, %v15443_v11  ;;  %v3630_v11 = vld [vmem:[%s18999_s25 + $0x8] sm:$0xff] }
 0x5c7   :  { %v2448_v34 = vmul.f32 %v13748_v28, %v15680_v8  ;;  %11601 = vmatprep.mubr.msk.f32.mxu1 %vm911_vm4, %v15446_v12  ;;  %12927 = vmatpush3.bf16.msra.mxu1 %v12924_v33  ;;  %v588_v12 = vld [vmem:[%s18998_s2 + $0x8] sm:$0xff]  ;;  %v13003_v8 = vpack.c.bf16 %v3630_v11, %v3629_v59 }
 0x5c8   :  { %11709 = vmatmul.mubr.msk.f32.gmra.mrb[40].mxu0 %vm1084_vm5, %v2452_v58  ;;  %12929 = vmatprep.subr.bf16.mxu1 %v12928_v53 }
 0x5c9   :  { %11711 = vmatprep.mubr.msk.f32.mxu0 %vm14842_vm2, %v18997_v56  ;;  %v2453_v48 = vmax.f32 %v2448_v34, 0.0 }
 0x5ca   :  { %11602 = vmatmul.mubr.msk.f32.gmra.mrb[24].mxu1 %vm911_vm4, %v15453_v13  ;;  %v590_v13 = vld [vmem:[%s18998_s2 + $0x18] sm:$0xff] }
 0x5cb   :  { %11604 = vmatprep.mubr.msk.f32.mxu1 %vm911_vm4, %v15456_v14  ;;  %12931 = vmatpush3.bf16.msra.mxu1 %v12928_v53  ;;  %v13006_v14 = vpack.c.bf16 %v3632_v40, %v3631_v23  ;;  %v12936_v53 = vpack.c.bf16 %v1903_v52, %v1902_v42 }
 0x5cc   :  { %11712 = vmatmul.mubr.msk.f32.gmra.mrb[42].mxu0 %vm1084_vm5, %v2453_v48 }
 0x5cd   :  { %11724 = vmatprep.mubr.msk.f32.mxu0 %vm18894_vm0, %v587_v4 }
 0x5ce   :  { %11605 = vmatmul.mubr.msk.f32.gmra.mrb[26].mxu1 %vm911_vm4, %v15463_v15  ;;  %v592_v15 = vld [vmem:[%s18998_s2 + $0x28] sm:$0xff] }
 0x5cf   :  { %11607 = vmatprep.mubr.msk.f32.mxu1 %vm911_vm4, %v15466_v16  ;;  %v593_v16 = vld [vmem:[%s18998_s2 + $0x30] sm:$0xff] }
 0x5d0   :  { %11725 = vmatmul.mubr.msk.f32.vlgmr.msra.gmra.mrb[44].mxu0 %vm18894_vm0, %v588_v12 }
 0x5d1   :  { %11727 = vmatprep.mubr.msk.f32.mxu0 %vm18894_vm0, %v589_v39  ;;  %13004 = vmatpush3.bf16.msra.mxu0 %v13003_v8 }
 0x5d2   :  { %13005 = vmatprep.subr.bf16.mxu0 %v19000_v27  ;;  %11608 = vmatmul.mubr.msk.f32.gmra.mrb[28].mxu1 %vm911_vm4, %v15473_v17  ;;  %v594_v17 = vld [vmem:[%s18998_s2 + $0x38] sm:$0xff] }
 0x5d3   :  { %11610 = vmatprep.mubr.msk.f32.mxu1 %vm911_vm4, %v15476_v18  ;;  %v595_v18 = vld [vmem:[%s18998_s2 + $0x40] sm:$0xff] }
 0x5d4   :  { %11728 = vmatmul.mubr.msk.f32.gmra.mrb[46].mxu0 %vm18894_vm0, %v590_v13 }
 0x5d5   :  { %11730 = vmatprep.mubr.msk.f32.mxu0 %vm18894_vm0, %v591_v21  ;;  %13007 = vmatpush3.bf16.msra.mxu0 %v13006_v14 }
 0x5d6   :  { %13008 = vmatprep.subr.bf16.mxu0 %v19000_v27  ;;  %11611 = vmatmul.mubr.msk.f32.gmra.mrb[30].mxu1 %vm911_vm4, %v15483_v19  ;;  %v598_v19 = vld [vmem:[%s18998_s2 + $0x58] sm:$0xff] }
 0x5d7   :  { %11613 = vmatprep.mubr.msk.f32.mxu1 %vm911_vm4, %v15486_v20  ;;  %v1900_v20 = vld [vmem:[%s19001_s7] sm:$0xff] }
 0x5d8   :  { %11731 = vmatmul.mubr.msk.f32.gmra.mrb[48].mxu0 %vm18894_vm0, %v592_v15  ;;  %v19019_v15 = vld [vmem:[#allocation127_spill] sm:$0xff] }
 0x5d9   :  { %11733 = vmatprep.mubr.msk.f32.mxu0 %vm18894_vm0, %v593_v16  ;;  %v10224_v16 = vld [vmem:[#allocation12] ss:$0 sm:$0xff] }
 0x5da   :  { %11614 = vmatmul.mubr.msk.f32.gmra.mrb[32].mxu1 %vm911_vm4, %v14157_v1 }
 0x5dc   :  { %11734 = vmatmul.mubr.msk.f32.gmra.mrb[50].mxu0 %vm18894_vm0, %v594_v17 }
 0x5dd   :  { %11736 = vmatprep.mubr.msk.f32.mxu0 %vm18894_vm0, %v595_v18 }
 0x5e0   :  { %11737 = vmatmul.mubr.msk.f32.gmra.mrb[52].mxu0 %vm18894_vm0, %v596_v22 }
 0x5e1   :  { %11739 = vmatprep.mubr.msk.f32.mxu0 %vm18894_vm0, %v597_v63 }
 0x5e4   :  { %11740 = vmatmul.mubr.msk.f32.gmra.mrb[54].mxu0 %vm18894_vm0, %v598_v19 }
 0x5e5   :  { %11867 = vmatprep.mubr.msk.f32.mxu0 %vm14842_vm2, %v18997_v56 }
 0x5e8   :  { %11868 = vmatmul.mubr.msk.f32.vlgmr.msra.gmra.mrb[56].mxu0 %vm1084_vm5, %v15559_v32  ;;  %v1901_v32 = vld [vmem:[%s19001_s7 + $0x8] sm:$0xff]  ;;  %s19111_s7 = sld [smem:[#allocation76_spill]] }
 0x5e9   :  { %11870 = vmatprep.mubr.msk.f32.mxu0 %vm14842_vm2, %v18997_v56 }
 0x5ec   :  { %11871 = vmatmul.mubr.msk.f32.gmra.mrb[58].mxu0 %vm1084_vm5, %v15564_v35  ;;  %v12932_v35 = vpack.c.bf16 %v1901_v32, %v1900_v20 }
 0x5ed   :  { %11873 = vmatprep.mubr.msk.f32.mxu0 %vm14842_vm2, %v18997_v56 }
 0x5ee   :  { %12933 = vmatprep.subr.bf16.mxu1 %v12932_v35 }
 0x5f0   :  { %11874 = vmatmul.mubr.msk.f32.gmra.mrb[60].mxu0 %vm1084_vm5, %v15580_v24 }
 0x5f1   :  { %11876 = vmatprep.mubr.msk.f32.mxu0 %vm14842_vm2, %v18997_v56 }
 0x5f4   :  { %11877 = vmatmul.mubr.msk.f32.gmra.mrb[62].mxu0 %vm1084_vm5, %v15588_v37 }
 0x5f5   :  { %11879 = vmatprep.mubr.msk.f32.mxu0 %vm14842_vm2, %v18997_v56 }
 0x5f8   :  { %11880 = vmatmul.mubr.msk.f32.gmra.mrb[64].mxu0 %vm1084_vm5, %v15595_v26 }
 0x5f9   :  { %11890 = vmatprep.mubr.msk.f32.mxu0 %vm14842_vm2, %v18997_v56 }
 0x68f   :  { %v16029_v24 = vpop.f32.mrb[34].mxu0 }
 0x690   :  { %v11701_v44 = vpop.f32.mrb[35].mxu0 }
 0x693   :  { %v16031_v51 = vpop.f32.mrb[36].mxu0 }
 0x694   :  { %v11704_v33 = vpop.f32.mrb[37].mxu0 }
 0x697   :  { %v16033_v37 = vpop.f32.mrb[38].mxu0 }
 0x698   :  { %v11707_v6 = vpop.f32.mrb[39].mxu0 }
 0x699   :  { %v11600_v58 = vpop.f32.mrb[22].mxu1 }
 0x69a   :  { %v1669_v26 = vpop.f32.mrb[23].mxu1 }
 0x69b   :  { %v16037_v28 = vpop.f32.mrb[40].mxu0  ;;  %11624 = vmatprep.mubr.msk.f32.mxu1 %vm1084_vm5, %v1669_v26 }
 0x69c   :  { %v11710_v34 = vpop.f32.mrb[41].mxu0  ;;  %11625 = vmatmul.mubr.msk.f32.vlgmr.msra.gmra.mrb[34].mxu1 %vm1084_vm5, %v11600_v58 }
 0x69d   :  { %v11603_v48 = vpop.f32.mrb[24].mxu1  ;;  %12935 = vmatpush3.bf16.msra.mxu1 %v12932_v35 }
 0x69e   :  { %v1679_v4 = vpop.f32.mrb[25].mxu1  ;;  %12937 = vmatprep.subr.bf16.mxu1 %v12936_v53 }
 0x69f   :  { %v16041_v59 = vpop.f32.mrb[42].mxu0  ;;  %11627 = vmatprep.mubr.msk.f32.mxu1 %vm1084_vm5, %v1679_v4 }
 0x6a0   :  { %v11713_v11 = vpop.f32.mrb[43].mxu0  ;;  %11628 = vmatmul.mubr.msk.f32.gmra.mrb[36].mxu1 %vm1084_vm5, %v11603_v48 }
 0x6a1   :  { %v11606_v12 = vpop.f32.mrb[26].mxu1  ;;  %12939 = vmatpush3.bf16.msra.mxu1 %v12936_v53 }
 0x6a2   :  { %v1689_v8 = vpop.f32.mrb[27].mxu1  ;;  %12960 = vmatprep.subr.bf16.mxu1 %v19000_v27 }
 0x6a3   :  { %11630 = vmatprep.mubr.msk.f32.mxu1 %vm1084_vm5, %v1689_v8 }
 0x6a4   :  { %11631 = vmatmul.mubr.msk.f32.gmra.mrb[38].mxu1 %vm1084_vm5, %v11606_v12 }
 0x6a5   :  { %v11609_v39 = vpop.f32.mrb[28].mxu1 }
 0x6a6   :  { %v1699_v23 = vpop.f32.mrb[29].mxu1 }
 0x6a7   :  { %11633 = vmatprep.mubr.msk.f32.mxu1 %vm1084_vm5, %v1699_v23 }
 0x6a8   :  { %11634 = vmatmul.mubr.msk.f32.gmra.mrb[40].mxu1 %vm1084_vm5, %v11609_v39 }
 0x6a9   :  { %v11612_v40 = vpop.f32.mrb[30].mxu1 }
 0x6aa   :  { %v1709_v13 = vpop.f32.mrb[31].mxu1 }
 0x6ab   :  { %11636 = vmatprep.mubr.msk.f32.mxu1 %vm1084_vm5, %v1709_v13 }
 0x6ac   :  { %11637 = vmatmul.mubr.msk.f32.gmra.mrb[42].mxu1 %vm1084_vm5, %v11612_v40 }
 0x6ad   :  { %v11615_v14 = vpop.f32.mrb[32].mxu1 }
 0x6ae   :  { %v1719_v21 = vpop.f32.mrb[33].mxu1 }
 0x6af   :  { %11639 = vmatprep.mubr.msk.f32.mxu1 %vm1084_vm5, %v1719_v21 }
 0x6b0   :  { %11640 = vmatmul.mubr.msk.f32.gmra.mrb[44].mxu1 %vm1084_vm5, %v11615_v14 }
 0x6b1   :  { %11650 = vmatprep.mubr.msk.f32.mxu1 %vm1084_vm5, %v1591_v3  ;;  %v19006_v3 = vld [vmem:[#allocation126_spill] sm:$0xff] }
 0x6b4   :  { %11651 = vmatmul.mubr.msk.f32.vlgmr.msra.gmra.mrb[34].mxu1 %vm1084_vm5, %v1592_v43  ;;  %v12978_v43 = vpack.c.bf16 %v2921_v61, %v2920_v57 }
 0x6b5   :  { %12962 = vmatpush3.bf16.msra.mxu1 %v15388_v49  ;;  %11653 = vmatprep.mubr.msk.f32.mxu1 %vm1084_vm5, %v1593_v46  ;;  %v19003_v49 = vld [vmem:[#allocation120_spill] sm:$0xff]  ;;  %v19007_v46 = vld [vmem:[#allocation129_spill] sm:$0xff] }
 0x6b6   :  { %12963 = vmatprep.subr.bf16.mxu1 %v19000_v27 }
 0x6b8   :  { %11654 = vmatmul.mubr.msk.f32.gmra.mrb[36].mxu1 %vm1084_vm5, %v1594_v29  ;;  %v12982_v29 = vpack.c.bf16 %v2923_v9, %v2922_v30  ;;  %v10260_v9 = vld [vmem:[#allocation9] ss:$0 sm:$0xff] }
 0x6b9   :  { %12965 = vmatpush3.bf16.msra.mxu1 %v15398_v54  ;;  %11656 = vmatprep.mubr.msk.f32.mxu1 %vm1084_vm5, %v1595_v47  ;;  %v19004_v54 = vld [vmem:[#allocation123_spill] sm:$0xff]  ;;  %v601_v47 = vld [vmem:[%s19005_s19 + $0x10] sm:$0xff] }
 0x6ba   :  { %12966 = vmatprep.subr.bf16.mxu1 %v19000_v27 }
 0x6bc   :  { %11657 = vmatmul.mubr.msk.f32.gmra.mrb[38].mxu1 %vm1084_vm5, %v1596_v7  ;;  %v603_v7 = vld [vmem:[%s19005_s19 + $0x20] sm:$0xf] }
 0x6bd   :  { %12968 = vmatpush3.bf16.msra.mxu1 %v19003_v49  ;;  %11659 = vmatprep.mubr.msk.f32.mxu1 %vm1084_vm5, %v1597_v0  ;;  %v19009_v0 = vld [vmem:[#allocation114_spill] sm:$0xff] }
 0x6be   :  { %12969 = vmatprep.subr.bf16.mxu1 %v19000_v27 }
 0x6c0   :  { %11660 = vmatmul.mubr.msk.f32.gmra.mrb[40].mxu1 %vm1084_vm5, %v1598_v25  ;;  %v19010_v25 = vld [vmem:[#allocation117_spill] sm:$0xff] }
 0x6c1   :  { %12971 = vmatpush3.bf16.msra.mxu1 %v19004_v54  ;;  %11662 = vmatprep.mubr.msk.f32.mxu1 %vm1084_vm5, %v1599_v2  ;;  %v19013_v2 = vld [vmem:[#allocation118_spill] sm:$0xff] }
 0x6c2   :  { %12972 = vmatprep.subr.bf16.mxu1 %v19000_v27 }
 0x6c4   :  { %11663 = vmatmul.mubr.msk.f32.gmra.mrb[42].mxu1 %vm1084_vm5, %v1600_v45  ;;  %v19014_v45 = vld [vmem:[#allocation122_spill] sm:$0xff] }
 0x6c5   :  { %12974 = vmatpush3.bf16.msra.mxu1 %v19006_v3  ;;  %11665 = vmatprep.mubr.msk.f32.mxu1 %vm1084_vm5, %v1601_v50  ;;  %v19017_v50 = vld [vmem:[#allocation124_spill] sm:$0xff] }
 0x6c6   :  { %12975 = vmatprep.subr.bf16.mxu1 %v19000_v27 }
 0x6c8   :  { %11666 = vmatmul.mubr.msk.f32.gmra.mrb[44].mxu1 %vm1084_vm5, %v1602_v62  ;;  %v19018_v62 = vld [vmem:[#allocation128_spill] sm:$0xff] }
 0x6c9   :  { %12977 = vmatpush3.bf16.msra.mxu1 %v19007_v46  ;;  %11766 = vmatprep.mubr.msk.f32.mxu1 %vm14842_vm2, %v18997_v56 }
 0x6ca   :  { %12979 = vmatprep.subr.bf16.mxu1 %v12978_v43 }
 0x6cc   :  { %11767 = vmatmul.mubr.msk.f32.vlgmr.msra.gmra.mrb[46].mxu1 %vm911_vm4, %v599_v41 }
 0x6cd   :  { %11769 = vmatprep.mubr.msk.f32.mxu1 %vm14842_vm2, %v18997_v56  ;;  %12981 = vmatpush3.bf16.msra.mxu1 %v12978_v43 }
 0x6ce   :  { %12983 = vmatprep.subr.bf16.mxu1 %v12982_v29 }
 0x6d0   :  { %11770 = vmatmul.mubr.msk.f32.gmra.mrb[48].mxu1 %vm911_vm4, %v600_v10  ;;  %v16198_v10 = vadd.f32 %v10260_v9, %v16031_v51 }
 0x6d1   :  { %11772 = vmatprep.mubr.msk.f32.mxu1 %vm14842_vm2, %v18997_v56  ;;  %12985 = vmatpush3.bf16.msra.mxu1 %v12982_v29 }
 0x6d4   :  { %11773 = vmatmul.mubr.msk.f32.gmra.mrb[50].mxu1 %vm911_vm4, %v601_v47 }
 0x6d5   :  { %11775 = vmatprep.mubr.msk.f32.mxu1 %vm14842_vm2, %v18997_v56 }
 0x6d8   :  { %11776 = vmatmul.mubr.msk.f32.gmra.mrb[52].mxu1 %vm911_vm4, %v602_v5 }
 0x6d9   :  { %11778 = vmatprep.mubr.msk.f32.mxu1 %vm14842_vm2, %v18997_v56 }
 0x6dc   :  { %11779 = vmatmul.mubr.msk.f32.gmra.mrb[54].mxu1 %vm911_vm4, %v603_v7 }
 0x6dd   :  { %11789 = vmatprep.mubr.msk.f32.mxu1 %vm1084_vm5, %v19008_v60  ;;  %v16204_v60 = vadd.f32 %v10260_v9, %v16029_v24  ;;  %v2576_v24 = vmul.f32 %v16198_v10, %v16198_v10 }
 0x6e0   :  { %11790 = vmatmul.mubr.msk.f32.vlgmr.msra.gmra.mrb[56].mxu1 %vm1084_vm5, %v19009_v0 }
 0x6e1   :  { %11792 = vmatprep.mubr.msk.f32.mxu1 %vm1084_vm5, %v19010_v25 }
 0x6e4   :  { %11793 = vmatmul.mubr.msk.f32.gmra.mrb[58].mxu1 %vm1084_vm5, %v19011_v36 }
 0x6e5   :  { %11795 = vmatprep.mubr.msk.f32.mxu1 %vm1084_vm5, %v19012_v38  ;;  %v16214_v38 = vadd.f32 %v10260_v9, %v16037_v28  ;;  %v2583_v28 = vsel %vm1084_vm5, %v2576_v24, 0.0 }
 0x6e8   :  { %11796 = vmatmul.mubr.msk.f32.gmra.mrb[60].mxu1 %vm1084_vm5, %v19013_v2 }
 0x6e9   :  { %11798 = vmatprep.mubr.msk.f32.mxu1 %vm1084_vm5, %v19014_v45  ;;  %v16220_v45 = vadd.f32 %v10260_v9, %v16033_v37 }
 0x6ec   :  { %11799 = vmatmul.mubr.msk.f32.gmra.mrb[62].mxu1 %vm1084_vm5, %v19015_v55 }
 0x6ed   :  { %11801 = vmatprep.mubr.msk.f32.mxu1 %vm1084_vm5, %v19016_v31  ;;  %v2575_v31 = vmul.f32 %v16204_v60, %v16204_v60 }
 0x6ef   :  { %v2580_v37 = vsel %vm1084_vm5, %v2575_v31, 0.0 }
 0x6f0   :  { %11802 = vmatmul.mubr.msk.f32.gmra.mrb[64].mxu1 %vm1084_vm5, %v19017_v50  ;;  %v2578_v50 = vmul.f32 %v16214_v38, %v16214_v38 }
 0x6f1   :  { %11804 = vmatprep.mubr.msk.f32.mxu1 %vm1084_vm5, %v19018_v62  ;;  %v16229_v62 = vadd.f32 %v10260_v9, %v16041_v59 }
 0x6f3   :  { %v2579_v59 = vmul.f32 %v16229_v62, %v16229_v62 }
 0x6f4   :  { %11805 = vmatmul.mubr.msk.f32.gmra.mrb[66].mxu1 %vm1084_vm5, %v19019_v15  ;;  %v2577_v15 = vmul.f32 %v16220_v45, %v16220_v45 }
 0x787   :  { %v11652_v17 = vpop.f32.mrb[34].mxu1 }
 0x788   :  { %v16149_v18 = vadd.f32 %v11652_v17, %v10224_v16  ;;  %v2006_v1 = vpop.f32.mrb[35].mxu1  ;;  %v2586_v17 = vsel %vm1084_vm5, %v2577_v15, 0.0 }
 0x789   :  { %v16151_v22 = vadd.f32 %v10224_v16, %v2006_v1  ;;  %v2592_v1 = vsel %vm2395_vm6, %v2579_v59, 0.0 }
 0x78a   :  { %v2078_v63 = vmul.f32 %v16149_v18, %v16149_v18 }
 0x78b   :  { %v11655_v19 = vpop.f32.mrb[36].mxu1  ;;  %v2077_v20 = vmul.f32 %v16151_v22, %v16151_v22 }
 0x78c   :  { %v16157_v32 = vadd.f32 %v11655_v19, %v10224_v16  ;;  %v2016_v35 = vpop.f32.mrb[37].mxu1  ;;  %v2092_v44 = vsel %vm1084_vm5, %v2078_v63, 0.0  ;;  %v2924_v63 = vld [vmem:[%s19002_s8 + $0x20] sm:$0xff]  ;;  %v2925_v19 = vld [vmem:[%s19002_s8 + $0x28] sm:$0xff] }
 0x78d   :  { %v16160_v33 = vadd.f32 %v10224_v16, %v2016_v35  ;;  %2093 = vadd.xlane.f32.xlu0 %v2092_v44  ;;  %v2089_v6 = vsel %vm1084_vm5, %v2077_v20, 0.0  ;;  %v12986_v20 = vpack.c.bf16 %v2925_v19, %v2924_v63  ;;  %v2926_v35 = vld [vmem:[%s19002_s8 + $0x30] sm:$0xff]  ;;  %v2927_v44 = vld [vmem:[%s19002_s8 + $0x38] sm:$0xff] }
 0x78e   :  { %2090 = vadd.xlane.f32.xlu1 %v2089_v6  ;;  %v2080_v42 = vmul.f32 %v16157_v32, %v16157_v32  ;;  %v12990_v6 = vpack.c.bf16 %v2927_v44, %v2926_v35 }
 0x78f   :  { %v11658_v52 = vpop.f32.mrb[38].mxu1  ;;  %v2079_v58 = vmul.f32 %v16160_v33, %v16160_v33  ;;  %12987 = vmatprep.subr.bf16.mxu1 %v12986_v20 }
 0x790   :  { %v16167_v26 = vadd.f32 %v11658_v52, %v10224_v16  ;;  %v2026_v53 = vpop.f32.mrb[39].mxu1  ;;  %v2098_v34 = vsel %vm1084_vm5, %v2080_v42, 0.0  ;;  %12989 = vmatpush3.bf16.msra.mxu1 %v12986_v20  ;;  %v2928_v42 = vld [vmem:[%s19002_s8 + $0x40] sm:$0xff]  ;;  %v2929_v52 = vld [vmem:[%s19002_s8 + $0x48] sm:$0xff] }
 0x791   :  { %v16170_v48 = vadd.f32 %v10224_v16, %v2026_v53  ;;  %2099 = vadd.xlane.f32.xlu0 %v2098_v34  ;;  %v2095_v4 = vsel %vm1084_vm5, %v2079_v58, 0.0  ;;  %12991 = vmatprep.subr.bf16.mxu1 %v12990_v6  ;;  %v16245_v58 = vpack.c.bf16 %v2929_v52, %v2928_v42  ;;  %v3633_v53 = vld [vmem:[%s18999_s25 + $0x20] sm:$0xff]  ;;  %v3634_v34 = vld [vmem:[%s18999_s25 + $0x28] sm:$0xff] }
 0x792   :  { %2096 = vadd.xlane.f32.xlu1 %v2095_v4  ;;  %v2082_v11 = vmul.f32 %v16167_v26, %v16167_v26  ;;  %v13009_v4 = vpack.c.bf16 %v3634_v34, %v3633_v53 }
 0x793   :  { %v11661_v12 = vpop.f32.mrb[40].mxu1  ;;  %v2081_v8 = vmul.f32 %v16170_v48, %v16170_v48 }
 0x794   :  { %v16177_v39 = vadd.f32 %v11661_v12, %v10224_v16  ;;  %v2036_v23 = vpop.f32.mrb[41].mxu1  ;;  %v2104_v40 = vsel %vm1084_vm5, %v2082_v11, 0.0  ;;  %12993 = vmatpush3.bf16.msra.mxu1 %v12990_v6  ;;  %v16250_v11 = vpop.f32.mrb[44].mxu0  ;;  %13010 = vmatpush3.bf16.msra.mxu0 %v13009_v4  ;;  %v3635_v12 = vld [vmem:[%s18999_s25 + $0x30] sm:$0xff] }
 0x795   :  { %v16180_v13 = vadd.f32 %v10224_v16, %v2036_v23  ;;  %2105 = vadd.xlane.f32.xlu0 %v2104_v40  ;;  %v2101_v14 = vsel %vm1084_vm5, %v2081_v8, 0.0  ;;  %12995 = vmatprep.subr.bf16.mxu1 %v16245_v58  ;;  %v3636_v8 = vld [vmem:[%s18999_s25 + $0x38] sm:$0xff]  ;;  %v16255_v40 = vpop.f32.mrb[45].mxu0 }
 0x796   :  { %2102 = vadd.xlane.f32.xlu1 %v2101_v14  ;;  %v2084_v21 = vmul.f32 %v16177_v39, %v16177_v39  ;;  %13011 = vmatprep.subr.bf16.mxu0 %v19000_v27  ;;  %v13012_v23 = vpack.c.bf16 %v3636_v8, %v3635_v12  ;;  %v16257_v14 = vpop.f32.mrb[46].mxu0 }
 0x797   :  { %v11664_v49 = vpop.f32.mrb[42].mxu1  ;;  %v2083_v54 = vmul.f32 %v16180_v13, %v16180_v13 }
 0x798   :  { %v16187_v57 = vadd.f32 %v11664_v49, %v10224_v16  ;;  %v2046_v61 = vpop.f32.mrb[43].mxu1  ;;  %v2110_v3 = vsel %vm1084_vm5, %v2084_v21, 0.0  ;;  %13013 = vmatpush3.bf16.msra.mxu0 %v13012_v23  ;;  %v16260_v21 = vpop.f32.mrb[47].mxu0 }
 0x799   :  { %v16190_v43 = vadd.f32 %v10224_v16, %v2046_v61  ;;  %2111 = vadd.xlane.f32.xlu0 %v2110_v3  ;;  %v2107_v30 = vsel %vm1084_vm5, %v2083_v54, 0.0  ;;  %13014 = vmatprep.subr.bf16.mxu0 %v19000_v27  ;;  %v16262_v49 = vpop.f32.mrb[48].mxu0 }
 0x79a   :  { %2108 = vadd.xlane.f32.xlu1 %v2107_v30  ;;  %v2086_v46 = vmul.f32 %v16187_v57, %v16187_v57  ;;  %v16264_v54 = vpop.f32.mrb[49].mxu0 }
 0x79b   :  { %v11667_v41 = vpop.f32.mrb[44].mxu1  ;;  %v2085_v29 = vmul.f32 %v16190_v43, %v16190_v43  ;;  %v16266_v61 = vpop.f32.mrb[50].mxu0 }
 0x79c   :  { %v16200_v47 = vadd.f32 %v11667_v41, %v10224_v16  ;;  %v2056_v5 = vpop.f32.mrb[45].mxu1  ;;  %v2116_v7 = vsel %vm1084_vm5, %v2086_v46, 0.0  ;;  %v16268_v3 = vpop.f32.mrb[51].mxu0 }
 0x79d   :  { %v16206_v0 = vadd.f32 %v10224_v16, %v2056_v5  ;;  %2117 = vadd.xlane.f32.xlu0 %v2116_v7  ;;  %v2113_v25 = vsel %vm1084_vm5, %v2085_v29, 0.0  ;;  %v2589_v16 = vsel %vm1084_vm5, %v2578_v50, 0.0  ;;  %v16270_v30 = vpop.f32.mrb[52].mxu0 }
 0x79e   :  { %2114 = vadd.xlane.f32.xlu1 %v2113_v25  ;;  %v2088_v36 = vmul.f32 %v16200_v47, %v16200_v47  ;;  %v16272_v9 = vpop.f32.mrb[53].mxu0 }
 0x79f   :  { %v2087_v51 = vmul.f32 %v16206_v0, %v16206_v0  ;;  %v16274_v46 = vpop.f32.mrb[54].mxu0  ;;  %v16278_v29 = vpop.f32.mrb[46].mxu1 }
 0x7a0   :  { %v2122_v2 = vsel %vm1084_vm5, %v2088_v36, 0.0  ;;  %v16276_v41 = vpop.f32.mrb[55].mxu0  ;;  %v11768_v5 = vpop.f32.mrb[47].mxu1 }
 0x7a1   :  { %2123 = vadd.xlane.f32.xlu0 %v2122_v2  ;;  %v2119_v55 = vsel %vm1084_vm5, %v2087_v51, 0.0 }
 0x7a2   :  { %2120 = vadd.xlane.f32.xlu1 %v2119_v55 }
 0x7a3   :  { %v16280_v7 = vpop.f32.mrb[48].mxu1 }
 0x7a4   :  { %v11771_v25 = vpop.f32.mrb[49].mxu1 }
 0x7a5   :  { %2584 = vadd.xlane.f32.xlu0 %v2583_v28 }
 0x7a6   :  { %2581 = vadd.xlane.f32.xlu1 %v2580_v37 }
 0x7a7   :  { %v16282_v36 = vpop.f32.mrb[50].mxu1 }
 0x7a8   :  { %19020 = vst [vmem:[#allocation120_spill] sm:$0xff] %v16282_v36  ;;  %v11774_v51 = vpop.f32.mrb[51].mxu1 }
 0x7a9   :  { %2590 = vadd.xlane.f32.xlu0 %v2589_v16  ;;  %v2930_v16 = vld [vmem:[%s19002_s8 + $0x50] sm:$0xff] }
 0x7aa   :  { %2587 = vadd.xlane.f32.xlu1 %v2586_v17  ;;  %v2931_v17 = vld [vmem:[%s19002_s8 + $0x58] sm:$0xff]  ;;  %s19112_s8 = sld [smem:[#allocation70_spill]] }
 0x7ab   :  { %v16284_v2 = vpop.f32.mrb[52].mxu1  ;;  %v16296_v63 = vpack.c.bf16 %v2931_v17, %v2930_v16 }
 0x7ac   :  { %19021 = vst [vmem:[#allocation123_spill] sm:$0xff] %v16284_v2  ;;  %v11777_v24 = vpop.f32.mrb[53].mxu1 }
 0x7ae   :  { %2593 = vadd.xlane.f32.xlu1 %v2592_v1 }
 0x7af   :  { %v16286_v55 = vpop.f32.mrb[54].mxu1 }
 0x7b0   :  { %19022 = vst [vmem:[#allocation126_spill] sm:$0xff] %v16286_v55  ;;  %v11780_v31 = vpop.f32.mrb[55].mxu1 }
 0x81a   :  { %v2094_v28 = vpop.xlane.xlu0 %2093 }
 0x81b   :  { %13749 = vrsqrt.f32 %v2094_v28  ;;  %v2091_v50 = vpop.xlane.xlu1 %2090  ;;  %vm2134_vm7 = vcmp.eq.f32.partialorder %v2094_v28, inf  ;;  %vm2136_vm8 = vcmp.eq.f32.partialorder %v2094_v28, 0.0  ;;  %v2137_v20 = vand.u32 2147483648, %v2094_v28 }
 0x81c   :  { %13751 = vrsqrt.f32 %v2091_v50  ;;  %vm2127_vm9 = vcmp.eq.f32.partialorder %v2091_v50, inf  ;;  %vm2129_vm11 = vcmp.eq.f32.partialorder %v2091_v50, 0.0  ;;  %v2130_v35 = vand.u32 2147483648, %v2091_v50 }
 0x81e   :  { %v2100_v37 = vpop.xlane.xlu0 %2099 }
 0x81f   :  { %13753 = vrsqrt.f32 %v2100_v37  ;;  %v2097_v15 = vpop.xlane.xlu1 %2096  ;;  %vm2148_vm12 = vcmp.eq.f32.partialorder %v2100_v37, inf  ;;  %vm2150_vm10 = vcmp.eq.f32.partialorder %v2100_v37, 0.0  ;;  %v2151_v42 = vand.u32 2147483648, %v2100_v37 }
 0x820   :  { %13755 = vrsqrt.f32 %v2097_v15  ;;  %vm2141_vm13 = vcmp.eq.f32.partialorder %v2097_v15, inf  ;;  %vm2143_vm15 = vcmp.eq.f32.partialorder %v2097_v15, 0.0  ;;  %v2144_v12 = vand.u32 2147483648, %v2097_v15 }
 0x822   :  { %v16290_v59 = vpop.xlane.xlu0 %2105 }
 0x823   :  { %13757 = vrsqrt.f32 %v16290_v59  ;;  %v16293_v1 = vpop.xlane.xlu1 %2102  ;;  %vm2162_vm14 = vcmp.eq.f32.partialorder %v16290_v59, inf  ;;  %vm2164_vm1 = vcmp.eq.f32.partialorder %v16290_v59, 0.0  ;;  %v2165_v25 = vand.u32 2147483648, %v16290_v59 }
 0x824   :  { %13759 = vrsqrt.f32 %v16293_v1  ;;  %vm2157_vm0 = vcmp.eq.f32.partialorder %v16293_v1, 0.0 }
 0x825   :  { %v13750_v19 = vpop.eup %13749 }
 0x826   :  { %v13752_v44 = vpop.eup %13751  ;;  %v2133_v6 = vmul.f32 %v13750_v19, %v2094_v28  ;;  %v16298_v52 = vpop.xlane.xlu0 %2111 }
 0x827   :  { %v2126_v53 = vmul.f32 %v13752_v44, %v2091_v50  ;;  %13761 = vrsqrt.f32 %v16298_v52  ;;  %v16301_v34 = vpop.xlane.xlu1 %2108 }
 0x828   :  { %v2135_v4 = vsel %vm2134_vm7, %v2094_v28, %v2133_v6  ;;  %13763 = vrsqrt.f32 %v16301_v34  ;;  %vm2155_vm7 = vcmp.eq.f32.partialorder %v16293_v1, inf  ;;  %v2158_v6 = vand.u32 2147483648, %v16293_v1 }
 0x829   :  { %v13754_v8 = vpop.eup %13753  ;;  %v2138_v23 = vsel %vm2136_vm8, %v2137_v20, %v2135_v4  ;;  %v2128_v5 = vsel %vm2127_vm9, %v2091_v50, %v2126_v53  ;;  %vm2176_vm8 = vcmp.eq.f32.partialorder %v16298_v52, inf  ;;  %vm2178_vm9 = vcmp.eq.f32.partialorder %v16298_v52, 0.0 }
 0x82a   :  { %v13756_v51 = vpop.eup %13755  ;;  %v2210_v24 = vmax.f32 %v2138_v23, 1e-12  ;;  %v2131_v31 = vsel %vm2129_vm11, %v2130_v35, %v2128_v5  ;;  %v2147_v16 = vmul.f32 %v13754_v8, %v2100_v37  ;;  %v16312_v17 = vpop.xlane.xlu0 %2117  ;;  %v2179_v4 = vand.u32 2147483648, %v16298_v52 }
 0x82b   :  { %v2209_v19 = vmax.f32 %v2131_v31, 1e-12  ;;  %v2140_v44 = vmul.f32 %v13756_v51, %v2097_v15  ;;  %13765 = vrsqrt.f32 %v16312_v17  ;;  %v16316_v28 = vpop.xlane.xlu1 %2114  ;;  %vm2169_vm11 = vcmp.eq.f32.partialorder %v16301_v34, inf }
 0x82c   :  { %v2149_v20 = vsel %vm2148_vm12, %v2100_v37, %v2147_v16  ;;  %13767 = vrcp.f32 %v2210_v24  ;;  %vm2171_vm12 = vcmp.eq.f32.partialorder %v16301_v34, 0.0 }
 0x82d   :  { %v13758_v50 = vpop.eup %13757  ;;  %v2152_v35 = vsel %vm2150_vm10, %v2151_v42, %v2149_v20  ;;  %v2142_v53 = vsel %vm2141_vm13, %v2097_v15, %v2140_v44  ;;  %13769 = vrsqrt.f32 %v16316_v28  ;;  %v2172_v42 = vand.u32 2147483648, %v16301_v34 }
 0x82e   :  { %v13760_v8 = vpop.eup %13759  ;;  %v2212_v23 = vmax.f32 %v2152_v35, 1e-12  ;;  %v2145_v5 = vsel %vm2143_vm15, %v2144_v12, %v2142_v53  ;;  %v2161_v51 = vmul.f32 %v13758_v50, %v16290_v59  ;;  %v16328_v31 = vpop.xlane.xlu0 %2123  ;;  %13771 = vrcp.f32 %v2209_v19 }
 0x82f   :  { %v2211_v16 = vmax.f32 %v2145_v5, 1e-12  ;;  %v2154_v24 = vmul.f32 %v13760_v8, %v16293_v1  ;;  %v16332_v37 = vpop.xlane.xlu1 %2120  ;;  %vm2190_vm10 = vcmp.eq.f32.partialorder %v16312_v17, inf  ;;  %vm2192_vm13 = vcmp.eq.f32.partialorder %v16312_v17, 0.0 }
 0x830   :  { %13773 = vrcp.f32 %v2212_v23  ;;  %v2163_v15 = vsel %vm2162_vm14, %v16290_v59, %v2161_v51  ;;  %vm2185_vm15 = vcmp.eq.f32.partialorder %v16316_v28, 0.0  ;;  %vm2204_vm14 = vcmp.eq.f32.partialorder %v16328_v31, inf }
 0x831   :  { %v13762_v12 = vpop.eup %13761  ;;  %13775 = vrcp.f32 %v2211_v16  ;;  %v2166_v19 = vsel %vm2164_vm1, %v2165_v25, %v2163_v15  ;;  %v2156_v44 = vsel %vm2155_vm7, %v16293_v1, %v2154_v24  ;;  %vm2206_vm1 = vcmp.eq.f32.partialorder %v16328_v31, 0.0 }
 0x832   :  { %v13764_v20 = vpop.eup %13763  ;;  %v2214_v50 = vmax.f32 %v2166_v19, 1e-12  ;;  %v2159_v35 = vsel %vm2157_vm0, %v2158_v6, %v2156_v44  ;;  %v2175_v53 = vmul.f32 %v13762_v12, %v16298_v52  ;;  %13777 = vrsqrt.f32 %v16328_v31  ;;  %v16349_v8 = vpop.xlane.xlu0 %2584 }
 0x833   :  { %v2213_v23 = vmax.f32 %v2159_v35, 1e-12  ;;  %v2168_v59 = vmul.f32 %v13764_v20, %v16301_v34  ;;  %13779 = vrsqrt.f32 %v16332_v37  ;;  %v16354_v25 = vpop.xlane.xlu1 %2581  ;;  %v2193_v6 = vand.u32 2147483648, %v16312_v17 }
 0x834   :  { %13781 = vrcp.f32 %v2214_v50  ;;  %v2177_v1 = vsel %vm2176_vm8, %v16298_v52, %v2175_v53  ;;  %vm2183_vm0 = vcmp.eq.f32.partialorder %v16316_v28, inf  ;;  %v2186_v12 = vand.u32 2147483648, %v16316_v28 }
 0x835   :  { %v13766_v5 = vpop.eup %13765  ;;  %13783 = vrcp.f32 %v2213_v23  ;;  %v2180_v51 = vsel %vm2178_vm9, %v2179_v4, %v2177_v1  ;;  %v2170_v16 = vsel %vm2169_vm11, %v16301_v34, %v2168_v59  ;;  %v2207_v50 = vand.u32 2147483648, %v16328_v31 }
 0x836   :  { %v2173_v24 = vsel %vm2171_vm12, %v2172_v42, %v2170_v16  ;;  %v2189_v15 = vmul.f32 %v13766_v5, %v16312_v17  ;;  %13785 = vrsqrt.f32 %v16349_v8  ;;  %v13768_v19 = vpop.eup %13767  ;;  %v16375_v52 = vpop.xlane.xlu0 %2590  ;;  %v2216_v42 = vmax.f32 %v2180_v51, 1e-12 }
 0x837   :  { %v2215_v44 = vmax.f32 %v2173_v24, 1e-12  ;;  %13787 = vrsqrt.f32 %v16354_v25  ;;  %v16377_v4 = vpop.xlane.xlu1 %2587  ;;  %v13770_v34 = vpop.eup %13769  ;;  %vm2197_vm7 = vcmp.eq.f32.partialorder %v16332_v37, inf  ;;  %vm2199_vm8 = vcmp.eq.f32.partialorder %v16332_v37, 0.0 }
 0x838   :  { %v2191_v20 = vsel %vm2190_vm10, %v16312_v17, %v2189_v15  ;;  %v13772_v35 = vpop.eup %13771  ;;  %v2182_v23 = vmul.f32 %v13770_v34, %v16316_v28  ;;  %v2200_v5 = vand.u32 2147483648, %v16332_v37  ;;  %vm2604_vm9 = vcmp.eq.f32.partialorder %v16349_v8, inf }
 0x839   :  { %13789 = vrcp.f32 %v2215_v44  ;;  %v2194_v53 = vsel %vm2192_vm13, %v2193_v6, %v2191_v20  ;;  %vm2606_vm11 = vcmp.eq.f32.partialorder %v16349_v8, 0.0  ;;  %v2607_v17 = vand.u32 2147483648, %v16349_v8 }
 0x83a   :  { %v13774_v59 = vpop.eup %13773  ;;  %v2218_v1 = vmax.f32 %v2194_v53, 1e-12  ;;  %13791 = vrsqrt.f32 %v16375_v52  ;;  %v2184_v16 = vsel %vm2183_vm0, %v16316_v28, %v2182_v23  ;;  %vm2597_vm12 = vcmp.eq.f32.partialorder %v16354_v25, inf }
 0x83b   :  { %v13776_v51 = vpop.eup %13775  ;;  %13793 = vrsqrt.f32 %v16377_v4  ;;  %v16397_v6 = vpop.xlane.xlu1 %2593  ;;  %v2187_v15 = vsel %vm2185_vm15, %v2186_v12, %v2184_v16  ;;  %vm2599_vm10 = vcmp.eq.f32.partialorder %v16354_v25, 0.0  ;;  %v2600_v53 = vand.u32 2147483648, %v16354_v25 }
 0x83c   :  { %v13778_v24 = vpop.eup %13777  ;;  %13795 = vrcp.f32 %v2216_v42  ;;  %v2217_v34 = vmax.f32 %v2187_v15, 1e-12  ;;  %vm2618_vm13 = vcmp.eq.f32.partialorder %v16375_v52, inf  ;;  %v2621_v28 = vand.u32 2147483648, %v16375_v52 }
 0x83d   :  { %v13780_v44 = vpop.eup %13779  ;;  %v2203_v20 = vmul.f32 %v13778_v24, %v16328_v31  ;;  %13797 = vrsqrt.f32 %v16397_v6  ;;  %v2222_v12 = vmul.f32 %v13772_v35, %v16151_v22  ;;  %v2224_v24 = vmul.f32 %v13768_v19, %v16149_v18 }
 0x83e   :  { %v13782_v23 = vpop.eup %13781  ;;  %13799 = vrcp.f32 %v2218_v1  ;;  %v2196_v55 = vmul.f32 %v13780_v44, %v16332_v37  ;;  %v2226_v15 = vmul.f32 %v13776_v51, %v16160_v33  ;;  %vm2620_vm0 = vcmp.eq.f32.partialorder %v16375_v52, 0.0 }
 0x83f   :  { %v13784_v42 = vpop.eup %13783  ;;  %13801 = vrcp.f32 %v2217_v34  ;;  %v2205_v16 = vsel %vm2204_vm14, %v16328_v31, %v2203_v20  ;;  %v2245_v22 = vmax.f32 %v2222_v12, 0.0  ;;  %v2228_v35 = vmul.f32 %v13774_v59, %v16157_v32 }
 0x840   :  { %v13786_v2 = vpop.eup %13785  ;;  %v2208_v1 = vsel %vm2206_vm1, %v2207_v50, %v2205_v16  ;;  %v2198_v44 = vsel %vm2197_vm7, %v16332_v37, %v2196_v55  ;;  %v2246_v19 = vmax.f32 %v2224_v24, 0.0  ;;  %v2247_v50 = vmax.f32 %v2226_v15, 0.0 }
 0x841   :  { %v13788_v34 = vpop.eup %13787  ;;  %v2220_v36 = vmax.f32 %v2208_v1, 1e-12  ;;  %v2201_v18 = vsel %vm2199_vm8, %v2200_v5, %v2198_v44  ;;  %v2603_v33 = vmul.f32 %v13786_v2, %v16349_v8  ;;  %11815 = vmatprep.mubr.msk.f32.mxu1 %vm1084_vm5, %v2245_v22  ;;  %v2248_v55 = vmax.f32 %v2228_v35, 0.0 }
 0x842   :  { %v2219_v51 = vmax.f32 %v2201_v18, 1e-12  ;;  %v2596_v31 = vmul.f32 %v13788_v34, %v16354_v25  ;;  %11816 = vmatmul.mubr.msk.f32.vlgmr.msra.gmra.mrb[56].mxu1 %vm1084_vm5, %v2246_v19  ;;  %v2230_v37 = vmul.f32 %v13784_v42, %v16170_v48  ;;  %v2232_v2 = vmul.f32 %v13782_v23, %v16167_v26 }
 0x843   :  { %v13790_v20 = vpop.eup %13789  ;;  %13803 = vrcp.f32 %v2220_v36  ;;  %v2605_v32 = vsel %vm2604_vm9, %v16349_v8, %v2603_v33  ;;  %12997 = vmatpush3.bf16.msra.mxu1 %v16245_v58  ;;  %11818 = vmatprep.mubr.msk.f32.mxu1 %vm1084_vm5, %v2247_v50  ;;  %vm2611_vm15 = vcmp.eq.f32.partialorder %v16377_v4, inf  ;;  %vm2613_vm14 = vcmp.eq.f32.partialorder %v16377_v4, 0.0 }
 0x844   :  { %v13792_v59 = vpop.eup %13791  ;;  %13805 = vrcp.f32 %v2219_v51  ;;  %v2608_v5 = vsel %vm2606_vm11, %v2607_v17, %v2605_v32  ;;  %v2598_v12 = vsel %vm2597_vm12, %v16354_v25, %v2596_v31  ;;  %v2234_v36 = vmul.f32 %v13790_v20, %v16180_v13  ;;  %12999 = vmatprep.subr.bf16.mxu1 %v16296_v63 }
 0x845   :  { %v13794_v16 = vpop.eup %13793  ;;  %v2631_v24 = vmax.f32 %v2608_v5, 1e-12  ;;  %v2601_v26 = vsel %vm2599_vm10, %v2600_v53, %v2598_v12  ;;  %v2617_v48 = vmul.f32 %v13792_v59, %v16375_v52  ;;  %v2249_v23 = vmax.f32 %v2230_v37, 0.0  ;;  %v3637_v12 = vld [vmem:[%s18999_s25 + $0x40] sm:$0xff] }
 0x846   :  { %v13796_v8 = vpop.eup %13795  ;;  %v2630_v17 = vmax.f32 %v2601_v26, 1e-12  ;;  %v2610_v42 = vmul.f32 %v13794_v16, %v16377_v4  ;;  %v2614_v25 = vand.u32 2147483648, %v16377_v4  ;;  %vm2625_vm1 = vcmp.eq.f32.partialorder %v16397_v6, inf  ;;  %11819 = vmatmul.mubr.msk.f32.gmra.mrb[58].mxu1 %vm1084_vm5, %v2248_v55 }
 0x847   :  { %v13798_v58 = vpop.eup %13797  ;;  %13807 = vrcp.f32 %v2631_v24  ;;  %v2619_v13 = vsel %vm2618_vm13, %v16375_v52, %v2617_v48  ;;  %11821 = vmatprep.mubr.msk.f32.mxu1 %vm1084_vm5, %v2249_v23  ;;  %v2251_v44 = vmax.f32 %v2234_v36, 0.0  ;;  %13001 = vmatpush3.bf16.msra.mxu1 %v16296_v63  ;;  %v2250_v18 = vmax.f32 %v2232_v2, 0.0  ;;  %v3638_v36 = vld [vmem:[%s18999_s25 + $0x48] sm:$0xff]  ;;  %v3639_v23 = vld [vmem:[%s18999_s25 + $0x50] sm:$0xff] }
 0x848   :  { %v13800_v53 = vpop.eup %13799  ;;  %13809 = vrcp.f32 %v2630_v17  ;;  %v2612_v15 = vsel %vm2611_vm15, %v16377_v4, %v2610_v42  ;;  %v2624_v1 = vmul.f32 %v13798_v58, %v16397_v6  ;;  %v2622_v35 = vsel %vm2620_vm0, %v2621_v28, %v2619_v13  ;;  %v14159_v13 = vld [vmem:[%s18971_s22 + $0x8] sm:$0xff] }
 0x849   :  { %v13802_v22 = vpop.eup %13801  ;;  %v2615_v34 = vsel %vm2613_vm14, %v2614_v25, %v2612_v15  ;;  %v2236_v33 = vmul.f32 %v13796_v8, %v16177_v39  ;;  %v2628_v50 = vand.u32 2147483648, %v16397_v6  ;;  %v2633_v63 = vmax.f32 %v2622_v35, 1e-12  ;;  %v3640_v8 = vld [vmem:[%s18999_s25 + $0x58] sm:$0xff]  ;;  %v14160_v25 = vld [vmem:[%s18971_s22 + $0x10] sm:$0xff]  ;;  %v14162_v15 = vld [vmem:[%s18971_s22 + $0x20] sm:$0xff] }
 0x84a   :  { %v2632_v19 = vmax.f32 %v2615_v34, 1e-12  ;;  %v2626_v51 = vsel %vm2625_vm1, %v16397_v6, %v2624_v1  ;;  %v2238_v31 = vmul.f32 %v13802_v22, %v16190_v43  ;;  %11822 = vmatmul.mubr.msk.f32.gmra.mrb[60].mxu1 %vm1084_vm5, %v2250_v18  ;;  %vm2627_vm7 = vcmp.eq.f32.partialorder %v16397_v6, 0.0  ;;  %v14163_v1 = vld [vmem:[%s18971_s22 + $0x28] sm:$0xff]  ;;  %v14165_v22 = vld [vmem:[%s18971_s22 + $0x38] sm:$0xff]  ;;  %v14166_v35 = vld [vmem:[%s18971_s22 + $0x40] sm:$0xff] }
 0x84b   :  { %11824 = vmatprep.mubr.msk.f32.mxu1 %vm1084_vm5, %v2251_v44  ;;  %v2629_v39 = vsel %vm2627_vm7, %v2628_v50, %v2626_v51  ;;  %v2252_v28 = vmax.f32 %v2236_v33, 0.0  ;;  %v2240_v55 = vmul.f32 %v13800_v53, %v16187_v57  ;;  %v13015_v26 = vpack.c.bf16 %v3638_v36, %v3637_v12  ;;  %v14161_v53 = vld [vmem:[%s18971_s22 + $0x18] sm:$0xff]  ;;  %v14164_v44 = vld [vmem:[%s18971_s22 + $0x30] sm:$0xff]  ;;  %v14167_v34 = vld [vmem:[%s18971_s22 + $0x48] sm:$0xff]  ;;  %s19109_s25 = sld [smem:[#allocation68_spill]] }
 0x84c   :  { %13811 = vrcp.f32 %v2632_v19  ;;  %v2253_v52 = vmax.f32 %v2238_v31, 0.0  ;;  %v2634_v32 = vmax.f32 %v2629_v39, 1e-12  ;;  %v13018_v17 = vpack.c.bf16 %v3640_v8, %v3639_v23  ;;  %v14168_v18 = vld [vmem:[%s18971_s22 + $0x50] sm:$0xff]  ;;  %v14169_v33 = vld [vmem:[%s18971_s22 + $0x58] sm:$0xff] }
 0x84d   :  { %v13804_v4 = vpop.eup %13803  ;;  %13813 = vrcp.f32 %v2633_v63  ;;  %v2254_v37 = vmax.f32 %v2240_v55, 0.0  ;;  %vm19027_vm8 = vcmask 392192   ;;  %v10291_v19 = vld [vmem:[#allocation15] ss:$0 sm:$0xff] }
 0x84e   :  { %v13806_v20 = vpop.eup %13805  ;;  %11825 = vmatmul.mubr.msk.f32.gmra.mrb[62].mxu1 %vm1084_vm5, %v2252_v28  ;;  %v2244_v59 = vmul.f32 %v13804_v4, %v16200_v47  ;;  %13815 = vrcp.f32 %v2634_v32  ;;  %vm19028_vm9 = vmmov %vm19027_vm8 }
 0x84f   :  { %v2242_v43 = vmul.f32 %v13806_v20, %v16206_v0  ;;  %11827 = vmatprep.mubr.msk.f32.mxu1 %vm1084_vm5, %v2253_v52  ;;  %vm19029_vm11 = vmmov %vm19027_vm8 }
 0x850   :  { %v2256_v0 = vmax.f32 %v2244_v59, 0.0  ;;  %vm19030_vm12 = vmmov %vm19027_vm8 }
 0x851   :  { %v13808_v6 = vpop.eup %13807  ;;  %v2255_v2 = vmax.f32 %v2242_v43, 0.0  ;;  %vm19031_vm10 = vmmov %vm19027_vm8 }
 0x852   :  { %v13810_v5 = vpop.eup %13809  ;;  %11828 = vmatmul.mubr.msk.f32.gmra.mrb[64].mxu1 %vm1084_vm5, %v2254_v37  ;;  %v2638_v24 = vmul.f32 %v13808_v6, %v16198_v10  ;;  %vm19032_vm13 = vmmov %vm19027_vm8 }
 0x853   :  { %v2636_v57 = vmul.f32 %v13810_v5, %v16204_v60  ;;  %11830 = vmatprep.mubr.msk.f32.mxu1 %vm1084_vm5, %v2255_v2  ;;  %vm19033_vm0 = vmmov %vm19027_vm8 }
 0x854   :  { %v2646_v47 = vmax.f32 %v2638_v24, 0.0  ;;  %vm19034_vm15 = vmmov %vm19033_vm0 }
 0x855   :  { %v2645_v16 = vmax.f32 %v2636_v57, 0.0  ;;  %vm19035_vm14 = vmmov %vm19033_vm0 }
 0x856   :  { %v13812_v48 = vpop.eup %13811  ;;  %11831 = vmatmul.mubr.msk.f32.gmra.mrb[66].mxu1 %vm1084_vm5, %v2256_v0  ;;  %vm19036_vm1 = vmmov %vm19033_vm0 }
 0x857   :  { %11891 = vmatmul.mubr.msk.f32.vlgmr.msra.gmra.mrb[56].mxu0 %vm1084_vm5, %v2645_v16  ;;  %11841 = vmatprep.mubr.msk.f32.mxu1 %vm1084_vm5, %v16255_v40  ;;  %v2640_v60 = vmul.f32 %v13812_v48, %v16220_v45  ;;  %v13814_v10 = vpop.eup %13813  ;;  %vm19037_vm7 = vmmov %vm19033_vm0 }
 0x858   :  { %11893 = vmatprep.mubr.msk.f32.mxu0 %vm14842_vm2, %v18997_v56  ;;  %13016 = vmatpush3.bf16.msra.mxu0 %v13015_v26  ;;  %v2642_v42 = vmul.f32 %v13814_v10, %v16214_v38  ;;  %v13816_v45 = vpop.eup %13815 }
 0x859   :  { %13017 = vmatprep.subr.bf16.mxu0 %v19000_v27  ;;  %v2647_v40 = vmax.f32 %v2640_v60, 0.0 }
 0x85a   :  { %11842 = vmatmul.mubr.msk.f32.vlgmr.msra.gmra.mrb[56].mxu1 %vm1084_vm5, %v16250_v11  ;;  %v2648_v11 = vmax.f32 %v2642_v42, 0.0 }
 0x85b   :  { %11894 = vmatmul.mubr.msk.f32.gmra.mrb[58].mxu0 %vm1084_vm5, %v2646_v47  ;;  %11844 = vmatprep.mubr.msk.f32.mxu1 %vm1084_vm5, %v16260_v21  ;;  %v2644_v21 = vmul.f32 %v13816_v45, %v16229_v62  ;;  %v19024_v62 = vld [vmem:[#allocation120_spill] sm:$0xff] }
 0x85c   :  { %11896 = vmatprep.mubr.msk.f32.mxu0 %vm14842_vm2, %v18997_v56  ;;  %13019 = vmatpush3.bf16.msra.mxu0 %v13018_v17 }
 0x85d   :  { %v2649_v38 = vmax.f32 %v2644_v21, 0.0 }
 0x85e   :  { %11845 = vmatmul.mubr.msk.f32.gmra.mrb[58].mxu1 %vm1084_vm5, %v16257_v14  ;;  %v19025_v14 = vld [vmem:[#allocation123_spill] sm:$0xff] }
 0x85f   :  { %11897 = vmatmul.mubr.msk.f32.gmra.mrb[60].mxu0 %vm1084_vm5, %v2647_v40  ;;  %11847 = vmatprep.mubr.msk.f32.mxu1 %vm1084_vm5, %v16264_v54  ;;  %v14158_v54 = vld [vmem:[%s18971_s22] sm:$0xff] }
 0x860   :  { %11899 = vmatprep.mubr.msk.f32.mxu0 %vm14842_vm2, %v18997_v56 }
 0x862   :  { %11848 = vmatmul.mubr.msk.f32.gmra.mrb[60].mxu1 %vm1084_vm5, %v16262_v49  ;;  %v19026_v49 = vld [vmem:[#allocation126_spill] sm:$0xff] }
 0x863   :  { %11900 = vmatmul.mubr.msk.f32.gmra.mrb[62].mxu0 %vm1084_vm5, %v2648_v11  ;;  %11850 = vmatprep.mubr.msk.f32.mxu1 %vm1084_vm5, %v16268_v3  ;;  %v4058_v3 = vld [vmem:[%s19023_s10 + $0x8] sm:$0xff] }
 0x864   :  { %11902 = vmatprep.mubr.msk.f32.mxu0 %vm14842_vm2, %v18997_v56 }
 0x866   :  { %11851 = vmatmul.mubr.msk.f32.gmra.mrb[62].mxu1 %vm1084_vm5, %v16266_v61  ;;  %v4057_v61 = vld [vmem:[%s19023_s10] sm:$0xff] }
 0x867   :  { %11903 = vmatmul.mubr.msk.f32.gmra.mrb[64].mxu0 %vm1084_vm5, %v2649_v38  ;;  %11853 = vmatprep.mubr.msk.f32.mxu1 %vm1084_vm5, %v16272_v9  ;;  %v13020_v9 = vpack.c.bf16 %v4058_v3, %v4057_v61 }
 0x868   :  { %11913 = vmatprep.mubr.msk.f32.mxu0 %vm14842_vm2, %v18997_v56 }
 0x869   :  { %13021 = vmatprep.subr.bf16.mxu0 %v13020_v9 }
 0x86a   :  { %11854 = vmatmul.mubr.msk.f32.gmra.mrb[64].mxu1 %vm1084_vm5, %v16270_v30  ;;  %v4059_v30 = vld [vmem:[%s19023_s10 + $0x10] sm:$0xff] }
 0x86b   :  { %11914 = vmatmul.mubr.msk.f32.vlgmr.msra.gmra.mrb[56].mxu0 %vm1084_vm5, %v16278_v29  ;;  %11856 = vmatprep.mubr.msk.f32.mxu1 %vm1084_vm5, %v16276_v41  ;;  %v4061_v29 = vld [vmem:[%s19023_s10 + $0x20] sm:$0xff] }
 0x86c   :  { %11916 = vmatprep.mubr.msk.f32.mxu0 %vm14842_vm2, %v18997_v56  ;;  %13023 = vmatpush3.bf16.msra.mxu0 %v13020_v9 }
 0x86e   :  { %11857 = vmatmul.mubr.msk.f32.gmra.mrb[66].mxu1 %vm1084_vm5, %v16274_v46  ;;  %v4060_v46 = vld [vmem:[%s19023_s10 + $0x18] sm:$0xff] }
 0x86f   :  { %11917 = vmatmul.mubr.msk.f32.gmra.mrb[58].mxu0 %vm1084_vm5, %v16280_v7  ;;  %v13024_v41 = vpack.c.bf16 %v4060_v46, %v4059_v30  ;;  %v4062_v7 = vld [vmem:[%s19023_s10 + $0x28] sm:$0xff]  ;;  %s19122_s10 = sld [smem:[#allocation66_spill]] }
 0x870   :  { %11919 = vmatprep.mubr.msk.f32.mxu0 %vm14842_vm2, %v18997_v56  ;;  %v13028_v58 = vpack.c.bf16 %v4062_v7, %v4061_v29 }
 0x871   :  { %13025 = vmatprep.subr.bf16.mxu0 %v13024_v41 }
 0x872   :  { %13027 = vmatpush3.bf16.msra.mxu0 %v13024_v41 }
 0x873   :  { %11920 = vmatmul.mubr.msk.f32.gmra.mrb[60].mxu0 %vm1084_vm5, %v19024_v62  ;;  %13029 = vmatprep.subr.bf16.mxu0 %v13028_v58 }
 0x874   :  { %11922 = vmatprep.mubr.msk.f32.mxu0 %vm14842_vm2, %v18997_v56 }
 0x876   :  { %13031 = vmatpush3.bf16.msra.mxu0 %v13028_v58 }
 0x877   :  { %11923 = vmatmul.mubr.msk.f32.gmra.mrb[62].mxu0 %vm1084_vm5, %v19025_v14 }
 0x878   :  { %11925 = vmatprep.mubr.msk.f32.mxu0 %vm14842_vm2, %v18997_v56 }
 0x87b   :  { %11926 = vmatmul.mubr.msk.f32.gmra.mrb[64].mxu0 %vm1084_vm5, %v19026_v49 }
 0x87c   :  { %11940 = vmatprep.mubr.msk.f32.mxu0 %vm19027_vm8, %v14158_v54  ;;  %vm19038_vm8 = vmmov %vm19033_vm0 }
 0x87f   :  { %11941 = vmatmul.mubr.msk.f32.vlgmr.msra.gmra.mrb[66].mxu0 %vm19028_vm9, %v14159_v13  ;;  %vm19052_vm9 = vcmask 1041408  }
 0x880   :  { %11943 = vmatprep.mubr.msk.f32.mxu0 %vm19029_vm11, %v14160_v25  ;;  %vm19053_vm11 = vcmask 146432  }
 0x883   :  { %11944 = vmatmul.mubr.msk.f32.gmra.mrb[68].mxu0 %vm19030_vm12, %v14161_v53  ;;  %vm19054_vm12 = vmmov %vm19053_vm11 }
 0x884   :  { %11946 = vmatprep.mubr.msk.f32.mxu0 %vm19031_vm10, %v14162_v15  ;;  %vm19055_vm10 = vmmov %vm19053_vm11 }
 0x887   :  { %11947 = vmatmul.mubr.msk.f32.gmra.mrb[70].mxu0 %vm19032_vm13, %v14163_v1  ;;  %vm19057_vm13 = vmmov %vm19055_vm10 }
 0x888   :  { %11949 = vmatprep.mubr.msk.f32.mxu0 %vm19033_vm0, %v14164_v44  ;;  %vm19058_vm0 = vmmov %vm19055_vm10 }
 0x88b   :  { %11950 = vmatmul.mubr.msk.f32.gmra.mrb[72].mxu0 %vm19034_vm15, %v14165_v22  ;;  %vm4800_vm15 = vcmask 7168  }
 0x88c   :  { %11952 = vmatprep.mubr.msk.f32.mxu0 %vm19035_vm14, %v14166_v35  ;;  %vm18895_vm14 = vcmask 3072  }
 0x88f   :  { %11953 = vmatmul.mubr.msk.f32.gmra.mrb[74].mxu0 %vm19036_vm1, %v14167_v34 }
 0x890   :  { %11955 = vmatprep.mubr.msk.f32.mxu0 %vm19037_vm7, %v14168_v18 }
 0x893   :  { %11956 = vmatmul.mubr.msk.f32.gmra.mrb[76].mxu0 %vm19038_vm8, %v14169_v33 }
 0x92d   :  { %v11843_v51 = vpop.f32.mrb[56].mxu1 }
 0x92e   :  { %v13360_v31 = vadd.f32 %v11843_v51, %v10291_v19  ;;  %v3351_v50 = vpop.f32.mrb[57].mxu1 }
 0x92f   :  { %v13361_v63 = vadd.f32 %v10291_v19, %v3351_v50 }
 0x930   :  { %v3425_v52 = vsel %vm1084_vm5, %v13360_v31, 0.0 }
 0x931   :  { %3426 = vadd.xlane.f32.xlu1 %v3425_v52  ;;  %v11846_v4 = vpop.f32.mrb[58].mxu1  ;;  %v3422_v39 = vsel %vm1084_vm5, %v13361_v63, 0.0 }
 0x932   :  { %v13362_v28 = vadd.f32 %v11846_v4, %v10291_v19  ;;  %3423 = vadd.xlane.f32.xlu0 %v3422_v39  ;;  %v3361_v55 = vpop.f32.mrb[59].mxu1 }
 0x933   :  { %v13363_v20 = vadd.f32 %v10291_v19, %v3361_v55 }
 0x934   :  { %v3431_v43 = vsel %vm1084_vm5, %v13362_v28, 0.0 }
 0x935   :  { %3432 = vadd.xlane.f32.xlu1 %v3431_v43  ;;  %v11849_v32 = vpop.f32.mrb[60].mxu1  ;;  %v3428_v6 = vsel %vm1084_vm5, %v13363_v20, 0.0 }
 0x936   :  { %v16578_v37 = vadd.f32 %v11849_v32, %v10291_v19  ;;  %3429 = vadd.xlane.f32.xlu0 %v3428_v6  ;;  %v3371_v2 = vpop.f32.mrb[61].mxu1 }
 0x937   :  { %v16580_v59 = vadd.f32 %v10291_v19, %v3371_v2 }
 0x938   :  { %v3437_v5 = vsel %vm1084_vm5, %v16578_v37, 0.0 }
 0x939   :  { %3438 = vadd.xlane.f32.xlu1 %v3437_v5  ;;  %v11852_v12 = vpop.f32.mrb[62].mxu1  ;;  %v3434_v36 = vsel %vm1084_vm5, %v16580_v59, 0.0 }
 0x93a   :  { %v16586_v57 = vadd.f32 %v11852_v12, %v10291_v19  ;;  %3435 = vadd.xlane.f32.xlu0 %v3434_v36  ;;  %v3381_v0 = vpop.f32.mrb[63].mxu1 }
 0x93b   :  { %v16588_v16 = vadd.f32 %v10291_v19, %v3381_v0 }
 0x93c   :  { %v3443_v24 = vsel %vm1084_vm5, %v16586_v57, 0.0 }
 0x93d   :  { %3444 = vadd.xlane.f32.xlu1 %v3443_v24  ;;  %v11855_v26 = vpop.f32.mrb[64].mxu1  ;;  %v3440_v48 = vsel %vm1084_vm5, %v16588_v16, 0.0 }
 0x93e   :  { %v16594_v23 = vpop.f32.mrb[56].mxu0  ;;  %v16596_v8 = vadd.f32 %v11855_v26, %v10291_v19  ;;  %3441 = vadd.xlane.f32.xlu0 %v3440_v48  ;;  %v3391_v47 = vpop.f32.mrb[65].mxu1 }
 0x93f   :  { %v11915_v60 = vpop.f32.mrb[57].mxu0  ;;  %v16598_v17 = vadd.f32 %v10291_v19, %v3391_v47 }
 0x940   :  { %v3449_v10 = vsel %vm1084_vm5, %v16596_v8, 0.0 }
 0x941   :  { %3450 = vadd.xlane.f32.xlu1 %v3449_v10  ;;  %v11858_v40 = vpop.f32.mrb[66].mxu1  ;;  %v3446_v42 = vsel %vm1084_vm5, %v16598_v17, 0.0 }
 0x942   :  { %v16604_v45 = vpop.f32.mrb[58].mxu0  ;;  %v16606_v11 = vadd.f32 %v11858_v40, %v10291_v19  ;;  %3447 = vadd.xlane.f32.xlu0 %v3446_v42  ;;  %v3401_v21 = vpop.f32.mrb[67].mxu1 }
 0x943   :  { %v11918_v38 = vpop.f32.mrb[59].mxu0  ;;  %v16608_v62 = vadd.f32 %v10291_v19, %v3401_v21 }
 0x944   :  { %v3455_v14 = vsel %vm1084_vm5, %v16606_v11, 0.0 }
 0x945   :  { %3456 = vadd.xlane.f32.xlu1 %v3455_v14  ;;  %v3452_v49 = vsel %vm1084_vm5, %v16608_v62, 0.0 }
 0x946   :  { %v16614_v54 = vpop.f32.mrb[60].mxu0  ;;  %3453 = vadd.xlane.f32.xlu0 %v3452_v49 }
 0x947   :  { %v11921_v61 = vpop.f32.mrb[61].mxu0 }
 0x94a   :  { %v16616_v3 = vpop.f32.mrb[62].mxu0 }
 0x94b   :  { %v11924_v30 = vpop.f32.mrb[63].mxu0 }
 0x94e   :  { %v16618_v9 = vpop.f32.mrb[64].mxu0 }
 0x94f   :  { %v11927_v46 = vpop.f32.mrb[65].mxu0 }
 0x9be   :  { %v3427_v41 = vpop.xlane.xlu1 %3426 }
 0x9bf   :  { %v3460_v29 = vmul.f32 0.03125, %v3427_v41  ;;  %v3424_v7 = vpop.xlane.xlu0 %3423 }
 0x9c0   :  { %v3459_v58 = vmul.f32 0.03125, %v3424_v7 }
 0x9c1   :  { %v16620_v13 = vsub.f32 %v13360_v31, %v3460_v29  ;;  %v10323_v29 = vld [vmem:[%s19039_s6] ss:$0 sm:$0xff]  ;;  %s19124_s6 = sld [smem:[#allocation60_spill]] }
 0x9c2   :  { %v16622_v25 = vsub.f32 %v13361_v63, %v3459_v58  ;;  %v3433_v53 = vpop.xlane.xlu1 %3432 }
 0x9c3   :  { %v3462_v15 = vmul.f32 0.03125, %v3433_v53  ;;  %v3430_v1 = vpop.xlane.xlu0 %3429  ;;  %v3484_v44 = vmul.f32 %v16620_v13, %v16620_v13  ;;  %v16688_v53 = vadd.f32 %v10323_v29, %v16604_v45  ;;  %v16701_v45 = vadd.f32 %v10323_v29, %v16614_v54 }
 0x9c4   :  { %v3461_v22 = vmul.f32 0.03125, %v3430_v1  ;;  %v3483_v35 = vmul.f32 %v16622_v25, %v16622_v25  ;;  %v16696_v1 = vadd.f32 %v10323_v29, %v16616_v3  ;;  %v4199_v3 = vld [vmem:[%s19040_s24 + $0x20] sm:$0xff] }
 0x9c5   :  { %v16628_v34 = vsub.f32 %v13362_v28, %v3462_v15  ;;  %v3498_v18 = vsel %vm1084_vm5, %v3484_v44, 0.0  ;;  %v3966_v44 = vsel %vm1084_vm5, %v16688_v53, 0.0  ;;  %v3969_v54 = vsel %vm1084_vm5, %v16701_v45, 0.0 }
 0x9c6   :  { %v16631_v33 = vsub.f32 %v13363_v20, %v3461_v22  ;;  %v3439_v19 = vpop.xlane.xlu1 %3438  ;;  %3499 = vadd.xlane.f32.xlu1 %v3498_v18  ;;  %v3495_v51 = vsel %vm1084_vm5, %v3483_v35, 0.0  ;;  %v3972_v22 = vsel %vm1084_vm5, %v16696_v1, 0.0  ;;  %v16708_v35 = vadd.f32 %v10323_v29, %v16618_v9  ;;  %v4200_v18 = vld [vmem:[%s19040_s24 + $0x28] sm:$0xff] }
 0x9c7   :  { %v3464_v31 = vmul.f32 0.03125, %v3439_v19  ;;  %3496 = vadd.xlane.f32.xlu0 %v3495_v51  ;;  %v3436_v50 = vpop.xlane.xlu0 %3435  ;;  %v3486_v63 = vmul.f32 %v16628_v34, %v16628_v34  ;;  %v13032_v19 = vpack.c.bf16 %v4200_v18, %v4199_v3  ;;  %v16747_v3 = vld [vmem:[#allocation18] ss:$0 sm:$0xff] }
 0x9c8   :  { %v3463_v52 = vmul.f32 0.03125, %v3436_v50  ;;  %v3485_v4 = vmul.f32 %v16631_v33, %v16631_v33  ;;  %v3975_v51 = vsel %vm2395_vm6, %v16708_v35, 0.0  ;;  %v4202_v50 = vld [vmem:[%s19040_s24 + $0x38] sm:$0xff] }
 0x9c9   :  { %v16639_v39 = vsub.f32 %v16578_v37, %v3464_v31  ;;  %v3504_v28 = vsel %vm1084_vm5, %v3486_v63, 0.0  ;;  %13033 = vmatprep.subr.bf16.mxu1 %v13032_v19  ;;  %v4201_v31 = vld [vmem:[%s19040_s24 + $0x30] sm:$0xff]  ;;  %v4195_v63 = vld [vmem:[%s19040_s24] sm:$0xff] }
 0x9ca   :  { %v16643_v55 = vsub.f32 %v16580_v59, %v3463_v52  ;;  %v3445_v20 = vpop.xlane.xlu1 %3444  ;;  %3505 = vadd.xlane.f32.xlu1 %v3504_v28  ;;  %v3501_v43 = vsel %vm1084_vm5, %v3485_v4, 0.0  ;;  %13035 = vmatpush3.bf16.msra.mxu1 %v13032_v19  ;;  %v13036_v9 = vpack.c.bf16 %v4202_v50, %v4201_v31  ;;  %v4196_v52 = vld [vmem:[%s19040_s24 + $0x8] sm:$0xff]  ;;  %v16723_v28 = vpop.f32.mrb[66].mxu0 }
 0x9cb   :  { %v3466_v32 = vmul.f32 0.03125, %v3445_v20  ;;  %3502 = vadd.xlane.f32.xlu0 %v3501_v43  ;;  %v3442_v6 = vpop.xlane.xlu0 %3441  ;;  %v3488_v2 = vmul.f32 %v16639_v39, %v16639_v39  ;;  %v16720_v4 = vpack.c.bf16 %v4196_v52, %v4195_v63  ;;  %v16725_v20 = vpop.f32.mrb[67].mxu0 }
 0x9cc   :  { %v3465_v5 = vmul.f32 0.03125, %v3442_v6  ;;  %v3487_v37 = vmul.f32 %v16643_v55, %v16643_v55  ;;  %13037 = vmatprep.subr.bf16.mxu1 %v13036_v9  ;;  %v16727_v43 = vpop.f32.mrb[68].mxu0 }
 0x9cd   :  { %v16651_v12 = vsub.f32 %v16586_v57, %v3466_v32  ;;  %v3510_v59 = vsel %vm1084_vm5, %v3488_v2, 0.0  ;;  %v16729_v32 = vpop.f32.mrb[69].mxu0 }
 0x9ce   :  { %v16655_v36 = vsub.f32 %v16588_v16, %v3465_v5  ;;  %v3451_v0 = vpop.xlane.xlu1 %3450  ;;  %3511 = vadd.xlane.f32.xlu1 %v3510_v59  ;;  %v3507_v24 = vsel %vm1084_vm5, %v3487_v37, 0.0  ;;  %13039 = vmatpush3.bf16.msra.mxu1 %v13036_v9  ;;  %v16731_v6 = vpop.f32.mrb[70].mxu0  ;;  %v16750_v9 = vld [vmem:[#allocation17] ss:$0 sm:$0xff] }
 0x9cf   :  { %v3468_v26 = vmul.f32 0.03125, %v3451_v0  ;;  %3508 = vadd.xlane.f32.xlu0 %v3507_v24  ;;  %v3448_v48 = vpop.xlane.xlu0 %3447  ;;  %v3490_v47 = vmul.f32 %v16651_v12, %v16651_v12  ;;  %13041 = vmatprep.subr.bf16.mxu1 %v16720_v4  ;;  %v16733_v2 = vpop.f32.mrb[71].mxu0 }
 0x9d0   :  { %v3467_v60 = vmul.f32 0.03125, %v3448_v48  ;;  %v3489_v57 = vmul.f32 %v16655_v36, %v16655_v36  ;;  %v16735_v5 = vpop.f32.mrb[72].mxu0 }
 0x9d1   :  { %v16663_v10 = vsub.f32 %v16596_v8, %v3468_v26  ;;  %v3516_v16 = vsel %vm1084_vm5, %v3490_v47, 0.0  ;;  %v16737_v37 = vpop.f32.mrb[73].mxu0 }
 0x9d2   :  { %v16667_v40 = vsub.f32 %v16598_v17, %v3467_v60  ;;  %3517 = vadd.xlane.f32.xlu1 %v3516_v16  ;;  %v3457_v42 = vpop.xlane.xlu1 %3456  ;;  %v3513_v21 = vsel %vm1084_vm5, %v3489_v57, 0.0  ;;  %v16739_v59 = vpop.f32.mrb[74].mxu0 }
 0x9d3   :  { %v3470_v38 = vmul.f32 0.03125, %v3457_v42  ;;  %3514 = vadd.xlane.f32.xlu0 %v3513_v21  ;;  %v3454_v14 = vpop.xlane.xlu0 %3453  ;;  %v3492_v49 = vmul.f32 %v16663_v10, %v16663_v10  ;;  %v16741_v0 = vpop.f32.mrb[75].mxu0 }
 0x9d4   :  { %v3469_v61 = vmul.f32 0.03125, %v3454_v14  ;;  %v3491_v8 = vmul.f32 %v16667_v40, %v16667_v40  ;;  %v16743_v24 = vpop.f32.mrb[76].mxu0 }
 0x9d5   :  { %v16675_v30 = vsub.f32 %v16606_v11, %v3470_v38  ;;  %v3522_v17 = vsel %vm1084_vm5, %v3492_v49, 0.0  ;;  %v16745_v26 = vpop.f32.mrb[77].mxu0 }
 0x9d6   :  { %v16679_v46 = vsub.f32 %v16608_v62, %v3469_v61  ;;  %3523 = vadd.xlane.f32.xlu1 %v3522_v17  ;;  %v3519_v41 = vsel %vm1084_vm5, %v3491_v8, 0.0  ;;  %v16692_v62 = vadd.f32 %v10323_v29, %v16594_v23 }
 0x9d7   :  { %3520 = vadd.xlane.f32.xlu0 %v3519_v41  ;;  %v3494_v7 = vmul.f32 %v16675_v30, %v16675_v30 }
 0x9d8   :  { %v3493_v58 = vmul.f32 %v16679_v46, %v16679_v46  ;;  %v3963_v23 = vsel %vm1084_vm5, %v16692_v62, 0.0 }
 0x9d9   :  { %v3528_v11 = vsel %vm1084_vm5, %v3494_v7, 0.0 }
 0x9da   :  { %3529 = vadd.xlane.f32.xlu1 %v3528_v11  ;;  %v3525_v15 = vsel %vm1084_vm5, %v3493_v58, 0.0 }
 0x9db   :  { %3526 = vadd.xlane.f32.xlu0 %v3525_v15 }
 0x9de   :  { %3967 = vadd.xlane.f32.xlu1 %v3966_v44 }
 0x9df   :  { %3964 = vadd.xlane.f32.xlu0 %v3963_v23 }
 0x9e2   :  { %3973 = vadd.xlane.f32.xlu1 %v3972_v22 }
 0x9e3   :  { %3970 = vadd.xlane.f32.xlu0 %v3969_v54 }
 0x9e7   :  { %3976 = vadd.xlane.f32.xlu0 %v3975_v51 }
 0xa53   :  { %v3500_v48 = vpop.xlane.xlu1 %3499 }
 0xa54   :  { %v3532_v47 = vmul.f32 0.03125, %v3500_v48  ;;  %v3497_v60 = vpop.xlane.xlu0 %3496 }
 0xa55   :  { %v3531_v57 = vmul.f32 0.03125, %v3497_v60 }
 0xa56   :  { %v3544_v16 = vadd.f32 1e-05, %v3532_v47 }
 0xa57   :  { %v3543_v42 = vadd.f32 1e-05, %v3531_v57  ;;  %v3506_v21 = vpop.xlane.xlu1 %3505 }
 0xa58   :  { %13817 = vrsqrt.f32 %v3544_v16  ;;  %v3534_v38 = vmul.f32 0.03125, %v3506_v21  ;;  %v3503_v14 = vpop.xlane.xlu0 %3502 }
 0xa59   :  { %13819 = vrsqrt.f32 %v3543_v42  ;;  %v3533_v49 = vmul.f32 0.03125, %v3503_v14 }
 0xa5a   :  { %v3546_v61 = vadd.f32 1e-05, %v3534_v38 }
 0xa5b   :  { %v3545_v8 = vadd.f32 1e-05, %v3533_v49  ;;  %v3512_v17 = vpop.xlane.xlu1 %3511 }
 0xa5c   :  { %13821 = vrsqrt.f32 %v3546_v61  ;;  %v3536_v41 = vmul.f32 0.03125, %v3512_v17  ;;  %v3509_v29 = vpop.xlane.xlu0 %3508  ;;  %v4197_v61 = vld [vmem:[%s19040_s24 + $0x10] sm:$0xff] }
 0xa5d   :  { %13823 = vrsqrt.f32 %v3545_v8  ;;  %v3535_v7 = vmul.f32 0.03125, %v3509_v29  ;;  %v4198_v8 = vld [vmem:[%s19040_s24 + $0x18] sm:$0xff]  ;;  %s19126_s24 = sld [smem:[#allocation110_spill]] }
 0xa5e   :  { %v3548_v58 = vadd.f32 1e-05, %v3536_v41 }
 0xa5f   :  { %v3547_v11 = vadd.f32 1e-05, %v3535_v7  ;;  %v3518_v15 = vpop.xlane.xlu1 %3517 }
 0xa60   :  { %13825 = vrsqrt.f32 %v3548_v58  ;;  %v3538_v44 = vmul.f32 0.03125, %v3518_v15  ;;  %v3515_v23 = vpop.xlane.xlu0 %3514 }
 0xa61   :  { %13827 = vrsqrt.f32 %v3547_v11  ;;  %v3537_v22 = vmul.f32 0.03125, %v3515_v23 }
 0xa62   :  { %v13818_v54 = vpop.eup %13817  ;;  %v3550_v18 = vadd.f32 1e-05, %v3538_v44 }
 0xa63   :  { %v13820_v19 = vpop.eup %13819  ;;  %v3568_v51 = vmul.f32 %v13818_v54, %v16620_v13  ;;  %v3549_v31 = vadd.f32 1e-05, %v3537_v22  ;;  %v3524_v50 = vpop.xlane.xlu1 %3523 }
 0xa64   :  { %13829 = vrsqrt.f32 %v3550_v18  ;;  %v3540_v63 = vmul.f32 0.03125, %v3524_v50  ;;  %v3521_v52 = vpop.xlane.xlu0 %3520  ;;  %v3567_v48 = vmul.f32 %v13820_v19, %v16622_v25 }
 0xa65   :  { %v3587_v47 = vmul.f32 %v16747_v3, %v3568_v51  ;;  %13831 = vrsqrt.f32 %v3549_v31  ;;  %v3539_v60 = vmul.f32 0.03125, %v3521_v52 }
 0xa66   :  { %v13822_v57 = vpop.eup %13821  ;;  %v3552_v16 = vadd.f32 1e-05, %v3540_v63  ;;  %v3586_v42 = vmul.f32 %v16747_v3, %v3567_v48 }
 0xa67   :  { %v13824_v13 = vpop.eup %13823  ;;  %v3606_v21 = vadd.f32 %v16750_v9, %v3587_v47  ;;  %v3551_v38 = vadd.f32 1e-05, %v3539_v60  ;;  %v3530_v14 = vpop.xlane.xlu1 %3529  ;;  %v3570_v49 = vmul.f32 %v13822_v57, %v16628_v34  ;;  %v13044_v34 = vpack.c.bf16 %v4198_v8, %v4197_v61 }
 0xa68   :  { %13833 = vrsqrt.f32 %v3552_v16  ;;  %v3542_v17 = vmul.f32 0.03125, %v3530_v14  ;;  %v3527_v25 = vpop.xlane.xlu0 %3526  ;;  %v3605_v41 = vadd.f32 %v16750_v9, %v3586_v42  ;;  %v3569_v29 = vmul.f32 %v13824_v13, %v16631_v33 }
 0xa69   :  { %13835 = vrsqrt.f32 %v3551_v38  ;;  %v3541_v7 = vmul.f32 0.03125, %v3527_v25  ;;  %v3589_v58 = vmul.f32 %v16747_v3, %v3570_v49  ;;  %v16765_v54 = vmax.f32 %v3606_v21, 0.0 }
 0xa6a   :  { %v13826_v11 = vpop.eup %13825  ;;  %v3554_v15 = vadd.f32 1e-05, %v3542_v17  ;;  %v16762_v44 = vmax.f32 %v3605_v41, 0.0  ;;  %v3588_v23 = vmul.f32 %v16747_v3, %v3569_v29 }
 0xa6b   :  { %v13828_v22 = vpop.eup %13827  ;;  %v3553_v18 = vadd.f32 1e-05, %v3541_v7  ;;  %v3968_v19 = vpop.xlane.xlu1 %3967  ;;  %v3608_v51 = vadd.f32 %v16750_v9, %v3589_v58  ;;  %v3572_v33 = vmul.f32 %v13826_v11, %v16639_v39 }
 0xa6c   :  { %13837 = vrsqrt.f32 %v3554_v15  ;;  %v3979_v31 = vmul.f32 0.03125, %v3968_v19  ;;  %11966 = vmatprep.mubr.msk.f32.mxu1 %vm1084_vm5, %v16762_v44  ;;  %v3965_v50 = vpop.xlane.xlu0 %3964  ;;  %v3607_v63 = vadd.f32 %v16750_v9, %v3588_v23  ;;  %v3571_v52 = vmul.f32 %v13828_v22, %v16643_v55 }
 0xa6d   :  { %13839 = vrsqrt.f32 %v3553_v18  ;;  %v3978_v48 = vmul.f32 0.03125, %v3965_v50  ;;  %11967 = vmatmul.mubr.msk.f32.vlgmr.msra.gmra.mrb[68].mxu1 %vm1084_vm5, %v16765_v54  ;;  %v3591_v47 = vmul.f32 %v16747_v3, %v3572_v33  ;;  %v16786_v21 = vmax.f32 %v3608_v51, 0.0 }
 0xa6e   :  { %v13830_v60 = vpop.eup %13829  ;;  %v16777_v39 = vsub.f32 %v16688_v53, %v3979_v31  ;;  %13043 = vmatpush3.bf16.msra.mxu1 %v16720_v4  ;;  %v16780_v57 = vmax.f32 %v3607_v63, 0.0  ;;  %v3590_v16 = vmul.f32 %v16747_v3, %v3571_v52 }
 0xa6f   :  { %v13832_v42 = vpop.eup %13831  ;;  %v16784_v55 = vsub.f32 %v16692_v62, %v3978_v48  ;;  %v3974_v13 = vpop.xlane.xlu1 %3973  ;;  %v3610_v38 = vadd.f32 %v16750_v9, %v3591_v47  ;;  %v3574_v14 = vmul.f32 %v13830_v60, %v16651_v12  ;;  %13045 = vmatprep.subr.bf16.mxu1 %v13044_v34 }
 0xa70   :  { %v3981_v53 = vmul.f32 0.03125, %v3974_v13  ;;  %11969 = vmatprep.mubr.msk.f32.mxu1 %vm1084_vm5, %v16780_v57  ;;  %v3971_v4 = vpop.xlane.xlu0 %3970  ;;  %v3989_v49 = vmul.f32 %v16777_v39, %v16777_v39  ;;  %v3609_v61 = vadd.f32 %v16750_v9, %v3590_v16  ;;  %v3573_v62 = vmul.f32 %v13832_v42, %v16655_v36 }
 0xa71   :  { %v3980_v8 = vmul.f32 0.03125, %v3971_v4  ;;  %11970 = vmatmul.mubr.msk.f32.gmra.mrb[70].mxu1 %vm1084_vm5, %v16786_v21  ;;  %v3988_v12 = vmul.f32 %v16784_v55, %v16784_v55  ;;  %v16800_v17 = vmax.f32 %v3610_v38, 0.0  ;;  %v3593_v25 = vmul.f32 %v16747_v3, %v3574_v14 }
 0xa72   :  { %v13834_v41 = vpop.eup %13833  ;;  %v16804_v29 = vsub.f32 %v16696_v1, %v3981_v53  ;;  %v3996_v7 = vsel %vm1084_vm5, %v3989_v49, 0.0  ;;  %v16807_v58 = vmax.f32 %v3609_v61, 0.0  ;;  %v3592_v36 = vmul.f32 %v16747_v3, %v3573_v62  ;;  %13047 = vmatpush3.bf16.msra.mxu1 %v13044_v34  ;;  %v10336_v61 = vld [vmem:[%s19041_s0] ss:$0 sm:$0xff]  ;;  %s19128_s0 = sld [smem:[#allocation111_spill]] }
 0xa73   :  { %v13836_v11 = vpop.eup %13835  ;;  %v16811_v15 = vsub.f32 %v16701_v45, %v3980_v8  ;;  %3997 = vadd.xlane.f32.xlu0 %v3996_v7  ;;  %v3993_v23 = vsel %vm1084_vm5, %v3988_v12, 0.0  ;;  %v3612_v22 = vadd.f32 %v16750_v9, %v3593_v25  ;;  %v3576_v18 = vmul.f32 %v13834_v41, %v16663_v10  ;;  %13059 = vmatprep.subr.bf16.mxu1 %v19000_v27 }
 0xa74   :  { %11972 = vmatprep.mubr.msk.f32.mxu1 %vm1084_vm5, %v16807_v58  ;;  %3994 = vadd.xlane.f32.xlu1 %v3993_v23  ;;  %v3977_v1 = vpop.xlane.xlu0 %3976  ;;  %v3991_v34 = vmul.f32 %v16804_v29, %v16804_v29  ;;  %v3611_v45 = vadd.f32 %v16750_v9, %v3592_v36  ;;  %v3575_v19 = vmul.f32 %v13836_v11, %v16667_v40  ;;  %v4940_v36 = vld [vmem:[%s19046_s4 + $0x28] sm:$0xff] }
 0xa75   :  { %v3982_v51 = vmul.f32 0.03125, %v3977_v1  ;;  %11973 = vmatmul.mubr.msk.f32.gmra.mrb[72].mxu1 %vm1084_vm5, %v16800_v17  ;;  %v3990_v10 = vmul.f32 %v16811_v15, %v16811_v15  ;;  %v3595_v33 = vmul.f32 %v16747_v3, %v3576_v18  ;;  %v16831_v52 = vmax.f32 %v3612_v22, 0.0  ;;  %v4558_v18 = vld [vmem:[%s19047_s9 + $0x10] sm:$0xff] }
 0xa76   :  { %v13838_v31 = vpop.eup %13837  ;;  %v4002_v50 = vsel %vm1084_vm5, %v3991_v34, 0.0  ;;  %v16829_v63 = vmax.f32 %v3611_v45, 0.0  ;;  %v3594_v48 = vmul.f32 %v16747_v3, %v3575_v19  ;;  %v4137_v8 = vadd.f32 %v10336_v61, %v16725_v20  ;;  %v4559_v34 = vld [vmem:[%s19047_s9 + $0x18] sm:$0xff] }
 0xa77   :  { %v13840_v47 = vpop.eup %13839  ;;  %v16835_v40 = vsub.f32 %v16708_v35, %v3982_v51  ;;  %4003 = vadd.xlane.f32.xlu0 %v4002_v50  ;;  %v3999_v60 = vsel %vm1084_vm5, %v3990_v10, 0.0  ;;  %v3614_v16 = vadd.f32 %v16750_v9, %v3595_v33  ;;  %v3578_v42 = vmul.f32 %v13838_v31, %v16675_v30 }
 0xa78   :  { %11975 = vmatprep.mubr.msk.f32.mxu1 %vm1084_vm5, %v16829_v63  ;;  %4000 = vadd.xlane.f32.xlu1 %v3999_v60  ;;  %v3613_v13 = vadd.f32 %v16750_v9, %v3594_v48  ;;  %v3577_v38 = vmul.f32 %v13840_v47, %v16679_v46  ;;  %v4142_v25 = vadd.f32 %v16723_v28, %v10336_v61 }
 0xa79   :  { %11976 = vmatmul.mubr.msk.f32.gmra.mrb[74].mxu1 %vm1084_vm5, %v16831_v52  ;;  %v3992_v35 = vmul.f32 %v16835_v40, %v16835_v40  ;;  %v3597_v14 = vmul.f32 %v16747_v3, %v3578_v42  ;;  %v16853_v49 = vmax.f32 %v3614_v16, 0.0  ;;  %v4157_v20 = vadd.f32 %v10336_v61, %v16733_v2 }
 0xa7a   :  { %v16849_v53 = vmax.f32 %v3613_v13, 0.0  ;;  %v3596_v30 = vmul.f32 %v16747_v3, %v3577_v38  ;;  %v4152_v41 = vadd.f32 %v16727_v43, %v10336_v61  ;;  %v4167_v7 = vadd.f32 %v10336_v61, %v16737_v37  ;;  %v4939_v43 = vld [vmem:[%s19046_s4 + $0x20] sm:$0xff] }
 0xa7b   :  { %v4005_v4 = vsel %vm2395_vm6, %v3992_v35, 0.0  ;;  %19043 = vst [vmem:[#allocation115_spill] sm:$0xff] %v16853_v49  ;;  %v3616_v62 = vadd.f32 %v16750_v9, %v3597_v14  ;;  %v4177_v28 = vadd.f32 %v10336_v61, %v16741_v0  ;;  %v4172_v2 = vadd.f32 %v16735_v5, %v10336_v61  ;;  %v4941_v5 = vld [vmem:[%s19046_s4 + $0x30] sm:$0xff]  ;;  %v4942_v0 = vld [vmem:[%s19046_s4 + $0x38] sm:$0xff] }
 0xa7c   :  { %19042 = vst [vmem:[#allocation129_spill] sm:$0xff] %v16849_v53  ;;  %11978 = vmatprep.mubr.msk.f32.mxu1 %vm1084_vm5, %v16849_v53  ;;  %4006 = vadd.xlane.f32.xlu1 %v4005_v4  ;;  %v3615_v46 = vadd.f32 %v16750_v9, %v3596_v30  ;;  %v4147_v9 = vadd.f32 %v10336_v61, %v16729_v32  ;;  %v10334_v4 = vld [vmem:[%s19048_s14] ss:$0 sm:$0xff] }
 0xa7d   :  { %11979 = vmatmul.mubr.msk.f32.gmra.mrb[76].mxu1 %vm1084_vm5, %v16853_v49  ;;  %v16865_v3 = vmax.f32 %v3616_v62, 0.0  ;;  %v4162_v32 = vadd.f32 %v16731_v6, %v10336_v61  ;;  %v4187_v37 = vadd.f32 %v10336_v61, %v16745_v26  ;;  %v13060_v6 = vpack.c.bf16 %v4940_v36, %v4939_v43  ;;  %v4557_v26 = vld [vmem:[%s19047_s9 + $0x8] sm:$0xff] }
 0xa7e   :  { %v16863_v12 = vmax.f32 %v3615_v46, 0.0  ;;  %v4182_v11 = vadd.f32 %v16739_v59, %v10336_v61  ;;  %v13063_v23 = vpack.c.bf16 %v4942_v0, %v4941_v5  ;;  %v4192_v22 = vadd.f32 %v16743_v24, %v10336_v61  ;;  %v4556_v59 = vld [vmem:[%s19047_s9] sm:$0xff] }
 0xa7f   :  { %19045 = vst [vmem:[#allocation117_spill] sm:$0xff] %v16865_v3  ;;  %v13048_v1 = vpack.c.bf16 %v4557_v26, %v4556_v59  ;;  %v13052_v45 = vpack.c.bf16 %v4559_v34, %v4558_v18  ;;  %v10335_v46 = vld [vmem:[%s19049_s13] ss:$0 sm:$0xff] }
 0xa80   :  { %19044 = vst [vmem:[#allocation114_spill] sm:$0xff] %v16863_v12  ;;  %11981 = vmatprep.mubr.msk.f32.mxu1 %vm1084_vm5, %v16863_v12  ;;  %v4832_v18 = vld [vmem:[%s19051_s20] sm:$0xff] }
 0xa81   :  { %11982 = vmatmul.mubr.msk.f32.gmra.mrb[78].mxu1 %vm1084_vm5, %v16865_v3  ;;  %13049 = vmatprep.subr.bf16.mxu0 %v13048_v1 }
 0xa82   :  { %11992 = vmatprep.mubr.msk.f32.mxu1 %vm1084_vm5, %v4137_v8  ;;  %13051 = vmatpush3.bf16.msra.mxu0 %v13048_v1  ;;  %v4833_v1 = vld [vmem:[%s19051_s20 + $0x8] sm:$0xff] }
 0xa83   :  { %13053 = vmatprep.subr.bf16.mxu0 %v13052_v45 }
 0xa85   :  { %11993 = vmatmul.mubr.msk.f32.vlgmr.msra.gmra.mrb[68].mxu1 %vm1084_vm5, %v4142_v25 }
 0xa86   :  { %11995 = vmatprep.mubr.msk.f32.mxu1 %vm1084_vm5, %v4147_v9  ;;  %13061 = vmatpush3.bf16.msra.mxu1 %v13060_v6 }
 0xa87   :  { %13062 = vmatprep.subr.bf16.mxu1 %v19000_v27  ;;  %13055 = vmatpush3.bf16.msra.mxu0 %v13052_v45 }
 0xa88   :  { %13056 = vmatprep.subr.bf16.mxu0 %v19000_v27 }
 0xa89   :  { %11996 = vmatmul.mubr.msk.f32.gmra.mrb[70].mxu1 %vm1084_vm5, %v4152_v41 }
 0xa8a   :  { %11998 = vmatprep.mubr.msk.f32.mxu1 %vm1084_vm5, %v4157_v20  ;;  %13064 = vmatpush3.bf16.msra.mxu1 %v13063_v23  ;;  %v10373_v23 = vld [vmem:[%s19050_s12] ss:$0 sm:$0xff] }
 0xa8b   :  { %13071 = vmatprep.subr.bf16.mxu1 %v19000_v27 }
 0xa8d   :  { %11999 = vmatmul.mubr.msk.f32.gmra.mrb[72].mxu1 %vm1084_vm5, %v4162_v32 }
 0xa8e   :  { %12001 = vmatprep.mubr.msk.f32.mxu1 %vm1084_vm5, %v4167_v7 }
 0xa91   :  { %12002 = vmatmul.mubr.msk.f32.gmra.mrb[74].mxu1 %vm1084_vm5, %v4172_v2 }
 0xa92   :  { %12004 = vmatprep.mubr.msk.f32.mxu1 %vm1084_vm5, %v4177_v28 }
 0xa95   :  { %12005 = vmatmul.mubr.msk.f32.gmra.mrb[76].mxu1 %vm1084_vm5, %v4182_v11 }
 0xa96   :  { %12007 = vmatprep.mubr.msk.f32.mxu1 %vm1084_vm5, %v4187_v37 }
 0xa99   :  { %12008 = vmatmul.mubr.msk.f32.gmra.mrb[78].mxu1 %vm1084_vm5, %v4192_v22 }
 0xa9a   :  { %12065 = vmatprep.mubr.msk.f32.mxu1 %vm14842_vm2, %v18997_v56 }
 0xb00   :  { %v3998_v24 = vpop.xlane.xlu0 %3997 }
 0xb01   :  { %v4009_v19 = vmul.f32 0.03125, %v3998_v24  ;;  %v3995_v51 = vpop.xlane.xlu1 %3994 }
 0xb02   :  { %v4008_v10 = vmul.f32 0.03125, %v3995_v51 }
 0xb03   :  { %v4014_v33 = vadd.f32 1e-05, %v4009_v19  ;;  %v13057_v19 = vpack.c.bf16 %v4833_v1, %v4832_v18  ;;  %v16978_v18 = vpack.c.bf16 %v16765_v54, %v16762_v44  ;;  %v14172_v1 = vld [vmem:[%s18973_s3 + $0x10] sm:$0xff] }
 0xb04   :  { %v4013_v31 = vadd.f32 1e-05, %v4008_v10  ;;  %v4004_v50 = vpop.xlane.xlu0 %4003 }
 0xb05   :  { %13841 = vrsqrt.f32 %v4014_v33  ;;  %v4011_v48 = vmul.f32 0.03125, %v4004_v50  ;;  %v4001_v47 = vpop.xlane.xlu1 %4000 }
 0xb06   :  { %13843 = vrsqrt.f32 %v4013_v31  ;;  %v4010_v60 = vmul.f32 0.03125, %v4001_v47 }
 0xb07   :  { %v4016_v16 = vadd.f32 1e-05, %v4011_v48 }
 0xb08   :  { %v4015_v42 = vadd.f32 1e-05, %v4010_v60 }
 0xb09   :  { %13845 = vrsqrt.f32 %v4016_v16  ;;  %v4007_v13 = vpop.xlane.xlu1 %4006 }
 0xb0a   :  { %13847 = vrsqrt.f32 %v4015_v42  ;;  %v4012_v38 = vmul.f32 0.03125, %v4007_v13  ;;  %v4834_v42 = vld [vmem:[%s19051_s20 + $0x10] sm:$0x3] }
 0xb0c   :  { %v4017_v35 = vadd.f32 1e-05, %v4012_v38 }
 0xb0e   :  { %13849 = vrsqrt.f32 %v4017_v35 }
 0xb0f   :  { %v13842_v14 = vpop.eup %13841 }
 0xb10   :  { %v13844_v30 = vpop.eup %13843  ;;  %v4024_v61 = vmul.f32 %v13842_v14, %v16777_v39 }
 0xb11   :  { %v4023_v62 = vmul.f32 %v13844_v30, %v16784_v55 }
 0xb12   :  { %v4036_v25 = vmul.f32 %v10334_v4, %v4024_v61 }
 0xb13   :  { %v13846_v8 = vpop.eup %13845  ;;  %v4035_v9 = vmul.f32 %v10334_v4, %v4023_v62 }
 0xb14   :  { %v13848_v20 = vpop.eup %13847  ;;  %v4048_v28 = vadd.f32 %v10335_v46, %v4036_v25  ;;  %v4026_v43 = vmul.f32 %v13846_v8, %v16804_v29 }
 0xb15   :  { %v4047_v41 = vadd.f32 %v10335_v46, %v4035_v9  ;;  %v4025_v7 = vmul.f32 %v13848_v20, %v16811_v15 }
 0xb16   :  { %v16920_v55 = vmax.f32 %v4048_v28, 0.0  ;;  %v4038_v15 = vmul.f32 %v10334_v4, %v4026_v43 }
 0xb17   :  { %v16912_v32 = vmax.f32 %v4047_v41, 0.0  ;;  %v4037_v2 = vmul.f32 %v10334_v4, %v4025_v7 }
 0xb18   :  { %v13850_v36 = vpop.eup %13849  ;;  %v4050_v6 = vadd.f32 %v10335_v46, %v4038_v15  ;;  %v4935_v15 = vld [vmem:[%s19046_s4] sm:$0xff] }
 0xb19   :  { %12066 = vmatmul.mubr.msk.f32.vlgmr.msra.gmra.mrb[80].mxu1 %vm1084_vm5, %v16912_v32  ;;  %v4027_v39 = vmul.f32 %v13850_v36, %v16835_v40  ;;  %v4049_v37 = vadd.f32 %v10335_v46, %v4037_v2 }
 0xb1a   :  { %12068 = vmatprep.mubr.msk.f32.mxu1 %vm14842_vm2, %v18997_v56  ;;  %v16932_v40 = vmax.f32 %v4050_v6, 0.0  ;;  %v4936_v6 = vld [vmem:[%s19046_s4 + $0x8] sm:$0xff] }
 0xb1b   :  { %v16926_v29 = vmax.f32 %v4049_v37, 0.0  ;;  %v4039_v11 = vmul.f32 %v10334_v4, %v4027_v39 }
 0xb1d   :  { %12069 = vmatmul.mubr.msk.f32.gmra.mrb[82].mxu1 %vm1084_vm5, %v16920_v55  ;;  %v4051_v5 = vadd.f32 %v10335_v46, %v4039_v11  ;;  %v13066_v11 = vpack.c.bf16 %v4936_v6, %v4935_v15 }
 0xb1e   :  { %12071 = vmatprep.mubr.msk.f32.mxu1 %vm14842_vm2, %v18997_v56 }
 0xb1f   :  { %v16938_v0 = vmax.f32 %v4051_v5, 0.0  ;;  %v4937_v5 = vld [vmem:[%s19046_s4 + $0x10] sm:$0xff] }
 0xb21   :  { %12072 = vmatmul.mubr.msk.f32.gmra.mrb[84].mxu1 %vm1084_vm5, %v16926_v29 }
 0xb22   :  { %12074 = vmatprep.mubr.msk.f32.mxu1 %vm14842_vm2, %v18997_v56 }
 0xb25   :  { %12075 = vmatmul.mubr.msk.f32.gmra.mrb[86].mxu1 %vm1084_vm5, %v16932_v40 }
 0xb26   :  { %12077 = vmatprep.mubr.msk.f32.mxu1 %vm14842_vm2, %v18997_v56 }
 0xb29   :  { %12078 = vmatmul.mubr.msk.f32.gmra.mrb[88].mxu1 %vm1084_vm5, %v16938_v0 }
 0xb2a   :  { %12111 = vmatprep.mubr.msk.f32.mxu1 %vm14842_vm2, %v18997_v56 }
 0xb58   :  { %v11994_v22 = vpop.f32.mrb[68].mxu1 }
 0xb59   :  { %v4533_v59 = vadd.f32 %v11994_v22, %v10373_v23  ;;  %v4466_v26 = vpop.f32.mrb[69].mxu1  ;;  %v14170_v22 = vld [vmem:[%s18973_s3] sm:$0xff] }
 0xb5a   :  { %v4532_v34 = vadd.f32 %v10373_v23, %v4466_v26  ;;  %v14171_v26 = vld [vmem:[%s18973_s3 + $0x8] sm:$0xff] }
 0xb5b   :  { %v4545_v51 = vmax.f32 %v4533_v59, 0.0 }
 0xb5c   :  { %v4544_v45 = vmax.f32 %v4532_v34, 0.0  ;;  %v11997_v24 = vpop.f32.mrb[70].mxu1  ;;  %v14173_v34 = vld [vmem:[%s18973_s3 + $0x18] sm:$0xff] }
 0xb5d   :  { %v4535_v10 = vadd.f32 %v11997_v24, %v10373_v23  ;;  %v4476_v33 = vpop.f32.mrb[71].mxu1 }
 0xb5e   :  { %v4534_v31 = vadd.f32 %v10373_v23, %v4476_v33  ;;  %12018 = vmatprep.mubr.msk.f32.mxu0 %vm1084_vm5, %v4544_v45  ;;  %v14174_v45 = vld [vmem:[%s18973_s3 + $0x20] sm:$0xf] }
 0xb5f   :  { %12019 = vmatmul.mubr.msk.f32.vlgmr.msra.gmra.mrb[78].mxu0 %vm1084_vm5, %v4545_v51  ;;  %v4547_v47 = vmax.f32 %v4535_v10, 0.0 }
 0xb60   :  { %v4546_v50 = vmax.f32 %v4534_v31, 0.0  ;;  %v12000_v48 = vpop.f32.mrb[72].mxu1  ;;  %13058 = vmatpush3.bf16.msra.mxu0 %v13057_v19 }
 0xb61   :  { %v4537_v60 = vadd.f32 %v12000_v48, %v10373_v23  ;;  %v4486_v16 = vpop.f32.mrb[73].mxu1  ;;  %12040 = vmatprep.subr.mxu0 %v18997_v56 }
 0xb62   :  { %v4536_v13 = vadd.f32 %v10373_v23, %v4486_v16  ;;  %12021 = vmatprep.mubr.msk.f32.mxu0 %vm1084_vm5, %v4546_v50  ;;  %v5172_v16 = vld [vmem:[%s19056_s15 + $0x10] sm:$0xff] }
 0xb63   :  { %12022 = vmatmul.mubr.msk.f32.gmra.mrb[80].mxu0 %vm1084_vm5, %v4547_v47  ;;  %v4549_v14 = vmax.f32 %v4537_v60, 0.0  ;;  %v5170_v47 = vld [vmem:[%s19056_s15] sm:$0xff]  ;;  %v5171_v60 = vld [vmem:[%s19056_s15 + $0x8] sm:$0xff] }
 0xb64   :  { %v4548_v38 = vmax.f32 %v4536_v13, 0.0  ;;  %v12003_v35 = vpop.f32.mrb[74].mxu1  ;;  %12041 = vmatpush3.msk.msra.mxu0 %vm19052_vm9, %v4834_v42  ;;  %v13072_v42 = vpack.c.bf16 %v5171_v60, %v5170_v47  ;;  %v5173_v13 = vld [vmem:[%s19056_s15 + $0x18] sm:$0xff] }
 0xb65   :  { %v4539_v30 = vadd.f32 %v12003_v35, %v10373_v23  ;;  %v4496_v4 = vpop.f32.mrb[75].mxu1  ;;  %13065 = vmatprep.subr.bf16.mxu0 %v19000_v27  ;;  %v13075_v35 = vpack.c.bf16 %v5173_v13, %v5172_v16 }
 0xb66   :  { %v4538_v61 = vadd.f32 %v10373_v23, %v4496_v4  ;;  %12024 = vmatprep.mubr.msk.f32.mxu0 %vm1084_vm5, %v4548_v38  ;;  %13073 = vmatpush3.bf16.msra.mxu1 %v13072_v42 }
 0xb67   :  { %12025 = vmatmul.mubr.msk.f32.gmra.mrb[82].mxu0 %vm1084_vm5, %v4549_v14  ;;  %v4551_v8 = vmax.f32 %v4539_v30, 0.0  ;;  %13074 = vmatprep.subr.bf16.mxu1 %v19000_v27  ;;  %v10374_v30 = vld [vmem:[#allocation4] ss:$0 sm:$0xff] }
 0xb68   :  { %v4550_v62 = vmax.f32 %v4538_v61, 0.0  ;;  %v12006_v46 = vpop.f32.mrb[76].mxu1 }
 0xb69   :  { %v4541_v9 = vadd.f32 %v12006_v46, %v10373_v23  ;;  %v4506_v25 = vpop.f32.mrb[77].mxu1 }
 0xb6a   :  { %v4540_v20 = vadd.f32 %v10373_v23, %v4506_v25  ;;  %12027 = vmatprep.mubr.msk.f32.mxu0 %vm1084_vm5, %v4550_v62  ;;  %13076 = vmatpush3.bf16.msra.mxu1 %v13075_v35 }
 0xb6b   :  { %12028 = vmatmul.mubr.msk.f32.gmra.mrb[84].mxu0 %vm1084_vm5, %v4551_v8  ;;  %v4553_v28 = vmax.f32 %v4541_v9, 0.0 }
 0xb6c   :  { %v4552_v41 = vmax.f32 %v4540_v20, 0.0  ;;  %v12009_v7 = vpop.f32.mrb[78].mxu1 }
 0xb6d   :  { %v4543_v2 = vadd.f32 %v12009_v7, %v10373_v23  ;;  %v4516_v43 = vpop.f32.mrb[79].mxu1 }
 0xb6e   :  { %v4542_v36 = vadd.f32 %v10373_v23, %v4516_v43  ;;  %12030 = vmatprep.mubr.msk.f32.mxu0 %vm1084_vm5, %v4552_v41  ;;  %v4938_v23 = vld [vmem:[%s19046_s4 + $0x18] sm:$0xff]  ;;  %s14843_s4 = smov [#allocation39]  }
 0xb6f   :  { %12031 = vmatmul.mubr.msk.f32.gmra.mrb[86].mxu0 %vm1084_vm5, %v4553_v28  ;;  %v4555_v37 = vmax.f32 %v4543_v2, 0.0  ;;  %v13069_v59 = vpack.c.bf16 %v4938_v23, %v4937_v5  ;;  %s10046_s9 = sshll.u32 %s14843_s4, 4  ;;  %s10047_s9 = int_to_ptr.vmem [resolvable:$true] %s10046_s9 }
 0xb70   :  { %v4554_v39 = vmax.f32 %v4542_v36, 0.0  ;;  %s14672_s14 = scalar_lea.vmem %s10047_s9, 16  ;;  %s14676_s13 = scalar_lea.vmem %s10047_s9, 32 }
 0xb71   :  { %p14673_p6 = scmp.ne.s32.totalorder %s10047_s9, %s14672_s14  ;;  %p14677_p7 = scmp.lt.s32.totalorder %s10047_s9, %s10047_s9 }
 0xb72   :  { %12033 = vmatprep.mubr.msk.f32.mxu0 %vm1084_vm5, %v4554_v39  ;;  %p14678_p8 = scmp.lt.s32.totalorder %s14676_s13, %s14672_s14 }
 0xb73   :  { %12034 = vmatmul.mubr.msk.f32.gmra.mrb[88].mxu0 %vm1084_vm5, %v4555_v37 }
 0xb74   :  { %12042 = vmatprep.mubr.msk.f32.mxu0 %vm14842_vm2, %v18997_v56  ;;  %p14679_p9 = por %p14678_p8, %p14677_p7 }
 0xb76   :  { %p14680_p10 = pnand %p14679_p9, %p14673_p6 }
 0xb77   :  { %12043 = vmatmul.mubr.msk.f32.vlgmr.msra.gmra.mrb[90].mxu0 %vm19053_vm11, %v14170_v22 }
 0xb78   :  { %13067 = vmatpush3.bf16.msra.mxu0 %v13066_v11  ;;  %12045 = vmatprep.mubr.msk.f32.mxu0 %vm14842_vm2, %v18997_v56 }
 0xb79   :  { %13068 = vmatprep.subr.bf16.mxu0 %v19000_v27 }
 0xb7b   :  { %12046 = vmatmul.mubr.msk.f32.gmra.mrb[92].mxu0 %vm19054_vm12, %v14171_v26 }
 0xb7c   :  { %13070 = vmatpush3.bf16.msra.mxu0 %v13069_v59  ;;  %12048 = vmatprep.mubr.msk.f32.mxu0 %vm14842_vm2, %v18997_v56 }
 0xb7d   :  { %13078 = vmatprep.subr.bf16.mxu0 %v16978_v18 }
 0xb7f   :  { %12049 = vmatmul.mubr.msk.f32.gmra.mrb[94].mxu0 %vm19055_vm10, %v14172_v1 }
 0xb80   :  { %12051 = vmatprep.mubr.msk.f32.mxu0 %vm14842_vm2, %v18997_v56 }
 0xb83   :  { %12052 = vmatmul.mubr.msk.f32.gmra.mrb[96].mxu0 %vm19057_vm13, %v14173_v34 }
 0xb84   :  { %12054 = vmatprep.mubr.msk.f32.mxu0 %vm14842_vm2, %v18997_v56 }
 0xb87   :  { %12055 = vmatmul.mubr.msk.f32.gmra.mrb[98].mxu0 %vm19058_vm0, %v14174_v45 }
 0xb88   :  { %12088 = vmatprep.mubr.msk.f32.mxu0 %vm14842_vm2, %v18997_v56 }
 0xbec   :  { %v16995_v24 = vpop.f32.mrb[80].mxu1 }
 0xbed   :  { %v12067_v19 = vpop.f32.mrb[81].mxu1 }
 0xbf0   :  { %v16997_v51 = vpop.f32.mrb[82].mxu1 }
 0xbf1   :  { %v12070_v10 = vpop.f32.mrb[83].mxu1 }
 0xbf4   :  { %v16999_v33 = vpop.f32.mrb[84].mxu1 }
 0xbf5   :  { %v12073_v31 = vpop.f32.mrb[85].mxu1 }
 0xbf8   :  { %v17001_v50 = vpop.f32.mrb[86].mxu1 }
 0xbf9   :  { %v12076_v48 = vpop.f32.mrb[87].mxu1 }
 0xbfc   :  { %v17007_v38 = vpop.f32.mrb[88].mxu1 }
 0xbfd   :  { %v12079_v14 = vpop.f32.mrb[89].mxu1 }
 0xc32   :  { %v12020_v4 = vpop.f32.mrb[78].mxu0 }
 0xc33   :  { %v4675_v61 = vadd.f32 %v12020_v4, %v10374_v30  ;;  %v4669_v62 = vpop.f32.mrb[79].mxu0 }
 0xc34   :  { %v4670_v46 = vadd.f32 %v10374_v30, %v4669_v62 }
 0xc35   :  { %v10388_v8 = vmul.f32 -1.442695, %v4675_v61 }
 0xc36   :  { %v10387_v9 = vmul.f32 -1.442695, %v4670_v46  ;;  %v12023_v25 = vpop.f32.mrb[80].mxu0 }
 0xc37   :  { %13851 = vpow2.f32 %v10388_v8  ;;  %v4685_v20 = vadd.f32 %v12023_v25, %v10374_v30  ;;  %v4679_v41 = vpop.f32.mrb[81].mxu0  ;;  %v17011_v8 = vld [vmem:[%s19059_s5] ss:$0 sm:$0xff] }
 0xc38   :  { %13853 = vpow2.f32 %v10387_v9  ;;  %v4680_v7 = vadd.f32 %v10374_v30, %v4679_v41 }
 0xc39   :  { %v10390_v28 = vmul.f32 -1.442695, %v4685_v20 }
 0xc3a   :  { %v10389_v2 = vmul.f32 -1.442695, %v4680_v7  ;;  %v12026_v43 = vpop.f32.mrb[82].mxu0 }
 0xc3b   :  { %13855 = vpow2.f32 %v10390_v28  ;;  %v4695_v36 = vadd.f32 %v12026_v43, %v10374_v30  ;;  %v4689_v39 = vpop.f32.mrb[83].mxu0 }
 0xc3c   :  { %13857 = vpow2.f32 %v10389_v2  ;;  %v4690_v37 = vadd.f32 %v10374_v30, %v4689_v39 }
 0xc3d   :  { %v10392_v15 = vmul.f32 -1.442695, %v4695_v36 }
 0xc3e   :  { %v10391_v6 = vmul.f32 -1.442695, %v4690_v37  ;;  %v12029_v11 = vpop.f32.mrb[84].mxu0 }
 0xc3f   :  { %13859 = vpow2.f32 %v10392_v15  ;;  %v4705_v5 = vadd.f32 %v12029_v11, %v10374_v30  ;;  %v4699_v23 = vpop.f32.mrb[85].mxu0 }
 0xc40   :  { %13861 = vpow2.f32 %v10391_v6  ;;  %v4700_v22 = vadd.f32 %v10374_v30, %v4699_v23 }
 0xc41   :  { %v13852_v59 = vpop.eup %13851  ;;  %v10394_v26 = vmul.f32 -1.442695, %v4705_v5 }
 0xc42   :  { %v13854_v1 = vpop.eup %13853  ;;  %v4765_v34 = vadd.f32 1.0, %v13852_v59  ;;  %v10393_v45 = vmul.f32 -1.442695, %v4700_v22  ;;  %v12032_v19 = vpop.f32.mrb[86].mxu0 }
 0xc43   :  { %v4764_v10 = vadd.f32 1.0, %v13854_v1  ;;  %13863 = vpow2.f32 %v10394_v26  ;;  %v4715_v31 = vadd.f32 %v12032_v19, %v10374_v30  ;;  %v4709_v48 = vpop.f32.mrb[87].mxu0  ;;  %v17029_v19 = vpack.c.bf16 %v16800_v17, %v16807_v58 }
 0xc44   :  { %13865 = vrcp.f32 %v4765_v34  ;;  %v4710_v47 = vadd.f32 %v10374_v30, %v4709_v48 }
 0xc45   :  { %v13856_v60 = vpop.eup %13855  ;;  %13867 = vrcp.f32 %v4764_v10  ;;  %v10396_v16 = vmul.f32 -1.442695, %v4715_v31 }
 0xc46   :  { %v13858_v42 = vpop.eup %13857  ;;  %v4767_v13 = vadd.f32 1.0, %v13856_v60  ;;  %13869 = vpow2.f32 %v10393_v45  ;;  %v10395_v35 = vmul.f32 -1.442695, %v4710_v47  ;;  %v12035_v14 = vpop.f32.mrb[88].mxu0 }
 0xc47   :  { %v4766_v4 = vadd.f32 1.0, %v13858_v42  ;;  %13871 = vpow2.f32 %v10396_v16  ;;  %v4725_v61 = vadd.f32 %v12035_v14, %v10374_v30  ;;  %v4719_v62 = vpop.f32.mrb[89].mxu0 }
 0xc48   :  { %13873 = vrcp.f32 %v4767_v13  ;;  %v4720_v46 = vadd.f32 %v10374_v30, %v4719_v62  ;;  %v17017_v30 = vpack.c.bf16 %v16786_v21, %v16780_v57 }
 0xc49   :  { %v13860_v9 = vpop.eup %13859  ;;  %13875 = vrcp.f32 %v4766_v4  ;;  %v10398_v25 = vmul.f32 -1.442695, %v4725_v61  ;;  %v17040_v61 = vpack.c.bf16 %v16831_v52, %v16829_v63 }
 0xc4a   :  { %v13862_v20 = vpop.eup %13861  ;;  %v4769_v41 = vadd.f32 1.0, %v13860_v9  ;;  %13877 = vpow2.f32 %v10395_v35  ;;  %v10397_v7 = vmul.f32 -1.442695, %v4720_v46  ;;  %v4911_v28 = vpop.f32.mrb[90].mxu0 }
 0xc4b   :  { %v4768_v2 = vadd.f32 1.0, %v13862_v20  ;;  %13879 = vpow2.f32 %v10398_v25  ;;  %v4912_v43 = vadd.f32 %v17011_v8, %v4911_v28  ;;  %v12044_v36 = vpop.f32.mrb[91].mxu0 }
 0xc4c   :  { %13881 = vrcp.f32 %v4769_v41 }
 0xc4d   :  { %v13864_v39 = vpop.eup %13863  ;;  %13883 = vrcp.f32 %v4768_v2  ;;  %12089 = vmatmul.mubr.msk.f32.vlgmr.msra.gmra.mrb[100].mxu0 %vm1084_vm5, %v4912_v43 }
 0xc4e   :  { %v13866_v37 = vpop.eup %13865  ;;  %v4771_v15 = vadd.f32 1.0, %v13864_v39  ;;  %13885 = vpow2.f32 %v10397_v7  ;;  %13080 = vmatpush3.bf16.msra.mxu0 %v16978_v18  ;;  %v4916_v6 = vpop.f32.mrb[92].mxu0  ;;  %12091 = vmatprep.mubr.msk.f32.mxu0 %vm14842_vm2, %v18997_v56 }
 0xc4f   :  { %v13868_v11 = vpop.eup %13867  ;;  %v4802_v5 = vsel %vm4800_vm15, %v13866_v37, 0.0  ;;  %v4917_v23 = vadd.f32 %v17011_v8, %v4916_v6  ;;  %13082 = vmatprep.subr.bf16.mxu0 %v17017_v30  ;;  %v12047_v22 = vpop.f32.mrb[93].mxu0  ;;  %v17052_v37 = vpack.c.bf16 %v16853_v49, %v16849_v53 }
 0xc50   :  { %v13870_v59 = vpop.eup %13869  ;;  %v4801_v26 = vsel %vm4800_vm15, %v13868_v11, 0.0  ;;  %13887 = vrcp.f32 %v4771_v15 }
 0xc51   :  { %v13872_v1 = vpop.eup %13871  ;;  %v4803_v34 = vadd.f32 %v4802_v5, %v4801_v26  ;;  %v4770_v45 = vadd.f32 1.0, %v13870_v59  ;;  %12092 = vmatmul.mubr.msk.f32.gmra.mrb[102].mxu0 %vm1084_vm5, %v4917_v23  ;;  %v17063_v26 = vpack.c.bf16 %v16865_v3, %v16863_v12 }
 0xc52   :  { %v13874_v10 = vpop.eup %13873  ;;  %v4773_v31 = vadd.f32 1.0, %v13872_v1  ;;  %13084 = vmatpush3.bf16.msra.mxu0 %v17017_v30  ;;  %v4921_v48 = vpop.f32.mrb[94].mxu0  ;;  %12094 = vmatprep.mubr.msk.f32.mxu0 %vm14842_vm2, %v18997_v56 }
 0xc53   :  { %v13876_v47 = vpop.eup %13875  ;;  %13889 = vrcp.f32 %v4770_v45  ;;  %v4922_v60 = vadd.f32 %v17011_v8, %v4921_v48  ;;  %13086 = vmatprep.subr.bf16.mxu0 %v17029_v19  ;;  %v12050_v16 = vpop.f32.mrb[95].mxu0  ;;  %v4806_v46 = vsel %vm4800_vm15, %v13874_v10, 0.0 }
 0xc54   :  { %v13878_v42 = vpop.eup %13877  ;;  %v4804_v13 = vsel %vm4800_vm15, %v13876_v47, 0.0  ;;  %13891 = vrcp.f32 %v4773_v31 }
 0xc55   :  { %v13880_v35 = vpop.eup %13879  ;;  %v4805_v14 = vadd.f32 %v4804_v13, %v4803_v34  ;;  %v4772_v4 = vadd.f32 1.0, %v13878_v42  ;;  %12095 = vmatmul.mubr.msk.f32.gmra.mrb[104].mxu0 %vm1084_vm5, %v4922_v60  ;;  %v14175_v34 = vld [vmem:[%s18974_s23] sm:$0xff] }
 0xc56   :  { %v13882_v62 = vpop.eup %13881  ;;  %v4775_v9 = vadd.f32 1.0, %v13880_v35  ;;  %13088 = vmatpush3.bf16.msra.mxu0 %v17029_v19  ;;  %v4926_v25 = vpop.f32.mrb[96].mxu0  ;;  %12097 = vmatprep.mubr.msk.f32.mxu0 %vm14842_vm2, %v18997_v56 }
 0xc57   :  { %v13884_v20 = vpop.eup %13883  ;;  %v4807_v41 = vadd.f32 %v4806_v46, %v4805_v14  ;;  %13893 = vrcp.f32 %v4772_v4  ;;  %v4927_v7 = vadd.f32 %v17011_v8, %v4926_v25  ;;  %13090 = vmatprep.subr.bf16.mxu0 %v17040_v61  ;;  %v12053_v28 = vpop.f32.mrb[97].mxu0  ;;  %v4810_v15 = vsel %vm4800_vm15, %v13882_v62, 0.0  ;;  %v14176_v14 = vld [vmem:[%s18974_s23 + $0x8] sm:$0xff]  ;;  %v14177_v62 = vld [vmem:[%s18974_s23 + $0x10] sm:$0xff] }
 0xc58   :  { %v13886_v2 = vpop.eup %13885  ;;  %v4808_v43 = vsel %vm4800_vm15, %v13884_v20, 0.0  ;;  %13895 = vrcp.f32 %v4775_v9  ;;  %v14178_v20 = vld [vmem:[%s18974_s23 + $0x18] sm:$0xff]  ;;  %v14181_v28 = vld [vmem:[%s18974_s23 + $0x30] sm:$0xff] }
 0xc59   :  { %v4809_v36 = vadd.f32 %v4808_v43, %v4807_v41  ;;  %v4774_v39 = vadd.f32 1.0, %v13886_v2  ;;  %12098 = vmatmul.mubr.msk.f32.gmra.mrb[106].mxu0 %vm1084_vm5, %v4927_v7  ;;  %v14179_v41 = vld [vmem:[%s18974_s23 + $0x20] sm:$0xff]  ;;  %v14180_v7 = vld [vmem:[%s18974_s23 + $0x28] sm:$0xff]  ;;  %v14182_v2 = vld [vmem:[%s18974_s23 + $0x38] sm:$0xff] }
 0xc5a   :  { %13092 = vmatpush3.bf16.msra.mxu0 %v17040_v61  ;;  %v4931_v6 = vpop.f32.mrb[98].mxu0  ;;  %12100 = vmatprep.mubr.msk.f32.mxu0 %vm14842_vm2, %v18997_v56  ;;  %v13888_v22 = vpop.eup %13887  ;;  %v14183_v43 = vld [vmem:[%s18974_s23 + $0x40] sm:$0xff] }
 0xc5b   :  { %v4811_v11 = vadd.f32 %v4810_v15, %v4809_v36  ;;  %13897 = vrcp.f32 %v4774_v39  ;;  %v4932_v5 = vadd.f32 %v17011_v8, %v4931_v6  ;;  %13094 = vmatprep.subr.bf16.mxu0 %v17052_v37  ;;  %v12056_v23 = vpop.f32.mrb[99].mxu0  ;;  %v4814_v10 = vsel %vm4800_vm15, %v13888_v22, 0.0  ;;  %v14184_v36 = vld [vmem:[%s18974_s23 + $0x48] sm:$0xff]  ;;  %v14185_v39 = vld [vmem:[%s18974_s23 + $0x50] sm:$0xff]  ;;  %v14186_v15 = vld [vmem:[%s18974_s23 + $0x58] sm:$0xff] }
 0xc5c   :  { %v5459_v6 = vld [vmem:[%s19060_s16] sm:$0xff] }
 0xc5d   :  { %v13890_v59 = vpop.eup %13889  ;;  %12101 = vmatmul.mubr.msk.f32.gmra.mrb[108].mxu0 %vm1084_vm5, %v4932_v5  ;;  %v10416_v22 = vld [vmem:[%s19061_s18] ss:$0 sm:$0xff] }
 0xc5e   :  { %v4812_v1 = vsel %vm4800_vm15, %v13890_v59, 0.0  ;;  %13096 = vmatpush3.bf16.msra.mxu0 %v17052_v37  ;;  %12150 = vmatprep.mubr.msk.f32.mxu0 %vm911_vm4, %v14175_v34  ;;  %v13892_v45 = vpop.eup %13891 }
 0xc5f   :  { %v4813_v8 = vadd.f32 %v4812_v1, %v4811_v11  ;;  %13098 = vmatprep.subr.bf16.mxu0 %v17063_v26  ;;  %v4818_v42 = vsel %vm4800_vm15, %v13892_v45, 0.0  ;;  %v5460_v11 = vld [vmem:[%s19060_s16 + $0x8] sm:$0xff]  ;;  %v5462_v45 = vld [vmem:[%s19060_s16 + $0x18] sm:$0xff] }
 0xc60   :  { %v13101_v5 = vpack.c.bf16 %v5460_v11, %v5459_v6 }
 0xc61   :  { %v13894_v31 = vpop.eup %13893  ;;  %v4815_v48 = vadd.f32 %v4814_v10, %v4813_v8  ;;  %v5461_v8 = vld [vmem:[%s19060_s16 + $0x10] sm:$0xff] }
 0xc62   :  { %v4816_v47 = vsel %vm4800_vm15, %v13894_v31, 0.0  ;;  %13100 = vmatpush3.bf16.msra.mxu0 %v17063_v26  ;;  %v13896_v16 = vpop.eup %13895  ;;  %13102 = vmatprep.subr.bf16.mxu1 %v13101_v5 }
 0xc63   :  { %v4817_v60 = vadd.f32 %v4816_v47, %v4815_v48  ;;  %v4822_v9 = vsel %vm4800_vm15, %v13896_v16, 0.0  ;;  %v5631_v16 = vld [vmem:[%s19062_s17] sm:$0xff] }
 0xc65   :  { %v13898_v13 = vpop.eup %13897  ;;  %v4819_v35 = vadd.f32 %v4818_v42, %v4817_v60  ;;  %12151 = vmatmul.mubr.msk.f32.vlgmr.msra.gmra.mrb[110].mxu0 %vm911_vm4, %v14176_v14  ;;  %v5632_v42 = vld [vmem:[%s19062_s17 + $0x8] sm:$0xff] }
 0xc66   :  { %v4820_v4 = vsel %vm4800_vm15, %v13898_v13, 0.0  ;;  %12153 = vmatprep.mubr.msk.f32.mxu0 %vm911_vm4, %v14177_v62  ;;  %v13109_v62 = vpack.c.bf16 %v5632_v42, %v5631_v16  ;;  %v6609_v16 = vld [vmem:[%s19063_s26 + $0x10] sm:$0xff]  ;;  %v6610_v42 = vld [vmem:[%s19063_s26 + $0x18] sm:$0xff] }
 0xc67   :  { %v4821_v46 = vadd.f32 %v4820_v4, %v4819_v35 }
 0xc69   :  { %v17080_v25 = vadd.f32 %v4822_v9, %v4821_v46  ;;  %12154 = vmatmul.mubr.msk.f32.gmra.mrb[112].mxu0 %vm911_vm4, %v14178_v20 }
 0xc6a   :  { %12156 = vmatprep.mubr.msk.f32.mxu0 %vm911_vm4, %v14179_v41 }
 0xc6d   :  { %12157 = vmatmul.mubr.msk.f32.gmra.mrb[114].mxu0 %vm911_vm4, %v14180_v7 }
 0xc6e   :  { %12159 = vmatprep.mubr.msk.f32.mxu0 %vm911_vm4, %v14181_v28 }
 0xc71   :  { %12160 = vmatmul.mubr.msk.f32.gmra.mrb[116].mxu0 %vm911_vm4, %v14182_v2 }
 0xc72   :  { %12162 = vmatprep.mubr.msk.f32.mxu0 %vm911_vm4, %v14183_v43 }
 0xc75   :  { %12163 = vmatmul.mubr.msk.f32.gmra.mrb[118].mxu0 %vm911_vm4, %v14184_v36 }
 0xc76   :  { %12165 = vmatprep.mubr.msk.f32.mxu0 %vm911_vm4, %v14185_v39  ;;  %v5633_v39 = vld [vmem:[%s19062_s17 + $0x10] sm:$0xff] }
 0xc79   :  { %12166 = vmatmul.mubr.msk.f32.gmra.mrb[120].mxu0 %vm911_vm4, %v14186_v15  ;;  %v5634_v15 = vld [vmem:[%s19062_s17 + $0x18] sm:$0xff] }
 0xc7a   :  { %12244 = vmatprep.mubr.msk.f32.mxu0 %vm911_vm4, %v14175_v34  ;;  %v13105_v34 = vpack.c.bf16 %v5462_v45, %v5461_v8 }
 0xd20   :  { %v5129_v23 = vpop.f32.mrb[100].mxu0 }
 0xd21   :  { %v5130_v59 = vadd.f32 %v5129_v23, %v16995_v24  ;;  %v12090_v1 = vpop.f32.mrb[101].mxu0 }
 0xd23   :  { %v5160_v10 = vadd.f32 %v10416_v22, %v5130_v59 }
 0xd24   :  { %v5134_v31 = vpop.f32.mrb[102].mxu0 }
 0xd25   :  { %v5165_v48 = vmax.f32 %v5160_v10, 0.0  ;;  %v5135_v47 = vadd.f32 %v5134_v31, %v16997_v51  ;;  %v12093_v60 = vpop.f32.mrb[103].mxu0 }
 0xd26   :  { %v6608_v60 = vld [vmem:[%s19063_s26 + $0x8] sm:$0xff] }
 0xd27   :  { %v5161_v13 = vadd.f32 %v10416_v22, %v5135_v47  ;;  %12112 = vmatmul.mubr.msk.f32.vlgmr.msra.gmra.mrb[90].mxu1 %vm1084_vm5, %v5165_v48  ;;  %v6607_v47 = vld [vmem:[%s19063_s26] sm:$0xff] }
 0xd28   :  { %v5139_v35 = vpop.f32.mrb[104].mxu0  ;;  %13104 = vmatpush3.bf16.msra.mxu1 %v13101_v5  ;;  %12114 = vmatprep.mubr.msk.f32.mxu1 %vm14842_vm2, %v18997_v56  ;;  %v13113_v5 = vpack.c.bf16 %v5634_v15, %v5633_v39 }
 0xd29   :  { %v5166_v24 = vmax.f32 %v5161_v13, 0.0  ;;  %v5140_v14 = vadd.f32 %v5139_v35, %v16999_v33  ;;  %v12096_v4 = vpop.f32.mrb[105].mxu0  ;;  %13106 = vmatprep.subr.bf16.mxu1 %v13105_v34  ;;  %v13161_v13 = vpack.c.bf16 %v6610_v42, %v6609_v16  ;;  %v6788_v35 = vld [vmem:[%s19064_s1] sm:$0xff] }
 0xd2a   :  { %v6790_v4 = vld [vmem:[%s19064_s1 + $0x10] sm:$0xff] }
 0xd2b   :  { %v5162_v46 = vadd.f32 %v10416_v22, %v5140_v14  ;;  %12115 = vmatmul.mubr.msk.f32.gmra.mrb[92].mxu1 %vm1084_vm5, %v5166_v24  ;;  %v6789_v24 = vld [vmem:[%s19064_s1 + $0x8] sm:$0xff] }
 0xd2c   :  { %v5144_v51 = vpop.f32.mrb[106].mxu0  ;;  %12117 = vmatprep.mubr.msk.f32.mxu1 %vm14842_vm2, %v18997_v56  ;;  %13108 = vmatpush3.bf16.msra.mxu1 %v13105_v34  ;;  %v13158_v34 = vpack.c.bf16 %v6608_v60, %v6607_v47  ;;  %v13164_v14 = vpack.c.bf16 %v6789_v24, %v6788_v35 }
 0xd2d   :  { %v5167_v9 = vmax.f32 %v5162_v46, 0.0  ;;  %v5145_v20 = vadd.f32 %v5144_v51, %v17001_v50  ;;  %v12099_v41 = vpop.f32.mrb[107].mxu0  ;;  %13110 = vmatprep.subr.bf16.mxu1 %v13109_v62  ;;  %v17186_v51 = vpack.c.bf16 %v16920_v55, %v16912_v32 }
 0xd2f   :  { %v5163_v7 = vadd.f32 %v10416_v22, %v5145_v20  ;;  %12118 = vmatmul.mubr.msk.f32.gmra.mrb[94].mxu1 %vm1084_vm5, %v5167_v9  ;;  %v10417_v9 = vld [vmem:[#allocation2] ss:$0 sm:$0xff] }
 0xd30   :  { %v5149_v33 = vpop.f32.mrb[108].mxu0  ;;  %12120 = vmatprep.mubr.msk.f32.mxu1 %vm14842_vm2, %v18997_v56 }
 0xd31   :  { %v5168_v28 = vmax.f32 %v5163_v7, 0.0  ;;  %v5150_v2 = vadd.f32 %v5149_v33, %v17007_v38  ;;  %v12102_v43 = vpop.f32.mrb[109].mxu0 }
 0xd33   :  { %v5164_v36 = vadd.f32 %v10416_v22, %v5150_v2  ;;  %12121 = vmatmul.mubr.msk.f32.gmra.mrb[96].mxu1 %vm1084_vm5, %v5168_v28 }
 0xd34   :  { %12123 = vmatprep.mubr.msk.f32.mxu1 %vm14842_vm2, %v18997_v56 }
 0xd35   :  { %v5169_v50 = vmax.f32 %v5164_v36, 0.0 }
 0xd37   :  { %12124 = vmatmul.mubr.msk.f32.gmra.mrb[98].mxu1 %vm1084_vm5, %v5169_v50 }
 0xd38   :  { %v12152_v6 = vpop.f32.mrb[110].mxu0 }
 0xd39   :  { %v5400_v11 = vpop.f32.mrb[111].mxu0 }
 0xd3a   :  { %12176 = vmatprep.mubr.msk.f32.mxu1 %vm1084_vm5, %v5400_v11 }
 0xd3b   :  { %12177 = vmatmul.mubr.msk.f32.vlgmr.msra.gmra.mrb[100].mxu1 %vm1084_vm5, %v12152_v6 }
 0xd3c   :  { %v12155_v38 = vpop.f32.mrb[112].mxu0  ;;  %13112 = vmatpush3.bf16.msra.mxu1 %v13109_v62  ;;  %v6791_v62 = vld [vmem:[%s19064_s1 + $0x18] sm:$0xff] }
 0xd3d   :  { %v5410_v23 = vpop.f32.mrb[113].mxu0  ;;  %13114 = vmatprep.subr.bf16.mxu1 %v13113_v5  ;;  %v13167_v46 = vpack.c.bf16 %v6791_v62, %v6790_v4 }
 0xd3e   :  { %12179 = vmatprep.mubr.msk.f32.mxu1 %vm1084_vm5, %v5410_v23 }
 0xd3f   :  { %12180 = vmatmul.mubr.msk.f32.gmra.mrb[102].mxu1 %vm1084_vm5, %v12155_v38 }
 0xd40   :  { %v12158_v22 = vpop.f32.mrb[114].mxu0  ;;  %13116 = vmatpush3.bf16.msra.mxu1 %v13113_v5 }
 0xd41   :  { %v5420_v59 = vpop.f32.mrb[115].mxu0  ;;  %13157 = vmatprep.subr.bf16.mxu1 %v19000_v27 }
 0xd42   :  { %12182 = vmatprep.mubr.msk.f32.mxu1 %vm1084_vm5, %v5420_v59 }
 0xd43   :  { %12183 = vmatmul.mubr.msk.f32.gmra.mrb[104].mxu1 %vm1084_vm5, %v12158_v22 }
 0xd44   :  { %v12161_v1 = vpop.f32.mrb[116].mxu0 }
 0xd45   :  { %v5430_v8 = vpop.f32.mrb[117].mxu0 }
 0xd46   :  { %12185 = vmatprep.mubr.msk.f32.mxu1 %vm1084_vm5, %v5430_v8 }
 0xd47   :  { %12186 = vmatmul.mubr.msk.f32.gmra.mrb[106].mxu1 %vm1084_vm5, %v12161_v1 }
 0xd48   :  { %v12164_v45 = vpop.f32.mrb[118].mxu0 }
 0xd49   :  { %v5440_v10 = vpop.f32.mrb[119].mxu0 }
 0xd4a   :  { %12188 = vmatprep.mubr.msk.f32.mxu1 %vm1084_vm5, %v5440_v10 }
 0xd4b   :  { %12189 = vmatmul.mubr.msk.f32.gmra.mrb[108].mxu1 %vm1084_vm5, %v12164_v45 }
 0xd4c   :  { %v12167_v31 = vpop.f32.mrb[120].mxu0 }
 0xd4d   :  { %v5450_v48 = vpop.f32.mrb[121].mxu0 }
 0xd4e   :  { %12191 = vmatprep.mubr.msk.f32.mxu1 %vm1084_vm5, %v5450_v48 }
 0xd4f   :  { %12192 = vmatmul.mubr.msk.f32.gmra.mrb[110].mxu1 %vm1084_vm5, %v12167_v31 }
 0xd50   :  { %12202 = vmatprep.mubr.msk.f32.mxu1 %vm1084_vm5, %v16762_v44 }
 0xd53   :  { %12203 = vmatmul.mubr.msk.f32.vlgmr.msra.gmra.mrb[100].mxu1 %vm1084_vm5, %v16765_v54 }
 0xd54   :  { %12205 = vmatprep.mubr.msk.f32.mxu1 %vm1084_vm5, %v16780_v57  ;;  %13159 = vmatpush3.bf16.msra.mxu1 %v13158_v34 }
 0xd55   :  { %13160 = vmatprep.subr.bf16.mxu1 %v19000_v27 }
 0xd57   :  { %12206 = vmatmul.mubr.msk.f32.gmra.mrb[102].mxu1 %vm1084_vm5, %v16786_v21 }
 0xd58   :  { %12208 = vmatprep.mubr.msk.f32.mxu1 %vm1084_vm5, %v16807_v58  ;;  %13162 = vmatpush3.bf16.msra.mxu1 %v13161_v13 }
 0xd59   :  { %13163 = vmatprep.subr.bf16.mxu1 %v19000_v27 }
 0xd5b   :  { %12209 = vmatmul.mubr.msk.f32.gmra.mrb[104].mxu1 %vm1084_vm5, %v16800_v17 }
 0xd5c   :  { %12211 = vmatprep.mubr.msk.f32.mxu1 %vm1084_vm5, %v16829_v63 }
 0xd5f   :  { %12212 = vmatmul.mubr.msk.f32.gmra.mrb[106].mxu1 %vm1084_vm5, %v16831_v52 }
 0xd60   :  { %12214 = vmatprep.mubr.msk.f32.mxu1 %vm1084_vm5, %v16849_v53 }
 0xd63   :  { %12215 = vmatmul.mubr.msk.f32.gmra.mrb[108].mxu1 %vm1084_vm5, %v16853_v49 }
 0xd64   :  { %12217 = vmatprep.mubr.msk.f32.mxu1 %vm1084_vm5, %v16863_v12 }
 0xd67   :  { %12218 = vmatmul.mubr.msk.f32.gmra.mrb[110].mxu1 %vm1084_vm5, %v16865_v3 }
 0xd68   :  { %12322 = vmatprep.mubr.msk.f32.mxu1 %vm14842_vm2, %v18997_v56 }
 0xd6b   :  { %12323 = vmatmul.mubr.msk.f32.vlgmr.msra.gmra.mrb[112].mxu1 %vm1084_vm5, %v16912_v32 }
 0xd6c   :  { %13165 = vmatpush3.bf16.msra.mxu1 %v13164_v14  ;;  %12325 = vmatprep.mubr.msk.f32.mxu1 %vm14842_vm2, %v18997_v56 }
 0xd6d   :  { %13166 = vmatprep.subr.bf16.mxu1 %v19000_v27 }
 0xd6f   :  { %12326 = vmatmul.mubr.msk.f32.gmra.mrb[114].mxu1 %vm1084_vm5, %v16920_v55 }
 0xd70   :  { %13168 = vmatpush3.bf16.msra.mxu1 %v13167_v46  ;;  %12328 = vmatprep.mubr.msk.f32.mxu1 %vm14842_vm2, %v18997_v56 }
 0xd71   :  { %13170 = vmatprep.subr.bf16.mxu1 %v17186_v51 }
 0xd73   :  { %12329 = vmatmul.mubr.msk.f32.gmra.mrb[116].mxu1 %vm1084_vm5, %v16926_v29 }
 0xd74   :  { %12331 = vmatprep.mubr.msk.f32.mxu1 %vm14842_vm2, %v18997_v56 }
 0xd77   :  { %12332 = vmatmul.mubr.msk.f32.gmra.mrb[118].mxu1 %vm1084_vm5, %v16932_v40 }
 0xd78   :  { %12334 = vmatprep.mubr.msk.f32.mxu1 %vm14842_vm2, %v18997_v56 }
 0xd7b   :  { %12335 = vmatmul.mubr.msk.f32.gmra.mrb[120].mxu1 %vm1084_vm5, %v16938_v0 }
 0xd7c   :  { %12345 = vmatprep.mubr.msk.f32.mxu1 %vm14842_vm2, %v18997_v56 }
 0xdfa   :  { %v5262_v20 = vpop.f32.mrb[90].mxu1 }
 0xdfb   :  { %v5263_v41 = vadd.f32 %v10417_v9, %v5262_v20  ;;  %v12113_v7 = vpop.f32.mrb[91].mxu1 }
 0xdfd   :  { %v10423_v33 = vmul.f32 -1.442695, %v5263_v41 }
 0xdfe   :  { %v5267_v28 = vpop.f32.mrb[92].mxu1 }
 0xdff   :  { %13899 = vpow2.f32 %v10423_v33  ;;  %v5268_v2 = vadd.f32 %v10417_v9, %v5267_v28  ;;  %v12116_v43 = vpop.f32.mrb[93].mxu1 }
 0xe00   :  { %v17209_v43 = vld [vmem:[#allocation27] ss:$0 sm:$0xff] }
 0xe01   :  { %v10424_v36 = vmul.f32 -1.442695, %v5268_v2 }
 0xe02   :  { %v5272_v50 = vpop.f32.mrb[94].mxu1 }
 0xe03   :  { %13901 = vpow2.f32 %v10424_v36  ;;  %v5273_v39 = vadd.f32 %v10417_v9, %v5272_v50  ;;  %v12119_v15 = vpop.f32.mrb[95].mxu1 }
 0xe05   :  { %v10425_v6 = vmul.f32 -1.442695, %v5273_v39 }
 0xe06   :  { %v5277_v11 = vpop.f32.mrb[96].mxu1 }
 0xe07   :  { %13903 = vpow2.f32 %v10425_v6  ;;  %v5278_v5 = vadd.f32 %v10417_v9, %v5277_v11  ;;  %v12122_v38 = vpop.f32.mrb[97].mxu1 }
 0xe09   :  { %v13900_v23 = vpop.eup %13899  ;;  %v10426_v22 = vmul.f32 -1.442695, %v5278_v5 }
 0xe0a   :  { %v5301_v59 = vadd.f32 1.0, %v13900_v23  ;;  %v5282_v1 = vpop.f32.mrb[98].mxu1 }
 0xe0b   :  { %13905 = vpow2.f32 %v10426_v22  ;;  %v5283_v8 = vadd.f32 %v10417_v9, %v5282_v1  ;;  %v12125_v45 = vpop.f32.mrb[99].mxu1  ;;  %v4824_v9 = vrot.slane %v17080_v25, 4 }
 0xe0c   :  { %13907 = vrcp.f32 %v5301_v59 }
 0xe0d   :  { %v13902_v10 = vpop.eup %13901  ;;  %v10427_v31 = vmul.f32 -1.442695, %v5283_v8  ;;  %v4825_v33 = vadd.f32 %v4824_v9, %v17080_v25 }
 0xe0e   :  { %v5302_v48 = vadd.f32 1.0, %v13902_v10 }
 0xe0f   :  { %13909 = vpow2.f32 %v10427_v31  ;;  %v4826_v39 = vrot.slane %v4825_v33, 2 }
 0xe10   :  { %13911 = vrcp.f32 %v5302_v48 }
 0xe11   :  { %v13904_v47 = vpop.eup %13903  ;;  %v4827_v1 = vadd.f32 %v4826_v39, %v4825_v33 }
 0xe12   :  { %v5303_v60 = vadd.f32 1.0, %v13904_v47 }
 0xe14   :  { %13913 = vrcp.f32 %v5303_v60 }
 0xe15   :  { %v13906_v34 = vpop.eup %13905 }
 0xe16   :  { %v5304_v16 = vadd.f32 1.0, %v13906_v34  ;;  %v13908_v42 = vpop.eup %13907 }
 0xe17   :  { %v5316_v14 = vsel %vm4800_vm15, %v13908_v42, 0.0  ;;  %v4828_v42 = vrot.slane %v4827_v1, 1 }
 0xe18   :  { %13915 = vrcp.f32 %v5304_v16 }
 0xe19   :  { %v13910_v13 = vpop.eup %13909 }
 0xe1a   :  { %v13912_v35 = vpop.eup %13911  ;;  %v5305_v24 = vadd.f32 1.0, %v13910_v13 }
 0xe1b   :  { %v5317_v4 = vsel %vm4800_vm15, %v13912_v35, 0.0 }
 0xe1c   :  { %v5318_v62 = vadd.f32 %v5317_v4, %v5316_v14  ;;  %13917 = vrcp.f32 %v5305_v24 }
 0xe1e   :  { %v13914_v46 = vpop.eup %13913 }
 0xe1f   :  { %v5319_v20 = vsel %vm4800_vm15, %v13914_v46, 0.0 }
 0xe20   :  { %v5320_v41 = vadd.f32 %v5319_v20, %v5318_v62 }
 0xe22   :  { %v13916_v7 = vpop.eup %13915 }
 0xe23   :  { %v5321_v28 = vsel %vm4800_vm15, %v13916_v7, 0.0  ;;  %v4829_v7 = vadd.f32 %v4828_v42, %v4827_v1 }
 0xe24   :  { %v5322_v2 = vadd.f32 %v5321_v28, %v5320_v41 }
 0xe26   :  { %v13918_v36 = vpop.eup %13917  ;;  %v12204_v50 = vpop.f32.mrb[100].mxu1 }
 0xe27   :  { %v5324_v15 = vsel %vm18895_vm14, %v13918_v36, 0.0  ;;  %v17213_v6 = vadd.f32 %v12204_v50, %v17209_v43  ;;  %v5701_v11 = vpop.f32.mrb[101].mxu1 }
 0xe28   :  { %v5325_v5 = vadd.f32 %v5324_v15, %v5322_v2  ;;  %v17216_v38 = vadd.f32 %v17209_v43, %v5701_v11 }
 0xe29   :  { %v5773_v25 = vmul.f32 %v17213_v6, %v17213_v6 }
 0xe2a   :  { %v5326_v23 = vrot.slane %v5325_v5, 4  ;;  %v12207_v22 = vpop.f32.mrb[102].mxu1  ;;  %v5772_v59 = vmul.f32 %v17216_v38, %v17216_v38 }
 0xe2b   :  { %v17223_v8 = vadd.f32 %v12207_v22, %v17209_v43  ;;  %v5711_v45 = vpop.f32.mrb[103].mxu1  ;;  %v5787_v10 = vsel %vm1084_vm5, %v5773_v25, 0.0 }
 0xe2c   :  { %v17227_v31 = vadd.f32 %v17209_v43, %v5711_v45  ;;  %5788 = vadd.xlane.f32.xlu1 %v5787_v10  ;;  %v5784_v48 = vsel %vm1084_vm5, %v5772_v59, 0.0  ;;  %v5327_v47 = vadd.f32 %v5326_v23, %v5325_v5  ;;  %v4830_v23 = vmul.f32 0.010416667, %v4829_v7 }
 0xe2d   :  { %5785 = vadd.xlane.f32.xlu0 %v5784_v48  ;;  %v5775_v60 = vmul.f32 %v17223_v8, %v17223_v8 }
 0xe2e   :  { %v12210_v34 = vpop.f32.mrb[104].mxu1  ;;  %v5774_v16 = vmul.f32 %v17227_v31, %v17227_v31  ;;  %v5328_v13 = vrot.slane %v5327_v47, 2 }
 0xe2f   :  { %v17235_v35 = vadd.f32 %v12210_v34, %v17209_v43  ;;  %v5721_v24 = vpop.f32.mrb[105].mxu1  ;;  %v5793_v14 = vsel %vm1084_vm5, %v5775_v60, 0.0 }
 0xe30   :  { %v17239_v4 = vadd.f32 %v17209_v43, %v5721_v24  ;;  %5794 = vadd.xlane.f32.xlu1 %v5793_v14  ;;  %v5790_v62 = vsel %vm1084_vm5, %v5774_v16, 0.0  ;;  %v5329_v46 = vadd.f32 %v5328_v13, %v5327_v47 }
 0xe31   :  { %5791 = vadd.xlane.f32.xlu0 %v5790_v62  ;;  %v5777_v9 = vmul.f32 %v17235_v35, %v17235_v35 }
 0xe32   :  { %v12213_v20 = vpop.f32.mrb[106].mxu1  ;;  %v5776_v41 = vmul.f32 %v17239_v4, %v17239_v4  ;;  %v5330_v33 = vrot.slane %v5329_v46, 1 }
 0xe33   :  { %v17247_v28 = vadd.f32 %v12213_v20, %v17209_v43  ;;  %v5731_v2 = vpop.f32.mrb[107].mxu1  ;;  %v5799_v36 = vsel %vm1084_vm5, %v5777_v9, 0.0 }
 0xe34   :  { %v17251_v50 = vadd.f32 %v17209_v43, %v5731_v2  ;;  %5800 = vadd.xlane.f32.xlu1 %v5799_v36  ;;  %v5796_v39 = vsel %vm1084_vm5, %v5776_v41, 0.0  ;;  %v5331_v15 = vadd.f32 %v5330_v33, %v5329_v46  ;;  %v10507_v46 = vld [vmem:[#allocation24] ss:$0 sm:$0xff] }
 0xe35   :  { %5797 = vadd.xlane.f32.xlu0 %v5796_v39  ;;  %v5779_v11 = vmul.f32 %v17247_v28, %v17247_v28 }
 0xe36   :  { %v12216_v5 = vpop.f32.mrb[108].mxu1  ;;  %v5778_v25 = vmul.f32 %v17251_v50, %v17251_v50  ;;  %v5332_v22 = vmul.f32 0.027777778, %v5331_v15 }
 0xe37   :  { %v17259_v59 = vadd.f32 %v12216_v5, %v17209_v43  ;;  %v5741_v1 = vpop.f32.mrb[109].mxu1  ;;  %v5805_v45 = vsel %vm1084_vm5, %v5779_v11, 0.0 }
 0xe38   :  { %v17263_v10 = vadd.f32 %v17209_v43, %v5741_v1  ;;  %5806 = vadd.xlane.f32.xlu1 %v5805_v45  ;;  %v5802_v48 = vsel %vm1084_vm5, %v5778_v25, 0.0  ;;  %v17266_v47 = vadd.f32 %v5332_v22, %v4830_v23 }
 0xe39   :  { %5803 = vadd.xlane.f32.xlu0 %v5802_v48  ;;  %v5781_v60 = vmul.f32 %v17259_v59, %v17259_v59 }
 0xe3a   :  { %19065 = vst [vmem:[#allocation116_spill] sm:$0xff] %v17266_v47  ;;  %v12219_v34 = vpop.f32.mrb[110].mxu1  ;;  %v5780_v16 = vmul.f32 %v17263_v10, %v17263_v10 }
 0xe3b   :  { %v17273_v42 = vadd.f32 %v12219_v34, %v17209_v43  ;;  %v5751_v13 = vpop.f32.mrb[111].mxu1  ;;  %v5811_v24 = vsel %vm1084_vm5, %v5781_v60, 0.0 }
 0xe3c   :  { %v17277_v14 = vadd.f32 %v17209_v43, %v5751_v13  ;;  %5812 = vadd.xlane.f32.xlu1 %v5811_v24  ;;  %v5808_v62 = vsel %vm1084_vm5, %v5780_v16, 0.0 }
 0xe3d   :  { %5809 = vadd.xlane.f32.xlu0 %v5808_v62  ;;  %v5783_v9 = vmul.f32 %v17273_v42, %v17273_v42 }
 0xe3e   :  { %v6677_v20 = vpop.f32.mrb[112].mxu1  ;;  %v5782_v41 = vmul.f32 %v17277_v14, %v17277_v14 }
 0xe3f   :  { %v17284_v7 = vadd.f32 %v10507_v46, %v6677_v20  ;;  %v12324_v33 = vpop.f32.mrb[113].mxu1  ;;  %v5817_v2 = vsel %vm1084_vm5, %v5783_v9, 0.0 }
 0xe40   :  { %5818 = vadd.xlane.f32.xlu1 %v5817_v2  ;;  %v5814_v43 = vsel %vm1084_vm5, %v5782_v41, 0.0 }
 0xe41   :  { %5815 = vadd.xlane.f32.xlu0 %v5814_v43  ;;  %v6712_v36 = vmul.f32 %v17284_v7, %v17284_v7 }
 0xe42   :  { %v6682_v39 = vpop.f32.mrb[114].mxu1 }
 0xe43   :  { %v17290_v15 = vadd.f32 %v10507_v46, %v6682_v39  ;;  %v12327_v11 = vpop.f32.mrb[115].mxu1  ;;  %v6717_v5 = vsel %vm1084_vm5, %v6712_v36, 0.0 }
 0xe45   :  { %6718 = vadd.xlane.f32.xlu0 %v6717_v5  ;;  %v6713_v25 = vmul.f32 %v17290_v15, %v17290_v15 }
 0xe46   :  { %v6687_v23 = vpop.f32.mrb[116].mxu1 }
 0xe47   :  { %v17295_v22 = vadd.f32 %v10507_v46, %v6687_v23  ;;  %v12330_v1 = vpop.f32.mrb[117].mxu1  ;;  %v6720_v45 = vsel %vm1084_vm5, %v6713_v25, 0.0 }
 0xe48   :  { %6721 = vadd.xlane.f32.xlu1 %v6720_v45 }
 0xe49   :  { %v6714_v48 = vmul.f32 %v17295_v22, %v17295_v22 }
 0xe4a   :  { %v6692_v60 = vpop.f32.mrb[118].mxu1 }
 0xe4b   :  { %v17300_v34 = vadd.f32 %v10507_v46, %v6692_v60  ;;  %v12333_v16 = vpop.f32.mrb[119].mxu1  ;;  %v6723_v13 = vsel %vm1084_vm5, %v6714_v48, 0.0 }
 0xe4c   :  { %6724 = vadd.xlane.f32.xlu0 %v6723_v13 }
 0xe4d   :  { %v6715_v24 = vmul.f32 %v17300_v34, %v17300_v34 }
 0xe4e   :  { %v6697_v62 = vpop.f32.mrb[120].mxu1 }
 0xe4f   :  { %v17305_v9 = vadd.f32 %v10507_v46, %v6697_v62  ;;  %v12336_v20 = vpop.f32.mrb[121].mxu1  ;;  %v6726_v41 = vsel %vm1084_vm5, %v6715_v24, 0.0 }
 0xe50   :  { %6727 = vadd.xlane.f32.xlu1 %v6726_v41 }
 0xe51   :  { %v6716_v33 = vmul.f32 %v17305_v9, %v17305_v9 }
 0xe53   :  { %v6729_v2 = vsel %vm2395_vm6, %v6716_v33, 0.0 }
 0xe54   :  { %6730 = vadd.xlane.f32.xlu0 %v6729_v2 }
 0xeb9   :  { %v5789_v43 = vpop.xlane.xlu1 %5788 }
 0xeba   :  { %13919 = vrsqrt.f32 %v5789_v43  ;;  %v5786_v36 = vpop.xlane.xlu0 %5785  ;;  %vm5829_vm1 = vcmp.eq.f32.partialorder %v5789_v43, inf  ;;  %vm5831_vm7 = vcmp.eq.f32.partialorder %v5789_v43, 0.0  ;;  %v5832_v23 = vand.u32 2147483648, %v5789_v43 }
 0xebb   :  { %13921 = vrsqrt.f32 %v5786_v36  ;;  %vm5822_vm8 = vcmp.eq.f32.partialorder %v5786_v36, inf  ;;  %vm5824_vm9 = vcmp.eq.f32.partialorder %v5786_v36, 0.0  ;;  %v5825_v48 = vand.u32 2147483648, %v5786_v36 }
 0xebd   :  { %v5795_v39 = vpop.xlane.xlu1 %5794 }
 0xebe   :  { %13923 = vrsqrt.f32 %v5795_v39  ;;  %v5792_v11 = vpop.xlane.xlu0 %5791  ;;  %vm5843_vm11 = vcmp.eq.f32.partialorder %v5795_v39, inf  ;;  %vm5845_vm12 = vcmp.eq.f32.partialorder %v5795_v39, 0.0  ;;  %v5846_v13 = vand.u32 2147483648, %v5795_v39 }
 0xebf   :  { %13925 = vrsqrt.f32 %v5792_v11  ;;  %vm5836_vm10 = vcmp.eq.f32.partialorder %v5792_v11, inf  ;;  %vm5838_vm13 = vcmp.eq.f32.partialorder %v5792_v11, 0.0  ;;  %v5839_v20 = vand.u32 2147483648, %v5792_v11 }
 0xec1   :  { %v17311_v46 = vpop.xlane.xlu1 %5800 }
 0xec2   :  { %13927 = vrsqrt.f32 %v17311_v46  ;;  %v17314_v5 = vpop.xlane.xlu0 %5797  ;;  %vm5857_vm0 = vcmp.eq.f32.partialorder %v17311_v46, inf  ;;  %vm5859_vm14 = vcmp.eq.f32.partialorder %v17311_v46, 0.0 }
 0xec3   :  { %13929 = vrsqrt.f32 %v17314_v5 }
 0xec4   :  { %v13920_v25 = vpop.eup %13919 }
 0xec5   :  { %v13922_v1 = vpop.eup %13921  ;;  %v5828_v45 = vmul.f32 %v13920_v25, %v5789_v43  ;;  %v17317_v60 = vpop.xlane.xlu1 %5806 }
 0xec6   :  { %v5821_v16 = vmul.f32 %v13922_v1, %v5786_v36  ;;  %13931 = vrsqrt.f32 %v17317_v60  ;;  %v17320_v24 = vpop.xlane.xlu0 %5803 }
 0xec7   :  { %v5830_v62 = vsel %vm5829_vm1, %v5789_v43, %v5828_v45  ;;  %13933 = vrsqrt.f32 %v17320_v24  ;;  %v5860_v45 = vand.u32 2147483648, %v17311_v46  ;;  %vm5850_vm1 = vcmp.eq.f32.partialorder %v17314_v5, inf }
 0xec8   :  { %v13924_v41 = vpop.eup %13923  ;;  %v5833_v33 = vsel %vm5831_vm7, %v5832_v23, %v5830_v62  ;;  %v5823_v2 = vsel %vm5822_vm8, %v5786_v36, %v5821_v16  ;;  %vm5852_vm7 = vcmp.eq.f32.partialorder %v17314_v5, 0.0  ;;  %v5853_v36 = vand.u32 2147483648, %v17314_v5 }
 0xec9   :  { %v13926_v25 = vpop.eup %13925  ;;  %v5905_v1 = vmax.f32 %v5833_v33, 1e-12  ;;  %v5826_v47 = vsel %vm5824_vm9, %v5825_v48, %v5823_v2  ;;  %v5842_v3 = vmul.f32 %v13924_v41, %v5795_v39  ;;  %v17330_v12 = vpop.xlane.xlu1 %5812  ;;  %vm5871_vm8 = vcmp.eq.f32.partialorder %v17317_v60, inf }
 0xeca   :  { %v5904_v49 = vmax.f32 %v5826_v47, 1e-12  ;;  %v5835_v53 = vmul.f32 %v13926_v25, %v5792_v11  ;;  %13935 = vrsqrt.f32 %v17330_v12  ;;  %v17334_v43 = vpop.xlane.xlu0 %5809  ;;  %vm5873_vm9 = vcmp.eq.f32.partialorder %v17317_v60, 0.0 }
 0xecb   :  { %13937 = vrcp.f32 %v5905_v1  ;;  %v5844_v23 = vsel %vm5843_vm11, %v5795_v39, %v5842_v3  ;;  %vm5864_vm11 = vcmp.eq.f32.partialorder %v17320_v24, inf }
 0xecc   :  { %v13928_v48 = vpop.eup %13927  ;;  %13939 = vrcp.f32 %v5904_v49  ;;  %v5847_v16 = vsel %vm5845_vm12, %v5846_v13, %v5844_v23  ;;  %v5837_v47 = vsel %vm5836_vm10, %v5792_v11, %v5835_v53  ;;  %v5874_v49 = vand.u32 2147483648, %v17317_v60 }
 0xecd   :  { %v13930_v62 = vpop.eup %13929  ;;  %v5907_v41 = vmax.f32 %v5847_v16, 1e-12  ;;  %v5840_v33 = vsel %vm5838_vm13, %v5839_v20, %v5837_v47  ;;  %v5856_v2 = vmul.f32 %v13928_v48, %v17311_v46  ;;  %13941 = vrsqrt.f32 %v17334_v43  ;;  %v17348_v39 = vpop.xlane.xlu1 %5818 }
 0xece   :  { %v5906_v3 = vmax.f32 %v5840_v33, 1e-12  ;;  %v5849_v25 = vmul.f32 %v13930_v62, %v17314_v5  ;;  %v17350_v53 = vpop.xlane.xlu0 %5815  ;;  %vm5866_vm12 = vcmp.eq.f32.partialorder %v17320_v24, 0.0  ;;  %v5867_v23 = vand.u32 2147483648, %v17320_v24 }
 0xecf   :  { %13943 = vrcp.f32 %v5907_v41  ;;  %v5858_v11 = vsel %vm5857_vm0, %v17311_v46, %v5856_v2  ;;  %vm5885_vm10 = vcmp.eq.f32.partialorder %v17330_v12, inf  ;;  %vm5878_vm13 = vcmp.eq.f32.partialorder %v17334_v43, inf }
 0xed0   :  { %v13932_v13 = vpop.eup %13931  ;;  %13945 = vrcp.f32 %v5906_v3  ;;  %v5861_v20 = vsel %vm5859_vm14, %v5860_v45, %v5858_v11  ;;  %v5851_v1 = vsel %vm5850_vm1, %v17314_v5, %v5849_v25  ;;  %vm5887_vm14 = vcmp.eq.f32.partialorder %v17330_v12, 0.0 }
 0xed1   :  { %v13934_v48 = vpop.eup %13933  ;;  %v5909_v16 = vmax.f32 %v5861_v20, 1e-12  ;;  %v5854_v47 = vsel %vm5852_vm7, %v5853_v36, %v5851_v1  ;;  %v5870_v62 = vmul.f32 %v13932_v13, %v17317_v60  ;;  %13947 = vrsqrt.f32 %v17348_v39 }
 0xed2   :  { %v5863_v41 = vmul.f32 %v13934_v48, %v17320_v24  ;;  %13949 = vrsqrt.f32 %v17350_v53  ;;  %v17371_v46 = vpop.xlane.xlu0 %6718  ;;  %v5908_v45 = vmax.f32 %v5854_v47, 1e-12  ;;  %v5888_v36 = vand.u32 2147483648, %v17330_v12 }
 0xed3   :  { %v5872_v5 = vsel %vm5871_vm8, %v17317_v60, %v5870_v62  ;;  %13951 = vrcp.f32 %v5909_v16  ;;  %vm5880_vm0 = vcmp.eq.f32.partialorder %v17334_v43, 0.0  ;;  %vm5899_vm1 = vcmp.eq.f32.partialorder %v17348_v39, inf }
 0xed4   :  { %v13936_v33 = vpop.eup %13935  ;;  %v5875_v2 = vsel %vm5873_vm9, %v5874_v49, %v5872_v5  ;;  %v5865_v3 = vsel %vm5864_vm11, %v17320_v24, %v5863_v41  ;;  %13953 = vrsqrt.f32 %v17371_v46  ;;  %v5881_v49 = vand.u32 2147483648, %v17334_v43 }
 0xed5   :  { %v13938_v25 = vpop.eup %13937  ;;  %v5911_v11 = vmax.f32 %v5875_v2, 1e-12  ;;  %v5868_v13 = vsel %vm5866_vm12, %v5867_v23, %v5865_v3  ;;  %v5884_v20 = vmul.f32 %v13936_v33, %v17330_v12  ;;  %v17388_v1 = vpop.xlane.xlu1 %6721  ;;  %vm5901_vm7 = vcmp.eq.f32.partialorder %v17348_v39, 0.0 }
 0xed6   :  { %v13940_v48 = vpop.eup %13939  ;;  %v5910_v60 = vmax.f32 %v5868_v13, 1e-12  ;;  %13955 = vrsqrt.f32 %v17388_v1  ;;  %v5902_v23 = vand.u32 2147483648, %v17348_v39  ;;  %vm5892_vm8 = vcmp.eq.f32.partialorder %v17350_v53, inf }
 0xed7   :  { %v13942_v16 = vpop.eup %13941  ;;  %13957 = vrcp.f32 %v5908_v45  ;;  %v5886_v24 = vsel %vm5885_vm10, %v17330_v12, %v5884_v20  ;;  %v17405_v33 = vmul.f32 %v13940_v48, %v17216_v38  ;;  %v17408_v2 = vmul.f32 %v13938_v25, %v17213_v6 }
 0xed8   :  { %13959 = vrcp.f32 %v5911_v11  ;;  %v5889_v47 = vsel %vm5887_vm14, %v5888_v36, %v5886_v24  ;;  %v5877_v62 = vmul.f32 %v13942_v16, %v17334_v43  ;;  %vm5894_vm9 = vcmp.eq.f32.partialorder %v17350_v53, 0.0 }
 0xed9   :  { %v13944_v41 = vpop.eup %13943  ;;  %13961 = vrcp.f32 %v5910_v60  ;;  %v5913_v5 = vmax.f32 %v5889_v47, 1e-12  ;;  %v17402_v45 = vpop.xlane.xlu0 %6724  ;;  %v5895_v36 = vand.u32 2147483648, %v17350_v53  ;;  %vm6734_vm11 = vcmp.eq.f32.partialorder %v17371_v46, inf }
 0xeda   :  { %v13946_v3 = vpop.eup %13945  ;;  %v5879_v12 = vsel %vm5878_vm13, %v17334_v43, %v5877_v62  ;;  %13963 = vrsqrt.f32 %v17402_v45  ;;  %v5940_v6 = vmax.f32 %v17405_v33, 0.0  ;;  %vm6736_vm12 = vcmp.eq.f32.partialorder %v17371_v46, 0.0 }
 0xedb   :  { %v13948_v11 = vpop.eup %13947  ;;  %13965 = vrcp.f32 %v5913_v5  ;;  %v5882_v38 = vsel %vm5880_vm0, %v5881_v49, %v5879_v12  ;;  %v5941_v48 = vmax.f32 %v17408_v2, 0.0  ;;  %v6737_v16 = vand.u32 2147483648, %v17371_v46  ;;  %v7202_v2 = vld [vmem:[%s19081_s27 + $0x10] sm:$0xff] }
 0xedc   :  { %v13950_v25 = vpop.eup %13949  ;;  %v5912_v13 = vmax.f32 %v5882_v38, 1e-12  ;;  %v5898_v20 = vmul.f32 %v13948_v11, %v17348_v39  ;;  %v17428_v43 = vmul.f32 %v13946_v3, %v17227_v31  ;;  %v17431_v49 = vmul.f32 %v13944_v41, %v17223_v8 }
 0xedd   :  { %v5891_v60 = vmul.f32 %v13950_v25, %v17350_v53  ;;  %v17425_v24 = vpop.xlane.xlu1 %6727  ;;  %v13952_v47 = vpop.eup %13951  ;;  %vm6741_vm10 = vcmp.eq.f32.partialorder %v17388_v1, inf  ;;  %v13117_v5 = vpack.c.bf16 %v5941_v48, %v5940_v6  ;;  %vm6743_vm14 = vcmp.eq.f32.partialorder %v17388_v1, 0.0 }
 0xede   :  { %13967 = vrcp.f32 %v5912_v13  ;;  %v5900_v62 = vsel %vm5899_vm1, %v17348_v39, %v5898_v20  ;;  %v13954_v12 = vpop.eup %13953  ;;  %v6744_v25 = vand.u32 2147483648, %v17388_v1  ;;  %v5942_v20 = vmax.f32 %v17428_v43, 0.0  ;;  %v14211_v43 = vld [vmem:[%s19005_s19 + $0x8] sm:$0xff] }
 0xedf   :  { %v5903_v31 = vsel %vm5901_vm7, %v5902_v23, %v5900_v62  ;;  %v5893_v8 = vsel %vm5892_vm8, %v17350_v53, %v5891_v60  ;;  %13969 = vrsqrt.f32 %v17425_v24  ;;  %v6733_v38 = vmul.f32 %v13954_v12, %v17371_v46  ;;  %13118 = vmatprep.subr.bf16.mxu0 %v13117_v5 }
 0xee0   :  { %v13956_v41 = vpop.eup %13955  ;;  %v5915_v3 = vmax.f32 %v5903_v31, 1e-12  ;;  %v5896_v11 = vsel %vm5894_vm9, %v5895_v36, %v5893_v8  ;;  %13120 = vmatpush3.bf16.msra.mxu0 %v13117_v5  ;;  %v5943_v60 = vmax.f32 %v17431_v49, 0.0  ;;  %vm6748_vm13 = vcmp.eq.f32.partialorder %v17402_v45, inf  ;;  %v14213_v49 = vld [vmem:[%s19005_s19 + $0x18] sm:$0xff] }
 0xee1   :  { %v13958_v39 = vpop.eup %13957  ;;  %v5914_v23 = vmax.f32 %v5896_v11, 1e-12  ;;  %v6740_v13 = vmul.f32 %v13956_v41, %v17388_v1  ;;  %v17455_v62 = vpop.xlane.xlu0 %6730  ;;  %v6735_v53 = vsel %vm6734_vm11, %v17371_v46, %v6733_v38  ;;  %vm6750_vm0 = vcmp.eq.f32.partialorder %v17402_v45, 0.0 }
 0xee2   :  { %v13960_v31 = vpop.eup %13959  ;;  %13971 = vrcp.f32 %v5915_v3  ;;  %v6738_v5 = vsel %vm6736_vm12, %v6737_v16, %v6735_v53  ;;  %v13121_v8 = vpack.c.bf16 %v5943_v60, %v5942_v20  ;;  %v6751_v38 = vand.u32 2147483648, %v17402_v45 }
 0xee3   :  { %v13962_v36 = vpop.eup %13961  ;;  %13973 = vrcp.f32 %v5914_v23  ;;  %v6742_v12 = vsel %vm6741_vm10, %v17388_v1, %v6740_v13  ;;  %v6767_v3 = vmax.f32 %v6738_v5, 1e-12  ;;  %v17477_v13 = vmul.f32 %v13958_v39, %v17239_v4 }
 0xee4   :  { %v13964_v41 = vpop.eup %13963  ;;  %v6745_v11 = vsel %vm6743_vm14, %v6744_v25, %v6742_v12  ;;  %13975 = vrsqrt.f32 %v17455_v62  ;;  %13122 = vmatprep.subr.bf16.mxu0 %v13121_v8  ;;  %v17480_v53 = vmul.f32 %v13952_v47, %v17235_v35  ;;  %v17483_v1 = vmul.f32 %v13962_v36, %v17251_v50 }
 0xee5   :  { %v13966_v46 = vpop.eup %13965  ;;  %v6768_v16 = vmax.f32 %v6745_v11, 1e-12  ;;  %v6747_v23 = vmul.f32 %v13964_v41, %v17402_v45  ;;  %13977 = vrcp.f32 %v6767_v3  ;;  %13124 = vmatpush3.bf16.msra.mxu0 %v13121_v8  ;;  %v17486_v25 = vmul.f32 %v13960_v31, %v17247_v28 }
 0xee6   :  { %v17489_v5 = vmul.f32 %v13966_v46, %v17259_v59  ;;  %v5944_v39 = vmax.f32 %v17477_v13, 0.0  ;;  %v5945_v35 = vmax.f32 %v17480_v53, 0.0  ;;  %v5946_v36 = vmax.f32 %v17483_v1, 0.0 }
 0xee7   :  { %13979 = vrcp.f32 %v6768_v16  ;;  %v6749_v4 = vsel %vm6748_vm13, %v17402_v45, %v6747_v23  ;;  %v5947_v28 = vmax.f32 %v17486_v25, 0.0  ;;  %vm6755_vm1 = vcmp.eq.f32.partialorder %v17425_v24, inf }
 0xee8   :  { %v13968_v47 = vpop.eup %13967  ;;  %v6752_v50 = vsel %vm6750_vm0, %v6751_v38, %v6749_v4  ;;  %v13125_v12 = vpack.c.bf16 %v5945_v35, %v5944_v39  ;;  %v18900_v41 = vmax.f32 %v17489_v5, 0.0  ;;  %v6758_v11 = vand.u32 2147483648, %v17425_v24 }
 0xee9   :  { %v13970_v31 = vpop.eup %13969  ;;  %v6769_v59 = vmax.f32 %v6752_v50, 1e-12  ;;  %v17505_v8 = vmul.f32 %v13968_v47, %v17263_v10  ;;  %v13129_v45 = vpack.c.bf16 %v5947_v28, %v5946_v36  ;;  %vm6757_vm7 = vcmp.eq.f32.partialorder %v17425_v24, 0.0 }
 0xeea   :  { %v6754_v3 = vmul.f32 %v13970_v31, %v17425_v24  ;;  %13126 = vmatprep.subr.bf16.mxu0 %v13125_v12  ;;  %vm6762_vm8 = vcmp.eq.f32.partialorder %v17455_v62, inf  ;;  %vm6764_vm9 = vcmp.eq.f32.partialorder %v17455_v62, 0.0  ;;  %vm19068_vm11 = vcmask 293888  }
 0xeeb   :  { %13981 = vrcp.f32 %v6769_v59  ;;  %v18901_v38 = vmax.f32 %v17505_v8, 0.0  ;;  %13128 = vmatpush3.bf16.msra.mxu0 %v13125_v12  ;;  %vm19069_vm12 = vmmov %vm19068_vm11  ;;  %v19083_v33 = vmax.f32 %v17489_v5, 0.0 }
 0xeec   :  { %v13972_v46 = vpop.eup %13971  ;;  %v6756_v10 = vsel %vm6755_vm1, %v17425_v24, %v6754_v3  ;;  %13130 = vmatprep.subr.bf16.mxu0 %v13129_v45  ;;  %vm19070_vm10 = vmmov %vm19068_vm11 }
 0xeed   :  { %v13974_v16 = vpop.eup %13973  ;;  %v6759_v23 = vsel %vm6757_vm7, %v6758_v11, %v6756_v10  ;;  %v13133_v4 = vpack.c.bf16 %v18900_v41, %v18901_v38  ;;  %v17523_v47 = vmul.f32 %v13972_v46, %v17273_v42  ;;  %v6765_v11 = vand.u32 2147483648, %v17455_v62  ;;  %vm19071_vm14 = vmmov %vm19070_vm10 }
 0xeee   :  { %v13976_v50 = vpop.eup %13975  ;;  %v6770_v31 = vmax.f32 %v6759_v23, 1e-12  ;;  %v17526_v59 = vmul.f32 %v13974_v16, %v17277_v14  ;;  %vm19072_vm13 = vmmov %vm19070_vm10 }
 0xeef   :  { %v6761_v3 = vmul.f32 %v13976_v50, %v17455_v62  ;;  %v5951_v24 = vmax.f32 %v17523_v47, 0.0  ;;  %v13978_v12 = vpop.eup %13977  ;;  %13132 = vmatpush3.bf16.msra.mxu0 %v13129_v45  ;;  %v6077_v45 = vld [vmem:[%s19066_s11] sm:$0xff]  ;;  %vm19073_vm0 = vmmov %vm19070_vm10 }
 0xef0   :  { %13983 = vrcp.f32 %v6770_v31  ;;  %v5950_v42 = vmax.f32 %v17526_v59, 0.0  ;;  %13134 = vmatprep.subr.bf16.mxu0 %v13133_v4  ;;  %v6773_v14 = vmul.f32 %v13978_v12, %v17284_v7  ;;  %v6078_v31 = vld [vmem:[%s19066_s11 + $0x8] sm:$0xff]  ;;  %v13173_v7 = vpack.c.bf16 %v16932_v40, %v16926_v29  ;;  %vm19074_vm1 = vmmov %vm19073_vm0 }
 0xef1   :  { %v13980_v46 = vpop.eup %13979  ;;  %v6763_v10 = vsel %vm6762_vm8, %v17455_v62, %v6761_v3  ;;  %v13141_v12 = vpack.c.bf16 %v6078_v31, %v6077_v45  ;;  %v14191_v31 = vld [vmem:[%s18974_s23 + $0x28] sm:$0xff]  ;;  %vm19075_vm7 = vmmov %vm19073_vm0 }
 0xef2   :  { %v6766_v16 = vsel %vm6764_vm9, %v6765_v11, %v6763_v10  ;;  %v13137_v23 = vpack.c.bf16 %v5951_v24, %v5950_v42  ;;  %v6775_v50 = vmul.f32 %v13980_v46, %v17290_v15  ;;  %v6782_v38 = vmax.f32 %v6773_v14, 0.0  ;;  %v6080_v11 = vld [vmem:[%s19066_s11 + $0x18] sm:$0xff]  ;;  %v14188_v10 = vld [vmem:[%s18974_s23 + $0x10] sm:$0xff]  ;;  %vm19076_vm8 = vmmov %vm19073_vm0 }
 0xef3   :  { %v6771_v41 = vmax.f32 %v6766_v16, 1e-12  ;;  %13136 = vmatpush3.bf16.msra.mxu0 %v13133_v4  ;;  %v6079_v4 = vld [vmem:[%s19066_s11 + $0x10] sm:$0xff]  ;;  %vm19077_vm9 = vmmov %vm19073_vm0 }
 0xef4   :  { %13138 = vmatprep.subr.bf16.mxu0 %v13137_v23  ;;  %12346 = vmatmul.mubr.msk.f32.vlgmr.msra.gmra.mrb[122].mxu1 %vm1084_vm5, %v6782_v38  ;;  %v6783_v62 = vmax.f32 %v6775_v50, 0.0  ;;  %v13145_v38 = vpack.c.bf16 %v6080_v11, %v6079_v4  ;;  %v7910_v4 = vld [vmem:[%s19067_s30 + $0x10] sm:$0xff]  ;;  %v7911_v11 = vld [vmem:[%s19067_s30 + $0x18] sm:$0xff] }
 0xef5   :  { %v13982_v3 = vpop.eup %13981  ;;  %13985 = vrcp.f32 %v6771_v41  ;;  %13172 = vmatpush3.bf16.msra.mxu1 %v17186_v51  ;;  %12348 = vmatprep.mubr.msk.f32.mxu1 %vm14842_vm2, %v18997_v56  ;;  %v14187_v51 = vld [vmem:[%s18974_s23 + $0x8] sm:$0xff] }
 0xef6   :  { %v6777_v15 = vmul.f32 %v13982_v3, %v17295_v22  ;;  %13174 = vmatprep.subr.bf16.mxu1 %v13173_v7  ;;  %v7908_v3 = vld [vmem:[%s19067_s30] sm:$0xff] }
 0xef7   :  { %13140 = vmatpush3.bf16.msra.mxu0 %v13137_v23  ;;  %v14190_v23 = vld [vmem:[%s18974_s23 + $0x20] sm:$0xff] }
 0xef8   :  { %12349 = vmatmul.mubr.msk.f32.gmra.mrb[124].mxu1 %vm1084_vm5, %v6783_v62  ;;  %v6784_v41 = vmax.f32 %v6777_v15, 0.0  ;;  %13142 = vmatprep.subr.bf16.mxu0 %v13141_v12  ;;  %v14192_v62 = vld [vmem:[%s18974_s23 + $0x30] sm:$0xff]  ;;  %v14194_v15 = vld [vmem:[%s18974_s23 + $0x38] sm:$0xff] }
 0xef9   :  { %13176 = vmatpush3.bf16.msra.mxu1 %v13173_v7  ;;  %12351 = vmatprep.mubr.msk.f32.mxu1 %vm14842_vm2, %v18997_v56  ;;  %v7909_v7 = vld [vmem:[%s19067_s30 + $0x8] sm:$0xff] }
 0xefa   :  { %v13984_v46 = vpop.eup %13983  ;;  %12245 = vmatmul.mubr.msk.f32.vlgmr.msra.gmra.mrb[122].mxu0 %vm911_vm4, %v14187_v51  ;;  %12368 = vmatprep.subr.msk.mxu1 %vm18902_vm3, %v16938_v0  ;;  %v13223_v51 = vpack.c.bf16 %v7911_v11, %v7910_v4 }
 0xefb   :  { %v6779_v22 = vmul.f32 %v13984_v46, %v17300_v34  ;;  %12247 = vmatprep.mubr.msk.f32.mxu0 %vm911_vm4, %v14188_v10  ;;  %13144 = vmatpush3.bf16.msra.mxu0 %v13141_v12  ;;  %v14189_v34 = vld [vmem:[%s18974_s23 + $0x18] sm:$0xff]  ;;  %v13220_v12 = vpack.c.bf16 %v7909_v7, %v7908_v3  ;;  %v14197_v46 = vld [vmem:[%s18998_s2 + $0x10] sm:$0xff]  ;;  %v14207_v3 = vld [vmem:[%s18998_s2 + $0x48] sm:$0xff] }
 0xefc   :  { %12352 = vmatmul.mubr.msk.f32.gmra.mrb[126].mxu1 %vm1084_vm5, %v6784_v41  ;;  %13146 = vmatprep.subr.bf16.mxu0 %v13145_v38  ;;  %v14195_v41 = vld [vmem:[%s18974_s23 + $0x40] sm:$0xff]  ;;  %v14199_v10 = vld [vmem:[%s18974_s23 + $0x50] sm:$0xff] }
 0xefd   :  { %v6785_v14 = vmax.f32 %v6779_v22, 0.0  ;;  %12369 = vmatpush3.msk.msra.mxu1 %vm18902_vm3, %v16938_v0  ;;  %12354 = vmatprep.mubr.msk.f32.mxu1 %vm14842_vm2, %v18997_v56  ;;  %v14198_v22 = vld [vmem:[%s18974_s23 + $0x48] sm:$0xff]  ;;  %v14208_v7 = vld [vmem:[%s18998_s2 + $0x50] sm:$0xff] }
 0xefe   :  { %12248 = vmatmul.mubr.msk.f32.gmra.mrb[124].mxu0 %vm911_vm4, %v14189_v34  ;;  %13219 = vmatprep.subr.bf16.mxu1 %v19000_v27  ;;  %v14202_v34 = vld [vmem:[%s18974_s23 + $0x58] sm:$0xff]  ;;  %s19078_s23 = sld [smem:[#allocation105_spill]] }
 0xeff   :  { %v13986_v16 = vpop.eup %13985  ;;  %12250 = vmatprep.mubr.msk.f32.mxu0 %vm911_vm4, %v14190_v23  ;;  %13148 = vmatpush3.bf16.msra.mxu0 %v13145_v38  ;;  %v14196_v38 = vld [vmem:[%s18998_s2 + $0x8] sm:$0xff] }
 0xf00   :  { %v6781_v50 = vmul.f32 %v13986_v16, %v17305_v9  ;;  %12355 = vmatmul.mubr.msk.f32.gmra.mrb[128].mxu1 %vm1084_vm5, %v6785_v14  ;;  %v14193_v9 = vld [vmem:[%s18998_s2] sm:$0xff]  ;;  %v14200_v14 = vld [vmem:[%s18998_s2 + $0x18] sm:$0xff]  ;;  %v14203_v23 = vld [vmem:[%s18998_s2 + $0x28] sm:$0xff] }
 0xf01   :  { %12357 = vmatprep.mubr.msk.f32.mxu1 %vm14842_vm2, %v18997_v56  ;;  %v14201_v16 = vld [vmem:[%s18998_s2 + $0x20] sm:$0xff] }
 0xf02   :  { %v6786_v45 = vmax.f32 %v6781_v50, 0.0  ;;  %12251 = vmatmul.mubr.msk.f32.gmra.mrb[126].mxu0 %vm911_vm4, %v14191_v31  ;;  %v14204_v50 = vld [vmem:[%s18998_s2 + $0x30] sm:$0xff]  ;;  %v14206_v31 = vld [vmem:[%s18998_s2 + $0x40] sm:$0xff] }
 0xf03   :  { %12253 = vmatprep.mubr.msk.f32.mxu0 %vm911_vm4, %v14192_v62  ;;  %v14209_v62 = vld [vmem:[%s18998_s2 + $0x58] sm:$0xff] }
 0xf04   :  { %12358 = vmatmul.mubr.msk.f32.gmra.mrb[130].mxu1 %vm1084_vm5, %v6786_v45  ;;  %v14205_v45 = vld [vmem:[%s18998_s2 + $0x38] sm:$0xff]  ;;  %v6251_v4 = vld [vmem:[%s19078_s23 + $0x10] sm:$0xff]  ;;  %s19108_s2 = sld [smem:[#allocation77_spill]] }
 0xf05   :  { %12370 = vmatprep.mubr.msk.f32.mxu1 %vm19068_vm11, %v14193_v9  ;;  %vm19079_vm11 = vmmov %vm19073_vm0 }
 0xf06   :  { %12254 = vmatmul.mubr.msk.f32.gmra.mrb[128].mxu0 %vm911_vm4, %v14194_v15 }
 0xf07   :  { %12256 = vmatprep.mubr.msk.f32.mxu0 %vm911_vm4, %v14195_v41 }
 0xf08   :  { %12371 = vmatmul.mubr.msk.f32.vlgmr.msra.gmra.mrb[132].mxu1 %vm19069_vm12, %v14196_v38  ;;  %vm19080_vm12 = vmmov %vm19073_vm0 }
 0xf09   :  { %12373 = vmatprep.mubr.msk.f32.mxu1 %vm19070_vm10, %v14197_v46  ;;  %13221 = vmatpush3.bf16.msra.mxu1 %v13220_v12 }
 0xf0a   :  { %12257 = vmatmul.mubr.msk.f32.gmra.mrb[130].mxu0 %vm911_vm4, %v14198_v22  ;;  %13222 = vmatprep.subr.bf16.mxu1 %v19000_v27 }
 0xf0b   :  { %12259 = vmatprep.mubr.msk.f32.mxu0 %vm911_vm4, %v14199_v10 }
 0xf0c   :  { %12374 = vmatmul.mubr.msk.f32.gmra.mrb[134].mxu1 %vm19071_vm14, %v14200_v14 }
 0xf0d   :  { %12376 = vmatprep.mubr.msk.f32.mxu1 %vm19072_vm13, %v14201_v16  ;;  %13224 = vmatpush3.bf16.msra.mxu1 %v13223_v51 }
 0xf0e   :  { %12260 = vmatmul.mubr.msk.f32.gmra.mrb[132].mxu0 %vm911_vm4, %v14202_v34  ;;  %13225 = vmatprep.subr.bf16.mxu1 %v19000_v27 }
 0xf10   :  { %12377 = vmatmul.mubr.msk.f32.gmra.mrb[136].mxu1 %vm19073_vm0, %v14203_v23 }
 0xf11   :  { %12379 = vmatprep.mubr.msk.f32.mxu1 %vm19074_vm1, %v14204_v50 }
 0xf14   :  { %12380 = vmatmul.mubr.msk.f32.gmra.mrb[138].mxu1 %vm19075_vm7, %v14205_v45 }
 0xf15   :  { %12382 = vmatprep.mubr.msk.f32.mxu1 %vm19076_vm8, %v14206_v31 }
 0xf18   :  { %12383 = vmatmul.mubr.msk.f32.gmra.mrb[140].mxu1 %vm19077_vm9, %v14207_v3 }
 0xf19   :  { %12385 = vmatprep.mubr.msk.f32.mxu1 %vm19079_vm11, %v14208_v7 }
 0xf1c   :  { %12386 = vmatmul.mubr.msk.f32.gmra.mrb[142].mxu1 %vm19080_vm12, %v14209_v62 }
 0xf1d   :  { %12513 = vmatprep.mubr.msk.f32.mxu1 %vm14842_vm2, %v18997_v56 }
 0xf20   :  { %12514 = vmatmul.mubr.msk.f32.vlgmr.msra.gmra.mrb[144].mxu1 %vm1084_vm5, %v16912_v32  ;;  %v6249_v32 = vld [vmem:[%s19078_s23] sm:$0xff] }
 0xf21   :  { %12516 = vmatprep.mubr.msk.f32.mxu1 %vm14842_vm2, %v18997_v56 }
 0xf24   :  { %12517 = vmatmul.mubr.msk.f32.gmra.mrb[146].mxu1 %vm1084_vm5, %v16920_v55  ;;  %v6250_v55 = vld [vmem:[%s19078_s23 + $0x8] sm:$0xff] }
 0xf25   :  { %12519 = vmatprep.mubr.msk.f32.mxu1 %vm14842_vm2, %v18997_v56  ;;  %v13149_v9 = vpack.c.bf16 %v6250_v55, %v6249_v32 }
 0xf27   :  { %13150 = vmatprep.subr.bf16.mxu0 %v13149_v9 }
 0xf28   :  { %12520 = vmatmul.mubr.msk.f32.gmra.mrb[148].mxu1 %vm1084_vm5, %v16926_v29 }
 0xf29   :  { %12522 = vmatprep.mubr.msk.f32.mxu1 %vm14842_vm2, %v18997_v56 }
 0xf2c   :  { %12523 = vmatmul.mubr.msk.f32.gmra.mrb[150].mxu1 %vm1084_vm5, %v16932_v40  ;;  %v6252_v40 = vld [vmem:[%s19078_s23 + $0x18] sm:$0xff] }
 0xf2d   :  { %12525 = vmatprep.mubr.msk.f32.mxu1 %vm14842_vm2, %v18997_v56  ;;  %v13153_v46 = vpack.c.bf16 %v6252_v40, %v6251_v4 }
 0xf30   :  { %12526 = vmatmul.mubr.msk.f32.gmra.mrb[152].mxu1 %vm1084_vm5, %v16938_v0 }
 0xf31   :  { %12536 = vmatprep.mubr.msk.f32.mxu1 %vm14842_vm2, %v18997_v56 }
 0xfc7   :  { %v17645_v29 = vpop.f32.mrb[122].mxu1 }
 0xfc8   :  { %v12347_v12 = vpop.f32.mrb[123].mxu1 }
 0xfcb   :  { %v17647_v15 = vpop.f32.mrb[124].mxu1 }
 0xfcc   :  { %v12350_v11 = vpop.f32.mrb[125].mxu1 }
 0xfcd   :  { %v12246_v41 = vpop.f32.mrb[122].mxu0 }
 0xfce   :  { %v6018_v38 = vpop.f32.mrb[123].mxu0 }
 0xfcf   :  { %12270 = vmatprep.mubr.msk.f32.mxu0 %vm1084_vm5, %v6018_v38  ;;  %v17652_v0 = vpop.f32.mrb[126].mxu1 }
 0xfd0   :  { %12271 = vmatmul.mubr.msk.f32.vlgmr.msra.gmra.mrb[134].mxu0 %vm1084_vm5, %v12246_v41  ;;  %v12353_v51 = vpop.f32.mrb[127].mxu1 }
 0xfd1   :  { %v12249_v22 = vpop.f32.mrb[124].mxu0  ;;  %13152 = vmatpush3.bf16.msra.mxu0 %v13149_v9 }
 0xfd2   :  { %v6028_v10 = vpop.f32.mrb[125].mxu0  ;;  %13154 = vmatprep.subr.bf16.mxu0 %v13153_v46 }
 0xfd3   :  { %12273 = vmatprep.mubr.msk.f32.mxu0 %vm1084_vm5, %v6028_v10  ;;  %v17656_v14 = vpop.f32.mrb[128].mxu1 }
 0xfd4   :  { %12274 = vmatmul.mubr.msk.f32.gmra.mrb[136].mxu0 %vm1084_vm5, %v12249_v22  ;;  %v12356_v16 = vpop.f32.mrb[129].mxu1 }
 0xfd5   :  { %v12252_v34 = vpop.f32.mrb[126].mxu0  ;;  %13156 = vmatpush3.bf16.msra.mxu0 %v13153_v46 }
 0xfd6   :  { %v6038_v23 = vpop.f32.mrb[127].mxu0  ;;  %13177 = vmatprep.subr.bf16.mxu0 %v19000_v27 }
 0xfd7   :  { %12276 = vmatprep.mubr.msk.f32.mxu0 %vm1084_vm5, %v6038_v23  ;;  %v17661_v50 = vpop.f32.mrb[130].mxu1 }
 0xfd8   :  { %12277 = vmatmul.mubr.msk.f32.gmra.mrb[138].mxu0 %vm1084_vm5, %v12252_v34  ;;  %v12359_v45 = vpop.f32.mrb[131].mxu1 }
 0xfd9   :  { %v12255_v31 = vpop.f32.mrb[128].mxu0 }
 0xfda   :  { %v6048_v3 = vpop.f32.mrb[129].mxu0 }
 0xfdb   :  { %12279 = vmatprep.mubr.msk.f32.mxu0 %vm1084_vm5, %v6048_v3 }
 0xfdc   :  { %12280 = vmatmul.mubr.msk.f32.gmra.mrb[140].mxu0 %vm1084_vm5, %v12255_v31 }
 0xfdd   :  { %v12258_v7 = vpop.f32.mrb[130].mxu0 }
 0xfde   :  { %v6058_v62 = vpop.f32.mrb[131].mxu0 }
 0xfdf   :  { %12282 = vmatprep.mubr.msk.f32.mxu0 %vm1084_vm5, %v6058_v62  ;;  %v10513_v62 = vld [vmem:[#allocation26] ss:$0 sm:$0xff] }
 0xfe0   :  { %12283 = vmatmul.mubr.msk.f32.gmra.mrb[142].mxu0 %vm1084_vm5, %v12258_v7 }
 0xfe1   :  { %v12261_v32 = vpop.f32.mrb[132].mxu0 }
 0xfe2   :  { %v6068_v55 = vpop.f32.mrb[133].mxu0 }
 0xfe3   :  { %12285 = vmatprep.mubr.msk.f32.mxu0 %vm1084_vm5, %v6068_v55 }
 0xfe4   :  { %12286 = vmatmul.mubr.msk.f32.gmra.mrb[144].mxu0 %vm1084_vm5, %v12261_v32 }
 0xfe5   :  { %12296 = vmatprep.mubr.msk.f32.mxu0 %vm1084_vm5, %v5940_v6  ;;  %v7203_v6 = vld [vmem:[%s19081_s27 + $0x18] sm:$0xff] }
 0xfe8   :  { %12297 = vmatmul.mubr.msk.f32.vlgmr.msra.gmra.mrb[134].mxu0 %vm1084_vm5, %v5941_v48  ;;  %v14210_v48 = vld [vmem:[%s19005_s19] sm:$0xff] }
 0xfe9   :  { %13179 = vmatpush3.bf16.msra.mxu0 %v16978_v18  ;;  %12299 = vmatprep.mubr.msk.f32.mxu0 %vm1084_vm5, %v5942_v20  ;;  %v19082_v18 = vmax.f32 %v17505_v8, 0.0  ;;  %v14214_v20 = vld [vmem:[%s19005_s19 + $0x20] sm:$0xf] }
 0xfea   :  { %13180 = vmatprep.subr.bf16.mxu0 %v19000_v27 }
 0xfec   :  { %12300 = vmatmul.mubr.msk.f32.gmra.mrb[136].mxu0 %vm1084_vm5, %v5943_v60 }
 0xfed   :  { %13182 = vmatpush3.bf16.msra.mxu0 %v17017_v30  ;;  %12302 = vmatprep.mubr.msk.f32.mxu0 %vm1084_vm5, %v5944_v39  ;;  %v7200_v30 = vld [vmem:[%s19081_s27] sm:$0xff] }
 0xfee   :  { %13183 = vmatprep.subr.bf16.mxu0 %v19000_v27 }
 0xff0   :  { %12303 = vmatmul.mubr.msk.f32.gmra.mrb[138].mxu0 %vm1084_vm5, %v5945_v35 }
 0xff1   :  { %13185 = vmatpush3.bf16.msra.mxu0 %v17029_v19  ;;  %12305 = vmatprep.mubr.msk.f32.mxu0 %vm1084_vm5, %v5946_v36  ;;  %v7201_v19 = vld [vmem:[%s19081_s27 + $0x8] sm:$0xff] }
 0xff2   :  { %13186 = vmatprep.subr.bf16.mxu0 %v19000_v27 }
 0xff4   :  { %12306 = vmatmul.mubr.msk.f32.gmra.mrb[140].mxu0 %vm1084_vm5, %v5947_v28 }
 0xff5   :  { %13188 = vmatpush3.bf16.msra.mxu0 %v17040_v61  ;;  %12308 = vmatprep.mubr.msk.f32.mxu0 %vm1084_vm5, %v19082_v18  ;;  %v13195_v61 = vpack.c.bf16 %v7201_v19, %v7200_v30  ;;  %v17814_v30 = vadd.f32 %v10513_v62, %v17647_v15 }
 0xff6   :  { %13189 = vmatprep.subr.bf16.mxu0 %v19000_v27 }
 0xff8   :  { %12309 = vmatmul.mubr.msk.f32.gmra.mrb[142].mxu0 %vm1084_vm5, %v19083_v33 }
 0xff9   :  { %13191 = vmatpush3.bf16.msra.mxu0 %v17052_v37  ;;  %12311 = vmatprep.mubr.msk.f32.mxu0 %vm1084_vm5, %v5950_v42  ;;  %v13199_v37 = vpack.c.bf16 %v7203_v6, %v7202_v2  ;;  %v17820_v2 = vadd.f32 %v10513_v62, %v17645_v29 }
 0xffa   :  { %13192 = vmatprep.subr.bf16.mxu0 %v19000_v27 }
 0xffc   :  { %12312 = vmatmul.mubr.msk.f32.gmra.mrb[144].mxu0 %vm1084_vm5, %v5951_v24 }
 0xffd   :  { %13194 = vmatpush3.bf16.msra.mxu0 %v17063_v26  ;;  %12412 = vmatprep.mubr.msk.f32.mxu0 %vm14842_vm2, %v18997_v56  ;;  %v14212_v26 = vld [vmem:[%s19005_s19 + $0x10] sm:$0xff]  ;;  %s19121_s19 = sld [smem:[#allocation59_spill]] }
 0xffe   :  { %13196 = vmatprep.subr.bf16.mxu0 %v13195_v61 }
0x1000   :  { %12413 = vmatmul.mubr.msk.f32.vlgmr.msra.gmra.mrb[146].mxu0 %vm911_vm4, %v14210_v48 }
0x1001   :  { %12415 = vmatprep.mubr.msk.f32.mxu0 %vm14842_vm2, %v18997_v56  ;;  %13198 = vmatpush3.bf16.msra.mxu0 %v13195_v61 }
0x1002   :  { %13200 = vmatprep.subr.bf16.mxu0 %v13199_v37 }
0x1004   :  { %12416 = vmatmul.mubr.msk.f32.gmra.mrb[148].mxu0 %vm911_vm4, %v14211_v43  ;;  %v6909_v43 = vmul.f32 %v17814_v30, %v17814_v30 }
0x1005   :  { %12418 = vmatprep.mubr.msk.f32.mxu0 %vm14842_vm2, %v18997_v56  ;;  %13202 = vmatpush3.bf16.msra.mxu0 %v13199_v37 }
0x1008   :  { %12419 = vmatmul.mubr.msk.f32.gmra.mrb[150].mxu0 %vm911_vm4, %v14212_v26  ;;  %v17832_v26 = vadd.f32 %v10513_v62, %v17656_v14  ;;  %v6916_v14 = vsel %vm1084_vm5, %v6909_v43, 0.0 }
0x1009   :  { %12421 = vmatprep.mubr.msk.f32.mxu0 %vm14842_vm2, %v18997_v56 }
0x100c   :  { %12422 = vmatmul.mubr.msk.f32.gmra.mrb[152].mxu0 %vm911_vm4, %v14213_v49  ;;  %v17836_v49 = vadd.f32 %v10513_v62, %v17652_v0  ;;  %v17847_v0 = vadd.f32 %v10513_v62, %v17661_v50 }
0x100d   :  { %12424 = vmatprep.mubr.msk.f32.mxu0 %vm14842_vm2, %v18997_v56 }
0x1010   :  { %12425 = vmatmul.mubr.msk.f32.gmra.mrb[154].mxu0 %vm911_vm4, %v14214_v20 }
0x1011   :  { %12435 = vmatprep.mubr.msk.f32.mxu0 %vm1084_vm5, %v16762_v44  ;;  %v19084_v44 = vld [vmem:[#allocation129_spill] sm:$0xff] }
0x1014   :  { %12436 = vmatmul.mubr.msk.f32.vlgmr.msra.gmra.mrb[156].mxu0 %vm1084_vm5, %v16765_v54  ;;  %v19085_v54 = vld [vmem:[#allocation115_spill] sm:$0xff] }
0x1015   :  { %12438 = vmatprep.mubr.msk.f32.mxu0 %vm1084_vm5, %v16780_v57  ;;  %v19086_v57 = vld [vmem:[#allocation114_spill] sm:$0xff] }
0x1018   :  { %12439 = vmatmul.mubr.msk.f32.gmra.mrb[158].mxu0 %vm1084_vm5, %v16786_v21  ;;  %v19087_v21 = vld [vmem:[#allocation117_spill] sm:$0xff] }
0x1019   :  { %12441 = vmatprep.mubr.msk.f32.mxu0 %vm1084_vm5, %v16807_v58  ;;  %v10477_v58 = vld [vmem:[#allocation29] ss:$0 sm:$0xff] }
0x101c   :  { %12442 = vmatmul.mubr.msk.f32.gmra.mrb[160].mxu0 %vm1084_vm5, %v16800_v17 }
0x101d   :  { %12444 = vmatprep.mubr.msk.f32.mxu0 %vm1084_vm5, %v16829_v63 }
0x1020   :  { %12445 = vmatmul.mubr.msk.f32.gmra.mrb[162].mxu0 %vm1084_vm5, %v16831_v52 }
0x1021   :  { %12447 = vmatprep.mubr.msk.f32.mxu0 %vm1084_vm5, %v19084_v44  ;;  %v6908_v44 = vmul.f32 %v17820_v2, %v17820_v2 }
0x1024   :  { %12448 = vmatmul.mubr.msk.f32.gmra.mrb[164].mxu0 %vm1084_vm5, %v19085_v54  ;;  %v6911_v54 = vmul.f32 %v17832_v26, %v17832_v26 }
0x1025   :  { %12450 = vmatprep.mubr.msk.f32.mxu0 %vm1084_vm5, %v19086_v57  ;;  %v6910_v57 = vmul.f32 %v17836_v49, %v17836_v49 }
0x1028   :  { %12451 = vmatmul.mubr.msk.f32.gmra.mrb[166].mxu0 %vm1084_vm5, %v19087_v21  ;;  %v6913_v21 = vsel %vm1084_vm5, %v6908_v44, 0.0 }
0x10bb   :  { %v12298_v17 = vpop.f32.mrb[134].mxu0 }
0x10bc   :  { %v17765_v60 = vadd.f32 %v12298_v17, %v10477_v58  ;;  %v6355_v63 = vpop.f32.mrb[135].mxu0  ;;  %v6912_v17 = vmul.f32 %v17847_v0, %v17847_v0 }
0x10bd   :  { %v17767_v13 = vadd.f32 %v10477_v58, %v6355_v63  ;;  %v6919_v63 = vsel %vm1084_vm5, %v6910_v57, 0.0 }
0x10be   :  { %v6427_v52 = vmul.f32 %v17765_v60, %v17765_v60  ;;  %v6925_v50 = vsel %vm2395_vm6, %v6912_v17, 0.0  ;;  %v7211_v17 = vld [vmem:[%s19081_s27 + $0x58] sm:$0xff] }
0x10bf   :  { %v12301_v53 = vpop.f32.mrb[136].mxu0  ;;  %v6426_v1 = vmul.f32 %v17767_v13, %v17767_v13 }
0x10c0   :  { %v17773_v25 = vadd.f32 %v12301_v53, %v10477_v58  ;;  %v6365_v5 = vpop.f32.mrb[137].mxu0  ;;  %v6441_v39 = vsel %vm1084_vm5, %v6427_v52, 0.0  ;;  %v7204_v52 = vld [vmem:[%s19081_s27 + $0x20] sm:$0xff]  ;;  %v7205_v53 = vld [vmem:[%s19081_s27 + $0x28] sm:$0xff] }
0x10c1   :  { %v17776_v35 = vadd.f32 %v10477_v58, %v6365_v5  ;;  %6442 = vadd.xlane.f32.xlu0 %v6441_v39  ;;  %v6438_v36 = vsel %vm1084_vm5, %v6426_v1, 0.0  ;;  %v13203_v1 = vpack.c.bf16 %v7205_v53, %v7204_v52  ;;  %v7206_v5 = vld [vmem:[%s19081_s27 + $0x30] sm:$0xff]  ;;  %v7207_v39 = vld [vmem:[%s19081_s27 + $0x38] sm:$0xff] }
0x10c2   :  { %6439 = vadd.xlane.f32.xlu1 %v6438_v36  ;;  %v6429_v28 = vmul.f32 %v17773_v25, %v17773_v25  ;;  %v13207_v36 = vpack.c.bf16 %v7207_v39, %v7206_v5 }
0x10c3   :  { %v12304_v8 = vpop.f32.mrb[138].mxu0  ;;  %v6428_v47 = vmul.f32 %v17776_v35, %v17776_v35  ;;  %13204 = vmatprep.subr.bf16.mxu0 %v13203_v1 }
0x10c4   :  { %v17783_v59 = vadd.f32 %v12304_v8, %v10477_v58  ;;  %v6375_v24 = vpop.f32.mrb[139].mxu0  ;;  %v6447_v42 = vsel %vm1084_vm5, %v6429_v28, 0.0  ;;  %13206 = vmatpush3.bf16.msra.mxu0 %v13203_v1  ;;  %v7208_v28 = vld [vmem:[%s19081_s27 + $0x40] sm:$0xff]  ;;  %v7209_v8 = vld [vmem:[%s19081_s27 + $0x48] sm:$0xff] }
0x10c5   :  { %v17786_v9 = vadd.f32 %v10477_v58, %v6375_v24  ;;  %6448 = vadd.xlane.f32.xlu0 %v6447_v42  ;;  %v6444_v12 = vsel %vm1084_vm5, %v6428_v47, 0.0  ;;  %13208 = vmatprep.subr.bf16.mxu0 %v13207_v36  ;;  %v17861_v47 = vpack.c.bf16 %v7209_v8, %v7208_v28  ;;  %v7912_v24 = vld [vmem:[%s19067_s30 + $0x20] sm:$0xff]  ;;  %v7913_v42 = vld [vmem:[%s19067_s30 + $0x28] sm:$0xff] }
0x10c6   :  { %6445 = vadd.xlane.f32.xlu1 %v6444_v12  ;;  %v6431_v4 = vmul.f32 %v17783_v59, %v17783_v59  ;;  %v13226_v12 = vpack.c.bf16 %v7913_v42, %v7912_v24 }
0x10c7   :  { %v12307_v40 = vpop.f32.mrb[140].mxu0  ;;  %v6430_v11 = vmul.f32 %v17786_v9, %v17786_v9 }
0x10c8   :  { %v17793_v41 = vadd.f32 %v12307_v40, %v10477_v58  ;;  %v6385_v38 = vpop.f32.mrb[141].mxu0  ;;  %v6453_v46 = vsel %vm1084_vm5, %v6431_v4, 0.0  ;;  %13210 = vmatpush3.bf16.msra.mxu0 %v13207_v36  ;;  %13227 = vmatpush3.bf16.msra.mxu1 %v13226_v12  ;;  %v7914_v4 = vld [vmem:[%s19067_s30 + $0x30] sm:$0xff]  ;;  %v7915_v40 = vld [vmem:[%s19067_s30 + $0x38] sm:$0xff] }
0x10c9   :  { %v17796_v51 = vadd.f32 %v10477_v58, %v6385_v38  ;;  %6454 = vadd.xlane.f32.xlu0 %v6453_v46  ;;  %v6450_v22 = vsel %vm1084_vm5, %v6430_v11, 0.0  ;;  %13212 = vmatprep.subr.bf16.mxu0 %v17861_v47  ;;  %v13229_v11 = vpack.c.bf16 %v7915_v40, %v7914_v4  ;;  %v17869_v38 = vpop.f32.mrb[132].mxu1 }
0x10ca   :  { %6451 = vadd.xlane.f32.xlu1 %v6450_v22  ;;  %v6433_v10 = vmul.f32 %v17793_v41, %v17793_v41  ;;  %13228 = vmatprep.subr.bf16.mxu1 %v19000_v27  ;;  %v17871_v46 = vpop.f32.mrb[133].mxu1 }
0x10cb   :  { %v12310_v16 = vpop.f32.mrb[142].mxu0  ;;  %v6432_v34 = vmul.f32 %v17796_v51, %v17796_v51  ;;  %v17874_v22 = vpop.f32.mrb[134].mxu1 }
0x10cc   :  { %v17803_v23 = vadd.f32 %v12310_v16, %v10477_v58  ;;  %v6395_v45 = vpop.f32.mrb[143].mxu0  ;;  %v6459_v31 = vsel %vm1084_vm5, %v6433_v10, 0.0  ;;  %13230 = vmatpush3.bf16.msra.mxu1 %v13229_v11  ;;  %v17876_v10 = vpop.f32.mrb[135].mxu1 }
0x10cd   :  { %v17806_v3 = vadd.f32 %v10477_v58, %v6395_v45  ;;  %6460 = vadd.xlane.f32.xlu0 %v6459_v31  ;;  %v6456_v7 = vsel %vm1084_vm5, %v6432_v34, 0.0  ;;  %13231 = vmatprep.subr.bf16.mxu1 %v19000_v27  ;;  %v17878_v16 = vpop.f32.mrb[136].mxu1 }
0x10ce   :  { %6457 = vadd.xlane.f32.xlu1 %v6456_v7  ;;  %v6435_v32 = vmul.f32 %v17803_v23, %v17803_v23  ;;  %v17880_v34 = vpop.f32.mrb[137].mxu1 }
0x10cf   :  { %v12313_v55 = vpop.f32.mrb[144].mxu0  ;;  %v6434_v18 = vmul.f32 %v17806_v3, %v17806_v3  ;;  %v17882_v45 = vpop.f32.mrb[138].mxu1 }
0x10d0   :  { %v17816_v19 = vadd.f32 %v12313_v55, %v10477_v58  ;;  %v6405_v33 = vpop.f32.mrb[145].mxu0  ;;  %v6465_v61 = vsel %vm1084_vm5, %v6435_v32, 0.0  ;;  %v17884_v31 = vpop.f32.mrb[139].mxu1 }
0x10d1   :  { %v17822_v6 = vadd.f32 %v10477_v58, %v6405_v33  ;;  %6466 = vadd.xlane.f32.xlu0 %v6465_v61  ;;  %v6462_v37 = vsel %vm1084_vm5, %v6434_v18, 0.0  ;;  %v6922_v58 = vsel %vm1084_vm5, %v6911_v54, 0.0  ;;  %v17886_v7 = vpop.f32.mrb[140].mxu1 }
0x10d2   :  { %6463 = vadd.xlane.f32.xlu1 %v6462_v37  ;;  %v6437_v48 = vmul.f32 %v17816_v19, %v17816_v19  ;;  %v17888_v62 = vpop.f32.mrb[141].mxu1 }
0x10d3   :  { %v6436_v15 = vmul.f32 %v17822_v6, %v17822_v6  ;;  %v17890_v32 = vpop.f32.mrb[142].mxu1  ;;  %v17892_v55 = vpop.f32.mrb[146].mxu0 }
0x10d4   :  { %v6471_v29 = vsel %vm1084_vm5, %v6437_v48, 0.0  ;;  %v17894_v18 = vpop.f32.mrb[143].mxu1  ;;  %v12414_v33 = vpop.f32.mrb[147].mxu0 }
0x10d5   :  { %6472 = vadd.xlane.f32.xlu0 %v6471_v29  ;;  %v6468_v20 = vsel %vm1084_vm5, %v6436_v15, 0.0 }
0x10d6   :  { %6469 = vadd.xlane.f32.xlu1 %v6468_v20 }
0x10d7   :  { %v17896_v61 = vpop.f32.mrb[148].mxu0 }
0x10d8   :  { %v12417_v37 = vpop.f32.mrb[149].mxu0 }
0x10d9   :  { %6917 = vadd.xlane.f32.xlu0 %v6916_v14 }
0x10da   :  { %6914 = vadd.xlane.f32.xlu1 %v6913_v21 }
0x10db   :  { %v17898_v48 = vpop.f32.mrb[150].mxu0 }
0x10dc   :  { %19088 = vst [vmem:[#allocation119_spill] sm:$0xff] %v17898_v48  ;;  %v12420_v15 = vpop.f32.mrb[151].mxu0 }
0x10dd   :  { %6923 = vadd.xlane.f32.xlu0 %v6922_v58  ;;  %v7210_v58 = vld [vmem:[%s19081_s27 + $0x50] sm:$0xff] }
0x10de   :  { %6920 = vadd.xlane.f32.xlu1 %v6919_v63  ;;  %v17912_v52 = vpack.c.bf16 %v7211_v17, %v7210_v58 }
0x10df   :  { %v17900_v43 = vpop.f32.mrb[152].mxu0 }
0x10e0   :  { %19089 = vst [vmem:[#allocation118_spill] sm:$0xff] %v17900_v43  ;;  %v12423_v29 = vpop.f32.mrb[153].mxu0 }
0x10e2   :  { %6926 = vadd.xlane.f32.xlu1 %v6925_v50 }
0x10e3   :  { %v17902_v20 = vpop.f32.mrb[154].mxu0 }
0x10e4   :  { %19090 = vst [vmem:[#allocation122_spill] sm:$0xff] %v17902_v20  ;;  %v12426_v44 = vpop.f32.mrb[155].mxu0 }
0x114e   :  { %v6443_v54 = vpop.xlane.xlu0 %6442 }
0x114f   :  { %13987 = vrsqrt.f32 %v6443_v54  ;;  %v6440_v14 = vpop.xlane.xlu1 %6439  ;;  %vm6483_vm10 = vcmp.eq.f32.partialorder %v6443_v54, inf  ;;  %vm6485_vm14 = vcmp.eq.f32.partialorder %v6443_v54, 0.0  ;;  %v6486_v1 = vand.u32 2147483648, %v6443_v54 }
0x1150   :  { %13989 = vrsqrt.f32 %v6440_v14  ;;  %vm6476_vm13 = vcmp.eq.f32.partialorder %v6440_v14, inf  ;;  %vm6478_vm0 = vcmp.eq.f32.partialorder %v6440_v14, 0.0  ;;  %v6479_v5 = vand.u32 2147483648, %v6440_v14 }
0x1152   :  { %v6449_v57 = vpop.xlane.xlu0 %6448 }
0x1153   :  { %13991 = vrsqrt.f32 %v6449_v57  ;;  %v6446_v21 = vpop.xlane.xlu1 %6445  ;;  %vm6497_vm1 = vcmp.eq.f32.partialorder %v6449_v57, inf  ;;  %vm6499_vm7 = vcmp.eq.f32.partialorder %v6449_v57, 0.0  ;;  %v6500_v28 = vand.u32 2147483648, %v6449_v57 }
0x1154   :  { %13993 = vrsqrt.f32 %v6446_v21  ;;  %vm6490_vm8 = vcmp.eq.f32.partialorder %v6446_v21, inf  ;;  %vm6492_vm9 = vcmp.eq.f32.partialorder %v6446_v21, 0.0  ;;  %v6493_v4 = vand.u32 2147483648, %v6446_v21 }
0x1156   :  { %v17906_v63 = vpop.xlane.xlu0 %6454 }
0x1157   :  { %13995 = vrsqrt.f32 %v17906_v63  ;;  %v17909_v50 = vpop.xlane.xlu1 %6451  ;;  %vm6511_vm11 = vcmp.eq.f32.partialorder %v17906_v63, inf  ;;  %vm6513_vm12 = vcmp.eq.f32.partialorder %v17906_v63, 0.0  ;;  %v6514_v37 = vand.u32 2147483648, %v17906_v63 }
0x1158   :  { %13997 = vrsqrt.f32 %v17909_v50  ;;  %vm6506_vm3 = vcmp.eq.f32.partialorder %v17909_v50, 0.0 }
0x1159   :  { %v13988_v53 = vpop.eup %13987 }
0x115a   :  { %v13990_v39 = vpop.eup %13989  ;;  %v6482_v36 = vmul.f32 %v13988_v53, %v6443_v54  ;;  %v17914_v8 = vpop.xlane.xlu0 %6460 }
0x115b   :  { %v6475_v24 = vmul.f32 %v13990_v39, %v6440_v14  ;;  %13999 = vrsqrt.f32 %v17914_v8  ;;  %v17917_v42 = vpop.xlane.xlu1 %6457 }
0x115c   :  { %v6484_v12 = vsel %vm6483_vm10, %v6443_v54, %v6482_v36  ;;  %14001 = vrsqrt.f32 %v17917_v42  ;;  %vm6504_vm10 = vcmp.eq.f32.partialorder %v17909_v50, inf  ;;  %v6507_v36 = vand.u32 2147483648, %v17909_v50 }
0x115d   :  { %v13992_v40 = vpop.eup %13991  ;;  %v6487_v11 = vsel %vm6485_vm14, %v6486_v1, %v6484_v12  ;;  %v6477_v33 = vsel %vm6476_vm13, %v6440_v14, %v6475_v24  ;;  %vm6525_vm14 = vcmp.eq.f32.partialorder %v17914_v8, inf  ;;  %vm6527_vm13 = vcmp.eq.f32.partialorder %v17914_v8, 0.0 }
0x115e   :  { %v13994_v15 = vpop.eup %13993  ;;  %v6559_v29 = vmax.f32 %v6487_v11, 1e-12  ;;  %v6480_v44 = vsel %vm6478_vm0, %v6479_v5, %v6477_v33  ;;  %v6496_v58 = vmul.f32 %v13992_v40, %v6449_v57  ;;  %v17928_v17 = vpop.xlane.xlu0 %6466  ;;  %v6528_v12 = vand.u32 2147483648, %v17914_v8 }
0x115f   :  { %v6558_v53 = vmax.f32 %v6480_v44, 1e-12  ;;  %v6489_v39 = vmul.f32 %v13994_v15, %v6446_v21  ;;  %14003 = vrsqrt.f32 %v17928_v17  ;;  %v17932_v54 = vpop.xlane.xlu1 %6463  ;;  %vm6518_vm0 = vcmp.eq.f32.partialorder %v17917_v42, inf }
0x1160   :  { %v6498_v1 = vsel %vm6497_vm1, %v6449_v57, %v6496_v58  ;;  %14005 = vrcp.f32 %v6559_v29  ;;  %vm6520_vm1 = vcmp.eq.f32.partialorder %v17917_v42, 0.0 }
0x1161   :  { %v13996_v14 = vpop.eup %13995  ;;  %v6501_v5 = vsel %vm6499_vm7, %v6500_v28, %v6498_v1  ;;  %v6491_v24 = vsel %vm6490_vm8, %v6446_v21, %v6489_v39  ;;  %14007 = vrsqrt.f32 %v17932_v54  ;;  %v6521_v28 = vand.u32 2147483648, %v17917_v42 }
0x1162   :  { %v13998_v40 = vpop.eup %13997  ;;  %v6561_v11 = vmax.f32 %v6501_v5, 1e-12  ;;  %v6494_v33 = vsel %vm6492_vm9, %v6493_v4, %v6491_v24  ;;  %v6510_v15 = vmul.f32 %v13996_v14, %v17906_v63  ;;  %v17944_v44 = vpop.xlane.xlu0 %6472  ;;  %14009 = vrcp.f32 %v6558_v53 }
0x1163   :  { %v6560_v58 = vmax.f32 %v6494_v33, 1e-12  ;;  %v6503_v29 = vmul.f32 %v13998_v40, %v17909_v50  ;;  %v17948_v57 = vpop.xlane.xlu1 %6469  ;;  %vm6539_vm7 = vcmp.eq.f32.partialorder %v17928_v17, inf  ;;  %vm6541_vm8 = vcmp.eq.f32.partialorder %v17928_v17, 0.0 }
0x1164   :  { %14011 = vrcp.f32 %v6561_v11  ;;  %v6512_v21 = vsel %vm6511_vm11, %v17906_v63, %v6510_v15  ;;  %vm6534_vm9 = vcmp.eq.f32.partialorder %v17932_v54, 0.0  ;;  %vm6553_vm11 = vcmp.eq.f32.partialorder %v17944_v44, inf }
0x1165   :  { %v14000_v4 = vpop.eup %13999  ;;  %14013 = vrcp.f32 %v6560_v58  ;;  %v6515_v53 = vsel %vm6513_vm12, %v6514_v37, %v6512_v21  ;;  %v6505_v39 = vsel %vm6504_vm10, %v17909_v50, %v6503_v29  ;;  %vm6555_vm12 = vcmp.eq.f32.partialorder %v17944_v44, 0.0 }
0x1166   :  { %v14002_v1 = vpop.eup %14001  ;;  %v6563_v14 = vmax.f32 %v6515_v53, 1e-12  ;;  %v6508_v5 = vsel %vm6506_vm3, %v6507_v36, %v6505_v39  ;;  %v6524_v24 = vmul.f32 %v14000_v4, %v17914_v8  ;;  %14015 = vrsqrt.f32 %v17944_v44  ;;  %v17965_v40 = vpop.xlane.xlu0 %6917 }
0x1167   :  { %v6562_v11 = vmax.f32 %v6508_v5, 1e-12  ;;  %v6517_v63 = vmul.f32 %v14002_v1, %v17917_v42  ;;  %14017 = vrsqrt.f32 %v17948_v57  ;;  %v17970_v37 = vpop.xlane.xlu1 %6914  ;;  %v6542_v36 = vand.u32 2147483648, %v17928_v17 }
0x1168   :  { %14019 = vrcp.f32 %v6563_v14  ;;  %v6526_v50 = vsel %vm6525_vm14, %v17914_v8, %v6524_v24  ;;  %vm6532_vm3 = vcmp.eq.f32.partialorder %v17932_v54, inf  ;;  %v6535_v4 = vand.u32 2147483648, %v17932_v54 }
0x1169   :  { %v14004_v33 = vpop.eup %14003  ;;  %14021 = vrcp.f32 %v6562_v11  ;;  %v6529_v15 = vsel %vm6527_vm13, %v6528_v12, %v6526_v50  ;;  %v6519_v58 = vsel %vm6518_vm0, %v17917_v42, %v6517_v63  ;;  %v6556_v14 = vand.u32 2147483648, %v17944_v44 }
0x116a   :  { %v6522_v29 = vsel %vm6520_vm1, %v6521_v28, %v6519_v58  ;;  %v6538_v21 = vmul.f32 %v14004_v33, %v17928_v17  ;;  %14023 = vrsqrt.f32 %v17965_v40  ;;  %v14006_v53 = vpop.eup %14005  ;;  %v17991_v8 = vpop.xlane.xlu0 %6923  ;;  %v6565_v28 = vmax.f32 %v6529_v15, 1e-12 }
0x116b   :  { %v6564_v39 = vmax.f32 %v6522_v29, 1e-12  ;;  %14025 = vrsqrt.f32 %v17970_v37  ;;  %v17993_v12 = vpop.xlane.xlu1 %6920  ;;  %v14008_v42 = vpop.eup %14007  ;;  %vm6546_vm10 = vcmp.eq.f32.partialorder %v17948_v57, inf  ;;  %vm6548_vm14 = vcmp.eq.f32.partialorder %v17948_v57, 0.0 }
0x116c   :  { %v6540_v1 = vsel %vm6539_vm7, %v17928_v17, %v6538_v21  ;;  %v14010_v5 = vpop.eup %14009  ;;  %v6531_v11 = vmul.f32 %v14008_v42, %v17932_v54  ;;  %v6549_v33 = vand.u32 2147483648, %v17948_v57  ;;  %vm6937_vm13 = vcmp.eq.f32.partialorder %v17965_v40, inf }
0x116d   :  { %14027 = vrcp.f32 %v6564_v39  ;;  %v6543_v24 = vsel %vm6541_vm8, %v6542_v36, %v6540_v1  ;;  %vm6939_vm0 = vcmp.eq.f32.partialorder %v17965_v40, 0.0  ;;  %v6940_v17 = vand.u32 2147483648, %v17965_v40 }
0x116e   :  { %v14012_v63 = vpop.eup %14011  ;;  %v6567_v50 = vmax.f32 %v6543_v24, 1e-12  ;;  %14029 = vrsqrt.f32 %v17991_v8  ;;  %v6533_v58 = vsel %vm6532_vm3, %v17932_v54, %v6531_v11  ;;  %vm6930_vm1 = vcmp.eq.f32.partialorder %v17970_v37, inf }
0x116f   :  { %v14014_v15 = vpop.eup %14013  ;;  %14031 = vrsqrt.f32 %v17993_v12  ;;  %v18013_v36 = vpop.xlane.xlu1 %6926  ;;  %v6536_v21 = vsel %vm6534_vm9, %v6535_v4, %v6533_v58  ;;  %vm6932_vm7 = vcmp.eq.f32.partialorder %v17970_v37, 0.0  ;;  %v6933_v24 = vand.u32 2147483648, %v17970_v37 }
0x1170   :  { %v14016_v29 = vpop.eup %14015  ;;  %14033 = vrcp.f32 %v6565_v28  ;;  %v6566_v42 = vmax.f32 %v6536_v21, 1e-12  ;;  %vm6951_vm8 = vcmp.eq.f32.partialorder %v17991_v8, inf  ;;  %v6954_v54 = vand.u32 2147483648, %v17991_v8 }
0x1171   :  { %v14018_v39 = vpop.eup %14017  ;;  %v6552_v1 = vmul.f32 %v14016_v29, %v17944_v44  ;;  %14035 = vrsqrt.f32 %v18013_v36  ;;  %v6571_v4 = vmul.f32 %v14010_v5, %v17767_v13  ;;  %v6573_v29 = vmul.f32 %v14006_v53, %v17765_v60 }
0x1172   :  { %v14020_v11 = vpop.eup %14019  ;;  %14037 = vrcp.f32 %v6567_v50  ;;  %v6545_v20 = vmul.f32 %v14018_v39, %v17948_v57  ;;  %v6575_v21 = vmul.f32 %v14014_v15, %v17776_v35  ;;  %vm6953_vm3 = vcmp.eq.f32.partialorder %v17991_v8, 0.0 }
0x1173   :  { %v14022_v28 = vpop.eup %14021  ;;  %14039 = vrcp.f32 %v6566_v42  ;;  %v6554_v58 = vsel %vm6553_vm11, %v17944_v44, %v6552_v1  ;;  %v6594_v13 = vmax.f32 %v6571_v4, 0.0  ;;  %v6577_v5 = vmul.f32 %v14012_v63, %v17773_v25 }
0x1174   :  { %v14024_v43 = vpop.eup %14023  ;;  %v6557_v50 = vsel %vm6555_vm12, %v6556_v14, %v6554_v58  ;;  %v6547_v39 = vsel %vm6546_vm10, %v17948_v57, %v6545_v20  ;;  %v6595_v53 = vmax.f32 %v6573_v29, 0.0  ;;  %v6596_v14 = vmax.f32 %v6575_v21, 0.0 }
0x1175   :  { %v14026_v42 = vpop.eup %14025  ;;  %v6569_v48 = vmax.f32 %v6557_v50, 1e-12  ;;  %v6550_v60 = vsel %vm6548_vm14, %v6549_v33, %v6547_v39  ;;  %v6936_v35 = vmul.f32 %v14024_v43, %v17965_v40  ;;  %12461 = vmatprep.mubr.msk.f32.mxu0 %vm1084_vm5, %v6594_v13  ;;  %v6597_v20 = vmax.f32 %v6577_v5, 0.0 }
0x1176   :  { %v6568_v15 = vmax.f32 %v6550_v60, 1e-12  ;;  %v6929_v44 = vmul.f32 %v14026_v42, %v17970_v37  ;;  %12462 = vmatmul.mubr.msk.f32.vlgmr.msra.gmra.mrb[156].mxu0 %vm1084_vm5, %v6595_v53  ;;  %v6579_v57 = vmul.f32 %v14022_v28, %v17786_v9  ;;  %v6581_v43 = vmul.f32 %v14020_v11, %v17783_v59 }
0x1177   :  { %v14028_v1 = vpop.eup %14027  ;;  %14041 = vrcp.f32 %v6569_v48  ;;  %v6938_v25 = vsel %vm6937_vm13, %v17965_v40, %v6936_v35  ;;  %13214 = vmatpush3.bf16.msra.mxu0 %v17861_v47  ;;  %12464 = vmatprep.mubr.msk.f32.mxu0 %vm1084_vm5, %v6596_v14  ;;  %vm6944_vm9 = vcmp.eq.f32.partialorder %v17993_v12, inf  ;;  %vm6946_vm11 = vcmp.eq.f32.partialorder %v17993_v12, 0.0 }
0x1178   :  { %v14030_v63 = vpop.eup %14029  ;;  %14043 = vrcp.f32 %v6568_v15  ;;  %v6941_v33 = vsel %vm6939_vm0, %v6940_v17, %v6938_v25  ;;  %v6931_v4 = vsel %vm6930_vm1, %v17970_v37, %v6929_v44  ;;  %v6583_v48 = vmul.f32 %v14028_v1, %v17796_v51  ;;  %13216 = vmatprep.subr.bf16.mxu0 %v17912_v52 }
0x1179   :  { %v14032_v58 = vpop.eup %14031  ;;  %v6964_v29 = vmax.f32 %v6941_v33, 1e-12  ;;  %v6934_v59 = vsel %vm6932_vm7, %v6933_v24, %v6931_v4  ;;  %v6950_v9 = vmul.f32 %v14030_v63, %v17991_v8  ;;  %v6598_v11 = vmax.f32 %v6579_v57, 0.0  ;;  %v7916_v4 = vld [vmem:[%s19067_s30 + $0x40] sm:$0xff] }
0x117a   :  { %v14034_v40 = vpop.eup %14033  ;;  %v6963_v17 = vmax.f32 %v6934_v59, 1e-12  ;;  %v6943_v28 = vmul.f32 %v14032_v58, %v17993_v12  ;;  %v6947_v37 = vand.u32 2147483648, %v17993_v12  ;;  %vm6958_vm12 = vcmp.eq.f32.partialorder %v18013_v36, inf  ;;  %12465 = vmatmul.mubr.msk.f32.gmra.mrb[158].mxu0 %vm1084_vm5, %v6597_v20 }
0x117b   :  { %v14036_v47 = vpop.eup %14035  ;;  %14045 = vrcp.f32 %v6964_v29  ;;  %v6952_v51 = vsel %vm6951_vm8, %v17991_v8, %v6950_v9  ;;  %12467 = vmatprep.mubr.msk.f32.mxu0 %vm1084_vm5, %v6598_v11  ;;  %v6600_v39 = vmax.f32 %v6583_v48, 0.0  ;;  %13218 = vmatpush3.bf16.msra.mxu0 %v17912_v52  ;;  %v6599_v60 = vmax.f32 %v6581_v43, 0.0  ;;  %v7917_v48 = vld [vmem:[%s19067_s30 + $0x48] sm:$0xff]  ;;  %v7918_v11 = vld [vmem:[%s19067_s30 + $0x50] sm:$0xff] }
0x117c   :  { %v14038_v24 = vpop.eup %14037  ;;  %14047 = vrcp.f32 %v6963_v17  ;;  %v6945_v21 = vsel %vm6944_vm9, %v17993_v12, %v6943_v28  ;;  %v6957_v50 = vmul.f32 %v14036_v47, %v18013_v36  ;;  %v6955_v5 = vsel %vm6953_vm3, %v6954_v54, %v6952_v51  ;;  %v14216_v51 = vld [vmem:[%s18971_s22 + $0x8] sm:$0xff] }
0x117d   :  { %v14040_v13 = vpop.eup %14039  ;;  %v6948_v42 = vsel %vm6946_vm11, %v6947_v37, %v6945_v21  ;;  %v6585_v35 = vmul.f32 %v14034_v40, %v17793_v41  ;;  %v6961_v14 = vand.u32 2147483648, %v18013_v36  ;;  %v6966_v52 = vmax.f32 %v6955_v5, 1e-12  ;;  %v7919_v40 = vld [vmem:[%s19067_s30 + $0x58] sm:$0xff]  ;;  %v14217_v37 = vld [vmem:[%s18971_s22 + $0x10] sm:$0xff]  ;;  %v14219_v21 = vld [vmem:[%s18971_s22 + $0x20] sm:$0xff] }
0x117e   :  { %v6965_v53 = vmax.f32 %v6948_v42, 1e-12  ;;  %v6959_v15 = vsel %vm6958_vm12, %v18013_v36, %v6957_v50  ;;  %v6587_v44 = vmul.f32 %v14040_v13, %v17806_v3  ;;  %12468 = vmatmul.mubr.msk.f32.gmra.mrb[160].mxu0 %vm1084_vm5, %v6599_v60  ;;  %vm6960_vm10 = vcmp.eq.f32.partialorder %v18013_v36, 0.0  ;;  %v14220_v50 = vld [vmem:[%s18971_s22 + $0x28] sm:$0xff]  ;;  %v14222_v13 = vld [vmem:[%s18971_s22 + $0x38] sm:$0xff]  ;;  %v14223_v5 = vld [vmem:[%s18971_s22 + $0x40] sm:$0xff] }
0x117f   :  { %12470 = vmatprep.mubr.msk.f32.mxu0 %vm1084_vm5, %v6600_v39  ;;  %v6962_v41 = vsel %vm6960_vm10, %v6961_v14, %v6959_v15  ;;  %v6601_v54 = vmax.f32 %v6585_v35, 0.0  ;;  %v6589_v20 = vmul.f32 %v14038_v24, %v17803_v23  ;;  %v13232_v59 = vpack.c.bf16 %v7917_v48, %v7916_v4  ;;  %v14218_v24 = vld [vmem:[%s18971_s22 + $0x18] sm:$0xff]  ;;  %v14221_v39 = vld [vmem:[%s18971_s22 + $0x30] sm:$0xff]  ;;  %v14224_v42 = vld [vmem:[%s18971_s22 + $0x48] sm:$0xff] }
0x1180   :  { %14049 = vrcp.f32 %v6965_v53  ;;  %v6602_v8 = vmax.f32 %v6587_v44, 0.0  ;;  %v6967_v25 = vmax.f32 %v6962_v41, 1e-12  ;;  %v13235_v17 = vpack.c.bf16 %v7919_v40, %v7918_v11  ;;  %v14225_v60 = vld [vmem:[%s18971_s22 + $0x50] sm:$0xff]  ;;  %v14226_v35 = vld [vmem:[%s18971_s22 + $0x58] sm:$0xff] }
0x1181   :  { %v14042_v12 = vpop.eup %14041  ;;  %14051 = vrcp.f32 %v6966_v52  ;;  %v6603_v57 = vmax.f32 %v6589_v20, 0.0  ;;  %vm19095_vm14 = vcmask 392192   ;;  %v10544_v53 = vld [vmem:[#allocation30] ss:$0 sm:$0xff] }
0x1182   :  { %v14044_v1 = vpop.eup %14043  ;;  %12471 = vmatmul.mubr.msk.f32.gmra.mrb[162].mxu0 %vm1084_vm5, %v6601_v54  ;;  %v6593_v63 = vmul.f32 %v14042_v12, %v17816_v19  ;;  %14053 = vrcp.f32 %v6967_v25  ;;  %vm19096_vm13 = vmmov %vm19095_vm14 }
0x1183   :  { %v6591_v3 = vmul.f32 %v14044_v1, %v17822_v6  ;;  %12473 = vmatprep.mubr.msk.f32.mxu0 %vm1084_vm5, %v6602_v8  ;;  %vm19097_vm0 = vmmov %vm19096_vm13 }
0x1184   :  { %v6605_v6 = vmax.f32 %v6593_v63, 0.0  ;;  %vm19098_vm1 = vmmov %vm19097_vm0 }
0x1185   :  { %v14046_v36 = vpop.eup %14045  ;;  %v6604_v43 = vmax.f32 %v6591_v3, 0.0  ;;  %vm19099_vm7 = vmmov %vm19097_vm0 }
0x1186   :  { %v14048_v33 = vpop.eup %14047  ;;  %12474 = vmatmul.mubr.msk.f32.gmra.mrb[164].mxu0 %vm1084_vm5, %v6603_v57  ;;  %v6971_v29 = vmul.f32 %v14046_v36, %v17814_v30  ;;  %vm19100_vm8 = vmmov %vm19097_vm0 }
0x1187   :  { %v6969_v23 = vmul.f32 %v14048_v33, %v17820_v2  ;;  %12476 = vmatprep.mubr.msk.f32.mxu0 %vm1084_vm5, %v6604_v43  ;;  %vm19101_vm3 = vmmov %vm19097_vm0 }
0x1188   :  { %v6979_v19 = vmax.f32 %v6971_v29, 0.0  ;;  %vm19102_vm9 = vmmov %vm19097_vm0 }
0x1189   :  { %v6978_v58 = vmax.f32 %v6969_v23, 0.0  ;;  %vm19103_vm11 = vmmov %vm19097_vm0 }
0x118a   :  { %v14050_v9 = vpop.eup %14049  ;;  %12477 = vmatmul.mubr.msk.f32.gmra.mrb[166].mxu0 %vm1084_vm5, %v6605_v6  ;;  %vm19104_vm12 = vmmov %vm19097_vm0 }
0x118b   :  { %12537 = vmatmul.mubr.msk.f32.vlgmr.msra.gmra.mrb[144].mxu1 %vm1084_vm5, %v6978_v58  ;;  %12487 = vmatprep.mubr.msk.f32.mxu0 %vm1084_vm5, %v17871_v46  ;;  %v6973_v2 = vmul.f32 %v14050_v9, %v17836_v49  ;;  %v14052_v30 = vpop.eup %14051  ;;  %vm19105_vm10 = vmmov %vm19097_vm0 }
0x118c   :  { %12539 = vmatprep.mubr.msk.f32.mxu1 %vm14842_vm2, %v18997_v56  ;;  %13233 = vmatpush3.bf16.msra.mxu1 %v13232_v59  ;;  %v6975_v28 = vmul.f32 %v14052_v30, %v17832_v26  ;;  %v14054_v49 = vpop.eup %14053 }
0x118d   :  { %13234 = vmatprep.subr.bf16.mxu1 %v19000_v27  ;;  %v6980_v46 = vmax.f32 %v6973_v2, 0.0 }
0x118e   :  { %12488 = vmatmul.mubr.msk.f32.vlgmr.msra.gmra.mrb[156].mxu0 %vm1084_vm5, %v17869_v38  ;;  %v6981_v38 = vmax.f32 %v6975_v28, 0.0 }
0x118f   :  { %12540 = vmatmul.mubr.msk.f32.gmra.mrb[146].mxu1 %vm1084_vm5, %v6979_v19  ;;  %12490 = vmatprep.mubr.msk.f32.mxu0 %vm1084_vm5, %v17876_v10  ;;  %v6977_v10 = vmul.f32 %v14054_v49, %v17847_v0  ;;  %v19092_v0 = vld [vmem:[#allocation119_spill] sm:$0xff] }
0x1190   :  { %12542 = vmatprep.mubr.msk.f32.mxu1 %vm14842_vm2, %v18997_v56  ;;  %13236 = vmatpush3.bf16.msra.mxu1 %v13235_v17 }
0x1191   :  { %v6982_v26 = vmax.f32 %v6977_v10, 0.0 }
0x1192   :  { %12491 = vmatmul.mubr.msk.f32.gmra.mrb[158].mxu0 %vm1084_vm5, %v17874_v22  ;;  %v19093_v22 = vld [vmem:[#allocation118_spill] sm:$0xff] }
0x1193   :  { %12543 = vmatmul.mubr.msk.f32.gmra.mrb[148].mxu1 %vm1084_vm5, %v6980_v46  ;;  %12493 = vmatprep.mubr.msk.f32.mxu0 %vm1084_vm5, %v17880_v34  ;;  %v14215_v34 = vld [vmem:[%s18971_s22] sm:$0xff]  ;;  %s19107_s22 = sld [smem:[#allocation78_spill]] }
0x1194   :  { %12545 = vmatprep.mubr.msk.f32.mxu1 %vm14842_vm2, %v18997_v56 }
0x1196   :  { %12494 = vmatmul.mubr.msk.f32.gmra.mrb[160].mxu0 %vm1084_vm5, %v17878_v16  ;;  %v19094_v16 = vld [vmem:[#allocation122_spill] sm:$0xff] }
0x1197   :  { %12546 = vmatmul.mubr.msk.f32.gmra.mrb[150].mxu1 %vm1084_vm5, %v6981_v38  ;;  %12496 = vmatprep.mubr.msk.f32.mxu0 %vm1084_vm5, %v17884_v31  ;;  %v8337_v31 = vld [vmem:[%s19091_s28 + $0x8] sm:$0xff] }
0x1198   :  { %12548 = vmatprep.mubr.msk.f32.mxu1 %vm14842_vm2, %v18997_v56 }
0x119a   :  { %12497 = vmatmul.mubr.msk.f32.gmra.mrb[162].mxu0 %vm1084_vm5, %v17882_v45  ;;  %v8336_v45 = vld [vmem:[%s19091_s28] sm:$0xff] }
0x119b   :  { %12549 = vmatmul.mubr.msk.f32.gmra.mrb[152].mxu1 %vm1084_vm5, %v6982_v26  ;;  %12499 = vmatprep.mubr.msk.f32.mxu0 %vm1084_vm5, %v17888_v62  ;;  %v13237_v62 = vpack.c.bf16 %v8337_v31, %v8336_v45 }
0x119c   :  { %12559 = vmatprep.mubr.msk.f32.mxu1 %vm14842_vm2, %v18997_v56 }
0x119d   :  { %13238 = vmatprep.subr.bf16.mxu1 %v13237_v62 }
0x119e   :  { %12500 = vmatmul.mubr.msk.f32.gmra.mrb[164].mxu0 %vm1084_vm5, %v17886_v7  ;;  %v8338_v7 = vld [vmem:[%s19091_s28 + $0x10] sm:$0xff] }
0x119f   :  { %12560 = vmatmul.mubr.msk.f32.vlgmr.msra.gmra.mrb[144].mxu1 %vm1084_vm5, %v17892_v55  ;;  %12502 = vmatprep.mubr.msk.f32.mxu0 %vm1084_vm5, %v17894_v18  ;;  %v8340_v18 = vld [vmem:[%s19091_s28 + $0x20] sm:$0xff] }
0x11a0   :  { %12562 = vmatprep.mubr.msk.f32.mxu1 %vm14842_vm2, %v18997_v56  ;;  %13240 = vmatpush3.bf16.msra.mxu1 %v13237_v62 }
0x11a2   :  { %12503 = vmatmul.mubr.msk.f32.gmra.mrb[166].mxu0 %vm1084_vm5, %v17890_v32  ;;  %v8339_v32 = vld [vmem:[%s19091_s28 + $0x18] sm:$0xff] }
0x11a3   :  { %12563 = vmatmul.mubr.msk.f32.gmra.mrb[146].mxu1 %vm1084_vm5, %v17896_v61  ;;  %v13241_v55 = vpack.c.bf16 %v8339_v32, %v8338_v7  ;;  %v8341_v61 = vld [vmem:[%s19091_s28 + $0x28] sm:$0xff] }
0x11a4   :  { %12565 = vmatprep.mubr.msk.f32.mxu1 %vm14842_vm2, %v18997_v56  ;;  %v13245_v47 = vpack.c.bf16 %v8341_v61, %v8340_v18 }
0x11a5   :  { %13242 = vmatprep.subr.bf16.mxu1 %v13241_v55 }
0x11a6   :  { %13244 = vmatpush3.bf16.msra.mxu1 %v13241_v55 }
0x11a7   :  { %12566 = vmatmul.mubr.msk.f32.gmra.mrb[148].mxu1 %vm1084_vm5, %v19092_v0  ;;  %13246 = vmatprep.subr.bf16.mxu1 %v13245_v47 }
0x11a8   :  { %12568 = vmatprep.mubr.msk.f32.mxu1 %vm14842_vm2, %v18997_v56 }
0x11aa   :  { %13248 = vmatpush3.bf16.msra.mxu1 %v13245_v47 }
0x11ab   :  { %12569 = vmatmul.mubr.msk.f32.gmra.mrb[150].mxu1 %vm1084_vm5, %v19093_v22 }
0x11ac   :  { %12571 = vmatprep.mubr.msk.f32.mxu1 %vm14842_vm2, %v18997_v56 }
0x11af   :  { %12572 = vmatmul.mubr.msk.f32.gmra.mrb[152].mxu1 %vm1084_vm5, %v19094_v16 }
0x11b0   :  { %12586 = vmatprep.mubr.msk.f32.mxu1 %vm19095_vm14, %v14215_v34  ;;  %vm19106_vm14 = vmmov %vm19097_vm0 }
0x11b3   :  { %12587 = vmatmul.mubr.msk.f32.vlgmr.msra.gmra.mrb[154].mxu1 %vm19096_vm13, %v14216_v51  ;;  %vm19114_vm13 = vcmask 146432  }
0x11b4   :  { %12589 = vmatprep.mubr.msk.f32.mxu1 %vm19097_vm0, %v14217_v37  ;;  %vm19115_vm0 = vmmov %vm19114_vm13 }
0x11b7   :  { %12590 = vmatmul.mubr.msk.f32.gmra.mrb[156].mxu1 %vm19098_vm1, %v14218_v24  ;;  %vm19116_vm1 = vmmov %vm19115_vm0 }
0x11b8   :  { %12592 = vmatprep.mubr.msk.f32.mxu1 %vm19099_vm7, %v14219_v21  ;;  %vm19117_vm7 = vmmov %vm19115_vm0 }
0x11bb   :  { %12593 = vmatmul.mubr.msk.f32.gmra.mrb[158].mxu1 %vm19100_vm8, %v14220_v50  ;;  %vm19119_vm8 = vmmov %vm19115_vm0 }
0x11bc   :  { %12595 = vmatprep.mubr.msk.f32.mxu1 %vm19101_vm3, %v14221_v39  ;;  %vm19127_vm3 = vcmask 293888  }
0x11bf   :  { %12596 = vmatmul.mubr.msk.f32.gmra.mrb[160].mxu1 %vm19102_vm9, %v14222_v13  ;;  %vm10011_vm9 = vcmask 0  }
0x11c0   :  { %12598 = vmatprep.mubr.msk.f32.mxu1 %vm19103_vm11, %v14223_v5 }
0x11c3   :  { %12599 = vmatmul.mubr.msk.f32.gmra.mrb[162].mxu1 %vm19104_vm12, %v14224_v42 }
0x11c4   :  { %12601 = vmatprep.mubr.msk.f32.mxu1 %vm19105_vm10, %v14225_v60 }
0x11c7   :  { %12602 = vmatmul.mubr.msk.f32.gmra.mrb[164].mxu1 %vm19106_vm14, %v14226_v35 }
0x1261   :  { %v12489_v15 = vpop.f32.mrb[156].mxu0 }
0x1262   :  { %v13401_v44 = vadd.f32 %v12489_v15, %v10544_v53  ;;  %v7631_v14 = vpop.f32.mrb[157].mxu0 }
0x1263   :  { %v13402_v52 = vadd.f32 %v10544_v53, %v7631_v14 }
0x1264   :  { %v7705_v8 = vsel %vm1084_vm5, %v13401_v44, 0.0 }
0x1265   :  { %7706 = vadd.xlane.f32.xlu1 %v7705_v8  ;;  %v12492_v12 = vpop.f32.mrb[158].mxu0  ;;  %v7702_v41 = vsel %vm1084_vm5, %v13402_v52, 0.0 }
0x1266   :  { %v13403_v54 = vadd.f32 %v12492_v12, %v10544_v53  ;;  %7703 = vadd.xlane.f32.xlu0 %v7702_v41  ;;  %v7641_v20 = vpop.f32.mrb[159].mxu0 }
0x1267   :  { %v13404_v1 = vadd.f32 %v10544_v53, %v7641_v20 }
0x1268   :  { %v7711_v3 = vsel %vm1084_vm5, %v13403_v54, 0.0 }
0x1269   :  { %7712 = vadd.xlane.f32.xlu1 %v7711_v3  ;;  %v12495_v25 = vpop.f32.mrb[160].mxu0  ;;  %v7708_v36 = vsel %vm1084_vm5, %v13404_v1, 0.0 }
0x126a   :  { %v18194_v57 = vadd.f32 %v12495_v25, %v10544_v53  ;;  %7709 = vadd.xlane.f32.xlu0 %v7708_v36  ;;  %v7651_v43 = vpop.f32.mrb[161].mxu0 }
0x126b   :  { %v18196_v63 = vadd.f32 %v10544_v53, %v7651_v43 }
0x126c   :  { %v7717_v33 = vsel %vm1084_vm5, %v18194_v57, 0.0 }
0x126d   :  { %7718 = vadd.xlane.f32.xlu1 %v7717_v33  ;;  %v12498_v4 = vpop.f32.mrb[162].mxu0  ;;  %v7714_v48 = vsel %vm1084_vm5, %v18196_v63, 0.0 }
0x126e   :  { %v18202_v23 = vadd.f32 %v12498_v4, %v10544_v53  ;;  %7715 = vadd.xlane.f32.xlu0 %v7714_v48  ;;  %v7661_v6 = vpop.f32.mrb[163].mxu0 }
0x126f   :  { %v18204_v58 = vadd.f32 %v10544_v53, %v7661_v6 }
0x1270   :  { %v7723_v29 = vsel %vm1084_vm5, %v18202_v23, 0.0 }
0x1271   :  { %7724 = vadd.xlane.f32.xlu1 %v7723_v29  ;;  %v12501_v59 = vpop.f32.mrb[164].mxu0  ;;  %v7720_v9 = vsel %vm1084_vm5, %v18204_v58, 0.0 }
0x1272   :  { %v18210_v11 = vpop.f32.mrb[144].mxu1  ;;  %v18212_v40 = vadd.f32 %v12501_v59, %v10544_v53  ;;  %7721 = vadd.xlane.f32.xlu0 %v7720_v9  ;;  %v7671_v19 = vpop.f32.mrb[165].mxu0 }
0x1273   :  { %v12561_v2 = vpop.f32.mrb[145].mxu1  ;;  %v18214_v17 = vadd.f32 %v10544_v53, %v7671_v19 }
0x1274   :  { %v7729_v30 = vsel %vm1084_vm5, %v18212_v40, 0.0 }
0x1275   :  { %7730 = vadd.xlane.f32.xlu1 %v7729_v30  ;;  %v12504_v46 = vpop.f32.mrb[166].mxu0  ;;  %v7726_v28 = vsel %vm1084_vm5, %v18214_v17, 0.0 }
0x1276   :  { %v18220_v49 = vpop.f32.mrb[146].mxu1  ;;  %v18222_v38 = vadd.f32 %v12504_v46, %v10544_v53  ;;  %7727 = vadd.xlane.f32.xlu0 %v7726_v28  ;;  %v7681_v10 = vpop.f32.mrb[167].mxu0 }
0x1277   :  { %v12564_v26 = vpop.f32.mrb[147].mxu1  ;;  %v18224_v0 = vadd.f32 %v10544_v53, %v7681_v10 }
0x1278   :  { %v7735_v22 = vsel %vm1084_vm5, %v18222_v38, 0.0 }
0x1279   :  { %7736 = vadd.xlane.f32.xlu1 %v7735_v22  ;;  %v7732_v16 = vsel %vm1084_vm5, %v18224_v0, 0.0 }
0x127a   :  { %v18230_v34 = vpop.f32.mrb[148].mxu1  ;;  %7733 = vadd.xlane.f32.xlu0 %v7732_v16 }
0x127b   :  { %v12567_v45 = vpop.f32.mrb[149].mxu1 }
0x127e   :  { %v18232_v31 = vpop.f32.mrb[150].mxu1 }
0x127f   :  { %v12570_v7 = vpop.f32.mrb[151].mxu1 }
0x1282   :  { %v18234_v62 = vpop.f32.mrb[152].mxu1 }
0x1283   :  { %v12573_v32 = vpop.f32.mrb[153].mxu1 }
0x12f2   :  { %v7707_v55 = vpop.xlane.xlu1 %7706 }
0x12f3   :  { %v7739_v18 = vmul.f32 0.03125, %v7707_v55  ;;  %v7704_v61 = vpop.xlane.xlu0 %7703 }
0x12f4   :  { %v7738_v47 = vmul.f32 0.03125, %v7704_v61 }
0x12f5   :  { %v18236_v51 = vsub.f32 %v13401_v44, %v7739_v18  ;;  %v10576_v18 = vld [vmem:[#allocation20] ss:$0 sm:$0xff] }
0x12f6   :  { %v18238_v37 = vsub.f32 %v13402_v52, %v7738_v47  ;;  %v7713_v24 = vpop.xlane.xlu1 %7712 }
0x12f7   :  { %v7741_v21 = vmul.f32 0.03125, %v7713_v24  ;;  %v7710_v50 = vpop.xlane.xlu0 %7709  ;;  %v7763_v39 = vmul.f32 %v18236_v51, %v18236_v51  ;;  %v18303_v24 = vadd.f32 %v10576_v18, %v18220_v49  ;;  %v18316_v49 = vadd.f32 %v10576_v18, %v18230_v34 }
0x12f8   :  { %v7740_v13 = vmul.f32 0.03125, %v7710_v50  ;;  %v7762_v5 = vmul.f32 %v18238_v37, %v18238_v37  ;;  %v18311_v50 = vadd.f32 %v10576_v18, %v18232_v31  ;;  %v8478_v31 = vld [vmem:[%s19107_s22 + $0x20] sm:$0xff] }
0x12f9   :  { %v18244_v42 = vsub.f32 %v13403_v54, %v7741_v21  ;;  %v7777_v60 = vsel %vm1084_vm5, %v7763_v39, 0.0  ;;  %v8245_v39 = vsel %vm1084_vm5, %v18303_v24, 0.0  ;;  %v8248_v34 = vsel %vm1084_vm5, %v18316_v49, 0.0 }
0x12fa   :  { %v18247_v35 = vsub.f32 %v13404_v1, %v7740_v13  ;;  %v7719_v53 = vpop.xlane.xlu1 %7718  ;;  %7778 = vadd.xlane.f32.xlu1 %v7777_v60  ;;  %v7774_v15 = vsel %vm1084_vm5, %v7762_v5, 0.0  ;;  %v8251_v13 = vsel %vm1084_vm5, %v18311_v50, 0.0  ;;  %v18323_v5 = vadd.f32 %v10576_v18, %v18234_v62  ;;  %v8479_v60 = vld [vmem:[%s19107_s22 + $0x28] sm:$0xff] }
0x12fb   :  { %v7743_v44 = vmul.f32 0.03125, %v7719_v53  ;;  %7775 = vadd.xlane.f32.xlu0 %v7774_v15  ;;  %v7716_v14 = vpop.xlane.xlu0 %7715  ;;  %v7765_v52 = vmul.f32 %v18244_v42, %v18244_v42  ;;  %v13249_v53 = vpack.c.bf16 %v8479_v60, %v8478_v31  ;;  %v18362_v31 = vld [vmem:[#allocation33] ss:$0 sm:$0xff] }
0x12fc   :  { %v7742_v8 = vmul.f32 0.03125, %v7716_v14  ;;  %v7764_v12 = vmul.f32 %v18247_v35, %v18247_v35  ;;  %v8254_v15 = vsel %vm2395_vm6, %v18323_v5, 0.0  ;;  %v8481_v14 = vld [vmem:[%s19107_s22 + $0x38] sm:$0xff] }
0x12fd   :  { %v18255_v41 = vsub.f32 %v18194_v57, %v7743_v44  ;;  %v7783_v54 = vsel %vm1084_vm5, %v7765_v52, 0.0  ;;  %13250 = vmatprep.subr.bf16.mxu0 %v13249_v53  ;;  %v8480_v44 = vld [vmem:[%s19107_s22 + $0x30] sm:$0xff]  ;;  %v8474_v52 = vld [vmem:[%s19107_s22] sm:$0xff] }
0x12fe   :  { %v18259_v20 = vsub.f32 %v18196_v63, %v7742_v8  ;;  %v7725_v1 = vpop.xlane.xlu1 %7724  ;;  %7784 = vadd.xlane.f32.xlu1 %v7783_v54  ;;  %v7780_v3 = vsel %vm1084_vm5, %v7764_v12, 0.0  ;;  %13252 = vmatpush3.bf16.msra.mxu0 %v13249_v53  ;;  %v13253_v62 = vpack.c.bf16 %v8481_v14, %v8480_v44  ;;  %v8475_v8 = vld [vmem:[%s19107_s22 + $0x8] sm:$0xff]  ;;  %v18338_v54 = vpop.f32.mrb[154].mxu1 }
0x12ff   :  { %v7745_v25 = vmul.f32 0.03125, %v7725_v1  ;;  %7781 = vadd.xlane.f32.xlu0 %v7780_v3  ;;  %v7722_v36 = vpop.xlane.xlu0 %7721  ;;  %v7767_v43 = vmul.f32 %v18255_v41, %v18255_v41  ;;  %v18335_v12 = vpack.c.bf16 %v8475_v8, %v8474_v52  ;;  %v18340_v1 = vpop.f32.mrb[155].mxu1 }
0x1300   :  { %v7744_v33 = vmul.f32 0.03125, %v7722_v36  ;;  %v7766_v57 = vmul.f32 %v18259_v20, %v18259_v20  ;;  %13254 = vmatprep.subr.bf16.mxu0 %v13253_v62  ;;  %v18342_v3 = vpop.f32.mrb[156].mxu1 }
0x1301   :  { %v18267_v4 = vsub.f32 %v18202_v23, %v7745_v25  ;;  %v7789_v63 = vsel %vm1084_vm5, %v7767_v43, 0.0  ;;  %v18344_v25 = vpop.f32.mrb[157].mxu1 }
0x1302   :  { %v18271_v48 = vsub.f32 %v18204_v58, %v7744_v33  ;;  %v7731_v6 = vpop.xlane.xlu1 %7730  ;;  %7790 = vadd.xlane.f32.xlu1 %v7789_v63  ;;  %v7786_v29 = vsel %vm1084_vm5, %v7766_v57, 0.0  ;;  %13256 = vmatpush3.bf16.msra.mxu0 %v13253_v62  ;;  %v18346_v36 = vpop.f32.mrb[158].mxu1  ;;  %v18365_v62 = vld [vmem:[#allocation32] ss:$0 sm:$0xff] }
0x1303   :  { %v7747_v59 = vmul.f32 0.03125, %v7731_v6  ;;  %7787 = vadd.xlane.f32.xlu0 %v7786_v29  ;;  %v7728_v9 = vpop.xlane.xlu0 %7727  ;;  %v7769_v19 = vmul.f32 %v18267_v4, %v18267_v4  ;;  %13258 = vmatprep.subr.bf16.mxu0 %v18335_v12  ;;  %v18348_v43 = vpop.f32.mrb[159].mxu1 }
0x1304   :  { %v7746_v2 = vmul.f32 0.03125, %v7728_v9  ;;  %v7768_v23 = vmul.f32 %v18271_v48, %v18271_v48  ;;  %v18350_v33 = vpop.f32.mrb[160].mxu1 }
0x1305   :  { %v18279_v30 = vsub.f32 %v18212_v40, %v7747_v59  ;;  %v7795_v58 = vsel %vm1084_vm5, %v7769_v19, 0.0  ;;  %v18352_v57 = vpop.f32.mrb[161].mxu1 }
0x1306   :  { %v18283_v46 = vsub.f32 %v18214_v17, %v7746_v2  ;;  %7796 = vadd.xlane.f32.xlu1 %v7795_v58  ;;  %v7737_v28 = vpop.xlane.xlu1 %7736  ;;  %v7792_v10 = vsel %vm1084_vm5, %v7768_v23, 0.0  ;;  %v18354_v63 = vpop.f32.mrb[162].mxu1 }
0x1307   :  { %v7749_v26 = vmul.f32 0.03125, %v7737_v28  ;;  %7793 = vadd.xlane.f32.xlu0 %v7792_v10  ;;  %v7734_v22 = vpop.xlane.xlu0 %7733  ;;  %v7771_v16 = vmul.f32 %v18279_v30, %v18279_v30  ;;  %v18356_v6 = vpop.f32.mrb[163].mxu1 }
0x1308   :  { %v7748_v45 = vmul.f32 0.03125, %v7734_v22  ;;  %v7770_v40 = vmul.f32 %v18283_v46, %v18283_v46  ;;  %v18358_v29 = vpop.f32.mrb[164].mxu1 }
0x1309   :  { %v18291_v7 = vsub.f32 %v18222_v38, %v7749_v26  ;;  %v7801_v17 = vsel %vm1084_vm5, %v7771_v16, 0.0  ;;  %v18360_v59 = vpop.f32.mrb[165].mxu1 }
0x130a   :  { %v18295_v32 = vsub.f32 %v18224_v0, %v7748_v45  ;;  %7802 = vadd.xlane.f32.xlu1 %v7801_v17  ;;  %v7798_v55 = vsel %vm1084_vm5, %v7770_v40, 0.0  ;;  %v18307_v0 = vadd.f32 %v10576_v18, %v18210_v11 }
0x130b   :  { %7799 = vadd.xlane.f32.xlu0 %v7798_v55  ;;  %v7773_v61 = vmul.f32 %v18291_v7, %v18291_v7 }
0x130c   :  { %v7772_v47 = vmul.f32 %v18295_v32, %v18295_v32  ;;  %v8242_v11 = vsel %vm1084_vm5, %v18307_v0, 0.0 }
0x130d   :  { %v7807_v38 = vsel %vm1084_vm5, %v7773_v61, 0.0 }
0x130e   :  { %7808 = vadd.xlane.f32.xlu1 %v7807_v38  ;;  %v7804_v21 = vsel %vm1084_vm5, %v7772_v47, 0.0 }
0x130f   :  { %7805 = vadd.xlane.f32.xlu0 %v7804_v21 }
0x1312   :  { %8246 = vadd.xlane.f32.xlu1 %v8245_v39 }
0x1313   :  { %8243 = vadd.xlane.f32.xlu0 %v8242_v11 }
0x1316   :  { %8252 = vadd.xlane.f32.xlu1 %v8251_v13 }
0x1317   :  { %8249 = vadd.xlane.f32.xlu0 %v8248_v34 }
0x131b   :  { %8255 = vadd.xlane.f32.xlu0 %v8254_v15 }
0x1387   :  { %v7779_v9 = vpop.xlane.xlu1 %7778 }
0x1388   :  { %v7811_v19 = vmul.f32 0.03125, %v7779_v9  ;;  %v7776_v2 = vpop.xlane.xlu0 %7775 }
0x1389   :  { %v7810_v23 = vmul.f32 0.03125, %v7776_v2 }
0x138a   :  { %v7823_v58 = vadd.f32 1e-05, %v7811_v19 }
0x138b   :  { %v7822_v28 = vadd.f32 1e-05, %v7810_v23  ;;  %v7785_v10 = vpop.xlane.xlu1 %7784 }
0x138c   :  { %14055 = vrsqrt.f32 %v7823_v58  ;;  %v7813_v26 = vmul.f32 0.03125, %v7785_v10  ;;  %v7782_v22 = vpop.xlane.xlu0 %7781 }
0x138d   :  { %14057 = vrsqrt.f32 %v7822_v28  ;;  %v7812_v16 = vmul.f32 0.03125, %v7782_v22 }
0x138e   :  { %v7825_v45 = vadd.f32 1e-05, %v7813_v26 }
0x138f   :  { %v7824_v40 = vadd.f32 1e-05, %v7812_v16  ;;  %v7791_v17 = vpop.xlane.xlu1 %7790 }
0x1390   :  { %14059 = vrsqrt.f32 %v7825_v45  ;;  %v7815_v55 = vmul.f32 0.03125, %v7791_v17  ;;  %v7788_v18 = vpop.xlane.xlu0 %7787 }
0x1391   :  { %14061 = vrsqrt.f32 %v7824_v40  ;;  %v7814_v61 = vmul.f32 0.03125, %v7788_v18  ;;  %v8477_v18 = vld [vmem:[%s19107_s22 + $0x18] sm:$0xff] }
0x1392   :  { %v7827_v47 = vadd.f32 1e-05, %v7815_v55  ;;  %v8476_v55 = vld [vmem:[%s19107_s22 + $0x10] sm:$0xff] }
0x1393   :  { %v7826_v38 = vadd.f32 1e-05, %v7814_v61  ;;  %v7797_v21 = vpop.xlane.xlu1 %7796 }
0x1394   :  { %14063 = vrsqrt.f32 %v7827_v47  ;;  %v7817_v39 = vmul.f32 0.03125, %v7797_v21  ;;  %v7794_v11 = vpop.xlane.xlu0 %7793 }
0x1395   :  { %14065 = vrsqrt.f32 %v7826_v38  ;;  %v7816_v13 = vmul.f32 0.03125, %v7794_v11 }
0x1396   :  { %v14056_v34 = vpop.eup %14055  ;;  %v7829_v60 = vadd.f32 1e-05, %v7817_v39 }
0x1397   :  { %v14058_v53 = vpop.eup %14057  ;;  %v7847_v15 = vmul.f32 %v14056_v34, %v18236_v51  ;;  %v7828_v44 = vadd.f32 1e-05, %v7816_v13  ;;  %v7803_v14 = vpop.xlane.xlu1 %7802 }
0x1398   :  { %14067 = vrsqrt.f32 %v7829_v60  ;;  %v7819_v52 = vmul.f32 0.03125, %v7803_v14  ;;  %v7800_v8 = vpop.xlane.xlu0 %7799  ;;  %v7846_v9 = vmul.f32 %v14058_v53, %v18238_v37 }
0x1399   :  { %v7866_v19 = vmul.f32 %v18362_v31, %v7847_v15  ;;  %14069 = vrsqrt.f32 %v7828_v44  ;;  %v7818_v2 = vmul.f32 0.03125, %v7800_v8  ;;  %v13261_v15 = vpack.c.bf16 %v8477_v18, %v8476_v55 }
0x139a   :  { %v14060_v23 = vpop.eup %14059  ;;  %v7831_v58 = vadd.f32 1e-05, %v7819_v52  ;;  %v7865_v28 = vmul.f32 %v18362_v31, %v7846_v9 }
0x139b   :  { %v14062_v51 = vpop.eup %14061  ;;  %v7885_v10 = vadd.f32 %v18365_v62, %v7866_v19  ;;  %v7830_v26 = vadd.f32 1e-05, %v7818_v2  ;;  %v7809_v22 = vpop.xlane.xlu1 %7808  ;;  %v7849_v16 = vmul.f32 %v14060_v23, %v18244_v42 }
0x139c   :  { %14071 = vrsqrt.f32 %v7831_v58  ;;  %v7821_v37 = vmul.f32 0.03125, %v7809_v22  ;;  %v7806_v45 = vpop.xlane.xlu0 %7805  ;;  %v7884_v40 = vadd.f32 %v18365_v62, %v7865_v28  ;;  %v7848_v17 = vmul.f32 %v14062_v51, %v18247_v35 }
0x139d   :  { %v18376_v61 = vmax.f32 %v7885_v10, 0.0  ;;  %14073 = vrsqrt.f32 %v7830_v26  ;;  %v7820_v47 = vmul.f32 0.03125, %v7806_v45  ;;  %v7868_v38 = vmul.f32 %v18362_v31, %v7849_v16 }
0x139e   :  { %v14064_v21 = vpop.eup %14063  ;;  %v7833_v39 = vadd.f32 1e-05, %v7821_v37  ;;  %v18379_v42 = vmax.f32 %v7884_v40, 0.0  ;;  %v7867_v11 = vmul.f32 %v18362_v31, %v7848_v17 }
0x139f   :  { %v14066_v13 = vpop.eup %14065  ;;  %10014 = vst.msk [vmem:[%s15221_s29 + $0x8] sm:$0xff] %vm1084_vm5, %v18376_v61  ;;  %v7832_v35 = vadd.f32 1e-05, %v7820_v47  ;;  %v8247_v34 = vpop.xlane.xlu1 %8246  ;;  %v7887_v60 = vadd.f32 %v18365_v62, %v7868_v38  ;;  %v7851_v53 = vmul.f32 %v14064_v21, %v18255_v41 }
0x13a0   :  { %14075 = vrsqrt.f32 %v7833_v39  ;;  %v8258_v44 = vmul.f32 0.03125, %v8247_v34  ;;  %12612 = vmatprep.mubr.msk.f32.mxu0 %vm1084_vm5, %v18379_v42  ;;  %10013 = vst.msk [vmem:[%s15221_s29] sm:$0xff] %vm1084_vm5, %v18379_v42  ;;  %v8244_v14 = vpop.xlane.xlu0 %8243  ;;  %v7886_v52 = vadd.f32 %v18365_v62, %v7867_v11  ;;  %v7850_v8 = vmul.f32 %v14066_v13, %v18259_v20 }
0x13a1   :  { %14077 = vrsqrt.f32 %v7832_v35  ;;  %v8257_v9 = vmul.f32 0.03125, %v8244_v14  ;;  %12613 = vmatmul.mubr.msk.f32.vlgmr.msra.gmra.mrb[168].mxu0 %vm1084_vm5, %v18376_v61  ;;  %v18396_v41 = vmax.f32 %v7887_v60, 0.0  ;;  %v7870_v19 = vmul.f32 %v18362_v31, %v7851_v53 }
0x13a2   :  { %v14068_v2 = vpop.eup %14067  ;;  %v18400_v23 = vsub.f32 %v18303_v24, %v8258_v44  ;;  %13260 = vmatpush3.bf16.msra.mxu0 %v18335_v12  ;;  %v18403_v58 = vmax.f32 %v7886_v52, 0.0  ;;  %v7869_v20 = vmul.f32 %v18362_v31, %v7850_v8  ;;  %v13295_v28 = vpack.c.bf16 %v18376_v61, %v18379_v42 }
0x13a3   :  { %v14070_v51 = vpop.eup %14069  ;;  %v18409_v10 = vsub.f32 %v18307_v0, %v8257_v9  ;;  %v8253_v26 = vpop.xlane.xlu1 %8252  ;;  %10016 = vst.msk [vmem:[%s15221_s29 + $0x18] sm:$0xff] %vm1084_vm5, %v18396_v41  ;;  %v7889_v24 = vadd.f32 %v18365_v62, %v7870_v19  ;;  %v7853_v22 = vmul.f32 %v14068_v2, %v18267_v4  ;;  %13262 = vmatprep.subr.bf16.mxu0 %v13261_v15 }
0x13a4   :  { %v8260_v12 = vmul.f32 0.03125, %v8253_v26  ;;  %12615 = vmatprep.mubr.msk.f32.mxu0 %vm1084_vm5, %v18403_v58  ;;  %10015 = vst.msk [vmem:[%s15221_s29 + $0x10] sm:$0xff] %vm1084_vm5, %v18403_v58  ;;  %v8250_v16 = vpop.xlane.xlu0 %8249  ;;  %v8268_v0 = vmul.f32 %v18400_v23, %v18400_v23  ;;  %v7888_v37 = vadd.f32 %v18365_v62, %v7869_v20  ;;  %v7852_v45 = vmul.f32 %v14070_v51, %v18271_v48 }
0x13a5   :  { %v8259_v40 = vmul.f32 0.03125, %v8250_v16  ;;  %12616 = vmatmul.mubr.msk.f32.gmra.mrb[170].mxu0 %vm1084_vm5, %v18396_v41  ;;  %v8267_v4 = vmul.f32 %v18409_v10, %v18409_v10  ;;  %v18429_v17 = vmax.f32 %v7889_v24, 0.0  ;;  %v7872_v55 = vmul.f32 %v18362_v31, %v7853_v22 }
0x13a6   :  { %v14072_v18 = vpop.eup %14071  ;;  %v18433_v47 = vsub.f32 %v18311_v50, %v8260_v12  ;;  %v8275_v38 = vsel %vm1084_vm5, %v8268_v0, 0.0  ;;  %v18436_v48 = vmax.f32 %v7888_v37, 0.0  ;;  %v7871_v21 = vmul.f32 %v18362_v31, %v7852_v45  ;;  %13264 = vmatpush3.bf16.msra.mxu0 %v13261_v15 }
0x13a7   :  { %v14074_v39 = vpop.eup %14073  ;;  %v18440_v11 = vsub.f32 %v18316_v49, %v8259_v40  ;;  %8276 = vadd.xlane.f32.xlu0 %v8275_v38  ;;  %v8272_v13 = vsel %vm1084_vm5, %v8267_v4, 0.0  ;;  %10018 = vst.msk [vmem:[%s15221_s29 + $0x28] sm:$0xff] %vm1084_vm5, %v18429_v17  ;;  %v7891_v50 = vadd.f32 %v18365_v62, %v7872_v55  ;;  %v7855_v35 = vmul.f32 %v14072_v18, %v18279_v30  ;;  %v10589_v4 = vld [vmem:[%s19108_s2] ss:$0 sm:$0xff] }
0x13a8   :  { %13276 = vmatprep.subr.bf16.mxu0 %v19000_v27  ;;  %12618 = vmatprep.mubr.msk.f32.mxu0 %vm1084_vm5, %v18436_v48  ;;  %10017 = vst.msk [vmem:[%s15221_s29 + $0x20] sm:$0xff] %vm1084_vm5, %v18436_v48  ;;  %v8256_v49 = vpop.xlane.xlu0 %8255  ;;  %v8270_v34 = vmul.f32 %v18433_v47, %v18433_v47  ;;  %v7890_v60 = vadd.f32 %v18365_v62, %v7871_v21 }
0x13a9   :  { %8273 = vadd.xlane.f32.xlu1 %v8272_v13  ;;  %v7854_v53 = vmul.f32 %v14074_v39, %v18283_v46  ;;  %v8261_v15 = vmul.f32 0.03125, %v8256_v49  ;;  %12619 = vmatmul.mubr.msk.f32.gmra.mrb[172].mxu0 %vm1084_vm5, %v18429_v17  ;;  %v8269_v30 = vmul.f32 %v18440_v11, %v18440_v11  ;;  %v18462_v44 = vmax.f32 %v7891_v50, 0.0 }
0x13aa   :  { %v7874_v14 = vmul.f32 %v18362_v31, %v7855_v35  ;;  %v14076_v52 = vpop.eup %14075  ;;  %v8281_v8 = vsel %vm1084_vm5, %v8270_v34, 0.0  ;;  %v18466_v9 = vmax.f32 %v7890_v60, 0.0  ;;  %v13298_v46 = vpack.c.bf16 %v18396_v41, %v18403_v58  ;;  %v9218_v34 = vld [vmem:[%s19109_s25 + $0x28] sm:$0xff] }
0x13ab   :  { %v7873_v19 = vmul.f32 %v18362_v31, %v7854_v53  ;;  %v14078_v2 = vpop.eup %14077  ;;  %v18472_v20 = vsub.f32 %v18323_v5, %v8261_v15  ;;  %8282 = vadd.xlane.f32.xlu0 %v8281_v8  ;;  %v8278_v51 = vsel %vm1084_vm5, %v8269_v30, 0.0  ;;  %10020 = vst.msk [vmem:[%s15221_s29 + $0x38] sm:$0xff] %vm1084_vm5, %v18462_v44  ;;  %v7857_v24 = vmul.f32 %v14076_v52, %v18291_v7 }
0x13ac   :  { %v7893_v26 = vadd.f32 %v18365_v62, %v7874_v14  ;;  %12621 = vmatprep.mubr.msk.f32.mxu0 %vm1084_vm5, %v18466_v9  ;;  %10019 = vst.msk [vmem:[%s15221_s29 + $0x30] sm:$0xff] %vm1084_vm5, %v18466_v9  ;;  %v7856_v22 = vmul.f32 %v14078_v2, %v18295_v32  ;;  %v13301_v12 = vpack.c.bf16 %v18429_v17, %v18436_v48 }
0x13ad   :  { %8279 = vadd.xlane.f32.xlu1 %v8278_v51  ;;  %v7892_v5 = vadd.f32 %v18365_v62, %v7873_v19  ;;  %12622 = vmatmul.mubr.msk.f32.gmra.mrb[174].mxu0 %vm1084_vm5, %v18462_v44  ;;  %v8271_v7 = vmul.f32 %v18472_v20, %v18472_v20  ;;  %v7876_v0 = vmul.f32 %v18362_v31, %v7857_v24 }
0x13ae   :  { %v18493_v16 = vmax.f32 %v7893_v26, 0.0  ;;  %v13304_v37 = vpack.c.bf16 %v18462_v44, %v18466_v9  ;;  %v7875_v32 = vmul.f32 %v18362_v31, %v7856_v22  ;;  %v8416_v39 = vadd.f32 %v10589_v4, %v18340_v1 }
0x13af   :  { %v18498_v45 = vmax.f32 %v7892_v5, 0.0  ;;  %v8284_v40 = vsel %vm2395_vm6, %v8271_v7, 0.0  ;;  %v7895_v55 = vadd.f32 %v18365_v62, %v7876_v0  ;;  %v8426_v1 = vadd.f32 %v10589_v4, %v18344_v25 }
0x13b0   :  { %10022 = vst.msk [vmem:[%s15221_s29 + $0x48] sm:$0xff] %vm1084_vm5, %v18493_v16  ;;  %v7894_v18 = vadd.f32 %v18365_v62, %v7875_v32  ;;  %v8421_v13 = vadd.f32 %v18338_v54, %v10589_v4  ;;  %v8436_v50 = vadd.f32 %v10589_v4, %v18348_v43  ;;  %v8431_v35 = vadd.f32 %v18342_v3, %v10589_v4  ;;  %v9217_v3 = vld [vmem:[%s19109_s25 + $0x20] sm:$0xff] }
0x13b1   :  { %12624 = vmatprep.mubr.msk.f32.mxu0 %vm1084_vm5, %v18498_v45  ;;  %10021 = vst.msk [vmem:[%s15221_s29 + $0x40] sm:$0xff] %vm1084_vm5, %v18498_v45  ;;  %8285 = vadd.xlane.f32.xlu1 %v8284_v40  ;;  %v13307_v31 = vpack.c.bf16 %v18493_v16, %v18498_v45  ;;  %v18517_v38 = vmax.f32 %v7895_v55, 0.0  ;;  %v8446_v49 = vadd.f32 %v10589_v4, %v18352_v57 }
0x13b2   :  { %12625 = vmatmul.mubr.msk.f32.gmra.mrb[176].mxu0 %vm1084_vm5, %v18493_v16  ;;  %v18519_v21 = vmax.f32 %v7894_v18, 0.0  ;;  %v8441_v25 = vadd.f32 %v18346_v36, %v10589_v4  ;;  %v8456_v54 = vadd.f32 %v10589_v4, %v18356_v6  ;;  %v8451_v43 = vadd.f32 %v18350_v33, %v10589_v4  ;;  %v9219_v33 = vld [vmem:[%s19109_s25 + $0x30] sm:$0xff]  ;;  %v9220_v6 = vld [vmem:[%s19109_s25 + $0x38] sm:$0xff] }
0x13b3   :  { %10024 = vst.msk [vmem:[%s15221_s29 + $0x58] sm:$0xff] %vm1084_vm5, %v18517_v38  ;;  %v8466_v57 = vadd.f32 %v10589_v4, %v18360_v59  ;;  %v13277_v36 = vpack.c.bf16 %v9218_v34, %v9217_v3  ;;  %v8461_v60 = vadd.f32 %v18354_v63, %v10589_v4  ;;  %v13280_v53 = vpack.c.bf16 %v9220_v6, %v9219_v33 }
0x13b4   :  { %12627 = vmatprep.mubr.msk.f32.mxu0 %vm1084_vm5, %v18519_v21  ;;  %10023 = vst.msk [vmem:[%s15221_s29 + $0x50] sm:$0xff] %vm1084_vm5, %v18519_v21  ;;  %v13310_v62 = vpack.c.bf16 %v18517_v38, %v18519_v21  ;;  %s19110_s29 = sld [smem:[#allocation79_spill]]  ;;  %v8471_v15 = vadd.f32 %v18358_v29, %v10589_v4 }
0x13b6   :  { %12628 = vmatmul.mubr.msk.f32.gmra.mrb[178].mxu0 %vm1084_vm5, %v18517_v38 }
0x13b7   :  { %12638 = vmatprep.mubr.msk.f32.mxu0 %vm1084_vm5, %v8416_v39 }
0x13ba   :  { %12639 = vmatmul.mubr.msk.f32.vlgmr.msra.gmra.mrb[168].mxu0 %vm1084_vm5, %v8421_v13  ;;  %v8835_v63 = vld [vmem:[%s19110_s29] sm:$0xff]  ;;  %v8836_v59 = vld [vmem:[%s19110_s29 + $0x8] sm:$0xff]  ;;  %v8837_v30 = vld [vmem:[%s19110_s29 + $0x10] sm:$0xff] }
0x13bb   :  { %12641 = vmatprep.mubr.msk.f32.mxu0 %vm1084_vm5, %v8426_v1  ;;  %13278 = vmatpush3.bf16.msra.mxu0 %v13277_v36  ;;  %v13265_v14 = vpack.c.bf16 %v8836_v59, %v8835_v63  ;;  %v8838_v52 = vld [vmem:[%s19110_s29 + $0x18] sm:$0xff] }
0x13bc   :  { %13279 = vmatprep.subr.bf16.mxu0 %v19000_v27  ;;  %v13269_v8 = vpack.c.bf16 %v8838_v52, %v8837_v30  ;;  %v10587_v1 = vld [vmem:[#allocation23] ss:$0 sm:$0xff] }
0x13bd   :  { %13266 = vmatprep.subr.bf16.mxu1 %v13265_v14 }
0x13be   :  { %12642 = vmatmul.mubr.msk.f32.gmra.mrb[170].mxu0 %vm1084_vm5, %v8431_v35  ;;  %13268 = vmatpush3.bf16.msra.mxu1 %v13265_v14  ;;  %v10588_v35 = vld [vmem:[#allocation21] ss:$0 sm:$0xff] }
0x13bf   :  { %12644 = vmatprep.mubr.msk.f32.mxu0 %vm1084_vm5, %v8436_v50  ;;  %13281 = vmatpush3.bf16.msra.mxu0 %v13280_v53 }
0x13c0   :  { %13288 = vmatprep.subr.bf16.mxu0 %v19000_v27  ;;  %13270 = vmatprep.subr.bf16.mxu1 %v13269_v8 }
0x13c2   :  { %12645 = vmatmul.mubr.msk.f32.gmra.mrb[172].mxu0 %vm1084_vm5, %v8441_v25  ;;  %13272 = vmatpush3.bf16.msra.mxu1 %v13269_v8 }
0x13c3   :  { %12647 = vmatprep.mubr.msk.f32.mxu0 %vm1084_vm5, %v8446_v49  ;;  %13273 = vmatprep.subr.bf16.mxu1 %v19000_v27 }
0x13c6   :  { %12648 = vmatmul.mubr.msk.f32.gmra.mrb[174].mxu0 %vm1084_vm5, %v8451_v43 }
0x13c7   :  { %12650 = vmatprep.mubr.msk.f32.mxu0 %vm1084_vm5, %v8456_v54 }
0x13ca   :  { %12651 = vmatmul.mubr.msk.f32.gmra.mrb[176].mxu0 %vm1084_vm5, %v8461_v60 }
0x13cb   :  { %12653 = vmatprep.mubr.msk.f32.mxu0 %vm1084_vm5, %v8466_v57 }
0x13ce   :  { %12654 = vmatmul.mubr.msk.f32.gmra.mrb[178].mxu0 %vm1084_vm5, %v8471_v15 }
0x13cf   :  { %12711 = vmatprep.mubr.msk.f32.mxu0 %vm14842_vm2, %v18997_v56 }
0x1434   :  { %v8277_v29 = vpop.xlane.xlu0 %8276 }
0x1435   :  { %v8288_v19 = vmul.f32 0.03125, %v8277_v29  ;;  %v10626_v29 = vld [vmem:[%s19111_s7] ss:$0 sm:$0xff] }
0x1436   :  { %v8274_v2 = vpop.xlane.xlu1 %8273 }
0x1437   :  { %v8287_v51 = vmul.f32 0.03125, %v8274_v2  ;;  %v8293_v26 = vadd.f32 1e-05, %v8288_v19 }
0x1438   :  { %v8283_v5 = vpop.xlane.xlu0 %8282 }
0x1439   :  { %v8292_v24 = vadd.f32 1e-05, %v8287_v51  ;;  %14079 = vrsqrt.f32 %v8293_v26  ;;  %v8290_v22 = vmul.f32 0.03125, %v8283_v5  ;;  %v9110_v26 = vld [vmem:[%s19112_s8] sm:$0xff] }
0x143a   :  { %v8280_v7 = vpop.xlane.xlu1 %8279 }
0x143b   :  { %14081 = vrsqrt.f32 %v8292_v24  ;;  %v8289_v0 = vmul.f32 0.03125, %v8280_v7  ;;  %v8295_v32 = vadd.f32 1e-05, %v8290_v22  ;;  %v9111_v24 = vld [vmem:[%s19112_s8 + $0x8] sm:$0xff] }
0x143d   :  { %v8294_v40 = vadd.f32 1e-05, %v8289_v0  ;;  %14083 = vrsqrt.f32 %v8295_v32  ;;  %v13274_v0 = vpack.c.bf16 %v9111_v24, %v9110_v26  ;;  %v14227_v24 = vld [vmem:[%s18973_s3] sm:$0xff] }
0x143e   :  { %v8286_v4 = vpop.xlane.xlu1 %8285 }
0x143f   :  { %14085 = vrsqrt.f32 %v8294_v40  ;;  %v8291_v55 = vmul.f32 0.03125, %v8286_v4 }
0x1441   :  { %v8296_v18 = vadd.f32 1e-05, %v8291_v55 }
0x1443   :  { %14087 = vrsqrt.f32 %v8296_v18  ;;  %v14080_v39 = vpop.eup %14079 }
0x1444   :  { %v8303_v50 = vmul.f32 %v14080_v39, %v18400_v23 }
0x1445   :  { %v14082_v13 = vpop.eup %14081 }
0x1446   :  { %v8302_v49 = vmul.f32 %v14082_v13, %v18409_v10  ;;  %v8315_v25 = vmul.f32 %v10587_v1, %v8303_v50 }
0x1447   :  { %v14084_v54 = vpop.eup %14083 }
0x1448   :  { %v8314_v43 = vmul.f32 %v10587_v1, %v8302_v49  ;;  %v8305_v34 = vmul.f32 %v14084_v54, %v18433_v47  ;;  %v8327_v57 = vadd.f32 %v10588_v35, %v8315_v25 }
0x1449   :  { %v14086_v3 = vpop.eup %14085 }
0x144a   :  { %v8326_v36 = vadd.f32 %v10588_v35, %v8314_v43  ;;  %v8304_v60 = vmul.f32 %v14086_v3, %v18440_v11  ;;  %v18574_v33 = vmax.f32 %v8327_v57, 0.0  ;;  %v8317_v6 = vmul.f32 %v10587_v1, %v8305_v34 }
0x144c   :  { %v18576_v23 = vmax.f32 %v8326_v36, 0.0  ;;  %v8316_v53 = vmul.f32 %v10587_v1, %v8304_v60  ;;  %10026 = vst.msk [vmem:[%s15226_s21 + $0x8] sm:$0xff] %vm1084_vm5, %v18574_v33  ;;  %v8329_v15 = vadd.f32 %v10588_v35, %v8317_v6 }
0x144d   :  { %v14088_v10 = vpop.eup %14087 }
0x144e   :  { %10025 = vst.msk [vmem:[%s15226_s21] sm:$0xff] %vm1084_vm5, %v18576_v23  ;;  %v8306_v47 = vmul.f32 %v14088_v10, %v18472_v20  ;;  %12712 = vmatmul.mubr.msk.f32.vlgmr.msra.gmra.mrb[180].mxu0 %vm1084_vm5, %v18576_v23  ;;  %v8328_v11 = vadd.f32 %v10588_v35, %v8316_v53  ;;  %v13313_v63 = vpack.c.bf16 %v18574_v33, %v18576_v23  ;;  %v18591_v59 = vmax.f32 %v8329_v15, 0.0 }
0x144f   :  { %12714 = vmatprep.mubr.msk.f32.mxu0 %vm14842_vm2, %v18997_v56 }
0x1450   :  { %v18593_v30 = vmax.f32 %v8328_v11, 0.0  ;;  %v8318_v14 = vmul.f32 %v10587_v1, %v8306_v47  ;;  %10028 = vst.msk [vmem:[%s15226_s21 + $0x18] sm:$0xff] %vm1084_vm5, %v18591_v59 }
0x1452   :  { %12715 = vmatmul.mubr.msk.f32.gmra.mrb[182].mxu0 %vm1084_vm5, %v18574_v33  ;;  %10027 = vst.msk [vmem:[%s15226_s21 + $0x10] sm:$0xff] %vm1084_vm5, %v18593_v30  ;;  %v8330_v20 = vadd.f32 %v10588_v35, %v8318_v14  ;;  %v13316_v52 = vpack.c.bf16 %v18591_v59, %v18593_v30  ;;  %v9112_v35 = vld [vmem:[%s19112_s8 + $0x10] sm:$0x3] }
0x1453   :  { %12717 = vmatprep.mubr.msk.f32.mxu0 %vm14842_vm2, %v18997_v56 }
0x1454   :  { %v18607_v8 = vmax.f32 %v8330_v20, 0.0 }
0x1456   :  { %12718 = vmatmul.mubr.msk.f32.gmra.mrb[184].mxu0 %vm1084_vm5, %v18593_v30  ;;  %10029 = vst.msk [vmem:[%s15226_s21 + $0x20] sm:$0xf] %vm2395_vm6, %v18607_v8  ;;  %vm19113_vm6 = vcmask 1041408   ;;  %s19118_s21 = sld [smem:[#allocation69_spill]] }
0x1457   :  { %12720 = vmatprep.mubr.msk.f32.mxu0 %vm14842_vm2, %v18997_v56 }
0x145a   :  { %12721 = vmatmul.mubr.msk.f32.gmra.mrb[186].mxu0 %vm1084_vm5, %v18591_v59 }
0x145b   :  { %12723 = vmatprep.mubr.msk.f32.mxu0 %vm14842_vm2, %v18997_v56 }
0x145e   :  { %12724 = vmatmul.mubr.msk.f32.gmra.mrb[188].mxu0 %vm1084_vm5, %v18607_v8 }
0x145f   :  { %12757 = vmatprep.mubr.msk.f32.mxu0 %vm14842_vm2, %v18997_v56 }
0x148d   :  { %v12640_v19 = vpop.f32.mrb[168].mxu0 }
0x148e   :  { %v8812_v2 = vadd.f32 %v12640_v19, %v10626_v29  ;;  %v8745_v51 = vpop.f32.mrb[169].mxu0 }
0x148f   :  { %v8811_v5 = vadd.f32 %v10626_v29, %v8745_v51 }
0x1490   :  { %v8824_v32 = vmax.f32 %v8812_v2, 0.0 }
0x1491   :  { %v8823_v22 = vmax.f32 %v8811_v5, 0.0  ;;  %v12643_v7 = vpop.f32.mrb[170].mxu0  ;;  %v14229_v5 = vld [vmem:[%s18973_s3 + $0x10] sm:$0xff] }
0x1492   :  { %v8814_v40 = vadd.f32 %v12643_v7, %v10626_v29  ;;  %v8755_v4 = vpop.f32.mrb[171].mxu0  ;;  %v14231_v7 = vld [vmem:[%s18973_s3 + $0x20] sm:$0xf] }
0x1493   :  { %v8813_v55 = vadd.f32 %v10626_v29, %v8755_v4  ;;  %12664 = vmatprep.mubr.msk.f32.mxu1 %vm1084_vm5, %v8823_v22  ;;  %v14230_v22 = vld [vmem:[%s18973_s3 + $0x18] sm:$0xff]  ;;  %v9215_v4 = vld [vmem:[%s19109_s25 + $0x10] sm:$0xff] }
0x1494   :  { %12665 = vmatmul.mubr.msk.f32.vlgmr.msra.gmra.mrb[166].mxu1 %vm1084_vm5, %v8824_v32  ;;  %v8826_v1 = vmax.f32 %v8814_v40, 0.0  ;;  %v9214_v32 = vld [vmem:[%s19109_s25 + $0x8] sm:$0xff] }
0x1495   :  { %v8825_v18 = vmax.f32 %v8813_v55, 0.0  ;;  %v12646_v39 = vpop.f32.mrb[172].mxu0  ;;  %13275 = vmatpush3.bf16.msra.mxu1 %v13274_v0  ;;  %v9213_v0 = vld [vmem:[%s19109_s25] sm:$0xff]  ;;  %v9216_v55 = vld [vmem:[%s19109_s25 + $0x18] sm:$0xff] }
0x1496   :  { %v8816_v13 = vadd.f32 %v12646_v39, %v10626_v29  ;;  %v8765_v50 = vpop.f32.mrb[173].mxu0  ;;  %12686 = vmatprep.subr.mxu1 %v18997_v56  ;;  %v13283_v40 = vpack.c.bf16 %v9214_v32, %v9213_v0  ;;  %v9448_v39 = vld [vmem:[%s19118_s21] sm:$0xff] }
0x1497   :  { %v8815_v49 = vadd.f32 %v10626_v29, %v8765_v50  ;;  %12667 = vmatprep.mubr.msk.f32.mxu1 %vm1084_vm5, %v8825_v18  ;;  %v13286_v18 = vpack.c.bf16 %v9216_v55, %v9215_v4 }
0x1498   :  { %12668 = vmatmul.mubr.msk.f32.gmra.mrb[168].mxu1 %vm1084_vm5, %v8826_v1  ;;  %v8828_v43 = vmax.f32 %v8816_v13, 0.0  ;;  %v9449_v1 = vld [vmem:[%s19118_s21 + $0x8] sm:$0xff]  ;;  %v9450_v13 = vld [vmem:[%s19118_s21 + $0x10] sm:$0xff] }
0x1499   :  { %v8827_v25 = vmax.f32 %v8815_v49, 0.0  ;;  %v12649_v54 = vpop.f32.mrb[174].mxu0  ;;  %12687 = vmatpush3.msk.msra.mxu1 %vm19113_vm6, %v9112_v35  ;;  %v13289_v50 = vpack.c.bf16 %v9449_v1, %v9448_v39  ;;  %v9451_v35 = vld [vmem:[%s19118_s21 + $0x18] sm:$0xff] }
0x149a   :  { %v8818_v3 = vadd.f32 %v12649_v54, %v10626_v29  ;;  %v8775_v34 = vpop.f32.mrb[175].mxu0  ;;  %13282 = vmatprep.subr.bf16.mxu1 %v19000_v27  ;;  %v13292_v49 = vpack.c.bf16 %v9451_v35, %v9450_v13 }
0x149b   :  { %v8817_v57 = vadd.f32 %v10626_v29, %v8775_v34  ;;  %12670 = vmatprep.mubr.msk.f32.mxu1 %vm1084_vm5, %v8827_v25  ;;  %13290 = vmatpush3.bf16.msra.mxu0 %v13289_v50 }
0x149c   :  { %12671 = vmatmul.mubr.msk.f32.gmra.mrb[170].mxu1 %vm1084_vm5, %v8828_v43  ;;  %v8830_v6 = vmax.f32 %v8818_v3, 0.0  ;;  %13291 = vmatprep.subr.bf16.mxu0 %v19000_v27 }
0x149d   :  { %v8829_v36 = vmax.f32 %v8817_v57, 0.0  ;;  %v12652_v60 = vpop.f32.mrb[176].mxu0 }
0x149e   :  { %v8820_v53 = vadd.f32 %v12652_v60, %v10626_v29  ;;  %v8785_v10 = vpop.f32.mrb[177].mxu0 }
0x149f   :  { %v8819_v15 = vadd.f32 %v10626_v29, %v8785_v10  ;;  %12673 = vmatprep.mubr.msk.f32.mxu1 %vm1084_vm5, %v8829_v36  ;;  %13293 = vmatpush3.bf16.msra.mxu0 %v13292_v49  ;;  %v10627_v10 = vld [vmem:[#allocation5] ss:$0 sm:$0xff] }
0x14a0   :  { %12674 = vmatmul.mubr.msk.f32.gmra.mrb[172].mxu1 %vm1084_vm5, %v8830_v6  ;;  %v8832_v14 = vmax.f32 %v8820_v53, 0.0  ;;  %13312 = vmatprep.subr.bf16.mxu0 %v19000_v27 }
0x14a1   :  { %v8831_v47 = vmax.f32 %v8819_v15, 0.0  ;;  %v12655_v11 = vpop.f32.mrb[178].mxu0 }
0x14a2   :  { %v8822_v20 = vadd.f32 %v12655_v11, %v10626_v29  ;;  %v8795_v19 = vpop.f32.mrb[179].mxu0 }
0x14a3   :  { %v8821_v2 = vadd.f32 %v10626_v29, %v8795_v19  ;;  %12676 = vmatprep.mubr.msk.f32.mxu1 %vm1084_vm5, %v8831_v47  ;;  %v14228_v29 = vld [vmem:[%s18973_s3 + $0x8] sm:$0xff]  ;;  %s19120_s3 = sld [smem:[#allocation67_spill]] }
0x14a4   :  { %12677 = vmatmul.mubr.msk.f32.gmra.mrb[174].mxu1 %vm1084_vm5, %v8832_v14  ;;  %v8834_v26 = vmax.f32 %v8822_v20, 0.0 }
0x14a5   :  { %v8833_v51 = vmax.f32 %v8821_v2, 0.0 }
0x14a7   :  { %12679 = vmatprep.mubr.msk.f32.mxu1 %vm1084_vm5, %v8833_v51 }
0x14a8   :  { %12680 = vmatmul.mubr.msk.f32.gmra.mrb[176].mxu1 %vm1084_vm5, %v8834_v26 }
0x14a9   :  { %12688 = vmatprep.mubr.msk.f32.mxu1 %vm14842_vm2, %v18997_v56 }
0x14ac   :  { %12689 = vmatmul.mubr.msk.f32.vlgmr.msra.gmra.mrb[178].mxu1 %vm19114_vm13, %v14227_v24 }
0x14ad   :  { %12691 = vmatprep.mubr.msk.f32.mxu1 %vm14842_vm2, %v18997_v56  ;;  %13284 = vmatpush3.bf16.msra.mxu1 %v13283_v40 }
0x14ae   :  { %13285 = vmatprep.subr.bf16.mxu1 %v19000_v27 }
0x14b0   :  { %12692 = vmatmul.mubr.msk.f32.gmra.mrb[180].mxu1 %vm19115_vm0, %v14228_v29 }
0x14b1   :  { %12694 = vmatprep.mubr.msk.f32.mxu1 %vm14842_vm2, %v18997_v56  ;;  %13287 = vmatpush3.bf16.msra.mxu1 %v13286_v18 }
0x14b2   :  { %13294 = vmatprep.subr.bf16.mxu1 %v19000_v27 }
0x14b4   :  { %12695 = vmatmul.mubr.msk.f32.gmra.mrb[182].mxu1 %vm19116_vm1, %v14229_v5 }
0x14b5   :  { %12697 = vmatprep.mubr.msk.f32.mxu1 %vm14842_vm2, %v18997_v56 }
0x14b8   :  { %12698 = vmatmul.mubr.msk.f32.gmra.mrb[184].mxu1 %vm19117_vm7, %v14230_v22 }
0x14b9   :  { %12700 = vmatprep.mubr.msk.f32.mxu1 %vm14842_vm2, %v18997_v56 }
0x14bc   :  { %12701 = vmatmul.mubr.msk.f32.gmra.mrb[186].mxu1 %vm19119_vm8, %v14231_v7 }
0x14bd   :  { %12734 = vmatprep.mubr.msk.f32.mxu1 %vm14842_vm2, %v18997_v56 }
0x1521   :  { %v18676_v25 = vpop.f32.mrb[180].mxu0 }
0x1522   :  { %v12713_v54 = vpop.f32.mrb[181].mxu0 }
0x1525   :  { %v18679_v43 = vpop.f32.mrb[182].mxu0 }
0x1526   :  { %v12716_v3 = vpop.f32.mrb[183].mxu0 }
0x1529   :  { %v18681_v34 = vpop.f32.mrb[184].mxu0 }
0x152a   :  { %v12719_v57 = vpop.f32.mrb[185].mxu0 }
0x152d   :  { %v18683_v36 = vpop.f32.mrb[186].mxu0 }
0x152e   :  { %v12722_v60 = vpop.f32.mrb[187].mxu0 }
0x1531   :  { %v18685_v6 = vpop.f32.mrb[188].mxu0 }
0x1532   :  { %v12725_v53 = vpop.f32.mrb[189].mxu0 }
0x1567   :  { %v12666_v15 = vpop.f32.mrb[166].mxu1 }
0x1568   :  { %v8954_v47 = vadd.f32 %v12666_v15, %v10627_v10  ;;  %v8948_v11 = vpop.f32.mrb[167].mxu1 }
0x1569   :  { %v8949_v14 = vadd.f32 %v10627_v10, %v8948_v11 }
0x156a   :  { %v10641_v20 = vmul.f32 -1.442695, %v8954_v47 }
0x156b   :  { %v10640_v19 = vmul.f32 -1.442695, %v8949_v14  ;;  %v12669_v2 = vpop.f32.mrb[168].mxu1 }
0x156c   :  { %14089 = vpow2.f32 %v10641_v20  ;;  %v8964_v51 = vadd.f32 %v12669_v2, %v10627_v10  ;;  %v8958_v26 = vpop.f32.mrb[169].mxu1 }
0x156d   :  { %14091 = vpow2.f32 %v10640_v19  ;;  %v8959_v24 = vadd.f32 %v10627_v10, %v8958_v26 }
0x156e   :  { %v10643_v29 = vmul.f32 -1.442695, %v8964_v51 }
0x156f   :  { %v10642_v5 = vmul.f32 -1.442695, %v8959_v24  ;;  %v12672_v22 = vpop.f32.mrb[170].mxu1 }
0x1570   :  { %14093 = vpow2.f32 %v10643_v29  ;;  %v8974_v7 = vadd.f32 %v12672_v22, %v10627_v10  ;;  %v8968_v0 = vpop.f32.mrb[171].mxu1 }
0x1571   :  { %14095 = vpow2.f32 %v10642_v5  ;;  %v8969_v32 = vadd.f32 %v10627_v10, %v8968_v0  ;;  %v18688_v5 = vld [vmem:[%s19120_s3] ss:$0 sm:$0xff] }
0x1572   :  { %v10645_v40 = vmul.f32 -1.442695, %v8974_v7 }
0x1573   :  { %v10644_v4 = vmul.f32 -1.442695, %v8969_v32  ;;  %v12675_v55 = vpop.f32.mrb[172].mxu1 }
0x1574   :  { %14097 = vpow2.f32 %v10645_v40  ;;  %v8984_v18 = vadd.f32 %v12675_v55, %v10627_v10  ;;  %v8978_v39 = vpop.f32.mrb[173].mxu1 }
0x1575   :  { %14099 = vpow2.f32 %v10644_v4  ;;  %v8979_v1 = vadd.f32 %v10627_v10, %v8978_v39 }
0x1576   :  { %v14090_v13 = vpop.eup %14089  ;;  %v10647_v50 = vmul.f32 -1.442695, %v8984_v18 }
0x1577   :  { %v14092_v35 = vpop.eup %14091  ;;  %v9044_v49 = vadd.f32 1.0, %v14090_v13  ;;  %v10646_v54 = vmul.f32 -1.442695, %v8979_v1  ;;  %v12678_v3 = vpop.f32.mrb[174].mxu1 }
0x1578   :  { %v9043_v57 = vadd.f32 1.0, %v14092_v35  ;;  %14101 = vpow2.f32 %v10647_v50  ;;  %v8994_v60 = vadd.f32 %v12678_v3, %v10627_v10  ;;  %v8988_v53 = vpop.f32.mrb[175].mxu1 }
0x1579   :  { %14103 = vrcp.f32 %v9044_v49  ;;  %v8989_v15 = vadd.f32 %v10627_v10, %v8988_v53 }
0x157a   :  { %v14094_v47 = vpop.eup %14093  ;;  %14105 = vrcp.f32 %v9043_v57  ;;  %v10649_v11 = vmul.f32 -1.442695, %v8994_v60 }
0x157b   :  { %v14096_v14 = vpop.eup %14095  ;;  %v9046_v20 = vadd.f32 1.0, %v14094_v47  ;;  %14107 = vpow2.f32 %v10646_v54  ;;  %v10648_v19 = vmul.f32 -1.442695, %v8989_v15  ;;  %v12681_v2 = vpop.f32.mrb[176].mxu1 }
0x157c   :  { %v9045_v51 = vadd.f32 1.0, %v14096_v14  ;;  %14109 = vpow2.f32 %v10649_v11  ;;  %v9004_v26 = vadd.f32 %v12681_v2, %v10627_v10  ;;  %v8998_v24 = vpop.f32.mrb[177].mxu1 }
0x157d   :  { %14111 = vrcp.f32 %v9046_v20  ;;  %v8999_v29 = vadd.f32 %v10627_v10, %v8998_v24 }
0x157e   :  { %v14098_v22 = vpop.eup %14097  ;;  %14113 = vrcp.f32 %v9045_v51  ;;  %v10651_v7 = vmul.f32 -1.442695, %v9004_v26 }
0x157f   :  { %v14100_v0 = vpop.eup %14099  ;;  %v9048_v32 = vadd.f32 1.0, %v14098_v22  ;;  %14115 = vpow2.f32 %v10648_v19  ;;  %v10650_v40 = vmul.f32 -1.442695, %v8999_v29  ;;  %v9189_v4 = vpop.f32.mrb[178].mxu1 }
0x1580   :  { %v9047_v55 = vadd.f32 1.0, %v14100_v0  ;;  %14117 = vpow2.f32 %v10651_v7  ;;  %v9190_v18 = vadd.f32 %v18688_v5, %v9189_v4  ;;  %v12690_v39 = vpop.f32.mrb[179].mxu1 }
0x1581   :  { %14119 = vrcp.f32 %v9048_v32 }
0x1582   :  { %v14102_v1 = vpop.eup %14101  ;;  %14121 = vrcp.f32 %v9047_v55  ;;  %12735 = vmatmul.mubr.msk.f32.vlgmr.msra.gmra.mrb[188].mxu1 %vm1084_vm5, %v9190_v18 }
0x1583   :  { %v14104_v10 = vpop.eup %14103  ;;  %v9050_v13 = vadd.f32 1.0, %v14102_v1  ;;  %14123 = vpow2.f32 %v10650_v40  ;;  %13296 = vmatpush3.bf16.msra.mxu1 %v13295_v28  ;;  %v9194_v50 = vpop.f32.mrb[180].mxu1  ;;  %12737 = vmatprep.mubr.msk.f32.mxu1 %vm14842_vm2, %v18997_v56 }
0x1584   :  { %v14106_v35 = vpop.eup %14105  ;;  %v9080_v49 = vsel %vm4800_vm15, %v14104_v10, 0.0  ;;  %v9195_v54 = vadd.f32 %v18688_v5, %v9194_v50  ;;  %v12693_v3 = vpop.f32.mrb[181].mxu1  ;;  %13297 = vmatprep.subr.bf16.mxu1 %v19000_v27 }
0x1585   :  { %v14108_v57 = vpop.eup %14107  ;;  %v9079_v60 = vsel %vm4800_vm15, %v14106_v35, 0.0  ;;  %14125 = vrcp.f32 %v9050_v13 }
0x1586   :  { %v14110_v53 = vpop.eup %14109  ;;  %v9081_v15 = vadd.f32 %v9080_v49, %v9079_v60  ;;  %v9049_v47 = vadd.f32 1.0, %v14108_v57  ;;  %12738 = vmatmul.mubr.msk.f32.gmra.mrb[190].mxu1 %vm1084_vm5, %v9195_v54 }
0x1587   :  { %v14112_v61 = vpop.eup %14111  ;;  %v9052_v42 = vadd.f32 1.0, %v14110_v53  ;;  %13299 = vmatpush3.bf16.msra.mxu1 %v13298_v46  ;;  %v9199_v28 = vpop.f32.mrb[182].mxu1  ;;  %12740 = vmatprep.mubr.msk.f32.mxu1 %vm14842_vm2, %v18997_v56 }
0x1588   :  { %v14114_v11 = vpop.eup %14113  ;;  %14127 = vrcp.f32 %v9049_v47  ;;  %v9200_v14 = vadd.f32 %v18688_v5, %v9199_v28  ;;  %v12696_v20 = vpop.f32.mrb[183].mxu1  ;;  %13300 = vmatprep.subr.bf16.mxu1 %v19000_v27  ;;  %v9084_v58 = vsel %vm4800_vm15, %v14112_v61, 0.0 }
0x1589   :  { %v14116_v19 = vpop.eup %14115  ;;  %v9082_v2 = vsel %vm4800_vm15, %v14114_v11, 0.0  ;;  %14129 = vrcp.f32 %v9052_v42  ;;  %v19123_v11 = vld [vmem:[#allocation116_spill] sm:$0xff] }
0x158a   :  { %v14118_v51 = vpop.eup %14117  ;;  %v9083_v26 = vadd.f32 %v9082_v2, %v9081_v15  ;;  %v9051_v24 = vadd.f32 1.0, %v14116_v19  ;;  %12741 = vmatmul.mubr.msk.f32.gmra.mrb[192].mxu1 %vm1084_vm5, %v9200_v14  ;;  %v9611_v20 = vld [vmem:[%s19121_s19] sm:$0x3] }
0x158b   :  { %v14120_v41 = vpop.eup %14119  ;;  %v9054_v46 = vadd.f32 1.0, %v14118_v51  ;;  %13302 = vmatpush3.bf16.msra.mxu1 %v13301_v12  ;;  %v9204_v29 = vpop.f32.mrb[184].mxu1  ;;  %12743 = vmatprep.mubr.msk.f32.mxu1 %vm14842_vm2, %v18997_v56  ;;  %v10669_v2 = vld [vmem:[%s19122_s10] ss:$0 sm:$0xff] }
0x158c   :  { %v14122_v22 = vpop.eup %14121  ;;  %v9085_v7 = vadd.f32 %v9084_v58, %v9083_v26  ;;  %14131 = vrcp.f32 %v9051_v24  ;;  %v9205_v0 = vadd.f32 %v18688_v5, %v9204_v29  ;;  %v12699_v32 = vpop.f32.mrb[185].mxu1  ;;  %13303 = vmatprep.subr.bf16.mxu1 %v19000_v27  ;;  %v9088_v17 = vsel %vm4800_vm15, %v14120_v41, 0.0 }
0x158d   :  { %v14124_v40 = vpop.eup %14123  ;;  %v9086_v4 = vsel %vm4800_vm15, %v14122_v22, 0.0  ;;  %14133 = vrcp.f32 %v9054_v46 }
0x158e   :  { %v9087_v55 = vadd.f32 %v9086_v4, %v9085_v7  ;;  %v9053_v18 = vadd.f32 1.0, %v14124_v40  ;;  %12744 = vmatmul.mubr.msk.f32.gmra.mrb[194].mxu1 %vm1084_vm5, %v9205_v0 }
0x158f   :  { %13305 = vmatpush3.bf16.msra.mxu1 %v13304_v37  ;;  %v9209_v48 = vpop.f32.mrb[186].mxu1  ;;  %12746 = vmatprep.mubr.msk.f32.mxu1 %vm14842_vm2, %v18997_v56  ;;  %v14126_v10 = vpop.eup %14125 }
0x1590   :  { %v9089_v12 = vadd.f32 %v9088_v17, %v9087_v55  ;;  %14135 = vrcp.f32 %v9053_v18  ;;  %v9210_v39 = vadd.f32 %v18688_v5, %v9209_v48  ;;  %v12702_v1 = vpop.f32.mrb[187].mxu1  ;;  %13306 = vmatprep.subr.bf16.mxu1 %v19000_v27  ;;  %v9092_v37 = vsel %vm4800_vm15, %v14126_v10, 0.0  ;;  %v9685_v55 = vld [vmem:[%s19124_s6] sm:$0x3]  ;;  %v9762_v18 = vld [vmem:[%s19126_s24 + $0x8] sm:$0xff]  ;;  %v9764_v10 = vld [vmem:[%s19126_s24 + $0x18] sm:$0xff] }
0x1591   :  { %v9765_v17 = vld [vmem:[%s19126_s24 + $0x20] sm:$0xff]  ;;  %v9766_v48 = vld [vmem:[%s19126_s24 + $0x28] sm:$0xff]  ;;  %v9763_v1 = vld [vmem:[%s19126_s24 + $0x10] sm:$0xff] }
0x1592   :  { %v14128_v13 = vpop.eup %14127  ;;  %12747 = vmatmul.mubr.msk.f32.gmra.mrb[196].mxu1 %vm1084_vm5, %v9210_v39  ;;  %v13319_v39 = vpack.c.bf16 %v9766_v48, %v9765_v17 }
0x1593   :  { %v9090_v50 = vsel %vm4800_vm15, %v14128_v13, 0.0  ;;  %13308 = vmatpush3.bf16.msra.mxu1 %v13307_v31  ;;  %12796 = vmatprep.mubr.msk.f32.mxu1 %vm14842_vm2, %v18997_v56  ;;  %v14130_v9 = vpop.eup %14129  ;;  %v9767_v13 = vld [vmem:[%s19126_s24 + $0x30] sm:$0xff] }
0x1594   :  { %v9091_v44 = vadd.f32 %v9090_v50, %v9089_v12  ;;  %13309 = vmatprep.subr.bf16.mxu1 %v19000_v27  ;;  %v9096_v45 = vsel %vm4800_vm15, %v14130_v9, 0.0  ;;  %v9768_v50 = vld [vmem:[%s19126_s24 + $0x38] sm:$0xff] }
0x1595   :  { %v13322_v9 = vpack.c.bf16 %v9768_v50, %v9767_v13  ;;  %v9924_v13 = vld [vmem:[%s19128_s0] sm:$0xff]  ;;  %v9925_v50 = vld [vmem:[%s19128_s0 + $0x8] sm:$0xff] }
0x1596   :  { %v14132_v5 = vpop.eup %14131  ;;  %v9093_v35 = vadd.f32 %v9092_v37, %v9091_v44  ;;  %v13328_v44 = vpack.c.bf16 %v9764_v10, %v9763_v1 }
0x1597   :  { %v9094_v49 = vsel %vm4800_vm15, %v14132_v5, 0.0  ;;  %13311 = vmatpush3.bf16.msra.mxu1 %v13310_v62  ;;  %v14134_v16 = vpop.eup %14133 }
0x1598   :  { %v9095_v54 = vadd.f32 %v9094_v49, %v9093_v35  ;;  %13318 = vmatprep.subr.bf16.mxu1 %v19000_v27  ;;  %v9100_v53 = vsel %vm4800_vm15, %v14134_v16, 0.0  ;;  %v10670_v35 = vld [vmem:[#allocation3] ss:$0 sm:$0xff] }
0x159a   :  { %v14136_v31 = vpop.eup %14135  ;;  %v9097_v3 = vadd.f32 %v9096_v45, %v9095_v54  ;;  %12797 = vmatmul.mubr.msk.f32.vlgmr.msra.gmra.mrb[198].mxu1 %vm911_vm4, %v9611_v20  ;;  %vm19125_vm4 = vcmask 1043456  }
0x159b   :  { %v9098_v57 = vsel %vm4800_vm15, %v14136_v31, 0.0  ;;  %12820 = vmatprep.mubr.msk.f32.mxu1 %vm14842_vm2, %v18997_v56  ;;  %13320 = vmatpush3.bf16.msra.mxu1 %v13319_v39 }
0x159c   :  { %v9099_v60 = vadd.f32 %v9098_v57, %v9097_v3  ;;  %13321 = vmatprep.subr.bf16.mxu1 %v19000_v27 }
0x159e   :  { %v9101_v15 = vadd.f32 %v9100_v53, %v9099_v60 }
0x159f   :  { %13323 = vmatpush3.bf16.msra.mxu1 %v13322_v9 }
0x15a0   :  { %v9102_v47 = vrot.slane %v9101_v15, 4  ;;  %13330 = vmatprep.subr.bf16.mxu1 %v19000_v27 }
0x15a2   :  { %v9103_v61 = vadd.f32 %v9102_v47, %v9101_v15 }
0x15a4   :  { %v9104_v38 = vrot.slane %v9103_v61, 2 }
0x15a6   :  { %v9105_v21 = vadd.f32 %v9104_v38, %v9103_v61 }
0x15a8   :  { %v9106_v62 = vrot.slane %v9105_v21, 1 }
0x15aa   :  { %v9107_v42 = vadd.f32 %v9106_v62, %v9105_v21 }
0x15ac   :  { %v9108_v28 = vmul.f32 0.010416667, %v9107_v42 }
0x15ae   :  { %v18747_v14 = vadd.f32 %v9108_v28, %v19123_v11 }
0x1655   :  { %v9407_v19 = vpop.f32.mrb[188].mxu1 }
0x1656   :  { %v9408_v51 = vadd.f32 %v9407_v19, %v18676_v25  ;;  %v12736_v26 = vpop.f32.mrb[189].mxu1 }
0x1658   :  { %v9438_v24 = vadd.f32 %v10669_v2, %v9408_v51 }
0x1659   :  { %v9412_v41 = vpop.f32.mrb[190].mxu1 }
0x165a   :  { %v9443_v58 = vmax.f32 %v9438_v24, 0.0  ;;  %v9413_v46 = vadd.f32 %v9412_v41, %v18679_v43  ;;  %v12739_v29 = vpop.f32.mrb[191].mxu1 }
0x165c   :  { %v9439_v22 = vadd.f32 %v10669_v2, %v9413_v46  ;;  %12758 = vmatmul.mubr.msk.f32.vlgmr.msra.gmra.mrb[190].mxu0 %vm1084_vm5, %v9443_v58 }
0x165d   :  { %13314 = vmatpush3.bf16.msra.mxu0 %v13313_v63  ;;  %v9417_v7 = vpop.f32.mrb[192].mxu1  ;;  %12760 = vmatprep.mubr.msk.f32.mxu0 %vm14842_vm2, %v18997_v56 }
0x165e   :  { %v9444_v0 = vmax.f32 %v9439_v22, 0.0  ;;  %v9418_v25 = vadd.f32 %v9417_v7, %v18681_v34  ;;  %v12742_v32 = vpop.f32.mrb[193].mxu1  ;;  %13315 = vmatprep.subr.bf16.mxu0 %v19000_v27 }
0x1660   :  { %v9440_v40 = vadd.f32 %v10669_v2, %v9418_v25  ;;  %12761 = vmatmul.mubr.msk.f32.gmra.mrb[192].mxu0 %vm1084_vm5, %v9444_v0 }
0x1661   :  { %13317 = vmatpush3.bf16.msra.mxu0 %v13316_v52  ;;  %v9422_v43 = vpop.f32.mrb[194].mxu1  ;;  %12763 = vmatprep.mubr.msk.f32.mxu0 %vm14842_vm2, %v18997_v56 }
0x1662   :  { %v9445_v33 = vmax.f32 %v9440_v40, 0.0  ;;  %v9423_v23 = vadd.f32 %v9422_v43, %v18683_v36  ;;  %v12745_v63 = vpop.f32.mrb[195].mxu1  ;;  %12807 = vmatprep.subr.mxu0 %v18997_v56 }
0x1664   :  { %v9441_v34 = vadd.f32 %v10669_v2, %v9423_v23  ;;  %12764 = vmatmul.mubr.msk.f32.gmra.mrb[194].mxu0 %vm1084_vm5, %v9445_v33 }
0x1665   :  { %12808 = vmatpush3.msk.msra.mxu0 %vm19125_vm4, %v18607_v8  ;;  %v9427_v59 = vpop.f32.mrb[196].mxu1  ;;  %12766 = vmatprep.mubr.msk.f32.mxu0 %vm14842_vm2, %v18997_v56 }
0x1666   :  { %v9446_v30 = vmax.f32 %v9441_v34, 0.0  ;;  %v9428_v52 = vadd.f32 %v9427_v59, %v18685_v6  ;;  %v12748_v36 = vpop.f32.mrb[197].mxu1  ;;  %13324 = vmatprep.subr.bf16.mxu0 %v19000_v27  ;;  %v9761_v6 = vld [vmem:[%s19126_s24] sm:$0xff] }
0x1667   :  { %v13325_v12 = vpack.c.bf16 %v9762_v18, %v9761_v6 }
0x1668   :  { %v9442_v4 = vadd.f32 %v10669_v2, %v9428_v52  ;;  %12767 = vmatmul.mubr.msk.f32.gmra.mrb[196].mxu0 %vm1084_vm5, %v9446_v30 }
0x1669   :  { %12769 = vmatprep.mubr.msk.f32.mxu0 %vm14842_vm2, %v18997_v56 }
0x166a   :  { %v9447_v8 = vmax.f32 %v9442_v4, 0.0 }
0x166c   :  { %12770 = vmatmul.mubr.msk.f32.gmra.mrb[198].mxu0 %vm1084_vm5, %v9447_v8 }
0x166d   :  { %12809 = vmatprep.mubr.msk.f32.mxu0 %vm14842_vm2, %v18997_v56  ;;  %v9681_v37 = vpop.f32.mrb[198].mxu1 }
0x166e   :  { %v12798_v5 = vpop.f32.mrb[199].mxu1 }
0x166f   :  { %v9927_v5 = vld [vmem:[%s19128_s0 + $0x18] sm:$0xff] }
0x1670   :  { %12810 = vmatmul.mubr.msk.f32.vlgmr.msra.gmra.mrb[200].mxu0 %vm19127_vm3, %v9685_v55 }
0x1671   :  { %12831 = vmatprep.mubr.msk.f32.mxu0 %vm14842_vm2, %v18997_v56  ;;  %13326 = vmatpush3.bf16.msra.mxu0 %v13325_v12 }
0x1672   :  { %13327 = vmatprep.subr.bf16.mxu0 %v19000_v27 }
0x1675   :  { %13329 = vmatpush3.bf16.msra.mxu0 %v13328_v44  ;;  %v13331_v44 = vpack.c.bf16 %v9925_v50, %v9924_v13 }
0x1678   :  { %12832 = vmatmul.mubr.msk.f32.vlgmr.msra.gmra.mrb[202].mxu0 %vm1084_vm5, %v9681_v37  ;;  %v9926_v37 = vld [vmem:[%s19128_s0 + $0x10] sm:$0xff] }
0x172f   :  { %v9540_v49 = vpop.f32.mrb[190].mxu0 }
0x1730   :  { %v9541_v54 = vadd.f32 %v10670_v35, %v9540_v49  ;;  %v12759_v16 = vpop.f32.mrb[191].mxu0  ;;  %v13334_v49 = vpack.c.bf16 %v9927_v5, %v9926_v37 }
0x1731   :  { %v10686_v16 = vld [vmem:[#allocation35] ss:$0 sm:$0xff] }
0x1732   :  { %v10676_v45 = vmul.f32 -1.442695, %v9541_v54 }
0x1733   :  { %v9545_v31 = vpop.f32.mrb[192].mxu0 }
0x1734   :  { %14137 = vpow2.f32 %v10676_v45  ;;  %v9546_v3 = vadd.f32 %v10670_v35, %v9545_v31  ;;  %v12762_v57 = vpop.f32.mrb[193].mxu0 }
0x1736   :  { %v10677_v60 = vmul.f32 -1.442695, %v9546_v3 }
0x1737   :  { %v9550_v53 = vpop.f32.mrb[194].mxu0 }
0x1738   :  { %14139 = vpow2.f32 %v10677_v60  ;;  %v9551_v15 = vadd.f32 %v10670_v35, %v9550_v53  ;;  %v12765_v47 = vpop.f32.mrb[195].mxu0 }
0x173a   :  { %v10678_v61 = vmul.f32 -1.442695, %v9551_v15 }
0x173b   :  { %v9555_v38 = vpop.f32.mrb[196].mxu0 }
0x173c   :  { %14141 = vpow2.f32 %v10678_v61  ;;  %v9556_v21 = vadd.f32 %v10670_v35, %v9555_v38  ;;  %v12768_v62 = vpop.f32.mrb[197].mxu0 }
0x173e   :  { %v14138_v42 = vpop.eup %14137  ;;  %v10679_v28 = vmul.f32 -1.442695, %v9556_v21 }
0x173f   :  { %v9579_v11 = vadd.f32 1.0, %v14138_v42  ;;  %v9560_v20 = vpop.f32.mrb[198].mxu0 }
0x1740   :  { %14143 = vpow2.f32 %v10679_v28  ;;  %v9561_v19 = vadd.f32 %v10670_v35, %v9560_v20  ;;  %v12771_v2 = vpop.f32.mrb[199].mxu0 }
0x1741   :  { %14145 = vrcp.f32 %v9579_v11 }
0x1742   :  { %v14140_v51 = vpop.eup %14139  ;;  %v10680_v26 = vmul.f32 -1.442695, %v9561_v19 }
0x1743   :  { %v9580_v24 = vadd.f32 1.0, %v14140_v51  ;;  %v9757_v41 = vpop.f32.mrb[200].mxu0 }
0x1744   :  { %14147 = vpow2.f32 %v10680_v26  ;;  %v12811_v58 = vpop.f32.mrb[201].mxu0  ;;  %12821 = vmatmul.mubr.msk.f32.vlgmr.msra.gmra.mrb[200].mxu1 %vm1084_vm5, %v9757_v41 }
0x1745   :  { %14149 = vrcp.f32 %v9580_v24  ;;  %12842 = vmatprep.mubr.msk.f32.mxu1 %vm14842_vm2, %v18997_v56  ;;  %vm19129_vm2 = vcmask 3072   ;;  %13332 = vmatpush3.bf16.msra.mxu1 %v13331_v44 }
0x1746   :  { %v14142_v46 = vpop.eup %14141  ;;  %13333 = vmatprep.subr.bf16.mxu1 %v19000_v27 }
0x1747   :  { %v9581_v29 = vadd.f32 1.0, %v14142_v46 }
0x1749   :  { %14151 = vrcp.f32 %v9581_v29  ;;  %13335 = vmatpush3.bf16.msra.mxu1 %v13334_v49 }
0x174a   :  { %v14144_v22 = vpop.eup %14143 }
0x174b   :  { %v9582_v7 = vadd.f32 1.0, %v14144_v22  ;;  %v14146_v0 = vpop.eup %14145  ;;  %v9911_v9 = vpop.f32.mrb[202].mxu0 }
0x174c   :  { %v9594_v43 = vsel %vm4800_vm15, %v14146_v0, 0.0  ;;  %v12833_v35 = vpop.f32.mrb[203].mxu0 }
0x174d   :  { %14153 = vrcp.f32 %v9582_v7 }
0x174e   :  { %v14148_v25 = vpop.eup %14147 }
0x174f   :  { %v14150_v32 = vpop.eup %14149  ;;  %v9583_v40 = vadd.f32 1.0, %v14148_v25 }
0x1750   :  { %v9595_v33 = vsel %vm4800_vm15, %v14150_v32, 0.0 }
0x1751   :  { %v9596_v23 = vadd.f32 %v9595_v33, %v9594_v43  ;;  %14155 = vrcp.f32 %v9583_v40 }
0x1753   :  { %v14152_v63 = vpop.eup %14151 }
0x1754   :  { %v9597_v34 = vsel %vm4800_vm15, %v14152_v63, 0.0 }
0x1755   :  { %v9598_v56 = vadd.f32 %v9597_v34, %v9596_v23 }
0x1757   :  { %v14154_v59 = vpop.eup %14153 }
0x1758   :  { %v9599_v30 = vsel %vm4800_vm15, %v14154_v59, 0.0 }
0x1759   :  { %v9600_v52 = vadd.f32 %v9599_v30, %v9598_v56 }
0x175b   :  { %v14156_v36 = vpop.eup %14155 }
0x175c   :  { %v9601_v4 = vsel %vm19129_vm2, %v14156_v36, 0.0 }
0x175d   :  { %v9602_v8 = vadd.f32 %v9601_v4, %v9600_v52 }
0x175f   :  { %v9603_v55 = vrot.slane %v9602_v8, 4 }
0x1761   :  { %v9604_v6 = vadd.f32 %v9603_v55, %v9602_v8 }
0x1763   :  { %v9605_v18 = vrot.slane %v9604_v6, 2 }
0x1765   :  { %v9606_v17 = vadd.f32 %v9605_v18, %v9604_v6 }
0x1767   :  { %v9607_v48 = vrot.slane %v9606_v17, 1 }
0x1769   :  { %v9608_v12 = vadd.f32 %v9607_v48, %v9606_v17 }
0x176b   :  { %v9609_v39 = vmul.f32 0.027777778, %v9608_v12 }
0x176d   :  { %v9610_v1 = vadd.f32 %v9609_v39, %v18747_v14 }
0x176f   :  { %v10010_v10 = vmul.f32 0.5, %v9610_v1 }
0x1771   :  { %10012 = vst.msk [vmem:[#allocation39] sm:$0x1] %vm10011_vm9, %v10010_v10 }
0x1817   :  { %v9838_v54 = vpop.f32.mrb[200].mxu1 }
0x1818   :  { %v9912_v45 = vadd.f32 %v9911_v9, %v9838_v54  ;;  %v12822_v31 = vpop.f32.mrb[201].mxu1 }
0x181a   :  { %v9922_v14 = vadd.f32 %v10686_v16, %v9912_v45 }
0x181c   :  { %v9923_v3 = vmax.f32 %v9922_v14, 0.0 }
0x181e   :  { %12843 = vmatmul.mubr.msk.f32.vlgmr.msra.gmra.mrb[202].mxu1 %vm1084_vm5, %v9923_v3 }
0x181f   :  { %14683 = shalt.err (!%p14680_p10)
}
0x1820   :  { %s19130_s12 = sld [smem:[#allocation113_spill]] }
0x1826   :  { %s14684_s20 = scalar_lea.hbm %s19130_s12, 16 }
0x1827   :  { %p14685_p11 = scmp.ne.s32.totalorder %s19130_s12, %s14684_s20  ;;  %p14688_p12 = scmp.lt.u32.totalorder %s14684_s20, %s19130_s12 }
0x1829   :  { %p14690_p13 = pnand %p14688_p12, %p14685_p11 }
0x182b   :  { %14693 = shalt.err (!%p14690_p13)
}
0x182c   :  { %10049 = dma.vmem_to_hbm [thread:$0]  %s10047_s9, 16, %s19130_s12, [#allocation40]   ;;  %v10687_v27 = vld [vmem:[#allocation36] ss:$0 sm:$0xff]  ;;  %vm10008_vm5 = vcmask 9216  }
0x182d   :  { %s14844_s15 = smov [#allocation38]  }
0x182e   :  { %s10036_s5 = sshll.u32 %s14844_s15, 4  ;;  %s10037_s5 = int_to_ptr.vmem [resolvable:$true] %s10036_s5 }
0x182f   :  { %s14694_s16 = scalar_lea.vmem %s10037_s5, 32  ;;  %p14699_p1 = scmp.lt.s32.totalorder %s10037_s5, %s10037_s5 }
0x1830   :  { %p14695_p0 = scmp.ne.s32.totalorder %s10037_s5, %s14694_s16  ;;  %p14700_p2 = scmp.lt.s32.totalorder %s14694_s16, %s14694_s16 }
0x1832   :  { %p14701_p3 = por %p14700_p2, %p14699_p1 }
0x1834   :  { %p14702_p4 = pnand %p14701_p3, %p14695_p0 }
0x18f1   :  { %v10004_v57 = vpop.f32.mrb[202].mxu1 }
0x18f2   :  { %v10005_v60 = vadd.f32 %v10687_v27, %v10004_v57  ;;  %v12844_v53 = vpop.f32.mrb[203].mxu1 }
0x18f4   :  { %10009 = vst.msk [vmem:[#allocation38] sm:$0x3] %vm10008_vm5, %v10005_v60 }
0x18f5   :  { %14705 = shalt.err (!%p14702_p4)
}
0x18f6   :  { %s19131_s18 = sld [smem:[#allocation112_spill]] }
0x18fc   :  { %s14706_s17 = scalar_lea.hbm %s19131_s18, 32 }
0x18fd   :  { %p14707_p5 = scmp.ne.s32.totalorder %s19131_s18, %s14706_s17  ;;  %p14710_p6 = scmp.lt.u32.totalorder %s14706_s17, %s19131_s18 }
0x18ff   :  { %p14712_p7 = pnand %p14710_p6, %p14707_p5 }
0x1901   :  { %14715 = shalt.err (!%p14712_p7)
}
0x1902   :  { %10039 = dma.vmem_to_hbm [thread:$0]  %s10037_s5, 32, %s19131_s18, [#allocation8]  }
0x1903   :  { %14738 = dma.done.wait [#allocation8], 32  }
0x1904   :  { %14739 = vsyncadd [#allocation8], 4294967264 }
0x1905   :  { %14740 = dma.done.wait [#allocation40], 16  }
0x1906   :  { %14741 = vsyncadd [#allocation40], 4294967280 }
0x1907   :  { %10064 = vsyncpa [#allocation7], 1 }
0x1908   :  { %10065 = vsyncpa [#allocation10], 1 }
0x1909   :  { %10066 = vsyncpa [#allocation13], 1 }
0x190a   :  { %10067 = vsyncpa [#allocation16], 1 }
0x190b   :  { %10068 = vsyncpa [#allocation19], 1 }
0x190c   :  { %10069 = vsyncpa [#allocation22], 1 }
0x190d   :  { %10070 = vsyncpa [#allocation25], 1 }
0x190e   :  { %10071 = vsyncpa [#allocation28], 1 }
0x190f   :  { %10072 = vsyncpa [#allocation31], 1 }
0x1910   :  { %10073 = vsyncpa [#allocation34], 1 }
0x1911   :  { %10074 = vsyncpa [#allocation37], 1 }
0x1912   :  { %10075 = vsyncpa [#allocation8], 1 }
0x1913   :  { %10076 = vsyncpa [#allocation40], 1 }

</bundles_post_ra>
